<compile_context>
chip_gen: v7x
topology: tpu7x:2x2x1
jax: 0.10.0
libtpu: 0.0.40
codegen_flags: <defaults>
</compile_context>

<pallas_src>
import functools

import jax
import jax.numpy as jnp
from jax.experimental import pallas as pl
from jax.experimental.pallas import tpu as pltpu


# ----------------------------- Pallas kernels ------------------------------

def _linear_kernel(x_ref, w_ref, b_ref, o_ref, *, act):
    y = jnp.dot(x_ref[...], w_ref[...], preferred_element_type=jnp.float32)
    y = y + b_ref[...]
    if act == "relu":
        y = jnp.maximum(y, 0.0)
    o_ref[...] = y.astype(o_ref.dtype)


def pallas_linear(x, w_bf16, b_row, act=None):
    """y = x @ w + b ; w pre-cast bf16 (K, N), b pre-shaped (1, N) f32."""
    M, K = x.shape
    N = w_bf16.shape[1]
    tm = 128 if (M % 128 == 0) else M          # >=2 grid steps when M>=256 (v7x megacore)
    grid = (M // tm,)
    return pl.pallas_call(
        functools.partial(_linear_kernel, act=act),
        out_shape=jax.ShapeDtypeStruct((M, N), jnp.float32),
        grid=grid,
        in_specs=[
            pl.BlockSpec((tm, K), lambda i: (i, 0)),
            pl.BlockSpec((K, N), lambda i: (0, 0)),
            pl.BlockSpec((1, N), lambda i: (0, 0)),
        ],
        out_specs=pl.BlockSpec((tm, N), lambda i: (i, 0)),
        compiler_params=pltpu.CompilerParams(
            dimension_semantics=("parallel",)),
    )(x.astype(jnp.bfloat16), w_bf16, b_row)


def _film_trunk_kernel(x_ref, w1_ref, bias1_ref, w2_ref, bias2_ref,
                       mult_ref, add_ref, pm_w1_ref, pm_b1_ref,
                       head_w_ref, head_b_ref, feat_ref, prop_ref, pad_ref,
                       *, n_res, Nb, H, W, C):
    """Fused FiLM trunk: all ResBlocks + proposal head for one batch block."""
    M = Nb * H * W
    # Halo scratch: zero ONCE per grid step; the 1-px ring stays zero and only
    # the interior is rewritten before each 3x3 im2col.
    pad_ref[...] = jnp.zeros(pad_ref.shape, pad_ref.dtype)

    def conv3x3_cols(img_f32):
        pad_ref[:, 1:H + 1, 1:W + 1, :] = img_f32
        xp = pad_ref[...]
        # taps are cast to bf16 BEFORE the lane concat -> (M, 9C) built in bf16.
        taps = [xp[:, dy:dy + H, dx:dx + W, :].reshape(M, C).astype(jnp.bfloat16)
                for dy in range(3) for dx in range(3)]
        return jnp.concatenate(taps, axis=-1)               # (M, 9C) bf16, lane-dense

    x = x_ref[...]                                           # (Nb, H, W, C) f32
    for i in range(n_res):
        # 1x1 conv (coord channels folded into bias1) + ReLU  -> identity branch
        xf = x.reshape(M, C).astype(jnp.bfloat16)
        h1 = jnp.dot(xf, w1_ref[i], preferred_element_type=jnp.float32)
        h1 = jnp.maximum(h1.reshape(Nb, H, W, C) + bias1_ref[i][None], 0.0)
        # 3x3 conv (BN folded into w2/bias2) -> FiLM -> ReLU -> + identity
        cols = conv3x3_cols(h1)
        h2 = jnp.dot(cols, w2_ref[i], preferred_element_type=jnp.float32)
        h2 = (h2 + bias2_ref[i]).reshape(Nb, H, W, C)
        h2 = jnp.maximum(mult_ref[:, i] * h2 + add_ref[:, i], 0.0)   # f32 elementwise
        x = h2 + h1

    feat_ref[...] = x.astype(feat_ref.dtype)

    # Proposal head: 3x3 conv + ReLU (eval dropout = identity) + fused conf|reg heads.
    cols = conv3x3_cols(x)
    hid = jnp.dot(cols, pm_w1_ref[...], preferred_element_type=jnp.float32) + pm_b1_ref[...]
    hid = jnp.maximum(hid, 0.0)
    out = jnp.dot(hid.astype(jnp.bfloat16), head_w_ref[...],
                  preferred_element_type=jnp.float32) + head_b_ref[...]
    prop_ref[...] = out.reshape(Nb, H, W, out.shape[-1])


def _classifier_kernel(x_ref, fcw_ref, fcb_ref, clsw_ref, clsb_ref, o_ref):
    h = jnp.dot(x_ref[...], fcw_ref[...], preferred_element_type=jnp.float32)
    h = jnp.maximum(h + fcb_ref[...], 0.0)                   # relu(dropout(fc)): eval
    o = jnp.dot(h.astype(jnp.bfloat16), clsw_ref[...],
                preferred_element_type=jnp.float32) + clsb_ref[...]
    o_ref[...] = o


# ------------------------------- plain-JAX glue -----------------------------

def coord_map(shape, start=-1.0, end=1.0):
    m, n = shape
    x_row = jnp.linspace(start, end, n, dtype=jnp.float32)
    y_row = jnp.linspace(start, end, m, dtype=jnp.float32)
    x_coords = jnp.broadcast_to(x_row[None, :], (m, n))[None]
    y_coords = jnp.broadcast_to(y_row[:, None], (m, n))[None]
    return jnp.concatenate([x_coords, y_coords], 0)          # (2, m, n)


def gen_anc_centers(out_size):
    out_h, out_w = out_size
    return (jnp.arange(out_w, dtype=jnp.float32) + 0.5,
            jnp.arange(out_h, dtype=jnp.float32) + 0.5)


def gen_anc_base(anc_pts_x, anc_pts_y, anc_scales, anc_ratios, out_size):
    out_h, out_w = out_size
    scales = jnp.asarray(anc_scales, jnp.float32)
    ratios = jnp.asarray(anc_ratios, jnp.float32)
    ws = (scales[:, None] * ratios[None, :]).reshape(-1)
    hs = jnp.broadcast_to(scales[:, None], (scales.shape[0], ratios.shape[0])).reshape(-1)
    nx, ny, na = anc_pts_x.shape[0], anc_pts_y.shape[0], ws.shape[0]
    xc = anc_pts_x[:, None, None]
    yc = anc_pts_y[None, :, None]
    xmin = jnp.clip(jnp.broadcast_to(xc - ws / 2.0, (nx, ny, na)), 0.0, out_w)
    xmax = jnp.clip(jnp.broadcast_to(xc + ws / 2.0, (nx, ny, na)), 0.0, out_w)
    ymin = jnp.clip(jnp.broadcast_to(yc - hs / 2.0, (nx, ny, na)), 0.0, out_h)
    ymax = jnp.clip(jnp.broadcast_to(yc + hs / 2.0, (nx, ny, na)), 0.0, out_h)
    return jnp.stack([xmin, ymin, xmax, ymax], axis=-1)[None]   # (1, nx, ny, n_anc, 4)


def generate_proposals(anchors, offsets):
    """Batched: anchors/offsets (..., 4) -> proposals (..., 4) (xyxy)."""
    cx = (anchors[..., 0] + anchors[..., 2]) * 0.5
    cy = (anchors[..., 1] + anchors[..., 3]) * 0.5
    w = anchors[..., 2] - anchors[..., 0]
    h = anchors[..., 3] - anchors[..., 1]
    pcx = cx + offsets[..., 0] * w
    pcy = cy + offsets[..., 1] * h
    pw = w * jnp.exp(offsets[..., 2])
    ph = h * jnp.exp(offsets[..., 3])
    return jnp.stack([pcx - pw / 2, pcy - ph / 2, pcx + pw / 2, pcy + ph / 2], axis=-1)


def roi_pool_single(fmap_chw, boxes, output_size, spatial_scale=1.0):
    """torchvision-style quantized ROI max-pool (data-dependent gather => JAX glue)."""
    C, H, W = fmap_chw.shape
    ph, pw = output_size
    x1 = jnp.round(boxes[:, 0] * spatial_scale)
    y1 = jnp.round(boxes[:, 1] * spatial_scale)
    x2 = jnp.round(boxes[:, 2] * spatial_scale)
    y2 = jnp.round(boxes[:, 3] * spatial_scale)
    roi_w = jnp.maximum(x2 - x1 + 1.0, 1.0)
    roi_h = jnp.maximum(y2 - y1 + 1.0, 1.0)
    bin_w = roi_w / pw
    bin_h = roi_h / ph
    rows = jnp.arange(H, dtype=jnp.float32)
    cols = jnp.arange(W, dtype=jnp.float32)
    bins = []
    for i in range(ph):
        for j in range(pw):
            hstart = jnp.clip(jnp.floor(i * bin_h) + y1, 0.0, float(H))
            hend = jnp.clip(jnp.ceil((i + 1) * bin_h) + y1, 0.0, float(H))
            wstart = jnp.clip(jnp.floor(j * bin_w) + x1, 0.0, float(W))
            wend = jnp.clip(jnp.ceil((j + 1) * bin_w) + x1, 0.0, float(W))
            rmask = (rows[None, :] >= hstart[:, None]) & (rows[None, :] < hend[:, None])
            cmask = (cols[None, :] >= wstart[:, None]) & (cols[None, :] < wend[:, None])
            mask = rmask[:, None, :, None] & cmask[:, None, None, :]     # (K,1,H,W)
            vals = jnp.where(mask, fmap_chw[None], -jnp.inf).max(axis=(2, 3))
            empty = (hend <= hstart) | (wend <= wstart)
            bins.append(jnp.where(empty[:, None], 0.0, vals))
    return jnp.stack(bins, axis=-1).reshape(boxes.shape[0], C, ph, pw)


# ----------------------------- module sub-forwards ---------------------------

def feature_extractor(params, obs_nchw, out_h, out_w):
    # TODO(synk): the reference `ResNetFeats` resnet18 backbone is an external,
    # undefined dependency; replaced by a deterministic patchify-conv + ReLU
    # stand-in producing the same (N, n_channels, out_h, out_w) feature map.
    N, C, H, W = obs_nchw.shape
    sh, sw = H // out_h, W // out_w
    x = jnp.transpose(obs_nchw, (0, 2, 3, 1))                         # NHWC
    x = x.reshape(N, out_h, sh, out_w, sw, C)
    x = jnp.transpose(x, (0, 1, 3, 2, 4, 5)).reshape(N * out_h * out_w, sh * sw * C)
    kpad = params["fe_w"].shape[0]
    if kpad > x.shape[1]:                                              # lane-pad K 48 -> 128
        x = jnp.concatenate(
            [x, jnp.zeros((x.shape[0], kpad - x.shape[1]), x.dtype)], axis=1)
    y = pallas_linear(x, params["fe_w"], params["fe_b"], act="relu")
    n_ch = params["fe_w"].shape[1]
    return y.reshape(N, out_h, out_w, n_ch)                           # NHWC


def film_trunk(params, feat_nhwc, mult_all, add_all, cfg):
    """One fused pallas_call: all ResBlocks + proposal head, batch-parallel grid."""
    N, H, W, C = feat_nhwc.shape
    n_res = cfg["n_res_blocks"]
    hidden = params["pm_w1"].shape[1]
    P = params["head_w"].shape[1]
    Nb = N // 2 if (N % 2 == 0 and N > 1) else N        # >=2 grid steps for v7x megacore
    grid = (N // Nb,)
    kern = functools.partial(_film_trunk_kernel, n_res=n_res, Nb=Nb, H=H, W=W, C=C)
    feat_out, prop_out = pl.pallas_call(
        kern,
        grid=grid,
        out_shape=(jax.ShapeDtypeStruct((N, H, W, C), jnp.float32),
                   jax.ShapeDtypeStruct((N, H, W, P), jnp.float32)),
        in_specs=[
            pl.BlockSpec((Nb, H, W, C), lambda b: (b, 0, 0, 0)),
            pl.BlockSpec((n_res, C, C), lambda b: (0, 0, 0)),
            pl.BlockSpec((n_res, H, W, C), lambda b: (0, 0, 0, 0)),
            pl.BlockSpec((n_res, 9 * C, C), lambda b: (0, 0, 0)),
            pl.BlockSpec((n_res, 1, C), lambda b: (0, 0, 0)),
            pl.BlockSpec((Nb, n_res, 1, 1, C), lambda b: (b, 0, 0, 0, 0)),
            pl.BlockSpec((Nb, n_res, 1, 1, C), lambda b: (b, 0, 0, 0, 0)),
            pl.BlockSpec((9 * C, hidden), lambda b: (0, 0)),
            pl.BlockSpec((1, hidden), lambda b: (0, 0)),
            pl.BlockSpec((hidden, P), lambda b: (0, 0)),
            pl.BlockSpec((1, P), lambda b: (0, 0)),
        ],
        out_specs=(pl.BlockSpec((Nb, H, W, C), lambda b: (b, 0, 0, 0)),
                   pl.BlockSpec((Nb, H, W, P), lambda b: (b, 0, 0, 0))),
        scratch_shapes=[pltpu.VMEM((Nb, H + 2, W + 2, C), jnp.float32)],
        compiler_params=pltpu.CompilerParams(
            dimension_semantics=("parallel",),
            vmem_limit_bytes=16 * 1024 * 1024),
    )(feat_nhwc, params["w1_all"], params["bias1_all"], params["w2_all"],
      params["bias2_all"], mult_all, add_all,
      params["pm_w1"], params["pm_b1"], params["head_w"], params["head_b"])
    return feat_out, prop_out


def film_and_proposals(params, agent_obs, task_emb, cfg):
    B, T, C, H, W = agent_obs.shape
    obs = agent_obs.reshape(B * T, C, H, W)                            # 'B T C H W -> (B T) C H W'
    feat = feature_extractor(params, obs, cfg["out_h"], cfg["out_w"])  # (N, h, w, n_ch) f32
    n_res, n_ch = cfg["n_res_blocks"], cfg["n_channels"]
    film_vec = pallas_linear(task_emb, params["film_w"], params["film_b"])
    film_vec = film_vec.reshape(B, n_res, 2, n_ch)
    film_vec = jnp.repeat(film_vec, T, axis=0)                         # repeat_interleave(T, 0)
    # FiLMBlock arg order in ResBlock.forward is swapped: index 0 of the film
    # vector is the multiplicative term, index 1 the additive term.
    mult_all = film_vec[:, :, 0, :][:, :, None, None, :]               # (N, n_res, 1, 1, C)
    add_all = film_vec[:, :, 1, :][:, :, None, None, :]
    return film_trunk(params, feat, mult_all, add_all, cfg)


def classifier_forward(params, feature_map_nchw, proposals, n_classes, roi_size=(2, 2)):
    # proposals: (B, K, 4); ROI max-pool is a data-dependent gather => plain-JAX glue.
    roi = jax.vmap(lambda f, b: roi_pool_single(f, b, roi_size))(feature_map_nchw, proposals)
    B, K, C = roi.shape[0], roi.shape[1], roi.shape[2]
    roi_feat = roi.reshape(B * K, C, roi_size[0] * roi_size[1]).mean(axis=-1)
    P = params["cls_w"].shape[1]
    out = pl.pallas_call(
        _classifier_kernel,
        out_shape=jax.ShapeDtypeStruct((B * K, P), jnp.float32),
    )(roi_feat.astype(jnp.bfloat16), params["fc_w"], params["fc_b"],
      params["cls_w"], params["cls_b"])
    return out[:, :n_classes]


# ------------------------------ AgentModule forward --------------------------

def agent_module_forward(params, cfg, agent_obs, task_embedding, gt_bb, gt_classes):
    ret = {"task_embedding": task_embedding}
    feat_nhwc, prop_out = film_and_proposals(params, agent_obs, task_embedding, cfg)
    feature_map = jnp.transpose(feat_nhwc, (0, 3, 1, 2))                 # NCHW (reference layout)

    B0, T0 = agent_obs.shape[0], agent_obs.shape[1]
    _ = gt_bb.reshape(B0 * T0, *gt_bb.shape[2:])                         # 'B T N C -> (B T) N C'
    _ = gt_classes.reshape(B0 * T0, *gt_classes.shape[2:])
    B = B0 * T0

    n_anc = cfg["n_anc_boxes"]
    anc_boxes_flat = jnp.broadcast_to(
        cfg["anc_base"], (B,) + cfg["anc_base"].shape[1:]).reshape(B, -1, 4)

    # conf/offset flattening mirrors the reference's (anc, H, W) channel-first reshape.
    conf = jnp.transpose(prop_out[..., :n_anc], (0, 3, 1, 2))            # (N, n_anc, h, w)
    reg = jnp.transpose(prop_out[..., n_anc:5 * n_anc], (0, 3, 1, 2))    # (N, 4*n_anc, h, w)
    conf_scores_pred = conf.reshape(B, -1)
    offsets_pred = reg.reshape(B, -1, 4)

    K = cfg["k_props"]
    # TODO(synk): reference uses conf_thresh filtering + torchvision NMS (dynamic shapes
    # with no static Pallas equivalent); a fixed top-K by confidence is used instead.
    conf_sig = jax.nn.sigmoid(conf_scores_pred)
    proposals_all = generate_proposals(anc_boxes_flat, offsets_pred)     # (B, n_tot, 4)
    top_conf, top_idx = jax.lax.top_k(conf_sig, K)                       # (B, K)
    proposals_top = jnp.take_along_axis(proposals_all, top_idx[..., None], axis=1)

    cls_scores = classifier_forward(params, feature_map, proposals_top, cfg["n_classes"])
    cls_probs = jax.nn.softmax(cls_scores, axis=-1)
    classes_all = jnp.argmax(cls_probs, axis=-1)

    # TODO(synk): reference returns variable-length per-image Python lists (post-NMS);
    # fixed-K batched arrays are returned here to avoid per-batch dispatch overhead.
    ret.update(proposals=proposals_top, conf_scores_final=top_conf,
               cls_scores=cls_scores, feature_map=feature_map,
               classes_final=classes_all.reshape(B, K))
    return ret


# --------------------------------- params ------------------------------------

def init_params(key, cfg):
    n_ch, n_res = cfg["n_channels"], cfg["n_res_blocks"]
    ted, s = cfg["task_embedding_dim"], cfg["patch"]
    n_anc, hidden = cfg["n_anc_boxes"], 512
    n_cls = cfg["n_classes"]
    ks = jax.random.split(key, 32)

    def w(k, shape, scale=0.05):
        return scale * jax.random.normal(k, shape, jnp.float32)

    # fused proposal head: [conf | reg | zero-pad] -> lane-dense 128-multiple
    head_cols = n_anc + 4 * n_anc
    head_pad = ((head_cols + 127) // 128) * 128
    head_w = jnp.concatenate(
        [w(ks[22], (hidden, n_anc)),
         w(ks[24], (hidden, 4 * n_anc), 0.02),
         jnp.zeros((hidden, head_pad - head_cols), jnp.float32)], axis=1)
    head_b = jnp.concatenate(
        [w(ks[23], (n_anc,)), w(ks[25], (4 * n_anc,), 0.02),
         jnp.zeros((head_pad - head_cols,), jnp.float32)])

    cls_pad = 128
    cls_w_pad = jnp.concatenate(
        [w(ks[28], (hidden, n_cls)), jnp.zeros((hidden, cls_pad - n_cls), jnp.float32)], axis=1)
    cls_b_pad = jnp.concatenate(
        [w(ks[29], (n_cls,)), jnp.zeros((cls_pad - n_cls,), jnp.float32)])

    p = {
        "fe_w": w(ks[0], (3 * s * s, n_ch)), "fe_b": w(ks[1], (n_ch,)),
        "film_w": w(ks[2], (ted, 2 * n_res * n_ch)), "film_b": w(ks[3], (2 * n_res * n_ch,)),
        # TODO(synk): w2_col/pm_w1col are im2col-flattened with (dy, dx) outer / Cin inner;
        # real PyTorch (Cout, Cin, 3, 3) weights must be flattened in the same order.
        "pm_w1col": w(ks[20], (9 * n_ch, hidden), 0.02), "pm_b1": w(ks[21], (hidden,)),
        "head_w": head_w, "head_b": head_b,
        "fc_w": w(ks[26], (n_ch, hidden)), "fc_b": w(ks[27], (hidden,)),
        "cls_w_pad": cls_w_pad, "cls_b_pad": cls_b_pad,
    }
    res = []
    for i in range(n_res):
        kk = jax.random.split(ks[4 + i], 8)
        res.append(dict(
            w1=w(kk[0], (n_ch + 2, n_ch)), b1=w(kk[1], (n_ch,)),
            w2_col=w(kk[2], (9 * n_ch, n_ch), 0.02), b2=w(kk[3], (n_ch,)),
            bn_gamma=1.0 + 0.1 * jax.random.normal(kk[4], (n_ch,), jnp.float32),
            bn_beta=w(kk[5], (n_ch,)),
            bn_mean=w(kk[6], (n_ch,)),
            bn_var=1.0 + jnp.abs(0.1 * jax.random.normal(kk[7], (n_ch,), jnp.float32)),
        ))
    p["res"] = res
    return p


def prepare_params(raw, cfg):
    """One-time (outside jit) weight folding + dtype casting for the kernels."""
    n_res, C = cfg["n_res_blocks"], cfg["n_channels"]
    H, W = cfg["out_h"], cfg["out_w"]
    eps = 1e-5
    coords = jnp.transpose(coord_map((H, W)), (1, 2, 0)).reshape(H * W, 2)   # (HW, 2)
    w1_l, bias1_l, w2_l, bias2_l = [], [], [], []
    for p in raw["res"]:
        bn_scale = p["bn_gamma"] / jnp.sqrt(p["bn_var"] + eps)
        bn_shift = p["bn_beta"] - p["bn_mean"] * bn_scale
        w1_l.append(p["w1"][:C, :])                                          # feature rows of 1x1 conv
        bias1_l.append((coords @ p["w1"][C:C + 2, :] + p["b1"][None, :]).reshape(H, W, C))
        w2_l.append(p["w2_col"] * bn_scale[None, :])                         # BN folded into 3x3 conv
        bias2_l.append((p["b2"] * bn_scale + bn_shift).reshape(1, C))
    fe_w = raw["fe_w"]
    kpad = ((fe_w.shape[0] + 127) // 128) * 128                              # lane-pad patchify K
    fe_w = jnp.concatenate(
        [fe_w, jnp.zeros((kpad - fe_w.shape[0], fe_w.shape[1]), fe_w.dtype)], axis=0)
    return dict(
        fe_w=fe_w.astype(jnp.bfloat16),
        fe_b=raw["fe_b"].reshape(1, -1).astype(jnp.float32),
        film_w=raw["film_w"].astype(jnp.bfloat16),
        film_b=raw["film_b"].reshape(1, -1).astype(jnp.float32),
        w1_all=jnp.stack(w1_l).astype(jnp.bfloat16),                         # (n_res, C, C)
        bias1_all=jnp.stack(bias1_l).astype(jnp.float32),                    # (n_res, H, W, C)
        w2_all=jnp.stack(w2_l).astype(jnp.bfloat16),                         # (n_res, 9C, C)
        bias2_all=jnp.stack(bias2_l).astype(jnp.float32),                    # (n_res, 1, C)
        pm_w1=raw["pm_w1col"].astype(jnp.bfloat16),                          # (9C, hidden)
        pm_b1=raw["pm_b1"].reshape(1, -1).astype(jnp.float32),
        head_w=raw["head_w"].astype(jnp.bfloat16),                           # (hidden, 256)
        head_b=raw["head_b"].reshape(1, -1).astype(jnp.float32),
        fc_w=raw["fc_w"].astype(jnp.bfloat16),
        fc_b=raw["fc_b"].reshape(1, -1).astype(jnp.float32),
        cls_w=raw["cls_w_pad"].astype(jnp.bfloat16),
        cls_b=raw["cls_b_pad"].reshape(1, -1).astype(jnp.float32),
    )


# ----------------------------------- main -------------------------------------

if __name__ == "__main__":
    # Small config consistent with AgentModule(__init__): 128 channels,
    # dim_H=dim_W=8, n_res_blocks=2, n_classes=2, task_embedding_dim=128.
    anc_scales = [1.0, 1.5, 2.0, 3.0, 4.0]
    anc_ratios = [0.2, 0.5, 0.8, 1.0, 1.2, 1.5, 2.0]
    cfg = dict(
        height=32, width=32, n_res_blocks=2, n_classes=2,
        task_embedding_dim=128, n_channels=128, out_h=8, out_w=8,
        n_anc_boxes=len(anc_scales) * len(anc_ratios), k_props=8,
    )
    cfg["patch"] = cfg["height"] // cfg["out_h"]
    anc_pts_x, anc_pts_y = gen_anc_centers((cfg["out_h"], cfg["out_w"]))
    cfg["anc_base"] = gen_anc_base(anc_pts_x, anc_pts_y, anc_scales, anc_ratios,
                                   (cfg["out_h"], cfg["out_w"]))

    key = jax.random.PRNGKey(0)
    k1, k2, k3, k4, k5 = jax.random.split(key, 5)
    B, T, C, H, W = 2, 2, 3, cfg["height"], cfg["width"]
    n_gt = 2
    agent_obs = jax.random.uniform(k1, (B, T, C, H, W), jnp.float32)
    task_embedding = jax.random.normal(k2, (B, cfg["task_embedding_dim"]), jnp.float32)
    gt_bb = jax.random.uniform(k3, (B, T, n_gt, 4), jnp.float32, 0.0, 16.0)
    gt_classes = jax.random.randint(k4, (B, T, n_gt), 0, cfg["n_classes"])

    raw_params = init_params(k5, cfg)
    params = prepare_params(raw_params, cfg)      # fold/cast ONCE, outside the jitted forward

    fwd = jax.jit(lambda p, obs, temb, bb, cls:
                  agent_module_forward(p, cfg, obs, temb, bb, cls))
    ret = fwd(params, agent_obs, task_embedding, gt_bb, gt_classes)
    jax.block_until_ready(ret)
    print("KERNEL_OK")
</pallas_src>

<mosaic_0001>
module attributes {stable_mosaic.version = 11 : i64} {
  func.func @_linear_kernel(%arg0: i32, %arg1: memref<2x128xbf16, #tpu.memory_space<vmem>>, %arg2: memref<128x512xbf16, #tpu.memory_space<vmem>>, %arg3: memref<1x512xf32, #tpu.memory_space<vmem>>, %arg4: memref<2x512xf32, #tpu.memory_space<vmem>>) attributes {dimension_semantics = [#tpu.dimension_semantics<parallel>], iteration_bounds = array<i64: 1>, scalar_prefetch = 0 : i64, scratch_operands = 0 : i64, tpu.core_type = #tpu.core_type<tc>, window_params = [{transform_indices = @transform_0, window_bounds = array<i64: 2, 128>}, {pipeline_mode = #tpu.pipeline_mode<synchronous>, transform_indices = @transform_1, window_bounds = array<i64: 128, 512>}, {pipeline_mode = #tpu.pipeline_mode<synchronous>, transform_indices = @transform_2, window_bounds = array<i64: 1, 512>}, {transform_indices = @transform_3, window_bounds = array<i64: 2, 512>}]} {
    %c0 = arith.constant 0 : index
    %c0_0 = arith.constant 0 : index
    %0 = vector.load %arg1[%c0, %c0_0] : memref<2x128xbf16, #tpu.memory_space<vmem>>, vector<2x128xbf16>
    %c0_1 = arith.constant 0 : index
    %c0_2 = arith.constant 0 : index
    %1 = vector.load %arg2[%c0_1, %c0_2] : memref<128x512xbf16, #tpu.memory_space<vmem>>, vector<128x512xbf16>
    %cst = arith.constant dense<0.000000e+00> : vector<2x512xf32>
    %2 = tpu.matmul %0, %1, %cst {dimension_numbers = #tpu.dot_dimension_numbers<[1], [0], [0], [1], [0, 0, 1, 1], [], []>} : vector<2x128xbf16>, vector<128x512xbf16>, vector<2x512xf32> -> vector<2x512xf32>
    %c0_3 = arith.constant 0 : index
    %c0_4 = arith.constant 0 : index
    %3 = vector.load %arg3[%c0_3, %c0_4] : memref<1x512xf32, #tpu.memory_space<vmem>>, vector<1x512xf32>
    %4 = vector.broadcast %3 : vector<1x512xf32> to vector<2x512xf32>
    %5 = arith.addf %2, %4 : vector<2x512xf32>
    %c0_5 = arith.constant 0 : index
    %c0_6 = arith.constant 0 : index
    %6 = vector.load %arg4[%c0_5, %c0_6] : memref<2x512xf32, #tpu.memory_space<vmem>>, vector<2x512xf32>
    tpu.vector_store %arg4[%c0_5, %c0_6], %5 {strides = array<i32>} : memref<2x512xf32, #tpu.memory_space<vmem>>, vector<2x512xf32>,
    return
  }
  func.func @transform_0(%arg0: i32) -> (i32, i32) {
    %c0_i32 = arith.constant 0 : i32
    %c0_i32_0 = arith.constant 0 : i32
    return %arg0, %c0_i32 : i32, i32
  }
  func.func @transform_1(%arg0: i32) -> (i32, i32) {
    %c0_i32 = arith.constant 0 : i32
    %c0_i32_0 = arith.constant 0 : i32
    %c0_i32_1 = arith.constant 0 : i32
    return %c0_i32, %c0_i32_0 : i32, i32
  }
  func.func @transform_2(%arg0: i32) -> (i32, i32) {
    %c0_i32 = arith.constant 0 : i32
    %c0_i32_0 = arith.constant 0 : i32
    %c0_i32_1 = arith.constant 0 : i32
    return %c0_i32, %c0_i32_0 : i32, i32
  }
  func.func @transform_3(%arg0: i32) -> (i32, i32) {
    %c0_i32 = arith.constant 0 : i32
    %c0_i32_0 = arith.constant 0 : i32
    return %arg0, %c0_i32 : i32, i32
  }
}

module attributes {stable_mosaic.version = 11 : i64} {
  func.func @_linear_kernel(%arg0: i32, %arg1: memref<128x128xbf16, #tpu.memory_space<vmem>>, %arg2: memref<128x128xbf16, #tpu.memory_space<vmem>>, %arg3: memref<1x128xf32, #tpu.memory_space<vmem>>, %arg4: memref<128x128xf32, #tpu.memory_space<vmem>>) attributes {dimension_semantics = [#tpu.dimension_semantics<parallel>], iteration_bounds = array<i64: 2>, scalar_prefetch = 0 : i64, scratch_operands = 0 : i64, tpu.core_type = #tpu.core_type<tc>, window_params = [{transform_indices = @transform_0, window_bounds = array<i64: 128, 128>}, {pipeline_mode = #tpu.pipeline_mode<synchronous>, transform_indices = @transform_1, window_bounds = array<i64: 128, 128>}, {pipeline_mode = #tpu.pipeline_mode<synchronous>, transform_indices = @transform_2, window_bounds = array<i64: 1, 128>}, {transform_indices = @transform_3, window_bounds = array<i64: 128, 128>}]} {
    %c0 = arith.constant 0 : index
    %c0_0 = arith.constant 0 : index
    %0 = vector.load %arg1[%c0, %c0_0] : memref<128x128xbf16, #tpu.memory_space<vmem>>, vector<128x128xbf16>
    %c0_1 = arith.constant 0 : index
    %c0_2 = arith.constant 0 : index
    %1 = vector.load %arg2[%c0_1, %c0_2] : memref<128x128xbf16, #tpu.memory_space<vmem>>, vector<128x128xbf16>
    %cst = arith.constant dense<0.000000e+00> : vector<128x128xf32>
    %2 = tpu.matmul %0, %1, %cst {dimension_numbers = #tpu.dot_dimension_numbers<[1], [0], [0], [1], [0, 0, 1, 1], [], []>} : vector<128x128xbf16>, vector<128x128xbf16>, vector<128x128xf32> -> vector<128x128xf32>
    %c0_3 = arith.constant 0 : index
    %c0_4 = arith.constant 0 : index
    %3 = vector.load %arg3[%c0_3, %c0_4] : memref<1x128xf32, #tpu.memory_space<vmem>>, vector<1x128xf32>
    %4 = vector.broadcast %3 : vector<1x128xf32> to vector<128x128xf32>
    %5 = arith.addf %2, %4 : vector<128x128xf32>
    %cst_5 = arith.constant 0.000000e+00 : f32
    %6 = vector.broadcast %cst_5 : f32 to vector<128x128xf32>
    %7 = arith.maximumf %5, %6 : vector<128x128xf32>
    %c0_6 = arith.constant 0 : index
    %c0_7 = arith.constant 0 : index
    %8 = vector.load %arg4[%c0_6, %c0_7] : memref<128x128xf32, #tpu.memory_space<vmem>>, vector<128x128xf32>
    tpu.vector_store %arg4[%c0_6, %c0_7], %7 {strides = array<i32>} : memref<128x128xf32, #tpu.memory_space<vmem>>, vector<128x128xf32>,
    return
  }
  func.func @transform_0(%arg0: i32) -> (i32, i32) {
    %c0_i32 = arith.constant 0 : i32
    %c0_i32_0 = arith.constant 0 : i32
    return %arg0, %c0_i32 : i32, i32
  }
  func.func @transform_1(%arg0: i32) -> (i32, i32) {
    %c0_i32 = arith.constant 0 : i32
    %c0_i32_0 = arith.constant 0 : i32
    %c0_i32_1 = arith.constant 0 : i32
    return %c0_i32, %c0_i32_0 : i32, i32
  }
  func.func @transform_2(%arg0: i32) -> (i32, i32) {
    %c0_i32 = arith.constant 0 : i32
    %c0_i32_0 = arith.constant 0 : i32
    %c0_i32_1 = arith.constant 0 : i32
    return %c0_i32, %c0_i32_0 : i32, i32
  }
  func.func @transform_3(%arg0: i32) -> (i32, i32) {
    %c0_i32 = arith.constant 0 : i32
    %c0_i32_0 = arith.constant 0 : i32
    return %arg0, %c0_i32 : i32, i32
  }
}

module attributes {stable_mosaic.version = 11 : i64} {
  func.func @_film_trunk_kernel(%arg0: i32, %arg1: memref<2x8x8x128xf32, #tpu.memory_space<vmem>>, %arg2: memref<2x128x128xbf16, #tpu.memory_space<vmem>>, %arg3: memref<2x8x8x128xf32, #tpu.memory_space<vmem>>, %arg4: memref<2x1152x128xbf16, #tpu.memory_space<vmem>>, %arg5: memref<2x1x128xf32, #tpu.memory_space<vmem>>, %arg6: memref<2x2x1x1x128xf32, #tpu.memory_space<vmem>>, %arg7: memref<2x2x1x1x128xf32, #tpu.memory_space<vmem>>, %arg8: memref<1152x512xbf16, #tpu.memory_space<vmem>>, %arg9: memref<1x512xf32, #tpu.memory_space<vmem>>, %arg10: memref<512x256xbf16, #tpu.memory_space<vmem>>, %arg11: memref<1x256xf32, #tpu.memory_space<vmem>>, %arg12: memref<2x8x8x128xf32, #tpu.memory_space<vmem>>, %arg13: memref<2x8x8x256xf32, #tpu.memory_space<vmem>>, %arg14: memref<2x10x10x128xf32, #tpu.memory_space<vmem>>) attributes {dimension_semantics = [#tpu.dimension_semantics<parallel>], iteration_bounds = array<i64: 2>, scalar_prefetch = 0 : i64, scratch_operands = 1 : i64, tpu.core_type = #tpu.core_type<tc>, window_params = [{transform_indices = @transform_0, window_bounds = array<i64: 2, 8, 8, 128>}, {pipeline_mode = #tpu.pipeline_mode<synchronous>, transform_indices = @transform_1, window_bounds = array<i64: 2, 128, 128>}, {pipeline_mode = #tpu.pipeline_mode<synchronous>, transform_indices = @transform_2, window_bounds = array<i64: 2, 8, 8, 128>}, {pipeline_mode = #tpu.pipeline_mode<synchronous>, transform_indices = @transform_3, window_bounds = array<i64: 2, 1152, 128>}, {pipeline_mode = #tpu.pipeline_mode<synchronous>, transform_indices = @transform_4, window_bounds = array<i64: 2, 1, 128>}, {transform_indices = @transform_5, window_bounds = array<i64: 2, 2, 1, 1, 128>}, {transform_indices = @transform_6, window_bounds = array<i64: 2, 2, 1, 1, 128>}, {pipeline_mode = #tpu.pipeline_mode<synchronous>, transform_indices = @transform_7, window_bounds = array<i64: 1152, 512>}, {pipeline_mode = #tpu.pipeline_mode<synchronous>, transform_indices = @transform_8, window_bounds = array<i64: 1, 512>}, {pipeline_mode = #tpu.pipeline_mode<synchronous>, transform_indices = @transform_9, window_bounds = array<i64: 512, 256>}, {pipeline_mode = #tpu.pipeline_mode<synchronous>, transform_indices = @transform_10, window_bounds = array<i64: 1, 256>}, {transform_indices = @transform_11, window_bounds = array<i64: 2, 8, 8, 128>}, {transform_indices = @transform_12, window_bounds = array<i64: 2, 8, 8, 256>}]} {
    %cst = arith.constant 0.000000e+00 : f32
    %0 = vector.broadcast %cst : f32 to vector<2x10x10x128xf32>
    %c0 = arith.constant 0 : index
    %c0_0 = arith.constant 0 : index
    %c0_1 = arith.constant 0 : index
    %c0_2 = arith.constant 0 : index
    %1 = vector.load %arg14[%c0, %c0_0, %c0_1, %c0_2] : memref<2x10x10x128xf32, #tpu.memory_space<vmem>>, vector<2x10x10x128xf32>
    tpu.vector_store %arg14[%c0, %c0_0, %c0_1, %c0_2], %0 {strides = array<i32>} : memref<2x10x10x128xf32, #tpu.memory_space<vmem>>, vector<2x10x10x128xf32>,
    %c0_3 = arith.constant 0 : index
    %c0_4 = arith.constant 0 : index
    %c0_5 = arith.constant 0 : index
    %c0_6 = arith.constant 0 : index
    %2 = vector.load %arg1[%c0_3, %c0_4, %c0_5, %c0_6] : memref<2x8x8x128xf32, #tpu.memory_space<vmem>>, vector<2x8x8x128xf32>
    %3 = vector.shape_cast %2 : vector<2x8x8x128xf32> to vector<128x128xf32>
    %4 = arith.truncf %3 : vector<128x128xf32> to vector<128x128xbf16>
    %c0_7 = arith.constant 0 : index
    %c0_8 = arith.constant 0 : index
    %c0_9 = arith.constant 0 : index
    %5 = vector.load %arg2[%c0_7, %c0_8, %c0_9] : memref<2x128x128xbf16, #tpu.memory_space<vmem>>, vector<1x128x128xbf16>
    %6 = vector.shape_cast %5 : vector<1x128x128xbf16> to vector<128x128xbf16>
    %cst_10 = arith.constant dense<0.000000e+00> : vector<128x128xf32>
    %7 = tpu.matmul %4, %6, %cst_10 {dimension_numbers = #tpu.dot_dimension_numbers<[1], [0], [0], [1], [0, 0, 1, 1], [], []>} : vector<128x128xbf16>, vector<128x128xbf16>, vector<128x128xf32> -> vector<128x128xf32>
    %8 = vector.shape_cast %7 : vector<128x128xf32> to vector<2x8x8x128xf32>
    %c0_11 = arith.constant 0 : index
    %c0_12 = arith.constant 0 : index
    %c0_13 = arith.constant 0 : index
    %c0_14 = arith.constant 0 : index
    %9 = vector.load %arg3[%c0_11, %c0_12, %c0_13, %c0_14] : memref<2x8x8x128xf32, #tpu.memory_space<vmem>>, vector<1x8x8x128xf32>
    %10 = vector.shape_cast %9 : vector<1x8x8x128xf32> to vector<8x8x128xf32>
    %11 = vector.shape_cast %10 : vector<8x8x128xf32> to vector<1x8x8x128xf32>
    %12 = vector.broadcast %11 : vector<1x8x8x128xf32> to vector<2x8x8x128xf32>
    %13 = arith.addf %8, %12 : vector<2x8x8x128xf32>
    %cst_15 = arith.constant 0.000000e+00 : f32
    %14 = vector.broadcast %cst_15 : f32 to vector<2x8x8x128xf32>
    %15 = arith.maximumf %13, %14 : vector<2x8x8x128xf32>
    %c0_16 = arith.constant 0 : index
    %c1 = arith.constant 1 : index
    %c1_17 = arith.constant 1 : index
    %c0_18 = arith.constant 0 : index
    %16 = vector.load %arg14[%c0_16, %c1, %c1_17, %c0_18] : memref<2x10x10x128xf32, #tpu.memory_space<vmem>>, vector<2x8x8x128xf32>
    tpu.vector_store %arg14[%c0_16, %c1, %c1_17, %c0_18], %15 {strides = array<i32>} : memref<2x10x10x128xf32, #tpu.memory_space<vmem>>, vector<2x8x8x128xf32>,
    %c0_19 = arith.constant 0 : index
    %c0_20 = arith.constant 0 : index
    %c0_21 = arith.constant 0 : index
    %c0_22 = arith.constant 0 : index
    %17 = vector.load %arg14[%c0_19, %c0_20, %c0_21, %c0_22] : memref<2x10x10x128xf32, #tpu.memory_space<vmem>>, vector<2x10x10x128xf32>
    %18 = vector.extract_strided_slice %17 {offsets = [0, 0, 0, 0], sizes = [2, 8, 8, 128], strides = [1, 1, 1, 1]} : vector<2x10x10x128xf32> to vector<2x8x8x128xf32>
    %19 = vector.shape_cast %18 : vector<2x8x8x128xf32> to vector<128x128xf32>
    %20 = arith.truncf %19 : vector<128x128xf32> to vector<128x128xbf16>
    %21 = vector.extract_strided_slice %17 {offsets = [0, 0, 1, 0], sizes = [2, 8, 8, 128], strides = [1, 1, 1, 1]} : vector<2x10x10x128xf32> to vector<2x8x8x128xf32>
    %22 = vector.shape_cast %21 : vector<2x8x8x128xf32> to vector<128x128xf32>
    %23 = arith.truncf %22 : vector<128x128xf32> to vector<128x128xbf16>
    %24 = vector.extract_strided_slice %17 {offsets = [0, 0, 2, 0], sizes = [2, 8, 8, 128], strides = [1, 1, 1, 1]} : vector<2x10x10x128xf32> to vector<2x8x8x128xf32>
    %25 = vector.shape_cast %24 : vector<2x8x8x128xf32> to vector<128x128xf32>
    %26 = arith.truncf %25 : vector<128x128xf32> to vector<128x128xbf16>
    %27 = vector.extract_strided_slice %17 {offsets = [0, 1, 0, 0], sizes = [2, 8, 8, 128], strides = [1, 1, 1, 1]} : vector<2x10x10x128xf32> to vector<2x8x8x128xf32>
    %28 = vector.shape_cast %27 : vector<2x8x8x128xf32> to vector<128x128xf32>
    %29 = arith.truncf %28 : vector<128x128xf32> to vector<128x128xbf16>
    %30 = vector.extract_strided_slice %17 {offsets = [0, 1, 1, 0], sizes = [2, 8, 8, 128], strides = [1, 1, 1, 1]} : vector<2x10x10x128xf32> to vector<2x8x8x128xf32>
    %31 = vector.shape_cast %30 : vector<2x8x8x128xf32> to vector<128x128xf32>
    %32 = arith.truncf %31 : vector<128x128xf32> to vector<128x128xbf16>
    %33 = vector.extract_strided_slice %17 {offsets = [0, 1, 2, 0], sizes = [2, 8, 8, 128], strides = [1, 1, 1, 1]} : vector<2x10x10x128xf32> to vector<2x8x8x128xf32>
    %34 = vector.shape_cast %33 : vector<2x8x8x128xf32> to vector<128x128xf32>
    %35 = arith.truncf %34 : vector<128x128xf32> to vector<128x128xbf16>
    %36 = vector.extract_strided_slice %17 {offsets = [0, 2, 0, 0], sizes = [2, 8, 8, 128], strides = [1, 1, 1, 1]} : vector<2x10x10x128xf32> to vector<2x8x8x128xf32>
    %37 = vector.shape_cast %36 : vector<2x8x8x128xf32> to vector<128x128xf32>
    %38 = arith.truncf %37 : vector<128x128xf32> to vector<128x128xbf16>
    %39 = vector.extract_strided_slice %17 {offsets = [0, 2, 1, 0], sizes = [2, 8, 8, 128], strides = [1, 1, 1, 1]} : vector<2x10x10x128xf32> to vector<2x8x8x128xf32>
    %40 = vector.shape_cast %39 : vector<2x8x8x128xf32> to vector<128x128xf32>
    %41 = arith.truncf %40 : vector<128x128xf32> to vector<128x128xbf16>
    %42 = vector.extract_strided_slice %17 {offsets = [0, 2, 2, 0], sizes = [2, 8, 8, 128], strides = [1, 1, 1, 1]} : vector<2x10x10x128xf32> to vector<2x8x8x128xf32>
    %43 = vector.shape_cast %42 : vector<2x8x8x128xf32> to vector<128x128xf32>
    %44 = arith.truncf %43 : vector<128x128xf32> to vector<128x128xbf16>
    %45 = tpu.concatenate %20, %23, %26, %29, %32, %35, %38, %41, %44 in 1 : vector<128x128xbf16>, vector<128x128xbf16>, vector<128x128xbf16>, vector<128x128xbf16>, vector<128x128xbf16>, vector<128x128xbf16>, vector<128x128xbf16>, vector<128x128xbf16>, vector<128x128xbf16> -> vector<128x1152xbf16>
    %c0_23 = arith.constant 0 : index
    %c0_24 = arith.constant 0 : index
    %c0_25 = arith.constant 0 : index
    %46 = vector.load %arg4[%c0_23, %c0_24, %c0_25] : memref<2x1152x128xbf16, #tpu.memory_space<vmem>>, vector<1x1152x128xbf16>
    %47 = vector.shape_cast %46 : vector<1x1152x128xbf16> to vector<1152x128xbf16>
    %cst_26 = arith.constant dense<0.000000e+00> : vector<128x128xf32>
    %48 = tpu.matmul %45, %47, %cst_26 {dimension_numbers = #tpu.dot_dimension_numbers<[1], [0], [0], [1], [0, 0, 1, 1], [], []>} : vector<128x1152xbf16>, vector<1152x128xbf16>, vector<128x128xf32> -> vector<128x128xf32>
    %c0_27 = arith.constant 0 : index
    %c0_28 = arith.constant 0 : index
    %c0_29 = arith.constant 0 : index
    %49 = vector.load %arg5[%c0_27, %c0_28, %c0_29] : memref<2x1x128xf32, #tpu.memory_space<vmem>>, vector<1x1x128xf32>
    %50 = vector.shape_cast %49 : vector<1x1x128xf32> to vector<1x128xf32>
    %51 = vector.broadcast %50 : vector<1x128xf32> to vector<128x128xf32>
    %52 = arith.addf %48, %51 : vector<128x128xf32>
    %53 = vector.shape_cast %52 : vector<128x128xf32> to vector<2x8x8x128xf32>
    %c0_30 = arith.constant 0 : index
    %c0_31 = arith.constant 0 : index
    %c0_32 = arith.constant 0 : index
    %c0_33 = arith.constant 0 : index
    %c0_34 = arith.constant 0 : index
    %54 = vector.load %arg6[%c0_30, %c0_31, %c0_32, %c0_33, %c0_34] : memref<2x2x1x1x128xf32, #tpu.memory_space<vmem>>, vector<2x1x1x1x128xf32>
    %55 = vector.shape_cast %54 : vector<2x1x1x1x128xf32> to vector<2x1x1x128xf32>
    %56 = vector.broadcast %55 : vector<2x1x1x128xf32> to vector<2x8x8x128xf32>
    %57 = arith.mulf %56, %53 : vector<2x8x8x128xf32>
    %c0_35 = arith.constant 0 : index
    %c0_36 = arith.constant 0 : index
    %c0_37 = arith.constant 0 : index
    %c0_38 = arith.constant 0 : index
    %c0_39 = arith.constant 0 : index
    %58 = vector.load %arg7[%c0_35, %c0_36, %c0_37, %c0_38, %c0_39] : memref<2x2x1x1x128xf32, #tpu.memory_space<vmem>>, vector<2x1x1x1x128xf32>
    %59 = vector.shape_cast %58 : vector<2x1x1x1x128xf32> to vector<2x1x1x128xf32>
    %60 = vector.broadcast %59 : vector<2x1x1x128xf32> to vector<2x8x8x128xf32>
    %61 = arith.addf %57, %60 : vector<2x8x8x128xf32>
    %cst_40 = arith.constant 0.000000e+00 : f32
    %62 = vector.broadcast %cst_40 : f32 to vector<2x8x8x128xf32>
    %63 = arith.maximumf %61, %62 : vector<2x8x8x128xf32>
    %64 = arith.addf %63, %15 : vector<2x8x8x128xf32>
    %65 = vector.shape_cast %64 : vector<2x8x8x128xf32> to vector<128x128xf32>
    %66 = arith.truncf %65 : vector<128x128xf32> to vector<128x128xbf16>
    %c1_41 = arith.constant 1 : index
    %c0_42 = arith.constant 0 : index
    %c0_43 = arith.constant 0 : index
    %67 = vector.load %arg2[%c1_41, %c0_42, %c0_43] : memref<2x128x128xbf16, #tpu.memory_space<vmem>>, vector<1x128x128xbf16>
    %68 = vector.shape_cast %67 : vector<1x128x128xbf16> to vector<128x128xbf16>
    %cst_44 = arith.constant dense<0.000000e+00> : vector<128x128xf32>
    %69 = tpu.matmul %66, %68, %cst_44 {dimension_numbers = #tpu.dot_dimension_numbers<[1], [0], [0], [1], [0, 0, 1, 1], [], []>} : vector<128x128xbf16>, vector<128x128xbf16>, vector<128x128xf32> -> vector<128x128xf32>
    %70 = vector.shape_cast %69 : vector<128x128xf32> to vector<2x8x8x128xf32>
    %c1_45 = arith.constant 1 : index
    %c0_46 = arith.constant 0 : index
    %c0_47 = arith.constant 0 : index
    %c0_48 = arith.constant 0 : index
    %71 = vector.load %arg3[%c1_45, %c0_46, %c0_47, %c0_48] : memref<2x8x8x128xf32, #tpu.memory_space<vmem>>, vector<1x8x8x128xf32>
    %72 = vector.shape_cast %71 : vector<1x8x8x128xf32> to vector<8x8x128xf32>
    %73 = vector.shape_cast %72 : vector<8x8x128xf32> to vector<1x8x8x128xf32>
    %74 = vector.broadcast %73 : vector<1x8x8x128xf32> to vector<2x8x8x128xf32>
    %75 = arith.addf %70, %74 : vector<2x8x8x128xf32>
    %cst_49 = arith.constant 0.000000e+00 : f32
    %76 = vector.broadcast %cst_49 : f32 to vector<2x8x8x128xf32>
    %77 = arith.maximumf %75, %76 : vector<2x8x8x128xf32>
    %c0_50 = arith.constant 0 : index
    %c1_51 = arith.constant 1 : index
    %c1_52 = arith.constant 1 : index
    %c0_53 = arith.constant 0 : index
    %78 = vector.load %arg14[%c0_50, %c1_51, %c1_52, %c0_53] : memref<2x10x10x128xf32, #tpu.memory_space<vmem>>, vector<2x8x8x128xf32>
    tpu.vector_store %arg14[%c0_50, %c1_51, %c1_52, %c0_53], %77 {strides = array<i32>} : memref<2x10x10x128xf32, #tpu.memory_space<vmem>>, vector<2x8x8x128xf32>,
    %c0_54 = arith.constant 0 : index
    %c0_55 = arith.constant 0 : index
    %c0_56 = arith.constant 0 : index
    %c0_57 = arith.constant 0 : index
    %79 = vector.load %arg14[%c0_54, %c0_55, %c0_56, %c0_57] : memref<2x10x10x128xf32, #tpu.memory_space<vmem>>, vector<2x10x10x128xf32>
    %80 = vector.extract_strided_slice %79 {offsets = [0, 0, 0, 0], sizes = [2, 8, 8, 128], strides = [1, 1, 1, 1]} : vector<2x10x10x128xf32> to vector<2x8x8x128xf32>
    %81 = vector.shape_cast %80 : vector<2x8x8x128xf32> to vector<128x128xf32>
    %82 = arith.truncf %81 : vector<128x128xf32> to vector<128x128xbf16>
    %83 = vector.extract_strided_slice %79 {offsets = [0, 0, 1, 0], sizes = [2, 8, 8, 128], strides = [1, 1, 1, 1]} : vector<2x10x10x128xf32> to vector<2x8x8x128xf32>
    %84 = vector.shape_cast %83 : vector<2x8x8x128xf32> to vector<128x128xf32>
    %85 = arith.truncf %84 : vector<128x128xf32> to vector<128x128xbf16>
    %86 = vector.extract_strided_slice %79 {offsets = [0, 0, 2, 0], sizes = [2, 8, 8, 128], strides = [1, 1, 1, 1]} : vector<2x10x10x128xf32> to vector<2x8x8x128xf32>
    %87 = vector.shape_cast %86 : vector<2x8x8x128xf32> to vector<128x128xf32>
    %88 = arith.truncf %87 : vector<128x128xf32> to vector<128x128xbf16>
    %89 = vector.extract_strided_slice %79 {offsets = [0, 1, 0, 0], sizes = [2, 8, 8, 128], strides = [1, 1, 1, 1]} : vector<2x10x10x128xf32> to vector<2x8x8x128xf32>
    %90 = vector.shape_cast %89 : vector<2x8x8x128xf32> to vector<128x128xf32>
    %91 = arith.truncf %90 : vector<128x128xf32> to vector<128x128xbf16>
    %92 = vector.extract_strided_slice %79 {offsets = [0, 1, 1, 0], sizes = [2, 8, 8, 128], strides = [1, 1, 1, 1]} : vector<2x10x10x128xf32> to vector<2x8x8x128xf32>
    %93 = vector.shape_cast %92 : vector<2x8x8x128xf32> to vector<128x128xf32>
    %94 = arith.truncf %93 : vector<128x128xf32> to vector<128x128xbf16>
    %95 = vector.extract_strided_slice %79 {offsets = [0, 1, 2, 0], sizes = [2, 8, 8, 128], strides = [1, 1, 1, 1]} : vector<2x10x10x128xf32> to vector<2x8x8x128xf32>
    %96 = vector.shape_cast %95 : vector<2x8x8x128xf32> to vector<128x128xf32>
    %97 = arith.truncf %96 : vector<128x128xf32> to vector<128x128xbf16>
    %98 = vector.extract_strided_slice %79 {offsets = [0, 2, 0, 0], sizes = [2, 8, 8, 128], strides = [1, 1, 1, 1]} : vector<2x10x10x128xf32> to vector<2x8x8x128xf32>
    %99 = vector.shape_cast %98 : vector<2x8x8x128xf32> to vector<128x128xf32>
    %100 = arith.truncf %99 : vector<128x128xf32> to vector<128x128xbf16>
    %101 = vector.extract_strided_slice %79 {offsets = [0, 2, 1, 0], sizes = [2, 8, 8, 128], strides = [1, 1, 1, 1]} : vector<2x10x10x128xf32> to vector<2x8x8x128xf32>
    %102 = vector.shape_cast %101 : vector<2x8x8x128xf32> to vector<128x128xf32>
    %103 = arith.truncf %102 : vector<128x128xf32> to vector<128x128xbf16>
    %104 = vector.extract_strided_slice %79 {offsets = [0, 2, 2, 0], sizes = [2, 8, 8, 128], strides = [1, 1, 1, 1]} : vector<2x10x10x128xf32> to vector<2x8x8x128xf32>
    %105 = vector.shape_cast %104 : vector<2x8x8x128xf32> to vector<128x128xf32>
    %106 = arith.truncf %105 : vector<128x128xf32> to vector<128x128xbf16>
    %107 = tpu.concatenate %82, %85, %88, %91, %94, %97, %100, %103, %106 in 1 : vector<128x128xbf16>, vector<128x128xbf16>, vector<128x128xbf16>, vector<128x128xbf16>, vector<128x128xbf16>, vector<128x128xbf16>, vector<128x128xbf16>, vector<128x128xbf16>, vector<128x128xbf16> -> vector<128x1152xbf16>
    %c1_58 = arith.constant 1 : index
    %c0_59 = arith.constant 0 : index
    %c0_60 = arith.constant 0 : index
    %108 = vector.load %arg4[%c1_58, %c0_59, %c0_60] : memref<2x1152x128xbf16, #tpu.memory_space<vmem>>, vector<1x1152x128xbf16>
    %109 = vector.shape_cast %108 : vector<1x1152x128xbf16> to vector<1152x128xbf16>
    %cst_61 = arith.constant dense<0.000000e+00> : vector<128x128xf32>
    %110 = tpu.matmul %107, %109, %cst_61 {dimension_numbers = #tpu.dot_dimension_numbers<[1], [0], [0], [1], [0, 0, 1, 1], [], []>} : vector<128x1152xbf16>, vector<1152x128xbf16>, vector<128x128xf32> -> vector<128x128xf32>
    %c1_62 = arith.constant 1 : index
    %c0_63 = arith.constant 0 : index
    %c0_64 = arith.constant 0 : index
    %111 = vector.load %arg5[%c1_62, %c0_63, %c0_64] : memref<2x1x128xf32, #tpu.memory_space<vmem>>, vector<1x1x128xf32>
    %112 = vector.shape_cast %111 : vector<1x1x128xf32> to vector<1x128xf32>
    %113 = vector.broadcast %112 : vector<1x128xf32> to vector<128x128xf32>
    %114 = arith.addf %110, %113 : vector<128x128xf32>
    %115 = vector.shape_cast %114 : vector<128x128xf32> to vector<2x8x8x128xf32>
    %c0_65 = arith.constant 0 : index
    %c1_66 = arith.constant 1 : index
    %c0_67 = arith.constant 0 : index
    %c0_68 = arith.constant 0 : index
    %c0_69 = arith.constant 0 : index
    %116 = vector.load %arg6[%c0_65, %c1_66, %c0_67, %c0_68, %c0_69] : memref<2x2x1x1x128xf32, #tpu.memory_space<vmem>>, vector<2x1x1x1x128xf32>
    %117 = vector.shape_cast %116 : vector<2x1x1x1x128xf32> to vector<2x1x1x128xf32>
    %118 = vector.broadcast %117 : vector<2x1x1x128xf32> to vector<2x8x8x128xf32>
    %119 = arith.mulf %118, %115 : vector<2x8x8x128xf32>
    %c0_70 = arith.constant 0 : index
    %c1_71 = arith.constant 1 : index
    %c0_72 = arith.constant 0 : index
    %c0_73 = arith.constant 0 : index
    %c0_74 = arith.constant 0 : index
    %120 = vector.load %arg7[%c0_70, %c1_71, %c0_72, %c0_73, %c0_74] : memref<2x2x1x1x128xf32, #tpu.memory_space<vmem>>, vector<2x1x1x1x128xf32>
    %121 = vector.shape_cast %120 : vector<2x1x1x1x128xf32> to vector<2x1x1x128xf32>
    %122 = vector.broadcast %121 : vector<2x1x1x128xf32> to vector<2x8x8x128xf32>
    %123 = arith.addf %119, %122 : vector<2x8x8x128xf32>
    %cst_75 = arith.constant 0.000000e+00 : f32
    %124 = vector.broadcast %cst_75 : f32 to vector<2x8x8x128xf32>
    %125 = arith.maximumf %123, %124 : vector<2x8x8x128xf32>
    %126 = arith.addf %125, %77 : vector<2x8x8x128xf32>
    %c0_76 = arith.constant 0 : index
    %c0_77 = arith.constant 0 : index
    %c0_78 = arith.constant 0 : index
    %c0_79 = arith.constant 0 : index
    %127 = vector.load %arg12[%c0_76, %c0_77, %c0_78, %c0_79] : memref<2x8x8x128xf32, #tpu.memory_space<vmem>>, vector<2x8x8x128xf32>
    tpu.vector_store %arg12[%c0_76, %c0_77, %c0_78, %c0_79], %126 {strides = array<i32>} : memref<2x8x8x128xf32, #tpu.memory_space<vmem>>, vector<2x8x8x128xf32>,
    %c0_80 = arith.constant 0 : index
    %c1_81 = arith.constant 1 : index
    %c1_82 = arith.constant 1 : index
    %c0_83 = arith.constant 0 : index
    %128 = vector.load %arg14[%c0_80, %c1_81, %c1_82, %c0_83] : memref<2x10x10x128xf32, #tpu.memory_space<vmem>>, vector<2x8x8x128xf32>
    tpu.vector_store %arg14[%c0_80, %c1_81, %c1_82, %c0_83], %126 {strides = array<i32>} : memref<2x10x10x128xf32, #tpu.memory_space<vmem>>, vector<2x8x8x128xf32>,
    %c0_84 = arith.constant 0 : index
    %c0_85 = arith.constant 0 : index
    %c0_86 = arith.constant 0 : index
    %c0_87 = arith.constant 0 : index
    %129 = vector.load %arg14[%c0_84, %c0_85, %c0_86, %c0_87] : memref<2x10x10x128xf32, #tpu.memory_space<vmem>>, vector<2x10x10x128xf32>
    %130 = vector.extract_strided_slice %129 {offsets = [0, 0, 0, 0], sizes = [2, 8, 8, 128], strides = [1, 1, 1, 1]} : vector<2x10x10x128xf32> to vector<2x8x8x128xf32>
    %131 = vector.shape_cast %130 : vector<2x8x8x128xf32> to vector<128x128xf32>
    %132 = arith.truncf %131 : vector<128x128xf32> to vector<128x128xbf16>
    %133 = vector.extract_strided_slice %129 {offsets = [0, 0, 1, 0], sizes = [2, 8, 8, 128], strides = [1, 1, 1, 1]} : vector<2x10x10x128xf32> to vector<2x8x8x128xf32>
    %134 = vector.shape_cast %133 : vector<2x8x8x128xf32> to vector<128x128xf32>
    %135 = arith.truncf %134 : vector<128x128xf32> to vector<128x128xbf16>
    %136 = vector.extract_strided_slice %129 {offsets = [0, 0, 2, 0], sizes = [2, 8, 8, 128], strides = [1, 1, 1, 1]} : vector<2x10x10x128xf32> to vector<2x8x8x128xf32>
    %137 = vector.shape_cast %136 : vector<2x8x8x128xf32> to vector<128x128xf32>
    %138 = arith.truncf %137 : vector<128x128xf32> to vector<128x128xbf16>
    %139 = vector.extract_strided_slice %129 {offsets = [0, 1, 0, 0], sizes = [2, 8, 8, 128], strides = [1, 1, 1, 1]} : vector<2x10x10x128xf32> to vector<2x8x8x128xf32>
    %140 = vector.shape_cast %139 : vector<2x8x8x128xf32> to vector<128x128xf32>
    %141 = arith.truncf %140 : vector<128x128xf32> to vector<128x128xbf16>
    %142 = vector.extract_strided_slice %129 {offsets = [0, 1, 1, 0], sizes = [2, 8, 8, 128], strides = [1, 1, 1, 1]} : vector<2x10x10x128xf32> to vector<2x8x8x128xf32>
    %143 = vector.shape_cast %142 : vector<2x8x8x128xf32> to vector<128x128xf32>
    %144 = arith.truncf %143 : vector<128x128xf32> to vector<128x128xbf16>
    %145 = vector.extract_strided_slice %129 {offsets = [0, 1, 2, 0], sizes = [2, 8, 8, 128], strides = [1, 1, 1, 1]} : vector<2x10x10x128xf32> to vector<2x8x8x128xf32>
    %146 = vector.shape_cast %145 : vector<2x8x8x128xf32> to vector<128x128xf32>
    %147 = arith.truncf %146 : vector<128x128xf32> to vector<128x128xbf16>
    %148 = vector.extract_strided_slice %129 {offsets = [0, 2, 0, 0], sizes = [2, 8, 8, 128], strides = [1, 1, 1, 1]} : vector<2x10x10x128xf32> to vector<2x8x8x128xf32>
    %149 = vector.shape_cast %148 : vector<2x8x8x128xf32> to vector<128x128xf32>
    %150 = arith.truncf %149 : vector<128x128xf32> to vector<128x128xbf16>
    %151 = vector.extract_strided_slice %129 {offsets = [0, 2, 1, 0], sizes = [2, 8, 8, 128], strides = [1, 1, 1, 1]} : vector<2x10x10x128xf32> to vector<2x8x8x128xf32>
    %152 = vector.shape_cast %151 : vector<2x8x8x128xf32> to vector<128x128xf32>
    %153 = arith.truncf %152 : vector<128x128xf32> to vector<128x128xbf16>
    %154 = vector.extract_strided_slice %129 {offsets = [0, 2, 2, 0], sizes = [2, 8, 8, 128], strides = [1, 1, 1, 1]} : vector<2x10x10x128xf32> to vector<2x8x8x128xf32>
    %155 = vector.shape_cast %154 : vector<2x8x8x128xf32> to vector<128x128xf32>
    %156 = arith.truncf %155 : vector<128x128xf32> to vector<128x128xbf16>
    %157 = tpu.concatenate %132, %135, %138, %141, %144, %147, %150, %153, %156 in 1 : vector<128x128xbf16>, vector<128x128xbf16>, vector<128x128xbf16>, vector<128x128xbf16>, vector<128x128xbf16>, vector<128x128xbf16>, vector<128x128xbf16>, vector<128x128xbf16>, vector<128x128xbf16> -> vector<128x1152xbf16>
    %c0_88 = arith.constant 0 : index
    %c0_89 = arith.constant 0 : index
    %158 = vector.load %arg8[%c0_88, %c0_89] : memref<1152x512xbf16, #tpu.memory_space<vmem>>, vector<1152x512xbf16>
    %cst_90 = arith.constant dense<0.000000e+00> : vector<128x512xf32>
    %159 = tpu.matmul %157, %158, %cst_90 {dimension_numbers = #tpu.dot_dimension_numbers<[1], [0], [0], [1], [0, 0, 1, 1], [], []>} : vector<128x1152xbf16>, vector<1152x512xbf16>, vector<128x512xf32> -> vector<128x512xf32>
    %c0_91 = arith.constant 0 : index
    %c0_92 = arith.constant 0 : index
    %160 = vector.load %arg9[%c0_91, %c0_92] : memref<1x512xf32, #tpu.memory_space<vmem>>, vector<1x512xf32>
    %161 = vector.broadcast %160 : vector<1x512xf32> to vector<128x512xf32>
    %162 = arith.addf %159, %161 : vector<128x512xf32>
    %cst_93 = arith.constant 0.000000e+00 : f32
    %163 = vector.broadcast %cst_93 : f32 to vector<128x512xf32>
    %164 = arith.maximumf %162, %163 : vector<128x512xf32>
    %165 = arith.truncf %164 : vector<128x512xf32> to vector<128x512xbf16>
    %c0_94 = arith.constant 0 : index
    %c0_95 = arith.constant 0 : index
    %166 = vector.load %arg10[%c0_94, %c0_95] : memref<512x256xbf16, #tpu.memory_space<vmem>>, vector<512x256xbf16>
    %cst_96 = arith.constant dense<0.000000e+00> : vector<128x256xf32>
    %167 = tpu.matmul %165, %166, %cst_96 {dimension_numbers = #tpu.dot_dimension_numbers<[1], [0], [0], [1], [0, 0, 1, 1], [], []>} : vector<128x512xbf16>, vector<512x256xbf16>, vector<128x256xf32> -> vector<128x256xf32>
    %c0_97 = arith.constant 0 : index
    %c0_98 = arith.constant 0 : index
    %168 = vector.load %arg11[%c0_97, %c0_98] : memref<1x256xf32, #tpu.memory_space<vmem>>, vector<1x256xf32>
    %169 = vector.broadcast %168 : vector<1x256xf32> to vector<128x256xf32>
    %170 = arith.addf %167, %169 : vector<128x256xf32>
    %171 = vector.shape_cast %170 : vector<128x256xf32> to vector<2x8x8x256xf32>
    %c0_99 = arith.constant 0 : index
    %c0_100 = arith.constant 0 : index
    %c0_101 = arith.constant 0 : index
    %c0_102 = arith.constant 0 : index
    %172 = vector.load %arg13[%c0_99, %c0_100, %c0_101, %c0_102] : memref<2x8x8x256xf32, #tpu.memory_space<vmem>>, vector<2x8x8x256xf32>
    tpu.vector_store %arg13[%c0_99, %c0_100, %c0_101, %c0_102], %171 {strides = array<i32>} : memref<2x8x8x256xf32, #tpu.memory_space<vmem>>, vector<2x8x8x256xf32>,
    return
  }
  func.func @transform_0(%arg0: i32) -> (i32, i32, i32, i32) {
    %c0_i32 = arith.constant 0 : i32
    %c0_i32_0 = arith.constant 0 : i32
    %c0_i32_1 = arith.constant 0 : i32
    %c0_i32_2 = arith.constant 0 : i32
    return %arg0, %c0_i32, %c0_i32_0, %c0_i32_1 : i32, i32, i32, i32
  }
  func.func @transform_1(%arg0: i32) -> (i32, i32, i32) {
    %c0_i32 = arith.constant 0 : i32
    %c0_i32_0 = arith.constant 0 : i32
    %c0_i32_1 = arith.constant 0 : i32
    %c0_i32_2 = arith.constant 0 : i32
    return %c0_i32, %c0_i32_0, %c0_i32_1 : i32, i32, i32
  }
  func.func @transform_2(%arg0: i32) -> (i32, i32, i32, i32) {
    %c0_i32 = arith.constant 0 : i32
    %c0_i32_0 = arith.constant 0 : i32
    %c0_i32_1 = arith.constant 0 : i32
    %c0_i32_2 = arith.constant 0 : i32
    %c0_i32_3 = arith.constant 0 : i32
    return %c0_i32, %c0_i32_0, %c0_i32_1, %c0_i32_2 : i32, i32, i32, i32
  }
  func.func @transform_3(%arg0: i32) -> (i32, i32, i32) {
    %c0_i32 = arith.constant 0 : i32
    %c0_i32_0 = arith.constant 0 : i32
    %c0_i32_1 = arith.constant 0 : i32
    %c0_i32_2 = arith.constant 0 : i32
    return %c0_i32, %c0_i32_0, %c0_i32_1 : i32, i32, i32
  }
  func.func @transform_4(%arg0: i32) -> (i32, i32, i32) {
    %c0_i32 = arith.constant 0 : i32
    %c0_i32_0 = arith.constant 0 : i32
    %c0_i32_1 = arith.constant 0 : i32
    %c0_i32_2 = arith.constant 0 : i32
    return %c0_i32, %c0_i32_0, %c0_i32_1 : i32, i32, i32
  }
  func.func @transform_5(%arg0: i32) -> (i32, i32, i32, i32, i32) {
    %c0_i32 = arith.constant 0 : i32
    %c0_i32_0 = arith.constant 0 : i32
    %c0_i32_1 = arith.constant 0 : i32
    %c0_i32_2 = arith.constant 0 : i32
    %c0_i32_3 = arith.constant 0 : i32
    return %arg0, %c0_i32, %c0_i32_0, %c0_i32_1, %c0_i32_2 : i32, i32, i32, i32, i32
  }
  func.func @transform_6(%arg0: i32) -> (i32, i32, i32, i32, i32) {
    %c0_i32 = arith.constant 0 : i32
    %c0_i32_0 = arith.constant 0 : i32
    %c0_i32_1 = arith.constant 0 : i32
    %c0_i32_2 = arith.constant 0 : i32
    %c0_i32_3 = arith.constant 0 : i32
    return %arg0, %c0_i32, %c0_i32_0, %c0_i32_1, %c0_i32_2 : i32, i32, i32, i32, i32
  }
  func.func @transform_7(%arg0: i32) -> (i32, i32) {
    %c0_i32 = arith.constant 0 : i32
    %c0_i32_0 = arith.constant 0 : i32
    %c0_i32_1 = arith.constant 0 : i32
    return %c0_i32, %c0_i32_0 : i32, i32
  }
  func.func @transform_8(%arg0: i32) -> (i32, i32) {
    %c0_i32 = arith.constant 0 : i32
    %c0_i32_0 = arith.constant 0 : i32
    %c0_i32_1 = arith.constant 0 : i32
    return %c0_i32, %c0_i32_0 : i32, i32
  }
  func.func @transform_9(%arg0: i32) -> (i32, i32) {
    %c0_i32 = arith.constant 0 : i32
    %c0_i32_0 = arith.constant 0 : i32
    %c0_i32_1 = arith.constant 0 : i32
    return %c0_i32, %c0_i32_0 : i32, i32
  }
  func.func @transform_10(%arg0: i32) -> (i32, i32) {
    %c0_i32 = arith.constant 0 : i32
    %c0_i32_0 = arith.constant 0 : i32
    %c0_i32_1 = arith.constant 0 : i32
    return %c0_i32, %c0_i32_0 : i32, i32
  }
  func.func @transform_11(%arg0: i32) -> (i32, i32, i32, i32) {
    %c0_i32 = arith.constant 0 : i32
    %c0_i32_0 = arith.constant 0 : i32
    %c0_i32_1 = arith.constant 0 : i32
    %c0_i32_2 = arith.constant 0 : i32
    return %arg0, %c0_i32, %c0_i32_0, %c0_i32_1 : i32, i32, i32, i32
  }
  func.func @transform_12(%arg0: i32) -> (i32, i32, i32, i32) {
    %c0_i32 = arith.constant 0 : i32
    %c0_i32_0 = arith.constant 0 : i32
    %c0_i32_1 = arith.constant 0 : i32
    %c0_i32_2 = arith.constant 0 : i32
    return %arg0, %c0_i32, %c0_i32_0, %c0_i32_1 : i32, i32, i32, i32
  }
}

module attributes {stable_mosaic.version = 11 : i64} {
  func.func @_classifier_kernel(%arg0: memref<32x128xbf16, #tpu.memory_space<vmem>>, %arg1: memref<128x512xbf16, #tpu.memory_space<vmem>>, %arg2: memref<1x512xf32, #tpu.memory_space<vmem>>, %arg3: memref<512x128xbf16, #tpu.memory_space<vmem>>, %arg4: memref<1x128xf32, #tpu.memory_space<vmem>>, %arg5: memref<32x128xf32, #tpu.memory_space<vmem>>) attributes {dimension_semantics = [], scalar_prefetch = 0 : i64, scratch_operands = 0 : i64, tpu.core_type = #tpu.core_type<tc>} {
    %c0 = arith.constant 0 : index
    %c0_0 = arith.constant 0 : index
    %0 = vector.load %arg0[%c0, %c0_0] : memref<32x128xbf16, #tpu.memory_space<vmem>>, vector<32x128xbf16>
    %c0_1 = arith.constant 0 : index
    %c0_2 = arith.constant 0 : index
    %1 = vector.load %arg1[%c0_1, %c0_2] : memref<128x512xbf16, #tpu.memory_space<vmem>>, vector<128x512xbf16>
    %cst = arith.constant dense<0.000000e+00> : vector<32x512xf32>
    %2 = tpu.matmul %0, %1, %cst {dimension_numbers = #tpu.dot_dimension_numbers<[1], [0], [0], [1], [0, 0, 1, 1], [], []>} : vector<32x128xbf16>, vector<128x512xbf16>, vector<32x512xf32> -> vector<32x512xf32>
    %c0_3 = arith.constant 0 : index
    %c0_4 = arith.constant 0 : index
    %3 = vector.load %arg2[%c0_3, %c0_4] : memref<1x512xf32, #tpu.memory_space<vmem>>, vector<1x512xf32>
    %4 = vector.broadcast %3 : vector<1x512xf32> to vector<32x512xf32>
    %5 = arith.addf %2, %4 : vector<32x512xf32>
    %cst_5 = arith.constant 0.000000e+00 : f32
    %6 = vector.broadcast %cst_5 : f32 to vector<32x512xf32>
    %7 = arith.maximumf %5, %6 : vector<32x512xf32>
    %8 = arith.truncf %7 : vector<32x512xf32> to vector<32x512xbf16>
    %c0_6 = arith.constant 0 : index
    %c0_7 = arith.constant 0 : index
    %9 = vector.load %arg3[%c0_6, %c0_7] : memref<512x128xbf16, #tpu.memory_space<vmem>>, vector<512x128xbf16>
    %cst_8 = arith.constant dense<0.000000e+00> : vector<32x128xf32>
    %10 = tpu.matmul %8, %9, %cst_8 {dimension_numbers = #tpu.dot_dimension_numbers<[1], [0], [0], [1], [0, 0, 1, 1], [], []>} : vector<32x512xbf16>, vector<512x128xbf16>, vector<32x128xf32> -> vector<32x128xf32>
    %c0_9 = arith.constant 0 : index
    %c0_10 = arith.constant 0 : index
    %11 = vector.load %arg4[%c0_9, %c0_10] : memref<1x128xf32, #tpu.memory_space<vmem>>, vector<1x128xf32>
    %12 = vector.broadcast %11 : vector<1x128xf32> to vector<32x128xf32>
    %13 = arith.addf %10, %12 : vector<32x128xf32>
    %c0_11 = arith.constant 0 : index
    %c0_12 = arith.constant 0 : index
    %14 = vector.load %arg5[%c0_11, %c0_12] : memref<32x128xf32, #tpu.memory_space<vmem>>, vector<32x128xf32>
    tpu.vector_store %arg5[%c0_11, %c0_12], %13 {strides = array<i32>} : memref<32x128xf32, #tpu.memory_space<vmem>>, vector<32x128xf32>,
    return
  }
}

</mosaic_0001>

<bundles_post_ra>
// kernel: _lambda_.5
= control target key start
LH: loop header
LB: loop body
LE: loop exit
PB: predicated region body
PF: predicated region fallthrough
CT: control target
= control target key end

     0   :  { %8 = vsyncpa [#allocation3], 0  ;;  %s557_s0 = inlined_call_operand.vmem [shape: bf16[2,128], index: 0, kind: input, shape index: {}]   ;;  %s558_s1 = inlined_call_operand.hbm [shape: bf16[128,512], index: 1, kind: input, shape index: {}]   ;;  %s559_s2 = inlined_call_operand.hbm [shape: f32[1,512], index: 2, kind: input, shape index: {}]   ;;  %s560_s3 = inlined_call_operand.vmem [shape: f32[2,512], index: 3, kind: output, shape index: {}]  }
   0x1   :  { %9 = vsyncpa [#allocation5], 0  ;;  %s501_s12 = smov [#allocation2]   ;;  %s453_s16 = scalar_lea.hbm %s558_s1, 4096 }
   0x2   :  { %s17_s13 = sshll.u32 %s501_s12, 4  ;;  %p454_p0 = scmp.ne.s32.totalorder %s558_s1, %s453_s16  ;;  %s18_s13 = int_to_ptr.vmem [resolvable:$true] %s17_s13 }
   0x3   :  { %p457_p1 = scmp.lt.u32.totalorder %s453_s16, %s558_s1 }
   0x5   :  { %p459_p2 = pnand %p457_p1, %p454_p0 }
   0x7   :  { %462 = shalt.err (!%p459_p2)
}
   0x8   :  { %s463_s21 = scalar_lea.vmem %s18_s13, 4096  ;;  %p468_p4 = scmp.lt.s32.totalorder %s18_s13, %s18_s13 }
   0x9   :  { %p464_p3 = scmp.ne.s32.totalorder %s18_s13, %s463_s21  ;;  %p469_p5 = scmp.lt.s32.totalorder %s463_s21, %s463_s21 }
   0xb   :  { %p470_p6 = por %p469_p5, %p468_p4 }
   0xd   :  { %p471_p7 = pnand %p470_p6, %p464_p3 }
   0xf   :  { %474 = shalt.err (!%p471_p7)
}
  0x10   :  { %s502_s22 = smov 256   ;;  %s503_s23 = smov 16  }
  0x11   :  { %23 = dma.hbm_to_vmem [thread:$0]  %s558_s1, 4096, %s18_s13, [#allocation3], %s502_s22, %s502_s22, %s503_s23  }
  0x12   :  { %s504_s26 = smov [#allocation4]   ;;  %s475_s30 = scalar_lea.hbm %s559_s2, 64 }
  0x13   :  { %s30_s27 = sshll.u32 %s504_s26, 4  ;;  %p476_p8 = scmp.ne.s32.totalorder %s559_s2, %s475_s30  ;;  %s31_s27 = int_to_ptr.vmem [resolvable:$true] %s30_s27 }
  0x14   :  { %p479_p9 = scmp.lt.u32.totalorder %s475_s30, %s559_s2 }
  0x16   :  { %p481_p10 = pnand %p479_p9, %p476_p8 }
  0x18   :  { %484 = shalt.err (!%p481_p10)
}
  0x19   :  { %s485_s8 = scalar_lea.vmem %s31_s27, 64  ;;  %p490_p12 = scmp.lt.s32.totalorder %s31_s27, %s31_s27 }
  0x1a   :  { %p486_p11 = scmp.ne.s32.totalorder %s31_s27, %s485_s8  ;;  %p491_p13 = scmp.lt.s32.totalorder %s485_s8, %s485_s8 }
  0x1c   :  { %p492_p0 = por %p491_p13, %p490_p12 }
  0x1e   :  { %p493_p1 = pnand %p492_p0, %p486_p11 }
  0x20   :  { %496 = shalt.err (!%p493_p1)
}
  0x21   :  { %33 = dma.hbm_to_vmem [thread:$0]  %s559_s2, 64, %s31_s27, [#allocation5]  }
  0x22   :  { %497 = dma.done.wait [#allocation3], 4096  }
  0x23   :  { %498 = vsyncadd [#allocation3], 4294963200 }
  0x24   :  { %499 = dma.done.wait [#allocation5], 64  }
  0x25   :  { %500 = vsyncadd [#allocation5], 4294967232  ;;  %v505_v0 = vmov 0   ;;  %v405_v1 = vld [vmem:[#allocation2 + $0x4] ss:$16 sps:$4 sm:$0xff]   ;;  %v76_v34 = vlaneseq }
  0x26   :  { %288 = vmatprep.mubr.bf16.mxu0 %v505_v0  ;;  %329 = vmatprep.mubr.bf16.mxu1 %v505_v0  ;;  %v407_v2 = vld [vmem:[#allocation2 + $0xc] ss:$16 sps:$4 sm:$0xff]   ;;  %v409_v3 = vld [vmem:[#allocation2] ss:$16 sps:$4 sm:$0xff]   ;;  %v410_v4 = vld [vmem:[#allocation2 + $0x8] ss:$16 sps:$4 sm:$0xff]  }
  0x27   :  { %256 = vmatprep.subr.bf16.mxu0 %v405_v1  ;;  %297 = vmatprep.subr.bf16.mxu1 %v407_v2  ;;  %v411_v5 = vld [vmem:[#allocation2 + $0x24] ss:$16 sps:$4 sm:$0xff]   ;;  %v413_v6 = vld [vmem:[#allocation2 + $0x2c] ss:$16 sps:$4 sm:$0xff]   ;;  %v415_v7 = vld [vmem:[#allocation2 + $0x20] ss:$16 sps:$4 sm:$0xff]  }
  0x28   :  { %257 = vmatpush1.bf16.msra.mxu0 %v409_v3  ;;  %298 = vmatpush1.bf16.msra.mxu1 %v410_v4  ;;  %v416_v8 = vld [vmem:[#allocation2 + $0x28] ss:$16 sps:$4 sm:$0xff]   ;;  %v417_v9 = vld [vmem:[#allocation2 + $0x44] ss:$16 sps:$4 sm:$0xff]   ;;  %v419_v10 = vld [vmem:[#allocation2 + $0x4c] ss:$16 sps:$4 sm:$0xff]  }
  0x29   :  { %258 = vmatprep.subr.bf16.mxu0 %v411_v5  ;;  %299 = vmatprep.subr.bf16.mxu1 %v413_v6  ;;  %v421_v11 = vld [vmem:[#allocation2 + $0x40] ss:$16 sps:$4 sm:$0xff]   ;;  %v422_v12 = vld [vmem:[#allocation2 + $0x48] ss:$16 sps:$4 sm:$0xff]   ;;  %v423_v13 = vld [vmem:[#allocation2 + $0x64] ss:$16 sps:$4 sm:$0xff]  }
  0x2a   :  { %v425_v14 = vld [vmem:[#allocation2 + $0x6c] ss:$16 sps:$4 sm:$0xff]   ;;  %v427_v15 = vld [vmem:[#allocation2 + $0x60] ss:$16 sps:$4 sm:$0xff]   ;;  %v428_v16 = vld [vmem:[#allocation2 + $0x68] ss:$16 sps:$4 sm:$0xff]  }
  0x2b   :  { %v429_v17 = vld [vmem:[#allocation2 + $0x84] ss:$16 sps:$4 sm:$0xff]   ;;  %v431_v18 = vld [vmem:[#allocation2 + $0x8c] ss:$16 sps:$4 sm:$0xff]   ;;  %v433_v19 = vld [vmem:[#allocation2 + $0x80] ss:$16 sps:$4 sm:$0xff]  }
  0x2c   :  { %259 = vmatpush1.bf16.msra.mxu0 %v415_v7  ;;  %300 = vmatpush1.bf16.msra.mxu1 %v416_v8  ;;  %v434_v20 = vld [vmem:[#allocation2 + $0x88] ss:$16 sps:$4 sm:$0xff]   ;;  %v435_v21 = vld [vmem:[#allocation2 + $0xa4] ss:$16 sps:$4 sm:$0xff]   ;;  %v437_v22 = vld [vmem:[#allocation2 + $0xac] ss:$16 sps:$4 sm:$0xff]  }
  0x2d   :  { %260 = vmatprep.subr.bf16.mxu0 %v417_v9  ;;  %301 = vmatprep.subr.bf16.mxu1 %v419_v10  ;;  %v439_v23 = vld [vmem:[#allocation2 + $0xa0] ss:$16 sps:$4 sm:$0xff]   ;;  %v440_v24 = vld [vmem:[#allocation2 + $0xa8] ss:$16 sps:$4 sm:$0xff]   ;;  %v441_v25 = vld [vmem:[#allocation2 + $0xc4] ss:$16 sps:$4 sm:$0xff]  }
  0x2e   :  { %v443_v26 = vld [vmem:[#allocation2 + $0xcc] ss:$16 sps:$4 sm:$0xff]   ;;  %v445_v27 = vld [vmem:[#allocation2 + $0xc0] ss:$16 sps:$4 sm:$0xff]   ;;  %v446_v28 = vld [vmem:[#allocation2 + $0xc8] ss:$16 sps:$4 sm:$0xff]  }
  0x2f   :  { %v447_v29 = vld [vmem:[#allocation2 + $0xe4] ss:$16 sps:$4 sm:$0xff]   ;;  %v449_v30 = vld [vmem:[#allocation2 + $0xec] ss:$16 sps:$4 sm:$0xff]   ;;  %v451_v31 = vld [vmem:[#allocation2 + $0xe0] ss:$16 sps:$4 sm:$0xff]  }
  0x30   :  { %261 = vmatpush1.bf16.msra.mxu0 %v421_v11  ;;  %302 = vmatpush1.bf16.msra.mxu1 %v422_v12  ;;  %v452_v32 = vld [vmem:[#allocation2 + $0xe8] ss:$16 sps:$4 sm:$0xff]   ;;  %v41_v33 = vld [vmem:[%s557_s0] sm:$0x1]  ;;  %v77_v35 = vshrl.u32 %v76_v34, 7 }
  0x31   :  { %262 = vmatprep.subr.bf16.mxu0 %v423_v13  ;;  %303 = vmatprep.subr.bf16.mxu1 %v425_v14  ;;  %v74_v38 = vld [vmem:[#allocation4] sm:$0xf]  ;;  %v506_v40 = vmov 1983009808  }
  0x32   :  { %v78_v36 = vsub.s32 0, %v77_v35  ;;  %v86_v37 = vsub.s32 2, %v77_v35  ;;  %v82_v39 = vsub.s32 1, %v77_v35  ;;  %v345_v41 = vunpack.c.l.s4 %v506_v40 }
  0x33   :  { %v90_v42 = vsub.s32 3, %v77_v35 }
  0x34   :  { %263 = vmatpush1.bf16.msra.mxu0 %v427_v15  ;;  %304 = vmatpush1.bf16.msra.mxu1 %v428_v16  ;;  %v79_v43 = vrot.slane %v74_v38, %v78_v36  ;;  %v87_v44 = vrot.slane %v74_v38, %v86_v37  ;;  %v83_v45 = vrot.slane %v74_v38, %v82_v39  ;;  %v346_v46 = vunpack.c.0.s8 %v345_v41 }
  0x35   :  { %264 = vmatprep.subr.bf16.mxu0 %v429_v17  ;;  %305 = vmatprep.subr.bf16.mxu1 %v431_v18  ;;  %v91_v47 = vrot.slane %v74_v38, %v90_v42 }
  0x36   :  { %v349_v55 = vsub.s32 %v346_v46, %v77_v35 }
  0x38   :  { %265 = vmatpush1.bf16.msra.mxu0 %v433_v19  ;;  %306 = vmatpush1.bf16.msra.mxu1 %v434_v20 }
  0x39   :  { %266 = vmatprep.subr.bf16.mxu0 %v435_v21  ;;  %307 = vmatprep.subr.bf16.mxu1 %v437_v22 }
  0x3c   :  { %267 = vmatpush1.bf16.msra.mxu0 %v439_v23  ;;  %308 = vmatpush1.bf16.msra.mxu1 %v440_v24 }
  0x3d   :  { %268 = vmatprep.subr.bf16.mxu0 %v441_v25  ;;  %309 = vmatprep.subr.bf16.mxu1 %v443_v26 }
  0x40   :  { %269 = vmatpush1.bf16.msra.mxu0 %v445_v27  ;;  %310 = vmatpush1.bf16.msra.mxu1 %v446_v28 }
  0x41   :  { %270 = vmatprep.subr.bf16.mxu0 %v447_v29  ;;  %311 = vmatprep.subr.bf16.mxu1 %v449_v30 }
  0x44   :  { %271 = vmatpush1.bf16.msra.mxu0 %v451_v31  ;;  %312 = vmatpush1.bf16.msra.mxu1 %v452_v32 }
  0x47   :  { %289 = vmatmul.mubr.bf16.vlgmr.msra.gmra.mrb[0].mxu0 %v41_v33  ;;  %330 = vmatmul.mubr.bf16.vlgmr.msra.gmra.mrb[0].mxu1 %v41_v33 }
 0x11a   :  { %v290_v48 = vpop.f32.mrb[0].mxu0  ;;  %v331_v49 = vpop.f32.mrb[0].mxu1 }
 0x11b   :  { %v291_v50 = vadd.f32 %v290_v48, %v79_v43  ;;  %v332_v51 = vadd.f32 %v331_v49, %v87_v44  ;;  %v292_v52 = vpop.f32.mrb[1].mxu0  ;;  %v333_v53 = vpop.f32.mrb[1].mxu1 }
 0x11c   :  { %v293_v54 = vadd.f32 %v292_v52, %v83_v45  ;;  %v334_v56 = vadd.f32 %v333_v53, %v91_v47  ;;  %v294_v57 = vpop.f32.mrb[2].mxu0  ;;  %v335_v58 = vpop.f32.mrb[2].mxu1 }
 0x11d   :  { %v295_v59 = vpop.f32.mrb[3].mxu0  ;;  %v336_v60 = vpop.f32.mrb[3].mxu1 }
 0x11e   :  { %v342_v61 = vcombine.low %v291_v50, %v293_v54  ;;  %v343_v62 = vcombine.low %v332_v51, %v334_v56 }
 0x120   :  { %v350_v63 = vrot.slane %v342_v61, %v349_v55  ;;  %v357_v0 = vrot.slane %v343_v62, %v349_v55 }
 0x122   :  { %v358_v1 = vcombine.low %v350_v63, %v357_v0 }
 0x124   :  { %360 = vst [vmem:[%s560_s3] sm:$0xff] %v358_v1 }
 0x125   :  { %365 = vsyncpa [#allocation3], 1 }
 0x126   :  { %366 = vsyncpa [#allocation5], 1 }

// kernel: _lambda_.4
= control target key start
LH: loop header
LB: loop body
LE: loop exit
PB: predicated region body
PF: predicated region fallthrough
CT: control target
= control target key end

     0   :  { %8 = vsyncpa [#allocation3], 0  ;;  %s913_s0 = inlined_call_operand.vmem [shape: bf16[256,128], index: 0, kind: input, shape index: {}]   ;;  %s914_s1 = inlined_call_operand.hbm [shape: bf16[128,128], index: 1, kind: input, shape index: {}]   ;;  %s915_s2 = inlined_call_operand.hbm [shape: f32[1,128], index: 2, kind: input, shape index: {}]   ;;  %s916_s3 = inlined_call_operand.vmem [shape: f32[256,128], index: 3, kind: output, shape index: {}]  }
   0x1   :  { %9 = vsyncpa [#allocation5], 0  ;;  %s784_s12 = smov 0  }
   0x2 LB: > { %s545_s13 = sadd.s32 4294967295, %s758_s12   ;;  %p547_p0 = scmp.ge.s32.totalorder %s758_s12, 1  ;;  %s758_s12 = sphi %s784_s12, %s15_s12  }
   0x3   : > { %p114_p1 = scmp.lt.s32.totalorder %s758_s12, 3  ;;  %s760_s14 = smov [#allocation2]  }
   0x4   : > { %s126_s15 = sshll.u32 %s760_s14, 4  ;;  %p798_p3 = scmp.eq.s32.totalorder %s545_s13, 0  ;;  %s127_s15 = int_to_ptr.vmem [resolvable:$true] %s126_s15 }
   0x5   : > { %p792_p2 = pnand %p547_p0, %p114_p1  ;;  %s761_s18 = smov [#allocation4]  }
   0x6   : > { %s921_s17 = scalar_select %p798_p3, 1, 0 }
   0x7   : > { %s920_s16 = scalar_select %p792_p2, 1, 0 }
   0x8   : > { %p649_p4 = pneg %p792_p2  ;;  %s140_s19 = sshll.u32 %s761_s18, 4  ;;  %s810_s19 = int_to_ptr.vmem [resolvable:$true] %s140_s19 }
   0x9   : > { %s688_s23 = scalar_lea.hbm %s914_s1, 1024 }
   0xa   : > { %p806_p5 = pnand %p798_p3, %p649_p4  ;;  %p689_p6 = scmp.ne.s32.totalorder %s914_s1, %s688_s23 }
   0xb   : > { %p695_p10 = scmp.lt.u32.totalorder %s688_s23, %s914_s1 }
   0xc   : > { %p690_p7 = pneg %p806_p5 }
   0xe   : > { %p691_p8 = pnand %p690_p7, %p689_p6 }
  0x10   : > { %p692_p9 = pneg %p691_p8 }
  0x12   : > { %p697_p11 = pnand %p695_p10, %p692_p9 }
  0x14   : > { %700 = shalt.err (!%p697_p11)
}
  0x15   : > { %s701_s28 = scalar_lea.vmem %s127_s15, 1024  ;;  %p709_p1 = scmp.lt.s32.totalorder %s127_s15, %s127_s15 }
  0x16   : > { %p702_p12 = scmp.ne.s32.totalorder %s127_s15, %s701_s28  ;;  %p710_p4 = scmp.lt.s32.totalorder %s701_s28, %s701_s28 }
  0x18   : > { %p704_p13 = pnand %p702_p12, %p690_p7  ;;  %p711_p3 = por %p710_p4, %p709_p1 }
  0x1a   : > { %p705_p0 = pneg %p704_p13 }
  0x1c   : > { %p712_p2 = pnand %p711_p3, %p705_p0 }
  0x1e   : > { %715 = shalt.err (!%p712_p2)
}
  0x1f   : > { %s762_s29 = smov 64   ;;  %s763_s30 = smov 4  }
  0x20   : > { %652 = dma.hbm_to_vmem [thread:$0]  (!%p806_p5), %s914_s1, 1024, %s127_s15, [#allocation3], %s762_s29, %s762_s29, %s763_s30  }
  0x21   : > { %s716_s8 = scalar_lea.hbm %s915_s2, 16 }
  0x22   : > { %p717_p6 = scmp.ne.s32.totalorder %s915_s2, %s716_s8  ;;  %p723_p8 = scmp.lt.u32.totalorder %s716_s8, %s915_s2 }
  0x24   : > { %p719_p2 = pnand %p717_p6, %p690_p7 }
  0x26   : > { %p720_p3 = pneg %p719_p2 }
  0x28   : > { %p725_p9 = pnand %p723_p8, %p720_p3 }
  0x2a   : > { %728 = shalt.err (!%p725_p9)
}
  0x2b   : > { %s729_s15 = scalar_lea.vmem %s810_s19, 16  ;;  %s736_s18 = scalar_lea.vmem %s810_s19, 32 }
  0x2c   : > { %p730_p10 = scmp.ne.s32.totalorder %s810_s19, %s729_s15  ;;  %p737_p13 = scmp.lt.s32.totalorder %s810_s19, %s810_s19 }
  0x2d   : > { %p738_p0 = scmp.lt.s32.totalorder %s736_s18, %s729_s15 }
  0x2e   : > { %p732_p11 = pnand %p730_p10, %p690_p7 }
  0x2f   : > { %p739_p1 = por %p738_p0, %p737_p13 }
  0x30   : > { %p733_p12 = pneg %p732_p11 }
  0x32   : > { %p740_p4 = pnand %p739_p1, %p733_p12 }
  0x34   : > { %743 = shalt.err (!%p740_p4)
}
  0x35   : > { %655 = dma.hbm_to_vmem [thread:$0]  (!%p806_p5), %s915_s2, 16, %s810_s19, [#allocation5]  }
  0x36   : > { %p923_p6 = scmp.ne.s32.totalorder %s920_s16, 0 }
  0x37   : > { %p924_p7 = scmp.ne.s32.totalorder (!%p923_p6), %s921_s17, 0 }
  0x38   : > { %162 = sbr.rel (%p923_p6) target bundleno = 327 (0x147), region = 32 }
  0x3f   : > { %749 = dma.done.wait (%p924_p7), [#allocation3], 1024  }
  0x40   : > { %751 = vsyncadd (%p924_p7), [#allocation3], 4294966272 }
  0x41   : > { %753 = dma.done.wait (%p924_p7), [#allocation5], 16  }
  0x42   : > { %755 = vsyncadd (%p924_p7), [#allocation5], 4294967280  ;;  %s554_s20 = sshll.u32 %s545_s13, 4  ;;  %v672_v0 = vld [vmem:[#allocation2] sm:$0xff]   ;;  %v673_v1 = vld [vmem:[#allocation2 + $0x8] sm:$0xff]  }
  0x43   : > { %p191_p2 = scmp.lt.s32.totalorder %s554_s20, 31  ;;  %593 = vmatprep.subr.bf16.mxu0 %v672_v0  ;;  %625 = vmatprep.subr.bf16.mxu1 %v672_v0  ;;  %v674_v2 = vld [vmem:[#allocation2 + $0x10] sm:$0xff]   ;;  %v675_v3 = vld [vmem:[#allocation2 + $0x18] sm:$0xff]   ;;  %v676_v6 = vld [vmem:[#allocation2 + $0x20] sm:$0xff]  }
  0x44   : > { %594 = vmatpush3.bf16.msra.mxu0 %v672_v0  ;;  %633 = vmatpush3.bf16.msra.mxu1 %v672_v0  ;;  %v677_v7 = vld [vmem:[#allocation2 + $0x28] sm:$0xff]   ;;  %v678_v8 = vld [vmem:[#allocation2 + $0x30] sm:$0xff]   ;;  %v679_v9 = vld [vmem:[#allocation2 + $0x38] sm:$0xff]  }
  0x45   : > { %s926_s20 = smov (!%p191_p2, %s554_s20), 31  ;;  %595 = vmatprep.subr.bf16.mxu0 %v673_v1  ;;  %626 = vmatprep.subr.bf16.mxu1 %v673_v1  ;;  %v558_v16 = vld [vmem:[#allocation4] ss:$0 sm:$0xff] }
  0x46   : > { %s555_s16 = sshll.u32 %s926_s20, 2  ;;  %s557_s13 = sshll.u32 %s926_s20, 3 }
  0x47   : > { %s878_s23 = scalar_lea.vmem %s913_s0, %s555_s16  ;;  %s892_s26 = scalar_lea.vmem %s916_s3, %s557_s13 }
  0x48   : > { %596 = vmatpush3.bf16.msra.mxu0 %v673_v1  ;;  %634 = vmatpush3.bf16.msra.mxu1 %v673_v1  ;;  %v680_v4 = vld [vmem:[%s878_s23] sm:$0xff]   ;;  %v682_v10 = vld [vmem:[%s878_s23 + $0x8] sm:$0xff]   ;;  %v684_v12 = vld [vmem:[%s878_s23 + $0x10] sm:$0xff]  }
  0x49   : > { %597 = vmatprep.subr.bf16.mxu0 %v674_v2  ;;  %627 = vmatprep.subr.bf16.mxu1 %v674_v2  ;;  %v681_v5 = vld [vmem:[%s878_s23 + $0x20] sm:$0xff]   ;;  %v683_v11 = vld [vmem:[%s878_s23 + $0x28] sm:$0xff]   ;;  %v685_v13 = vld [vmem:[%s878_s23 + $0x30] sm:$0xff]  }
  0x4a   : > { %609 = vmatprep.mubr.bf16.mxu0 %v680_v4  ;;  %617 = vmatprep.mubr.bf16.mxu1 %v681_v5  ;;  %v686_v14 = vld [vmem:[%s878_s23 + $0x18] sm:$0xff]  }
  0x4b   : > { %v687_v15 = vld [vmem:[%s878_s23 + $0x38] sm:$0xff]  }
  0x4c   : > { %598 = vmatpush3.bf16.msra.mxu0 %v674_v2  ;;  %635 = vmatpush3.bf16.msra.mxu1 %v674_v2 }
  0x4d   : > { %599 = vmatprep.subr.bf16.mxu0 %v675_v3  ;;  %628 = vmatprep.subr.bf16.mxu1 %v675_v3 }
  0x50   : > { %600 = vmatpush3.bf16.msra.mxu0 %v675_v3  ;;  %636 = vmatpush3.bf16.msra.mxu1 %v675_v3 }
  0x51   : > { %601 = vmatprep.subr.bf16.mxu0 %v676_v6  ;;  %629 = vmatprep.subr.bf16.mxu1 %v676_v6 }
  0x54   : > { %602 = vmatpush3.bf16.msra.mxu0 %v676_v6  ;;  %637 = vmatpush3.bf16.msra.mxu1 %v676_v6 }
  0x55   : > { %603 = vmatprep.subr.bf16.mxu0 %v677_v7  ;;  %630 = vmatprep.subr.bf16.mxu1 %v677_v7 }
  0x58   : > { %604 = vmatpush3.bf16.msra.mxu0 %v677_v7  ;;  %638 = vmatpush3.bf16.msra.mxu1 %v677_v7 }
  0x59   : > { %605 = vmatprep.subr.bf16.mxu0 %v678_v8  ;;  %631 = vmatprep.subr.bf16.mxu1 %v678_v8 }
  0x5c   : > { %606 = vmatpush3.bf16.msra.mxu0 %v678_v8  ;;  %639 = vmatpush3.bf16.msra.mxu1 %v678_v8 }
  0x5d   : > { %607 = vmatprep.subr.bf16.mxu0 %v679_v9  ;;  %632 = vmatprep.subr.bf16.mxu1 %v679_v9 }
  0x60   : > { %608 = vmatpush3.bf16.msra.mxu0 %v679_v9  ;;  %640 = vmatpush3.bf16.msra.mxu1 %v679_v9 }
  0x63   : > { %610 = vmatmul.mubr.bf16.vlgmr.msra.gmra.mrb[0].mxu0 %v682_v10  ;;  %618 = vmatmul.mubr.bf16.vlgmr.msra.gmra.mrb[0].mxu1 %v683_v11 }
  0x64   : > { %613 = vmatprep.mubr.bf16.mxu0 %v684_v12  ;;  %621 = vmatprep.mubr.bf16.mxu1 %v685_v13 }
  0x6b   : > { %614 = vmatmul.mubr.bf16.gmra.mrb[4].mxu0 %v686_v14  ;;  %622 = vmatmul.mubr.bf16.gmra.mrb[4].mxu1 %v687_v15 }
 0x136   : > { %v611_v17 = vpop.f32.mrb[0].mxu0  ;;  %v619_v18 = vpop.f32.mrb[0].mxu1 }
 0x137   : > { %v381_v19 = vadd.f32 %v611_v17, %v558_v16  ;;  %v413_v20 = vadd.f32 %v619_v18, %v558_v16  ;;  %v372_v21 = vpop.f32.mrb[1].mxu0  ;;  %v404_v22 = vpop.f32.mrb[1].mxu1 }
 0x138   : > { %v373_v23 = vadd.f32 %v558_v16, %v372_v21  ;;  %v405_v24 = vadd.f32 %v558_v16, %v404_v22  ;;  %v612_v25 = vpop.f32.mrb[2].mxu0  ;;  %v620_v26 = vpop.f32.mrb[2].mxu1 }
 0x139   : > { %v437_v27 = vmax.f32 %v381_v19, 0.0  ;;  %v445_v28 = vmax.f32 %v413_v20, 0.0  ;;  %v384_v29 = vadd.f32 %v612_v25, %v558_v16  ;;  %v416_v30 = vadd.f32 %v620_v26, %v558_v16  ;;  %v375_v31 = vpop.f32.mrb[3].mxu0  ;;  %v407_v32 = vpop.f32.mrb[3].mxu1 }
 0x13a   : > { %v435_v33 = vmax.f32 %v373_v23, 0.0  ;;  %v443_v34 = vmax.f32 %v405_v24, 0.0  ;;  %v376_v35 = vadd.f32 %v558_v16, %v375_v31  ;;  %v408_v36 = vadd.f32 %v558_v16, %v407_v32 }
 0x13b   : > { %453 = vst [vmem:[%s892_s26 + $0x10] sm:$0xff] %v437_v27  ;;  %461 = vst [vmem:[%s892_s26 + $0x50] sm:$0xff] %v445_v28  ;;  %v438_v37 = vmax.f32 %v384_v29, 0.0  ;;  %v446_v38 = vmax.f32 %v416_v30, 0.0 }
 0x13c   : > { %451 = vst [vmem:[%s892_s26] sm:$0xff] %v435_v33  ;;  %459 = vst [vmem:[%s892_s26 + $0x40] sm:$0xff] %v443_v34  ;;  %v436_v39 = vmax.f32 %v376_v35, 0.0  ;;  %v444_v40 = vmax.f32 %v408_v36, 0.0 }
 0x13d   : > { %454 = vst [vmem:[%s892_s26 + $0x18] sm:$0xff] %v438_v37  ;;  %462 = vst [vmem:[%s892_s26 + $0x58] sm:$0xff] %v446_v38 }
 0x13e   : > { %452 = vst [vmem:[%s892_s26 + $0x8] sm:$0xff] %v436_v39  ;;  %460 = vst [vmem:[%s892_s26 + $0x48] sm:$0xff] %v444_v40  ;;  %v615_v41 = vpop.f32.mrb[4].mxu0  ;;  %v623_v42 = vpop.f32.mrb[4].mxu1 }
 0x13f   : > { %v397_v43 = vadd.f32 %v615_v41, %v558_v16  ;;  %v429_v44 = vadd.f32 %v623_v42, %v558_v16  ;;  %v388_v45 = vpop.f32.mrb[5].mxu0  ;;  %v420_v46 = vpop.f32.mrb[5].mxu1 }
 0x140   : > { %v389_v47 = vadd.f32 %v558_v16, %v388_v45  ;;  %v421_v48 = vadd.f32 %v558_v16, %v420_v46  ;;  %v616_v49 = vpop.f32.mrb[6].mxu0  ;;  %v624_v50 = vpop.f32.mrb[6].mxu1 }
 0x141   : > { %v441_v51 = vmax.f32 %v397_v43, 0.0  ;;  %v449_v52 = vmax.f32 %v429_v44, 0.0  ;;  %v400_v53 = vadd.f32 %v616_v49, %v558_v16  ;;  %v432_v54 = vadd.f32 %v624_v50, %v558_v16  ;;  %v391_v55 = vpop.f32.mrb[7].mxu0  ;;  %v423_v56 = vpop.f32.mrb[7].mxu1 }
 0x142   : > { %v439_v57 = vmax.f32 %v389_v47, 0.0  ;;  %v447_v58 = vmax.f32 %v421_v48, 0.0  ;;  %v392_v59 = vadd.f32 %v558_v16, %v391_v55  ;;  %v424_v60 = vadd.f32 %v558_v16, %v423_v56 }
 0x143   : > { %457 = vst [vmem:[%s892_s26 + $0x30] sm:$0xff] %v441_v51  ;;  %465 = vst [vmem:[%s892_s26 + $0x70] sm:$0xff] %v449_v52  ;;  %v442_v61 = vmax.f32 %v400_v53, 0.0  ;;  %v450_v62 = vmax.f32 %v432_v54, 0.0 }
 0x144   : > { %455 = vst [vmem:[%s892_s26 + $0x20] sm:$0xff] %v439_v57  ;;  %463 = vst [vmem:[%s892_s26 + $0x60] sm:$0xff] %v447_v58  ;;  %v440_v63 = vmax.f32 %v392_v59, 0.0  ;;  %v448_v0 = vmax.f32 %v424_v60, 0.0 }
 0x145   : > { %458 = vst [vmem:[%s892_s26 + $0x38] sm:$0xff] %v442_v61  ;;  %466 = vst [vmem:[%s892_s26 + $0x78] sm:$0xff] %v450_v62 }
 0x146   : > { %456 = vst [vmem:[%s892_s26 + $0x28] sm:$0xff] %v440_v63  ;;  %464 = vst [vmem:[%s892_s26 + $0x68] sm:$0xff] %v448_v0 }
 0x147 PF: > { %s15_s12 = sadd.s32 1, %s758_s12  }
 0x148   : > { %p12_p5 = scmp.ge.s32.totalorder %s15_s12, 4  }
 0x14a   :  { %14 = sbr.rel (!%p12_p5) target bundleno = 2 (0x2), region = 71 }
 0x151   :  { %489 = vsyncpa [#allocation3], 1 }
 0x152   :  { %491 = vsyncpa [#allocation3 + $0x1], 1 }
 0x153   :  { %492 = vsyncpa [#allocation5], 1 }

// kernel: custom-call
= control target key start
LH: loop header
LB: loop body
LE: loop exit
PB: predicated region body
PF: predicated region fallthrough
CT: control target
= control target key end

     0   :  { %5 = vsyncpa [#allocation9], 0  ;;  %v1307_v0 = vmov 2147483648   ;;  %v1308_v1 = vmov 2147483647   ;;  %s1473_s0 = inlined_call_operand.vmem [shape: f32[4,2240], index: 0, kind: input, shape index: {}]   ;;  %s1474_s1 = inlined_call_operand.hbm [shape: f32[4,8], index: 1, kind: output, shape index: {0}]   ;;  %s1475_s2 = inlined_call_operand.vmem [shape: s32[4,8], index: 2, kind: output, shape index: {1}]  }
   0x1   :  { %7 = vst [vmem:[#allocation12] sm:$0xff] %v1307_v0  ;;  %8 = vst [vmem:[#allocation14] sm:$0xff] %v1308_v1 }
   0x2   :  { %v25_v2 = vld [vmem:[%s1473_s0] sm:$0xff]  ;;  %v27_v3 = vld [vmem:[%s1473_s0 + $0x8] sm:$0xff]  ;;  %v29_v4 = vld [vmem:[%s1473_s0 + $0x10] sm:$0xff]  ;;  %v48_v5 = vlaneseq  ;;  %v1309_v8 = vmov 2147483648   ;;  %v1310_v9 = vmov 2147483647  }
   0x3   :  { %v31_v6 = vld [vmem:[%s1473_s0 + $0x18] sm:$0xff]  ;;  %vm58_vm0 = vcmp.lt.s32.totalorder %v25_v2, 0  ;;  %v59_v7 = vsub.s32 2147483647, %v25_v2  ;;  %173 = vst [vmem:[#allocation13] sm:$0xff] %v1309_v8  ;;  %174 = vst [vmem:[#allocation15] sm:$0xff] %v1310_v9 }
   0x4   :  { %v33_v10 = vld [vmem:[%s1473_s0 + $0x20] sm:$0xff]  ;;  %v35_v11 = vld [vmem:[%s1473_s0 + $0x28] sm:$0xff]  ;;  %v37_v12 = vld [vmem:[%s1473_s0 + $0x30] sm:$0xff]  ;;  %v1354_v13 = vshrl.u32 %v48_v5, 7  ;;  %v49_v14 = vand.u32 127, %v48_v5  ;;  %vm67_vm1 = vcmp.lt.s32.totalorder %v27_v3, 0 }
   0x5   :  { %v68_v15 = vsub.s32 2147483647, %v27_v3  ;;  %v77_v16 = vsub.s32 2147483647, %v29_v4  ;;  %v39_v17 = vld [vmem:[%s1473_s0 + $0x38] sm:$0xff]  ;;  %v60_v19 = vsel %vm58_vm0, %v59_v7, %v25_v2  ;;  %vm76_vm2 = vcmp.lt.s32.totalorder %v29_v4, 0 }
   0x6   :  { %v52_v18 = vshrl.u32 %v1354_v13, 2  ;;  %v86_v20 = vsub.s32 2147483647, %v31_v6  ;;  %vm85_vm3 = vcmp.lt.s32.totalorder %v31_v6, 0  ;;  %vm94_vm4 = vcmp.lt.s32.totalorder %v33_v10, 0  ;;  %v41_v22 = vld [vmem:[%s1473_s0 + $0x40] sm:$0xff] }
   0x7   :  { %v95_v21 = vsub.s32 2147483647, %v33_v10  ;;  %vm103_vm5 = vcmp.lt.s32.totalorder %v35_v11, 0  ;;  %v69_v24 = vsel %vm67_vm1, %v68_v15, %v27_v3  ;;  %v104_v25 = vsub.s32 2147483647, %v35_v11  ;;  %s1366_s0 = smov 0  }
   0x8   :  { %v54_v23 = vmul.u32 128, %v52_v18  ;;  %vm112_vm6 = vcmp.lt.s32.totalorder %v37_v12, 0  ;;  %v78_v26 = vsel %vm76_vm2, %v77_v16, %v29_v4  ;;  %v113_v27 = vsub.s32 2147483647, %v37_v12 }
   0x9   :  { %vm121_vm7 = vcmp.lt.s32.totalorder %v39_v17, 0  ;;  %v122_v28 = vsub.s32 2147483647, %v39_v17  ;;  %v87_v30 = vsel %vm85_vm3, %v86_v20, %v31_v6  ;;  %v96_v31 = vsel %vm94_vm4, %v95_v21, %v33_v10 }
   0xa   :  { %v55_v29 = vadd.s32 %v54_v23, %v49_v14  ;;  %v105_v32 = vsel %vm103_vm5, %v104_v25, %v35_v11  ;;  %v114_v33 = vsel %vm112_vm6, %v113_v27, %v37_v12  ;;  %vm130_vm8 = vcmp.lt.s32.totalorder %v41_v22, 0 }
   0xb   :  { %v123_v34 = vsel %vm121_vm7, %v122_v28, %v39_v17  ;;  %v131_v35 = vsub.s32 2147483647, %v41_v22 }
   0xc   :  { %vm62_vm9 = vcmp.lt.s32.totalorder %v55_v29, 2240  ;;  %v70_v36 = vadd.s32 256, %v55_v29  ;;  %v79_v37 = vadd.s32 512, %v55_v29  ;;  %v88_v38 = vadd.s32 768, %v55_v29  ;;  %147 = vst [vmem:[#allocation17] sm:$0xff] %v55_v29 }
   0xd   :  { %v63_v39 = vsel %vm62_vm9, %v60_v19, 2147483648  ;;  %v97_v40 = vadd.s32 1024, %v55_v29  ;;  %v106_v41 = vadd.s32 1280, %v55_v29  ;;  %v115_v42 = vadd.s32 1536, %v55_v29 }
   0xe   :  { %64 = vst [vmem:[#allocation16] sm:$0xff] %v63_v39  ;;  %vm71_vm10 = vcmp.lt.s32.totalorder %v70_v36, 2240  ;;  %vm80_vm11 = vcmp.lt.s32.totalorder %v79_v37, 2240  ;;  %vm89_vm12 = vcmp.lt.s32.totalorder %v88_v38, 2240  ;;  %v124_v43 = vadd.s32 1792, %v55_v29  ;;  %150 = vst [vmem:[#allocation17 + $0x8] sm:$0xff] %v70_v36 }
   0xf   :  { %153 = vst [vmem:[#allocation17 + $0x10] sm:$0xff] %v79_v37  ;;  %156 = vst [vmem:[#allocation17 + $0x18] sm:$0xff] %v88_v38  ;;  %v72_v44 = vsel %vm71_vm10, %v69_v24, 2147483648  ;;  %v81_v45 = vsel %vm80_vm11, %v78_v26, 2147483648  ;;  %v90_v46 = vsel %vm89_vm12, %v87_v30, 2147483648  ;;  %vm98_vm13 = vcmp.lt.s32.totalorder %v97_v40, 2240 }
  0x10   :  { %159 = vst [vmem:[#allocation17 + $0x20] sm:$0xff] %v97_v40  ;;  %162 = vst [vmem:[#allocation17 + $0x28] sm:$0xff] %v106_v41  ;;  %v99_v47 = vsel %vm98_vm13, %v96_v31, 2147483648  ;;  %vm107_vm14 = vcmp.lt.s32.totalorder %v106_v41, 2240  ;;  %vm116_vm15 = vcmp.lt.s32.totalorder %v115_v42, 2240  ;;  %vm125_vm0 = vcmp.lt.s32.totalorder %v124_v43, 2240 }
  0x11   :  { %165 = vst [vmem:[#allocation17 + $0x30] sm:$0xff] %v115_v42  ;;  %73 = vst [vmem:[#allocation16 + $0x8] sm:$0xff] %v72_v44  ;;  %v108_v48 = vsel %vm107_vm14, %v105_v32, 2147483648  ;;  %v117_v49 = vsel %vm116_vm15, %v114_v33, 2147483648  ;;  %v126_v50 = vsel %vm125_vm0, %v123_v34, 2147483648  ;;  %v132_v51 = vsel %vm130_vm8, %v131_v35, %v41_v22 }
  0x12   :  { %82 = vst [vmem:[#allocation16 + $0x10] sm:$0xff] %v81_v45  ;;  %91 = vst [vmem:[#allocation16 + $0x18] sm:$0xff] %v90_v46  ;;  %v133_v52 = vadd.s32 2048, %v55_v29 }
  0x13   :  { %168 = vst [vmem:[#allocation17 + $0x38] sm:$0xff] %v124_v43  ;;  %100 = vst [vmem:[#allocation16 + $0x20] sm:$0xff] %v99_v47 }
  0x14   :  { %109 = vst [vmem:[#allocation16 + $0x28] sm:$0xff] %v108_v48  ;;  %118 = vst [vmem:[#allocation16 + $0x30] sm:$0xff] %v117_v49  ;;  %vm134_vm1 = vcmp.lt.s32.totalorder %v133_v52, 2240 }
  0x15   :  { %127 = vst [vmem:[#allocation16 + $0x38] sm:$0xff] %v126_v50  ;;  %171 = vst [vmem:[#allocation17 + $0x40] sm:$0xff] %v133_v52  ;;  %v135_v53 = vsel %vm134_vm1, %v132_v51, 2147483648 }
  0x16   :  { %136 = vst [vmem:[#allocation16 + $0x40] sm:$0xff] %v135_v53 }
  0x17 LB: > { %v182_v54 = vld [vmem:[#allocation16] sm:$0xff]  ;;  %v183_v55 = vld [vmem:[#allocation17] sm:$0xff]  ;;  %v188_v57 = vld [vmem:[#allocation17 + $0x8] sm:$0xff]  ;;  %s577_s27 = scalar_lea.vmem [#allocation13], %s1305_s0  ;;  %s579_s28 = scalar_lea.vmem [#allocation15], %s1305_s0  ;;  %s1305_s0 = sphi %s1366_s0, %s181_s0  }
  0x18   : > { %v186_v56 = vld [vmem:[#allocation16 + $0x8] sm:$0xff]  ;;  %vm192_vm4 = vcmp.lt.s32.totalorder %v188_v57, %v183_v55  ;;  %v201_v59 = vld [vmem:[#allocation17 + $0x10] sm:$0xff]  ;;  %v214_v63 = vld [vmem:[#allocation17 + $0x18] sm:$0xff]  ;;  %s181_s0 = sadd.s32 1, %s1305_s0  }
  0x19   : > { %vm190_vm2 = vcmp.gt.s32.totalorder %v186_v56, %v182_v54  ;;  %vm191_vm3 = vcmp.eq.s32.totalorder %v186_v56, %v182_v54  ;;  %v199_v58 = vld [vmem:[#allocation16 + $0x10] sm:$0xff]  ;;  %v212_v62 = vld [vmem:[#allocation16 + $0x18] sm:$0xff]  ;;  %v227_v3 = vld [vmem:[#allocation17 + $0x20] sm:$0xff]  ;;  %p178_p4 = scmp.ge.s32.totalorder %s181_s0, 8  }
  0x1a   : > { %vm193_vm5 = vmand %vm191_vm3, %vm192_vm4  ;;  %v225_v2 = vld [vmem:[#allocation16 + $0x20] sm:$0xff]  ;;  %v240_v8 = vld [vmem:[#allocation17 + $0x28] sm:$0xff]  ;;  %s1316_s0 = smov (%p178_p4), [#allocation8]  }
  0x1b   : > { %vm194_vm6 = vmor %vm190_vm2, %vm193_vm5  ;;  %v238_v7 = vld [vmem:[#allocation16 + $0x28] sm:$0xff]  ;;  %v251_v11 = vld [vmem:[#allocation16 + $0x30] sm:$0xff] }
  0x1c   : > { %v195_v60 = vsel %vm194_vm6, %v186_v56, %v182_v54  ;;  %v196_v61 = vsel %vm194_vm6, %v188_v57, %v183_v55  ;;  %v253_v12 = vld [vmem:[#allocation17 + $0x30] sm:$0xff]  ;;  %v266_v17 = vld [vmem:[#allocation17 + $0x38] sm:$0xff]  ;;  %v279_v21 = vld [vmem:[#allocation17 + $0x40] sm:$0xff] }
  0x1d   : > { %vm203_vm7 = vcmp.gt.s32.totalorder %v199_v58, %v195_v60  ;;  %vm204_vm8 = vcmp.eq.s32.totalorder %v199_v58, %v195_v60  ;;  %vm205_vm9 = vcmp.lt.s32.totalorder %v201_v59, %v196_v61  ;;  %v264_v16 = vld [vmem:[#allocation16 + $0x38] sm:$0xff]  ;;  %v277_v20 = vld [vmem:[#allocation16 + $0x40] sm:$0xff] }
  0x1e   : > { %vm206_vm10 = vmand %vm204_vm8, %vm205_vm9 }
  0x1f   : > { %vm207_vm11 = vmor %vm203_vm7, %vm206_vm10 }
  0x20   : > { %v208_v0 = vsel %vm207_vm11, %v199_v58, %v195_v60  ;;  %v209_v1 = vsel %vm207_vm11, %v201_v59, %v196_v61 }
  0x21   : > { %vm216_vm12 = vcmp.gt.s32.totalorder %v212_v62, %v208_v0  ;;  %vm217_vm13 = vcmp.eq.s32.totalorder %v212_v62, %v208_v0  ;;  %vm218_vm14 = vcmp.lt.s32.totalorder %v214_v63, %v209_v1 }
  0x22   : > { %vm219_vm15 = vmand %vm217_vm13, %vm218_vm14 }
  0x23   : > { %vm220_vm0 = vmor %vm216_vm12, %vm219_vm15 }
  0x24   : > { %v221_v4 = vsel %vm220_vm0, %v212_v62, %v208_v0  ;;  %v222_v6 = vsel %vm220_vm0, %v214_v63, %v209_v1 }
  0x25   : > { %vm229_vm1 = vcmp.gt.s32.totalorder %v225_v2, %v221_v4  ;;  %vm230_vm2 = vcmp.eq.s32.totalorder %v225_v2, %v221_v4  ;;  %vm231_vm3 = vcmp.lt.s32.totalorder %v227_v3, %v222_v6 }
  0x26   : > { %vm232_vm4 = vmand %vm230_vm2, %vm231_vm3 }
  0x27   : > { %vm233_vm5 = vmor %vm229_vm1, %vm232_vm4 }
  0x28   : > { %v234_v9 = vsel %vm233_vm5, %v225_v2, %v221_v4  ;;  %v235_v10 = vsel %vm233_vm5, %v227_v3, %v222_v6 }
  0x29   : > { %vm242_vm6 = vcmp.gt.s32.totalorder %v238_v7, %v234_v9  ;;  %vm243_vm7 = vcmp.eq.s32.totalorder %v238_v7, %v234_v9  ;;  %vm244_vm8 = vcmp.lt.s32.totalorder %v240_v8, %v235_v10 }
  0x2a   : > { %vm245_vm9 = vmand %vm243_vm7, %vm244_vm8 }
  0x2b   : > { %vm246_vm10 = vmor %vm242_vm6, %vm245_vm9 }
  0x2c   : > { %v247_v14 = vsel %vm246_vm10, %v238_v7, %v234_v9  ;;  %v248_v15 = vsel %vm246_vm10, %v240_v8, %v235_v10 }
  0x2d   : > { %vm255_vm11 = vcmp.gt.s32.totalorder %v251_v11, %v247_v14  ;;  %vm256_vm12 = vcmp.eq.s32.totalorder %v251_v11, %v247_v14  ;;  %vm257_vm13 = vcmp.lt.s32.totalorder %v253_v12, %v248_v15 }
  0x2e   : > { %vm258_vm14 = vmand %vm256_vm12, %vm257_vm13 }
  0x2f   : > { %vm259_vm15 = vmor %vm255_vm11, %vm258_vm14 }
  0x30   : > { %v260_v18 = vsel %vm259_vm15, %v251_v11, %v247_v14  ;;  %v261_v19 = vsel %vm259_vm15, %v253_v12, %v248_v15 }
  0x31   : > { %vm268_vm0 = vcmp.gt.s32.totalorder %v264_v16, %v260_v18  ;;  %vm269_vm1 = vcmp.eq.s32.totalorder %v264_v16, %v260_v18  ;;  %vm270_vm2 = vcmp.lt.s32.totalorder %v266_v17, %v261_v19 }
  0x32   : > { %vm271_vm3 = vmand %vm269_vm1, %vm270_vm2 }
  0x33   : > { %vm272_vm4 = vmor %vm268_vm0, %vm271_vm3 }
  0x34   : > { %v273_v22 = vsel %vm272_vm4, %v264_v16, %v260_v18  ;;  %v274_v23 = vsel %vm272_vm4, %v266_v17, %v261_v19 }
  0x35   : > { %vm281_vm5 = vcmp.gt.s32.totalorder %v277_v20, %v273_v22  ;;  %vm282_vm6 = vcmp.eq.s32.totalorder %v277_v20, %v273_v22  ;;  %vm283_vm7 = vcmp.lt.s32.totalorder %v279_v21, %v274_v23 }
  0x36   : > { %vm284_vm8 = vmand %vm282_vm6, %vm283_vm7 }
  0x37   : > { %vm285_vm9 = vmor %vm281_vm5, %vm284_vm8 }
  0x38   : > { %v286_v24 = vsel %vm285_vm9, %v277_v20, %v273_v22  ;;  %v287_v25 = vsel %vm285_vm9, %v279_v21, %v274_v23 }
  0x39   : > { %v289_v26 = vrot.slane %v286_v24, 4  ;;  %v290_v27 = vrot.slane %v287_v25, 4 }
  0x3b   : > { %vm292_vm10 = vcmp.gt.s32.totalorder %v289_v26, %v286_v24  ;;  %vm293_vm11 = vcmp.eq.s32.totalorder %v289_v26, %v286_v24  ;;  %vm294_vm12 = vcmp.lt.s32.totalorder %v290_v27, %v287_v25 }
  0x3c   : > { %vm295_vm13 = vmand %vm293_vm11, %vm294_vm12 }
  0x3d   : > { %vm296_vm14 = vmor %vm292_vm10, %vm295_vm13 }
  0x3e   : > { %v298_v28 = vsel %vm296_vm14, %v290_v27, %v287_v25  ;;  %v297_v29 = vsel %vm296_vm14, %v289_v26, %v286_v24 }
  0x3f   : > { %332 = vxpose.xlu1.b32.start [1/16] %v298_v28, 128  ;;  %300 = vxpose.xlu0.b32.start [1/16] %v297_v29, 128 }
  0x43   : > { %333 = vxpose.xlu1.b32.cont [2/16] %v298_v28, 128  ;;  %301 = vxpose.xlu0.b32.cont [2/16] %v297_v29, 128 }
  0x47   : > { %334 = vxpose.xlu1.b32.cont [3/16] %v298_v28, 128  ;;  %302 = vxpose.xlu0.b32.cont [3/16] %v297_v29, 128 }
  0x4b   : > { %335 = vxpose.xlu1.b32.cont [4/16] %v298_v28, 128  ;;  %303 = vxpose.xlu0.b32.cont [4/16] %v297_v29, 128 }
  0x4f   : > { %336 = vxpose.xlu1.b32.cont [5/16] %v298_v28, 128  ;;  %304 = vxpose.xlu0.b32.cont [5/16] %v297_v29, 128 }
  0x53   : > { %337 = vxpose.xlu1.b32.cont [6/16] %v298_v28, 128  ;;  %305 = vxpose.xlu0.b32.cont [6/16] %v297_v29, 128 }
  0x57   : > { %338 = vxpose.xlu1.b32.cont [7/16] %v298_v28, 128  ;;  %306 = vxpose.xlu0.b32.cont [7/16] %v297_v29, 128 }
  0x5b   : > { %339 = vxpose.xlu1.b32.cont [8/16] %v298_v28, 128  ;;  %307 = vxpose.xlu0.b32.cont [8/16] %v297_v29, 128 }
  0x5f   : > { %340 = vxpose.xlu1.b32.cont [9/16] %v298_v28, 128  ;;  %308 = vxpose.xlu0.b32.cont [9/16] %v297_v29, 128 }
  0x63   : > { %341 = vxpose.xlu1.b32.cont [10/16] %v298_v28, 128  ;;  %309 = vxpose.xlu0.b32.cont [10/16] %v297_v29, 128 }
  0x67   : > { %342 = vxpose.xlu1.b32.cont [11/16] %v298_v28, 128  ;;  %310 = vxpose.xlu0.b32.cont [11/16] %v297_v29, 128 }
  0x6b   : > { %343 = vxpose.xlu1.b32.cont [12/16] %v298_v28, 128  ;;  %311 = vxpose.xlu0.b32.cont [12/16] %v297_v29, 128 }
  0x6f   : > { %344 = vxpose.xlu1.b32.cont [13/16] %v298_v28, 128  ;;  %312 = vxpose.xlu0.b32.cont [13/16] %v297_v29, 128 }
  0x73   : > { %345 = vxpose.xlu1.b32.cont [14/16] %v298_v28, 128  ;;  %313 = vxpose.xlu0.b32.cont [14/16] %v297_v29, 128 }
  0x77   : > { %346 = vxpose.xlu1.b32.cont [15/16] %v298_v28, 128  ;;  %314 = vxpose.xlu0.b32.cont [15/16] %v297_v29, 128 }
  0x7b   : > { %347 = vxpose.xlu1.b32.end [16/16] %v298_v28, 128  ;;  %315 = vxpose.xlu0.b32.end [16/16] %v297_v29, 128 }
  0xbf   : > { %v348_v30 = vpop.trf.xlu1  ;;  %v316_v31 = vpop.trf.xlu0 }
  0xc3   : > { %v349_v32 = vpop.trf.xlu1  ;;  %v317_v33 = vpop.trf.xlu0 }
  0xc4   : > { %vm368_vm15 = vcmp.lt.s32.totalorder %v349_v32, %v348_v30  ;;  %vm366_vm0 = vcmp.gt.s32.totalorder %v317_v33, %v316_v31  ;;  %vm367_vm1 = vcmp.eq.s32.totalorder %v317_v33, %v316_v31 }
  0xc5   : > { %vm369_vm2 = vmand %vm367_vm1, %vm368_vm15 }
  0xc6   : > { %vm370_vm3 = vmor %vm366_vm0, %vm369_vm2 }
  0xc7   : > { %v371_v34 = vsel %vm370_vm3, %v317_v33, %v316_v31  ;;  %v350_v35 = vpop.trf.xlu1  ;;  %v372_v36 = vsel %vm370_vm3, %v349_v32, %v348_v30  ;;  %v318_v37 = vpop.trf.xlu0 }
  0xc8   : > { %vm377_vm4 = vcmp.lt.s32.totalorder %v350_v35, %v372_v36  ;;  %vm375_vm5 = vcmp.gt.s32.totalorder %v318_v37, %v371_v34  ;;  %vm376_vm6 = vcmp.eq.s32.totalorder %v318_v37, %v371_v34 }
  0xc9   : > { %vm378_vm7 = vmand %vm376_vm6, %vm377_vm4 }
  0xca   : > { %vm379_vm8 = vmor %vm375_vm5, %vm378_vm7 }
  0xcb   : > { %v380_v38 = vsel %vm379_vm8, %v318_v37, %v371_v34  ;;  %v351_v39 = vpop.trf.xlu1  ;;  %v381_v40 = vsel %vm379_vm8, %v350_v35, %v372_v36  ;;  %v319_v41 = vpop.trf.xlu0 }
  0xcc   : > { %vm386_vm9 = vcmp.lt.s32.totalorder %v351_v39, %v381_v40  ;;  %vm384_vm10 = vcmp.gt.s32.totalorder %v319_v41, %v380_v38  ;;  %vm385_vm11 = vcmp.eq.s32.totalorder %v319_v41, %v380_v38 }
  0xcd   : > { %vm387_vm12 = vmand %vm385_vm11, %vm386_vm9 }
  0xce   : > { %vm388_vm13 = vmor %vm384_vm10, %vm387_vm12 }
  0xcf   : > { %v389_v42 = vsel %vm388_vm13, %v319_v41, %v380_v38  ;;  %v352_v43 = vpop.trf.xlu1  ;;  %v390_v44 = vsel %vm388_vm13, %v351_v39, %v381_v40  ;;  %v320_v45 = vpop.trf.xlu0 }
  0xd0   : > { %vm395_vm14 = vcmp.lt.s32.totalorder %v352_v43, %v390_v44  ;;  %vm393_vm15 = vcmp.gt.s32.totalorder %v320_v45, %v389_v42  ;;  %vm394_vm0 = vcmp.eq.s32.totalorder %v320_v45, %v389_v42 }
  0xd1   : > { %vm396_vm1 = vmand %vm394_vm0, %vm395_vm14 }
  0xd2   : > { %vm397_vm2 = vmor %vm393_vm15, %vm396_vm1 }
  0xd3   : > { %v398_v46 = vsel %vm397_vm2, %v320_v45, %v389_v42  ;;  %v353_v47 = vpop.trf.xlu1  ;;  %v399_v48 = vsel %vm397_vm2, %v352_v43, %v390_v44  ;;  %v321_v49 = vpop.trf.xlu0 }
  0xd4   : > { %vm404_vm3 = vcmp.lt.s32.totalorder %v353_v47, %v399_v48  ;;  %vm402_vm4 = vcmp.gt.s32.totalorder %v321_v49, %v398_v46  ;;  %vm403_vm5 = vcmp.eq.s32.totalorder %v321_v49, %v398_v46 }
  0xd5   : > { %vm405_vm6 = vmand %vm403_vm5, %vm404_vm3 }
  0xd6   : > { %vm406_vm7 = vmor %vm402_vm4, %vm405_vm6 }
  0xd7   : > { %v407_v50 = vsel %vm406_vm7, %v321_v49, %v398_v46  ;;  %v354_v51 = vpop.trf.xlu1  ;;  %v408_v52 = vsel %vm406_vm7, %v353_v47, %v399_v48  ;;  %v322_v53 = vpop.trf.xlu0 }
  0xd8   : > { %vm413_vm8 = vcmp.lt.s32.totalorder %v354_v51, %v408_v52  ;;  %vm411_vm9 = vcmp.gt.s32.totalorder %v322_v53, %v407_v50  ;;  %vm412_vm10 = vcmp.eq.s32.totalorder %v322_v53, %v407_v50 }
  0xd9   : > { %vm414_vm11 = vmand %vm412_vm10, %vm413_vm8 }
  0xda   : > { %vm415_vm12 = vmor %vm411_vm9, %vm414_vm11 }
  0xdb   : > { %v416_v54 = vsel %vm415_vm12, %v322_v53, %v407_v50  ;;  %v355_v55 = vpop.trf.xlu1  ;;  %v417_v56 = vsel %vm415_vm12, %v354_v51, %v408_v52  ;;  %v323_v57 = vpop.trf.xlu0 }
  0xdc   : > { %vm422_vm13 = vcmp.lt.s32.totalorder %v355_v55, %v417_v56  ;;  %vm420_vm14 = vcmp.gt.s32.totalorder %v323_v57, %v416_v54  ;;  %vm421_vm15 = vcmp.eq.s32.totalorder %v323_v57, %v416_v54 }
  0xdd   : > { %vm423_vm0 = vmand %vm421_vm15, %vm422_vm13 }
  0xde   : > { %vm424_vm1 = vmor %vm420_vm14, %vm423_vm0 }
  0xdf   : > { %v425_v58 = vsel %vm424_vm1, %v323_v57, %v416_v54  ;;  %v356_v59 = vpop.trf.xlu1  ;;  %v426_v60 = vsel %vm424_vm1, %v355_v55, %v417_v56  ;;  %v324_v61 = vpop.trf.xlu0 }
  0xe0   : > { %vm431_vm2 = vcmp.lt.s32.totalorder %v356_v59, %v426_v60  ;;  %vm429_vm3 = vcmp.gt.s32.totalorder %v324_v61, %v425_v58  ;;  %vm430_vm4 = vcmp.eq.s32.totalorder %v324_v61, %v425_v58 }
  0xe1   : > { %vm432_vm5 = vmand %vm430_vm4, %vm431_vm2 }
  0xe2   : > { %vm433_vm6 = vmor %vm429_vm3, %vm432_vm5 }
  0xe3   : > { %v434_v62 = vsel %vm433_vm6, %v324_v61, %v425_v58  ;;  %v357_v63 = vpop.trf.xlu1  ;;  %v435_v0 = vsel %vm433_vm6, %v356_v59, %v426_v60  ;;  %v325_v1 = vpop.trf.xlu0 }
  0xe4   : > { %vm440_vm7 = vcmp.lt.s32.totalorder %v357_v63, %v435_v0  ;;  %vm438_vm8 = vcmp.gt.s32.totalorder %v325_v1, %v434_v62  ;;  %vm439_vm9 = vcmp.eq.s32.totalorder %v325_v1, %v434_v62 }
  0xe5   : > { %vm441_vm10 = vmand %vm439_vm9, %vm440_vm7 }
  0xe6   : > { %vm442_vm11 = vmor %vm438_vm8, %vm441_vm10 }
  0xe7   : > { %v443_v2 = vsel %vm442_vm11, %v325_v1, %v434_v62  ;;  %v358_v3 = vpop.trf.xlu1  ;;  %v444_v4 = vsel %vm442_vm11, %v357_v63, %v435_v0  ;;  %v326_v6 = vpop.trf.xlu0  ;;  %v1311_v63 = vmov 2147483648   ;;  %v1312_v0 = vmov 2147483647  }
  0xe8   : > { %vm449_vm12 = vcmp.lt.s32.totalorder %v358_v3, %v444_v4  ;;  %vm447_vm13 = vcmp.gt.s32.totalorder %v326_v6, %v443_v2  ;;  %vm448_vm14 = vcmp.eq.s32.totalorder %v326_v6, %v443_v2 }
  0xe9   : > { %vm450_vm15 = vmand %vm448_vm14, %vm449_vm12 }
  0xea   : > { %vm451_vm0 = vmor %vm447_vm13, %vm450_vm15 }
  0xeb   : > { %v452_v7 = vsel %vm451_vm0, %v326_v6, %v443_v2  ;;  %v359_v8 = vpop.trf.xlu1  ;;  %v453_v9 = vsel %vm451_vm0, %v358_v3, %v444_v4  ;;  %v327_v10 = vpop.trf.xlu0 }
  0xec   : > { %vm458_vm1 = vcmp.lt.s32.totalorder %v359_v8, %v453_v9  ;;  %vm456_vm2 = vcmp.gt.s32.totalorder %v327_v10, %v452_v7  ;;  %vm457_vm3 = vcmp.eq.s32.totalorder %v327_v10, %v452_v7 }
  0xed   : > { %vm459_vm4 = vmand %vm457_vm3, %vm458_vm1 }
  0xee   : > { %vm460_vm5 = vmor %vm456_vm2, %vm459_vm4 }
  0xef   : > { %v461_v11 = vsel %vm460_vm5, %v327_v10, %v452_v7  ;;  %v360_v12 = vpop.trf.xlu1  ;;  %v462_v14 = vsel %vm460_vm5, %v359_v8, %v453_v9  ;;  %v328_v15 = vpop.trf.xlu0  ;;  %v723_v10 = vld [vmem:[#allocation12] sm:$0xff] (%p178_p4) }
  0xf0   : > { %vm467_vm6 = vcmp.lt.s32.totalorder %v360_v12, %v462_v14  ;;  %vm465_vm7 = vcmp.gt.s32.totalorder %v328_v15, %v461_v11  ;;  %vm466_vm8 = vcmp.eq.s32.totalorder %v328_v15, %v461_v11 }
  0xf1   : > { %vm468_vm9 = vmand %vm466_vm8, %vm467_vm6 }
  0xf2   : > { %vm469_vm10 = vmor %vm465_vm7, %vm468_vm9 }
  0xf3   : > { %v470_v16 = vsel %vm469_vm10, %v328_v15, %v461_v11  ;;  %v361_v17 = vpop.trf.xlu1  ;;  %v471_v18 = vsel %vm469_vm10, %v360_v12, %v462_v14  ;;  %v329_v19 = vpop.trf.xlu0  ;;  %v724_v11 = vld [vmem:[#allocation14] sm:$0xff] (%p178_p4)  ;;  %v1313_v12 = vmov (%p178_p4), 839939668   ;;  %v1314_v15 = vmov (%p178_p4), 1417023538  }
  0xf4   : > { %vm476_vm11 = vcmp.lt.s32.totalorder %v361_v17, %v471_v18  ;;  %vm474_vm12 = vcmp.gt.s32.totalorder %v329_v19, %v470_v16  ;;  %vm475_vm13 = vcmp.eq.s32.totalorder %v329_v19, %v470_v16  ;;  %v748_v14 = vunpack.c.l.s4 (%p178_p4), %v1313_v12 }
  0xf5   : > { %vm477_vm14 = vmand %vm475_vm13, %vm476_vm11 }
  0xf6   : > { %vm478_vm15 = vmor %vm474_vm12, %vm477_vm14 }
  0xf7   : > { %v479_v20 = vsel %vm478_vm15, %v329_v19, %v470_v16  ;;  %v362_v21 = vpop.trf.xlu1  ;;  %v480_v22 = vsel %vm478_vm15, %v361_v17, %v471_v18  ;;  %v330_v23 = vpop.trf.xlu0  ;;  %v776_v16 = vunpack.c.l.s4 (%p178_p4), %v1314_v15  ;;  %v749_v17 = vunpack.c.0.s8 (%p178_p4), %v748_v14 }
  0xf8   : > { %vm485_vm0 = vcmp.lt.s32.totalorder %v362_v21, %v480_v22  ;;  %vm483_vm1 = vcmp.gt.s32.totalorder %v330_v23, %v479_v20  ;;  %vm484_vm2 = vcmp.eq.s32.totalorder %v330_v23, %v479_v20 }
  0xf9   : > { %vm486_vm3 = vmand %vm484_vm2, %vm485_vm0 }
  0xfa   : > { %vm487_vm4 = vmor %vm483_vm1, %vm486_vm3 }
  0xfb   : > { %v488_v24 = vsel %vm487_vm4, %v330_v23, %v479_v20  ;;  %v363_v25 = vpop.trf.xlu1  ;;  %v489_v26 = vsel %vm487_vm4, %v362_v21, %v480_v22  ;;  %v331_v27 = vpop.trf.xlu0  ;;  %v769_v21 = vand.u32 (%p178_p4), 4, %v1354_v13  ;;  %v777_v23 = vunpack.c.0.s8 (%p178_p4), %v776_v16 }
  0xfc   : > { %vm494_vm5 = vcmp.lt.s32.totalorder %v363_v25, %v489_v26  ;;  %vm492_vm6 = vcmp.gt.s32.totalorder %v331_v27, %v488_v24  ;;  %vm493_vm7 = vcmp.eq.s32.totalorder %v331_v27, %v488_v24 }
  0xfd   : > { %vm495_vm8 = vmand %vm493_vm7, %vm494_vm5 }
  0xfe   : > { %vm496_vm9 = vmor %vm492_vm6, %vm495_vm8 }
  0xff   : > { %v497_v28 = vsel %vm496_vm9, %v331_v27, %v488_v24  ;;  %v498_v29 = vsel %vm496_vm9, %v363_v25, %v489_v26 }
 0x100   : > { %v500_v30 = vrot.slane %v497_v28, 1  ;;  %v501_v31 = vrot.slane %v498_v29, 1 }
 0x102   : > { %vm503_vm10 = vcmp.gt.s32.totalorder %v500_v30, %v497_v28  ;;  %vm504_vm11 = vcmp.eq.s32.totalorder %v500_v30, %v497_v28  ;;  %vm505_vm12 = vcmp.lt.s32.totalorder %v501_v31, %v498_v29 }
 0x103   : > { %vm506_vm13 = vmand %vm504_vm11, %vm505_vm12 }
 0x104   : > { %vm507_vm14 = vmor %vm503_vm10, %vm506_vm13 }
 0x105   : > { %v508_v32 = vsel %vm507_vm14, %v500_v30, %v497_v28  ;;  %v509_v33 = vsel %vm507_vm14, %v501_v31, %v498_v29  ;;  %v1315_v29 = vmov (%p178_p4), 1732584193   ;;  %v1399_v31 = vsub.s32 (%p178_p4), %v777_v23, %v1354_v13 }
 0x106   : > { %v511_v34 = vrot.slane %v508_v32, 1  ;;  %v512_v35 = vrot.slane %v509_v33, 1  ;;  %v804_v30 = vunpack.c.l.s4 (%p178_p4), %v1315_v29 }
 0x108   : > { %vm514_vm15 = vcmp.gt.s32.totalorder %v511_v34, %v508_v32  ;;  %vm515_vm0 = vcmp.eq.s32.totalorder %v511_v34, %v508_v32  ;;  %vm516_vm1 = vcmp.lt.s32.totalorder %v512_v35, %v509_v33 }
 0x109   : > { %vm517_vm2 = vmand %vm515_vm0, %vm516_vm1 }
 0x10a   : > { %vm518_vm3 = vmor %vm514_vm15, %vm517_vm2 }
 0x10b   : > { %v519_v36 = vsel %vm518_vm3, %v511_v34, %v508_v32  ;;  %v520_v37 = vsel %vm518_vm3, %v512_v35, %v509_v33  ;;  %v797_v32 = vand.u32 (%p178_p4), 2, %v1354_v13  ;;  %v805_v35 = vunpack.c.0.s8 (%p178_p4), %v804_v30 }
 0x10c   : > { %v522_v38 = vrot.slane %v519_v36, 1  ;;  %v523_v39 = vrot.slane %v520_v37, 1 }
 0x10e   : > { %vm527_vm4 = vcmp.lt.s32.totalorder %v523_v39, %v520_v37  ;;  %vm525_vm5 = vcmp.gt.s32.totalorder %v522_v38, %v519_v36  ;;  %vm526_vm6 = vcmp.eq.s32.totalorder %v522_v38, %v519_v36 }
 0x10f   : > { %vm528_vm7 = vmand %vm526_vm6, %vm527_vm4 }
 0x110   : > { %vm529_vm8 = vmor %vm525_vm5, %vm528_vm7 }
 0x111   : > { %v530_v40 = vsel %vm529_vm8, %v522_v38, %v519_v36  ;;  %v531_v41 = vsel %vm529_vm8, %v523_v39, %v520_v37 }
 0x112   : > { %v533_v42 = vrot.slane %v530_v40, 1  ;;  %v534_v43 = vrot.slane %v531_v41, 1 }
 0x114   : > { %vm536_vm9 = vcmp.gt.s32.totalorder %v533_v42, %v530_v40  ;;  %vm537_vm10 = vcmp.eq.s32.totalorder %v533_v42, %v530_v40  ;;  %vm538_vm11 = vcmp.lt.s32.totalorder %v534_v43, %v531_v41 }
 0x115   : > { %vm539_vm12 = vmand %vm537_vm10, %vm538_vm11 }
 0x116   : > { %vm540_vm13 = vmor %vm536_vm9, %vm539_vm12 }
 0x117   : > { %v541_v44 = vsel %vm540_vm13, %v533_v42, %v530_v40  ;;  %v542_v45 = vsel %vm540_vm13, %v534_v43, %v531_v41  ;;  %v1413_v40 = vsub.s32 (%p178_p4), %v805_v35, %v1354_v13 }
 0x118   : > { %v544_v46 = vrot.slane %v541_v44, 1  ;;  %v545_v47 = vrot.slane %v542_v45, 1 }
 0x11a   : > { %vm547_vm14 = vcmp.gt.s32.totalorder %v544_v46, %v541_v44  ;;  %vm548_vm15 = vcmp.eq.s32.totalorder %v544_v46, %v541_v44  ;;  %vm549_vm0 = vcmp.lt.s32.totalorder %v545_v47, %v542_v45 }
 0x11b   : > { %vm550_vm1 = vmand %vm548_vm15, %vm549_vm0 }
 0x11c   : > { %vm551_vm2 = vmor %vm547_vm14, %vm550_vm1 }
 0x11d   : > { %v552_v48 = vsel %vm551_vm2, %v544_v46, %v541_v44  ;;  %v553_v49 = vsel %vm551_vm2, %v545_v47, %v542_v45  ;;  %v825_v44 = vand.u32 (%p178_p4), 1, %v1354_v13 }
 0x11e   : > { %v555_v50 = vrot.slane %v552_v48, 1  ;;  %v556_v51 = vrot.slane %v553_v49, 1 }
 0x120   : > { %vm558_vm3 = vcmp.gt.s32.totalorder %v555_v50, %v552_v48  ;;  %vm559_vm4 = vcmp.eq.s32.totalorder %v555_v50, %v552_v48  ;;  %vm560_vm5 = vcmp.lt.s32.totalorder %v556_v51, %v553_v49 }
 0x121   : > { %vm561_vm6 = vmand %vm559_vm4, %vm560_vm5 }
 0x122   : > { %vm562_vm7 = vmor %vm558_vm3, %vm561_vm6  ;;  %vm1393_vm6 = vcmp.ne.s32.totalorder (%p178_p4), %v769_v21, 0 }
 0x123   : > { %v563_v52 = vsel %vm562_vm7, %v555_v50, %v552_v48  ;;  %v564_v53 = vsel %vm562_vm7, %v556_v51, %v553_v49 }
 0x124   : > { %v566_v54 = vrot.slane %v563_v52, 1  ;;  %v567_v55 = vrot.slane %v564_v53, 1 }
 0x126   : > { %vm569_vm8 = vcmp.gt.s32.totalorder %v566_v54, %v563_v52  ;;  %vm570_vm9 = vcmp.eq.s32.totalorder %v566_v54, %v563_v52  ;;  %vm571_vm10 = vcmp.lt.s32.totalorder %v567_v55, %v564_v53 }
 0x127   : > { %vm572_vm11 = vmand %vm570_vm9, %vm571_vm10 }
 0x128   : > { %vm573_vm12 = vmor %vm569_vm8, %vm572_vm11 }
 0x129   : > { %v575_v56 = vsel %vm573_vm12, %v567_v55, %v564_v53  ;;  %v574_v57 = vsel %vm573_vm12, %v566_v54, %v563_v52 }
 0x12a   : > { %582 = vxpose.xlu0.b32.start.end [1/1] (short) (narrow) %v575_v56, 8  ;;  %578 = vst [vmem:[%s577_s27] sm:$0x1] %v574_v57  ;;  %580 = vst [vmem:[%s579_s28] sm:$0x1] %v575_v56 }
 0x131   :  { %v711_v8 = vld [vmem:[#allocation13 + $0x7] ss:$-1 sm:$0xff] (%p178_p4)  ;;  %v717_v9 = vld [vmem:[#allocation15 + $0x7] ss:$-1 sm:$0xff] (%p178_p4) }
 0x132   :  { %vm729_vm1 = vcmp.gt.s32.totalorder (%p178_p4), %v723_v10, %v711_v8  ;;  %vm730_vm2 = vcmp.eq.s32.totalorder (%p178_p4), %v723_v10, %v711_v8  ;;  %vm731_vm3 = vcmp.lt.s32.totalorder (%p178_p4), %v724_v11, %v717_v9 }
 0x133   :  { %vm732_vm4 = vmand (%p178_p4), %vm730_vm2, %vm731_vm3  ;;  %vm1406_vm2 = vcmp.ne.s32.totalorder (%p178_p4), %v797_v32, 0 }
 0x134   :  { %vm733_vm5 = vmor (%p178_p4), %vm729_vm1, %vm732_vm4 }
 0x135   :  { %v734_v18 = vsel (%p178_p4), %vm733_vm5, %v723_v10, %v711_v8  ;;  %v736_v19 = vsel (%p178_p4), %vm733_vm5, %v711_v8, %v723_v10  ;;  %v738_v20 = vsel (%p178_p4), %vm733_vm5, %v724_v11, %v717_v9  ;;  %v740_v22 = vsel (%p178_p4), %vm733_vm5, %v717_v9, %v724_v11 }
 0x1aa   : > { %v598_v58 = vpop.trf.xlu0 }
 0x1ab   : > { %v637_v59 = vrot.slane %v598_v58, 1  ;;  %1248 = vpush %v598_v58 }
 0x1ad   : > { %1250 = vpush %v637_v59  ;;  %v661_v60 = vrot.slane %v637_v59, 1 }
 0x1af   : > { %1252 = vpush %v661_v60  ;;  %v685_v61 = vrot.slane %v661_v60, 1 }
 0x1b1   : > { %1254 = vpush %v685_v61 }
 0x1dc   : > { %s1249_s29 = spop %1248 }
 0x1dd   : > { %s615_s30 = sshrl.u32 %s1249_s29, 8  ;;  %s617_s3 = ssub.s32 0, %s1249_s29 }
 0x1de   : > { %p616_p0 = scmp.lt.s32.totalorder %s1249_s29, 0  ;;  %s1232_s4 = smin.u32 %s1249_s29, %s617_s3 }
 0x1df   : > { %s619_s5 = sand.u32 255, %s1232_s4   ;;  %s1234_s6 = sshll.u32 %s615_s30, 3 }
 0x1e0   : > { %s620_s7 = ssub.s32 0, %s619_s5  ;;  %s1251_s8 = spop %1250 }
 0x1e1   : > { %s1483_s7 = smov (!%p616_p0, %s620_s7), %s619_s5  ;;  %s639_s9 = sshrl.u32 %s1251_s8, 8 }
 0x1e2   : > { %s622_s10 = sshrl.u32 %s1483_s7, 7  ;;  %s624_s11 = sand.u32 127, %s1483_s7  }
 0x1e3   : > { %s1233_s12 = sshll.u32 %s622_s10, 9  ;;  %s641_s13 = ssub.s32 0, %s1251_s8 }
 0x1e4   : > { %s625_s14 = sadd.s32 %s1233_s12, %s624_s11  ;;  %s1236_s15 = smin.u32 %s1251_s8, %s641_s13 }
 0x1e5   : > { %v627_v62 = vstv %s625_s14  ;;  %p640_p1 = scmp.lt.s32.totalorder %s1251_s8, 0  ;;  %s643_s16 = sand.u32 255, %s1236_s15  }
 0x1e6   : > { %vm629_vm13 = vcmp.eq.s32.totalorder %v48_v5, %v627_v62  ;;  %s644_s17 = ssub.s32 0, %s643_s16  ;;  %s631_s18 = scalar_lea.vmem [#allocation16], %s1234_s6 }
 0x1e7   : > { %632 = vst.msk [vmem:[%s631_s18] sm:$0xff] %vm629_vm13, %v1311_v63  ;;  %s634_s19 = scalar_lea.vmem [#allocation17], %s1234_s6  ;;  %s1485_s17 = smov (!%p640_p1, %s644_s17), %s643_s16 }
 0x1e8   : > { %635 = vst.msk [vmem:[%s634_s19] sm:$0xff] %vm629_vm13, %v1312_v0  ;;  %s1238_s20 = sshll.u32 %s639_s9, 3  ;;  %s1253_s21 = spop %1252 }
 0x1e9   : > { %s646_s22 = sshrl.u32 %s1485_s17, 7  ;;  %s648_s23 = sand.u32 127, %s1485_s17  }
 0x1ea   : > { %s1237_s24 = sshll.u32 %s646_s22, 9  ;;  %s665_s26 = ssub.s32 0, %s1253_s21 }
 0x1eb   : > { %s649_s25 = sadd.s32 %s1237_s24, %s648_s23  ;;  %s663_s27 = sshrl.u32 %s1253_s21, 8 }
 0x1ec   : > { %v651_v1 = vstv %s649_s25  ;;  %s1240_s28 = smin.u32 %s1253_s21, %s665_s26  ;;  %p664_p2 = scmp.lt.s32.totalorder %s1253_s21, 0 }
 0x1ed   : > { %v652_v2 = vadd.s32 128, %v651_v1  ;;  %s667_s29 = sand.u32 255, %s1240_s28   ;;  %s1375_s3 = spop %1254 }
 0x1ee   : > { %s668_s30 = ssub.s32 0, %s667_s29  ;;  %s655_s4 = scalar_lea.vmem [#allocation16], %s1238_s20 }
 0x1ef   : > { %vm653_vm14 = vcmp.eq.s32.totalorder %v48_v5, %v652_v2  ;;  %s658_s5 = scalar_lea.vmem [#allocation17], %s1238_s20  ;;  %s1487_s30 = smov (!%p664_p2, %s668_s30), %s667_s29 }
 0x1f0   : > { %656 = vst.msk [vmem:[%s655_s4] sm:$0xff] %vm653_vm14, %v1311_v63  ;;  %659 = vst.msk [vmem:[%s658_s5] sm:$0xff] %vm653_vm14, %v1312_v0  ;;  %s1242_s6 = sshll.u32 %s663_s27, 3  ;;  %s670_s7 = sshrl.u32 %s1487_s30, 7 }
 0x1f1   : > { %s672_s8 = sand.u32 127, %s1487_s30   ;;  %s1241_s9 = sshll.u32 %s670_s7, 9 }
 0x1f2   : > { %s689_s10 = ssub.s32 0, %s1375_s3  ;;  %s673_s11 = sadd.s32 %s1241_s9, %s672_s8 }
 0x1f3   : > { %s1244_s12 = smin.u32 %s1375_s3, %s689_s10  ;;  %v675_v3 = vstv %s673_s11  ;;  %p688_p3 = scmp.lt.s32.totalorder %s1375_s3, 0 }
 0x1f4   : > { %s691_s13 = sand.u32 255, %s1244_s12   ;;  %v676_v4 = vadd.s32 256, %v675_v3  ;;  %s687_s15 = sshrl.u32 %s1375_s3, 8 }
 0x1f5   : > { %s692_s14 = ssub.s32 0, %s691_s13  ;;  %s679_s16 = scalar_lea.vmem [#allocation16], %s1242_s6 }
 0x1f6   : > { %s1489_s14 = smov (!%p688_p3, %s692_s14), %s691_s13  ;;  %vm677_vm15 = vcmp.eq.s32.totalorder %v48_v5, %v676_v4  ;;  %s682_s17 = scalar_lea.vmem [#allocation17], %s1242_s6 }
 0x1f7   : > { %680 = vst.msk [vmem:[%s679_s16] sm:$0xff] %vm677_vm15, %v1311_v63  ;;  %683 = vst.msk [vmem:[%s682_s17] sm:$0xff] %vm677_vm15, %v1312_v0  ;;  %s694_s18 = sshrl.u32 %s1489_s14, 7  ;;  %s696_s19 = sand.u32 127, %s1489_s14  }
 0x1f8   : > { %s1245_s20 = sshll.u32 %s694_s18, 9  ;;  %s1246_s22 = sshll.u32 %s687_s15, 3 }
 0x1f9   : > { %s697_s21 = sadd.s32 %s1245_s20, %s696_s19  ;;  %s703_s23 = scalar_lea.vmem [#allocation16], %s1246_s22 }
 0x1fa   : > { %v699_v6 = vstv %s697_s21  ;;  %s706_s24 = scalar_lea.vmem [#allocation17], %s1246_s22  ;;  %s1164_s25 = sshll.u32 (%p178_p4), %s1316_s0, 4  ;;  %s1165_s25 = int_to_ptr.vmem [resolvable:$true] %s1164_s25 }
 0x1fb   : > { %v700_v7 = vadd.s32 384, %v699_v6  ;;  %s1275_s26 = scalar_lea.vmem (%p178_p4), %s1165_s25, 64  ;;  %p1280_p6 = scmp.lt.s32.totalorder (%p178_p4), %s1165_s25, %s1165_s25 }
 0x1fc   :  { %180 = sbr.rel (!%p178_p4) target bundleno = 23 (0x17), region = 130  ;;  %p1276_p5 = scmp.ne.s32.totalorder (%p178_p4), %s1165_s25, %s1275_s26 }
 0x1fd   : > { %vm701_vm0 = vcmp.eq.s32.totalorder %v48_v5, %v700_v7  ;;  %v1388_v5 = vsub.s32 (%p178_p4), %v749_v17, %v1354_v13  ;;  %p1281_p7 = scmp.lt.s32.totalorder (%p178_p4), %s1275_s26, %s1275_s26 }
 0x1fe   : > { %704 = vst.msk [vmem:[%s703_s23] sm:$0xff] %vm701_vm0, %v1311_v63  ;;  %707 = vst.msk [vmem:[%s706_s24] sm:$0xff] %vm701_vm0, %v1312_v0 }
 0x1ff   :  { %v753_v24 = vrot.slane (%p178_p4), %v734_v18, %v1388_v5  ;;  %v760_v25 = vrot.slane (%p178_p4), %v738_v20, %v1388_v5  ;;  %v934_v26 = vrot.slane (%p178_p4), %v736_v19, %v1388_v5  ;;  %v941_v28 = vrot.slane (%p178_p4), %v740_v22, %v1388_v5  ;;  %p1282_p8 = por (%p178_p4), %p1281_p7, %p1280_p6 }
 0x201   :  { %vm762_vm7 = vcmp.gt.s32.totalorder (%p178_p4), %v734_v18, %v753_v24  ;;  %vm763_vm8 = vcmp.eq.s32.totalorder (%p178_p4), %v734_v18, %v753_v24  ;;  %vm764_vm9 = vcmp.lt.s32.totalorder (%p178_p4), %v738_v20, %v760_v25  ;;  %vm944_vm11 = vcmp.eq.s32.totalorder (%p178_p4), %v736_v19, %v934_v26  ;;  %p1283_p9 = pnand (%p178_p4), %p1282_p8, %p1276_p5 }
 0x202   :  { %vm765_vm10 = vmand (%p178_p4), %vm763_vm8, %vm764_vm9  ;;  %vm945_vm12 = vcmp.lt.s32.totalorder (%p178_p4), %v740_v22, %v941_v28  ;;  %vm943_vm14 = vcmp.gt.s32.totalorder (%p178_p4), %v736_v19, %v934_v26 }
 0x203   :  { %vm766_vm13 = vmor %vm762_vm7, %vm765_vm10 }
 0x204   :  { %vm771_vm15 = vmxor %vm766_vm13, %vm1393_vm6 }
 0x205   :  { %v772_v33 = vsel %vm771_vm15, %v734_v18, %v753_v24  ;;  %v773_v34 = vsel %vm771_vm15, %v738_v20, %v760_v25  ;;  %vm946_vm0 = vmand %vm944_vm11, %vm945_vm12 }
 0x206   :  { %v781_v36 = vrot.slane %v772_v33, %v1399_v31  ;;  %v788_v37 = vrot.slane %v773_v34, %v1399_v31  ;;  %vm947_vm1 = vmor %vm943_vm14, %vm946_vm0 }
 0x207   :  { %vm952_vm3 = vmxor %vm947_vm1, %vm1393_vm6 }
 0x208   :  { %vm790_vm4 = vcmp.gt.s32.totalorder %v772_v33, %v781_v36  ;;  %vm791_vm5 = vcmp.eq.s32.totalorder %v772_v33, %v781_v36  ;;  %vm792_vm7 = vcmp.lt.s32.totalorder %v773_v34, %v788_v37  ;;  %v953_v39 = vsel %vm952_vm3, %v736_v19, %v934_v26 }
 0x209   :  { %vm793_vm8 = vmand %vm791_vm5, %vm792_vm7  ;;  %v954_v41 = vsel %vm952_vm3, %v740_v22, %v941_v28  ;;  %v962_v42 = vrot.slane %v953_v39, %v1399_v31 }
 0x20a   :  { %vm794_vm9 = vmor %vm790_vm4, %vm793_vm8  ;;  %v969_v43 = vrot.slane %v954_v41, %v1399_v31  ;;  %vm1422_vm4 = vcmp.ne.s32.totalorder %v825_v44, 0 }
 0x20b   :  { %vm799_vm10 = vmxor %vm794_vm9, %vm1406_vm2  ;;  %vm971_vm11 = vcmp.gt.s32.totalorder %v953_v39, %v962_v42  ;;  %vm972_vm12 = vcmp.eq.s32.totalorder %v953_v39, %v962_v42 }
 0x20c   :  { %v800_v45 = vsel %vm799_vm10, %v772_v33, %v781_v36  ;;  %v801_v46 = vsel %vm799_vm10, %v773_v34, %v788_v37  ;;  %vm973_vm13 = vcmp.lt.s32.totalorder %v954_v41, %v969_v43 }
 0x20d   :  { %v809_v47 = vrot.slane %v800_v45, %v1413_v40  ;;  %v816_v48 = vrot.slane %v801_v46, %v1413_v40  ;;  %vm974_vm14 = vmand %vm972_vm12, %vm973_vm13 }
 0x20e   :  { %vm975_vm15 = vmor %vm971_vm11, %vm974_vm14 }
 0x20f   :  { %vm818_vm0 = vcmp.gt.s32.totalorder %v800_v45, %v809_v47  ;;  %vm819_vm1 = vcmp.eq.s32.totalorder %v800_v45, %v809_v47  ;;  %vm820_vm3 = vcmp.lt.s32.totalorder %v801_v46, %v816_v48  ;;  %vm980_vm5 = vmxor %vm975_vm15, %vm1406_vm2 }
 0x210   :  { %vm821_vm7 = vmand %vm819_vm1, %vm820_vm3  ;;  %v981_v13 = vsel %vm980_vm5, %v953_v39, %v962_v42  ;;  %v982_v50 = vsel %vm980_vm5, %v954_v41, %v969_v43 }
 0x211   :  { %vm822_vm8 = vmor %vm818_vm0, %vm821_vm7  ;;  %v990_v51 = vrot.slane %v981_v13, %v1413_v40  ;;  %v997_v52 = vrot.slane %v982_v50, %v1413_v40 }
 0x212   :  { %vm827_vm9 = vmxor %vm822_vm8, %vm1422_vm4 }
 0x213   :  { %v828_v53 = vsel %vm827_vm9, %v800_v45, %v809_v47  ;;  %v829_v54 = vsel %vm827_vm9, %v801_v46, %v816_v48  ;;  %vm999_vm10 = vcmp.gt.s32.totalorder %v981_v13, %v990_v51  ;;  %vm1000_vm11 = vcmp.eq.s32.totalorder %v981_v13, %v990_v51 }
 0x214   :  { %v843_v55 = vrot.slane %v828_v53, %v1388_v5  ;;  %v850_v56 = vrot.slane %v829_v54, %v1388_v5  ;;  %vm1001_vm12 = vcmp.lt.s32.totalorder %v982_v50, %v997_v52 }
 0x215   :  { %vm1002_vm13 = vmand %vm1000_vm11, %vm1001_vm12 }
 0x216   :  { %vm852_vm14 = vcmp.gt.s32.totalorder %v828_v53, %v843_v55  ;;  %vm853_vm15 = vcmp.eq.s32.totalorder %v828_v53, %v843_v55  ;;  %vm854_vm0 = vcmp.lt.s32.totalorder %v829_v54, %v850_v56  ;;  %vm1003_vm1 = vmor %vm999_vm10, %vm1002_vm13 }
 0x217   :  { %vm855_vm3 = vmand %vm853_vm15, %vm854_vm0 }
 0x218   :  { %vm856_vm5 = vmor %vm852_vm14, %vm855_vm3 }
 0x219   :  { %vm861_vm7 = vmxor %vm856_vm5, %vm1393_vm6 }
 0x21a   :  { %v862_v57 = vsel %vm861_vm7, %v828_v53, %v843_v55  ;;  %v863_v58 = vsel %vm861_vm7, %v829_v54, %v850_v56  ;;  %vm1008_vm8 = vmxor %vm1003_vm1, %vm1422_vm4 }
 0x21b   :  { %v871_v59 = vrot.slane %v862_v57, %v1399_v31  ;;  %v878_v60 = vrot.slane %v863_v58, %v1399_v31  ;;  %v1009_v61 = vsel %vm1008_vm8, %v981_v13, %v990_v51  ;;  %v1010_v62 = vsel %vm1008_vm8, %v982_v50, %v997_v52 }
 0x21c   :  { %v1024_v63 = vrot.slane %v1009_v61, %v1388_v5  ;;  %v1031_v0 = vrot.slane %v1010_v62, %v1388_v5 }
 0x21d   :  { %vm880_vm9 = vcmp.gt.s32.totalorder %v862_v57, %v871_v59  ;;  %vm881_vm10 = vcmp.eq.s32.totalorder %v862_v57, %v871_v59  ;;  %vm882_vm11 = vcmp.lt.s32.totalorder %v863_v58, %v878_v60 }
 0x21e   :  { %vm883_vm12 = vmand %vm881_vm10, %vm882_vm11  ;;  %vm1034_vm13 = vcmp.eq.s32.totalorder %v1009_v61, %v1024_v63  ;;  %vm1035_vm14 = vcmp.lt.s32.totalorder %v1010_v62, %v1031_v0  ;;  %vm1033_vm0 = vcmp.gt.s32.totalorder %v1009_v61, %v1024_v63 }
 0x21f   :  { %vm884_vm15 = vmor %vm880_vm9, %vm883_vm12 }
 0x220   :  { %vm889_vm1 = vmxor %vm884_vm15, %vm1406_vm2 }
 0x221   :  { %v890_v1 = vsel %vm889_vm1, %v862_v57, %v871_v59  ;;  %v891_v2 = vsel %vm889_vm1, %v863_v58, %v878_v60  ;;  %vm1036_vm3 = vmand %vm1034_vm13, %vm1035_vm14 }
 0x222   :  { %v899_v3 = vrot.slane %v890_v1, %v1413_v40  ;;  %v906_v4 = vrot.slane %v891_v2, %v1413_v40  ;;  %vm1037_vm5 = vmor %vm1033_vm0, %vm1036_vm3 }
 0x223   :  { %vm1042_vm7 = vmxor %vm1037_vm5, %vm1393_vm6 }
 0x224   :  { %vm908_vm8 = vcmp.gt.s32.totalorder %v890_v1, %v899_v3  ;;  %vm909_vm10 = vcmp.eq.s32.totalorder %v890_v1, %v899_v3  ;;  %vm910_vm11 = vcmp.lt.s32.totalorder %v891_v2, %v906_v4  ;;  %v1043_v6 = vsel %vm1042_vm7, %v1009_v61, %v1024_v63 }
 0x225   :  { %vm911_vm9 = vmand %vm909_vm10, %vm910_vm11  ;;  %v1044_v7 = vsel %vm1042_vm7, %v1010_v62, %v1031_v0  ;;  %v1052_v8 = vrot.slane %v1043_v6, %v1399_v31 }
 0x226   :  { %vm912_vm12 = vmor %vm908_vm8, %vm911_vm9  ;;  %v1059_v9 = vrot.slane %v1044_v7, %v1399_v31 }
 0x227   :  { %vm917_vm13 = vmxor %vm912_vm12, %vm1422_vm4  ;;  %vm1061_vm14 = vcmp.gt.s32.totalorder %v1043_v6, %v1052_v8  ;;  %vm1062_vm15 = vcmp.eq.s32.totalorder %v1043_v6, %v1052_v8 }
 0x228   :  { %v918_v10 = vsel %vm917_vm13, %v890_v1, %v899_v3  ;;  %v919_v11 = vsel %vm917_vm13, %v891_v2, %v906_v4  ;;  %vm1063_vm0 = vcmp.lt.s32.totalorder %v1044_v7, %v1059_v9 }
 0x229   :  { %921 = vst [vmem:[#allocation12] sm:$0xff] %v918_v10  ;;  %922 = vst [vmem:[#allocation14] sm:$0xff] %v919_v11 }
 0x22a   :  { %vm1064_vm6 = vmand %vm1062_vm15, %vm1063_vm0 }
 0x22b   :  { %vm1065_vm1 = vmor %vm1061_vm14, %vm1064_vm6 }
 0x22c   :  { %vm1070_vm3 = vmxor %vm1065_vm1, %vm1406_vm2 }
 0x22d   :  { %v1071_v12 = vsel %vm1070_vm3, %v1043_v6, %v1052_v8  ;;  %v1072_v14 = vsel %vm1070_vm3, %v1044_v7, %v1059_v9 }
 0x22e   :  { %v1080_v15 = vrot.slane %v1071_v12, %v1413_v40  ;;  %v1087_v16 = vrot.slane %v1072_v14, %v1413_v40 }
 0x230   :  { %vm1089_vm5 = vcmp.gt.s32.totalorder %v1071_v12, %v1080_v15  ;;  %vm1090_vm7 = vcmp.eq.s32.totalorder %v1071_v12, %v1080_v15  ;;  %vm1091_vm8 = vcmp.lt.s32.totalorder %v1072_v14, %v1087_v16  ;;  %v1129_v19 = vld [vmem:[#allocation14] sm:$0xff]  ;;  %v1105_v20 = vld [vmem:[#allocation12] sm:$0xff] }
 0x231   :  { %vm1092_vm10 = vmand %vm1090_vm7, %vm1091_vm8  ;;  %1130 = vxpose.xlu0.b32.start.end [1/1] (short) (narrow) %v1129_v19, 8  ;;  %vm1106_vm2 = vcmp.lt.s32.totalorder %v1105_v20, 0  ;;  %v1107_v21 = vsub.s32 2147483647, %v1105_v20 }
 0x232   :  { %vm1093_vm11 = vmor %vm1089_vm5, %vm1092_vm10 }
 0x233   :  { %vm1098_vm9 = vmxor %vm1093_vm11, %vm1422_vm4  ;;  %v1108_v22 = vsel %vm1106_vm2, %v1107_v21, %v1105_v20 }
 0x234   :  { %v1099_v17 = vsel %vm1098_vm9, %v1071_v12, %v1080_v15  ;;  %v1100_v18 = vsel %vm1098_vm9, %v1072_v14, %v1087_v16  ;;  %1109 = vst [vmem:[#allocation12] sm:$0xff] %v1108_v22 }
 0x235   :  { %1102 = vst [vmem:[#allocation13] sm:$0xff] %v1099_v17  ;;  %1103 = vst [vmem:[#allocation15] sm:$0xff] %v1100_v18  ;;  %1111 = vxpose.xlu0.b32.start.end [1/1] (short) (narrow) %v1108_v22, 8 }
 0x2b1   :  { %v1131_v5 = vpop.trf.xlu0 }
 0x2b2   :  { %1147 = vst [vmem:[#allocation10] sm:$0xff] %v1131_v5 }
 0x2b5   :  { %v1112_v23 = vpop.trf.xlu0 }
 0x2b6   :  { %1128 = vst [vmem:[#allocation7] sm:$0xff] %v1112_v23 }
 0x2b9   :  { %v1157_v24 = vld [vmem:[#allocation10] sm:$0xf] }
 0x2ba   :  { %1159 = vst [vmem:[#allocation11] sm:$0xf] %v1157_v24 }
 0x2bd   :  { %v1151_v25 = vld [vmem:[#allocation7] sm:$0xf] }
 0x2be   :  { %1153 = vst [vmem:[#allocation8] sm:$0xf] %v1151_v25 }
 0x2bf   :  { %1286 = shalt.err (!%p1283_p9)
}
 0x2c0   :  { %s1287_s29 = scalar_lea.hbm %s1474_s1, 64 }
 0x2c1   :  { %p1288_p10 = scmp.ne.s32.totalorder %s1474_s1, %s1287_s29  ;;  %p1291_p11 = scmp.lt.u32.totalorder %s1287_s29, %s1474_s1 }
 0x2c3   :  { %p1293_p12 = pnand %p1291_p11, %p1288_p10 }
 0x2c5   :  { %1296 = shalt.err (!%p1293_p12)
}
 0x2c6   :  { %1167 = dma.vmem_to_hbm [thread:$0]  %s1165_s25, 64, %s1474_s1, [#allocation9]   ;;  %v1183_v26 = vld [vmem:[#allocation11] sm:$0xf] }
 0x2c7   :  { %1184 = vst [vmem:[%s1475_s2] sm:$0xf] %v1183_v26 }
 0x2c8   :  { %1301 = dma.done.wait [#allocation9], 64  }
 0x2c9   :  { %1302 = vsyncadd [#allocation9], 4294967232 }
 0x2ca   :  { %1200 = vsyncpa [#allocation9], 1 }

// kernel: _lambda_.6
= control target key start
LH: loop header
LB: loop body
LE: loop exit
PB: predicated region body
PF: predicated region fallthrough
CT: control target
= control target key end

     0   :  { %s13191_s0 = inlined_call_operand.vmem [shape: f32[4,8,8,128], index: 0, kind: input, shape index: {}]   ;;  %s13192_s1 = inlined_call_operand.hbm [shape: bf16[2,128,128], index: 1, kind: input, shape index: {}]   ;;  %s13193_s2 = inlined_call_operand.hbm [shape: f32[2,8,8,128], index: 2, kind: input, shape index: {}]   ;;  %s13194_s3 = inlined_call_operand.hbm [shape: bf16[2,1152,128], index: 3, kind: input, shape index: {}]   ;;  %s13195_s4 = inlined_call_operand.hbm [shape: f32[2,1,128], index: 4, kind: input, shape index: {}]   ;;  %s13196_s5 = inlined_call_operand.vmem [shape: f32[4,2,1,1,128], index: 5, kind: input, shape index: {}]   ;;  %s13197_s6 = inlined_call_operand.vmem [shape: f32[4,2,1,1,128], index: 6, kind: input, shape index: {}]   ;;  %s13198_s7 = inlined_call_operand.hbm [shape: bf16[1152,512], index: 7, kind: input, shape index: {}]   ;;  %s13199_s8 = inlined_call_operand.hbm [shape: f32[1,512], index: 8, kind: input, shape index: {}]   ;;  %s13200_s9 = inlined_call_operand.hbm [shape: bf16[512,256], index: 9, kind: input, shape index: {}]   ;;  %s13201_s10 = inlined_call_operand.hbm [shape: f32[1,256], index: 10, kind: input, shape index: {}]   ;;  %s13202_s11 = inlined_call_operand.vmem [shape: f32[4,8,8,128], index: 11, kind: output, shape index: {0}]   ;;  %s13203_s12 = inlined_call_operand.vmem [shape: f32[4,8,8,256], index: 12, kind: output, shape index: {1}]  }
   0x1   :  { %13249 = sst [smem:[#allocation46_spill]] %s13193_s2 }
   0x2   :  { %13250 = sst [smem:[#allocation47_spill]] %s13195_s4 }
   0x3   :  { %13251 = sst [smem:[#allocation48_spill]] %s13203_s12 }
   0x4   :  { %18 = vsyncpa [#allocation4], 0 }
   0x5   :  { %19 = vsyncpa [#allocation6], 0 }
   0x6   :  { %20 = vsyncpa [#allocation9], 0 }
   0x7   :  { %21 = vsyncpa [#allocation12], 0 }
   0x8   :  { %22 = vsyncpa [#allocation15], 0  ;;  %s10983_s21 = smov 0  }
   0x9 LB: > { %s10901_s22 = smov [#allocation5]   ;;  %s13204_s24 = sadd.s32 4294967295, %s10899_s21   ;;  %s10899_s21 = sphi %s10983_s21, %s28_s21  }
   0xa   : > { %s356_s23 = sshll.u32 %s10901_s22, 4  ;;  %p8174_p0 = scmp.ge.s32.totalorder %s10899_s21, 1  ;;  %s10997_s23 = int_to_ptr.vmem [resolvable:$true] %s356_s23 }
   0xb   : > { %p331_p1 = scmp.lt.s32.totalorder %s10899_s21, 3  ;;  %p10993_p2 = scmp.eq.s32.totalorder %s13204_s24, 0 }
   0xc   : > { %s10902_s27 = smov [#allocation8]   ;;  %s10903_s30 = smov [#allocation11]  }
   0xd   : > { %s13252_s25 = scalar_select %p10993_p2, 1, 0 }
   0xe   : > { %p10999_p3 = pnand %p8174_p0, %p331_p1  ;;  %s382_s28 = sshll.u32 %s10902_s27, 4  ;;  %s11005_s28 = int_to_ptr.vmem [resolvable:$true] %s382_s28 }
   0xf   : > { %s11013_s13 = sshll.u32 %s10903_s30, 4  ;;  %s13255_s2 = sld [smem:[#allocation46_spill]]  ;;  %s410_s13 = int_to_ptr.vmem [resolvable:$true] %s11013_s13 }
  0x10   : > { %s13253_s26 = scalar_select %p10999_p3, 1, 0 }
  0x11   : > { %p9857_p4 = pneg %p10999_p3 }
  0x13   : > { %p11009_p5 = pnand %p10993_p2, %p9857_p4 }
  0x15   : > { %s10649_s16 = scalar_lea.hbm %s13255_s2, 2048  ;;  %p11023_p7 = pneg %p11009_p5 }
  0x16   : > { %p10650_p6 = scmp.ne.s32.totalorder %s13255_s2, %s10649_s16  ;;  %p10656_p10 = scmp.lt.u32.totalorder %s10649_s16, %s13255_s2 }
  0x18   : > { %p10652_p8 = pnand %p11023_p7, %p10650_p6 }
  0x1a   : > { %p10653_p9 = pneg %p10652_p8 }
  0x1c   : > { %p10658_p11 = pnand %p10656_p10, %p10653_p9 }
  0x1e   : > { %10661 = shalt.err (!%p10658_p11)
}
  0x1f   : > { %s10662_s27 = scalar_lea.vmem %s10997_s23, 2048  ;;  %p10670_p1 = scmp.lt.s32.totalorder %s10997_s23, %s10997_s23 }
  0x20   : > { %p10663_p12 = scmp.ne.s32.totalorder %s10997_s23, %s10662_s27  ;;  %p10671_p4 = scmp.lt.s32.totalorder %s10662_s27, %s10662_s27 }
  0x22   : > { %p10665_p13 = pnand %p10663_p12, %p11023_p7  ;;  %p10672_p6 = por %p10671_p4, %p10670_p1 }
  0x24   : > { %p10666_p0 = pneg %p10665_p13 }
  0x26   : > { %p10673_p8 = pnand %p10672_p6, %p10666_p0 }
  0x28   : > { %10676 = shalt.err (!%p10673_p8)
}
  0x29   : > { %s13205_s30 = smov 128   ;;  %s13206_s14 = smov 8  }
  0x2a   : > { %9863 = dma.hbm_to_vmem [thread:$0]  (!%p11009_p5), %s13255_s2, 2048, %s10997_s23, [#allocation6], %s13205_s30, %s13205_s30, %s13206_s14  }
  0x2b   : > { %s13257_s4 = sld [smem:[#allocation47_spill]] }
  0x31   : > { %s10677_s20 = scalar_lea.hbm %s13257_s4, 32 }
  0x32   : > { %p10678_p9 = scmp.ne.s32.totalorder %s13257_s4, %s10677_s20  ;;  %p10684_p12 = scmp.lt.u32.totalorder %s10677_s20, %s13257_s4 }
  0x34   : > { %p10680_p10 = pnand %p10678_p9, %p11023_p7 }
  0x36   : > { %p10681_p11 = pneg %p10680_p10 }
  0x38   : > { %p10686_p13 = pnand %p10684_p12, %p10681_p11 }
  0x3a   : > { %10689 = shalt.err (!%p10686_p13)
}
  0x3b   : > { %s10690_s23 = scalar_lea.vmem %s11005_s28, 32  ;;  %p10698_p6 = scmp.lt.s32.totalorder %s11005_s28, %s11005_s28 }
  0x3c   : > { %p10691_p0 = scmp.ne.s32.totalorder %s11005_s28, %s10690_s23  ;;  %p10699_p8 = scmp.lt.s32.totalorder %s10690_s23, %s10690_s23 }
  0x3e   : > { %p10693_p1 = pnand %p10691_p0, %p11023_p7  ;;  %p10700_p9 = por %p10699_p8, %p10698_p6 }
  0x40   : > { %p10694_p4 = pneg %p10693_p1 }
  0x42   : > { %p10701_p10 = pnand %p10700_p9, %p10694_p4 }
  0x44   : > { %10704 = shalt.err (!%p10701_p10)
}
  0x45   : > { %s13210_s15 = smov 16   ;;  %s10907_s12 = smov 1  }
  0x46   : > { %9869 = dma.hbm_to_vmem [thread:$0]  (!%p11009_p5), %s13257_s4, 32, %s11005_s28, [#allocation9], %s13210_s15, %s13210_s15, %s10907_s12  }
  0x47   : > { %s10908_s17 = smov [#allocation3]   ;;  %s10705_s27 = scalar_lea.hbm %s13199_s8, 64 }
  0x48   : > { %s343_s18 = sshll.u32 %s10908_s17, 4  ;;  %p10706_p11 = scmp.ne.s32.totalorder %s13199_s8, %s10705_s27  ;;  %s344_s18 = int_to_ptr.vmem [resolvable:$true] %s343_s18 }
  0x49   : > { %p10712_p0 = scmp.lt.u32.totalorder %s10705_s27, %s13199_s8 }
  0x4a   : > { %p10708_p12 = pnand %p10706_p11, %p11023_p7 }
  0x4c   : > { %p10709_p13 = pneg %p10708_p12 }
  0x4e   : > { %p10714_p1 = pnand %p10712_p0, %p10709_p13 }
  0x50   : > { %10717 = shalt.err (!%p10714_p1)
}
  0x51   : > { %s10718_s28 = scalar_lea.vmem %s410_s13, 64  ;;  %p10726_p9 = scmp.lt.s32.totalorder %s410_s13, %s410_s13 }
  0x52   : > { %p10719_p4 = scmp.ne.s32.totalorder %s410_s13, %s10718_s28  ;;  %p10727_p10 = scmp.lt.s32.totalorder %s10718_s28, %s10718_s28 }
  0x54   : > { %p10721_p6 = pnand %p10719_p4, %p11023_p7  ;;  %p10728_p2 = por %p10727_p10, %p10726_p9 }
  0x56   : > { %p10722_p8 = pneg %p10721_p6 }
  0x58   : > { %p10729_p3 = pnand %p10728_p2, %p10722_p8 }
  0x5a   : > { %10732 = shalt.err (!%p10729_p3)
}
  0x5b   : > { %9875 = dma.hbm_to_vmem [thread:$0]  (!%p11009_p5), %s13199_s8, 64, %s410_s13, [#allocation12]  }
  0x5c   : > { %s10733_s24 = scalar_lea.hbm %s13192_s1, 2048 }
  0x5d   : > { %p10734_p11 = scmp.ne.s32.totalorder %s13192_s1, %s10733_s24  ;;  %p10740_p3 = scmp.lt.u32.totalorder %s10733_s24, %s13192_s1 }
  0x5f   : > { %p10736_p12 = pnand %p10734_p11, %p11023_p7 }
  0x61   : > { %p10737_p2 = pneg %p10736_p12 }
  0x63   : > { %p10742_p13 = pnand %p10740_p3, %p10737_p2 }
  0x65   : > { %10745 = shalt.err (!%p10742_p13)
}
  0x66   : > { %s10746_s27 = scalar_lea.vmem %s344_s18, 2048  ;;  %p10754_p6 = scmp.lt.s32.totalorder %s344_s18, %s344_s18 }
  0x67   : > { %p10747_p0 = scmp.ne.s32.totalorder %s344_s18, %s10746_s27  ;;  %p10755_p8 = scmp.lt.s32.totalorder %s10746_s27, %s10746_s27 }
  0x69   : > { %p10749_p1 = pnand %p10747_p0, %p11023_p7  ;;  %p10756_p9 = por %p10755_p8, %p10754_p6 }
  0x6b   : > { %p10750_p4 = pneg %p10749_p1 }
  0x6d   : > { %p10757_p10 = pnand %p10756_p9, %p10750_p4 }
  0x6f   : > { %10760 = shalt.err (!%p10757_p10)
}
  0x70   : > { %s10909_s13 = smov 64   ;;  %s10910_s23 = smov 4  }
  0x71   : > { %9860 = dma.hbm_to_vmem [thread:$0]  (!%p11009_p5), %s13192_s1, 2048, %s344_s18, [#allocation4], %s10909_s13, %s10909_s13, %s10910_s23  }
  0x72   : > { %s10911_s12 = smov [#allocation7]   ;;  %s10912_s14 = smov [#allocation10]  }
  0x73   : > { %s369_s2 = sshll.u32 %s10911_s12, 4  ;;  %s395_s24 = sshll.u32 %s10912_s14, 4  ;;  %s370_s2 = int_to_ptr.vmem [resolvable:$true] %s369_s2  ;;  %s396_s24 = int_to_ptr.vmem [resolvable:$true] %s395_s24 }
  0x74   : > { %s10761_s20 = scalar_lea.hbm %s13194_s3, 18432 }
  0x75   : > { %p10762_p11 = scmp.ne.s32.totalorder %s13194_s3, %s10761_s20  ;;  %p10768_p3 = scmp.lt.u32.totalorder %s10761_s20, %s13194_s3 }
  0x77   : > { %p10764_p12 = pnand %p10762_p11, %p11023_p7 }
  0x79   : > { %p10765_p2 = pneg %p10764_p12 }
  0x7b   : > { %p10770_p13 = pnand %p10768_p3, %p10765_p2 }
  0x7d   : > { %10773 = shalt.err (!%p10770_p13)
}
  0x7e   : > { %s10774_s18 = scalar_lea.vmem %s370_s2, 18432  ;;  %p10782_p6 = scmp.lt.s32.totalorder %s370_s2, %s370_s2 }
  0x7f   : > { %p10775_p0 = scmp.ne.s32.totalorder %s370_s2, %s10774_s18  ;;  %p10783_p8 = scmp.lt.s32.totalorder %s10774_s18, %s10774_s18 }
  0x81   : > { %p10777_p1 = pnand %p10775_p0, %p11023_p7  ;;  %p10784_p9 = por %p10783_p8, %p10782_p6 }
  0x83   : > { %p10778_p4 = pneg %p10777_p1 }
  0x85   : > { %p10785_p10 = pnand %p10784_p9, %p10778_p4 }
  0x87   : > { %10788 = shalt.err (!%p10785_p10)
}
  0x88   : > { %9866 = dma.hbm_to_vmem [thread:$0]  (!%p11009_p5), %s13194_s3, 18432, %s370_s2, [#allocation6], %s10909_s13, %s10909_s13, %s10910_s23  }
  0x89   : > { %s10789_s12 = scalar_lea.hbm %s13198_s7, 36864 }
  0x8a   : > { %p10790_p11 = scmp.ne.s32.totalorder %s13198_s7, %s10789_s12  ;;  %p10796_p3 = scmp.lt.u32.totalorder %s10789_s12, %s13198_s7 }
  0x8c   : > { %p10792_p12 = pnand %p10790_p11, %p11023_p7 }
  0x8e   : > { %p10793_p2 = pneg %p10792_p12 }
  0x90   : > { %p10798_p13 = pnand %p10796_p3, %p10793_p2 }
  0x92   : > { %10801 = shalt.err (!%p10798_p13)
}
  0x93   : > { %s10802_s22 = scalar_lea.vmem %s396_s24, 36864  ;;  %p10810_p6 = scmp.lt.s32.totalorder %s396_s24, %s396_s24 }
  0x94   : > { %p10803_p0 = scmp.ne.s32.totalorder %s396_s24, %s10802_s22  ;;  %p10811_p8 = scmp.lt.s32.totalorder %s10802_s22, %s10802_s22 }
  0x96   : > { %p10805_p1 = pnand %p10803_p0, %p11023_p7  ;;  %p10812_p9 = por %p10811_p8, %p10810_p6 }
  0x98   : > { %p10806_p4 = pneg %p10805_p1 }
  0x9a   : > { %p10813_p10 = pnand %p10812_p9, %p10806_p4 }
  0x9c   : > { %10816 = shalt.err (!%p10813_p10)
}
  0x9d   : > { %s10913_s13 = smov 256   ;;  %s13258_s23 = smov 16  }
  0x9e   : > { %9872 = dma.hbm_to_vmem [thread:$0]  (!%p11009_p5), %s13198_s7, 36864, %s396_s24, [#allocation9], %s10913_s13, %s10913_s13, %s13258_s23  }
  0x9f   : > { %s10914_s18 = smov [#allocation13]   ;;  %s10915_s30 = smov [#allocation14]  }
  0xa0   : > { %s419_s28 = sshll.u32 %s10914_s18, 4  ;;  %s433_s4 = sshll.u32 %s10915_s30, 4  ;;  %s420_s28 = int_to_ptr.vmem [resolvable:$true] %s419_s28  ;;  %s11146_s4 = int_to_ptr.vmem [resolvable:$true] %s433_s4 }
  0xa1   : > { %s10817_s14 = scalar_lea.hbm %s13200_s9, 8192 }
  0xa2   : > { %p10818_p11 = scmp.ne.s32.totalorder %s13200_s9, %s10817_s14  ;;  %p10824_p3 = scmp.lt.u32.totalorder %s10817_s14, %s13200_s9 }
  0xa4   : > { %p10820_p12 = pnand %p10818_p11, %p11023_p7 }
  0xa6   : > { %p10821_p2 = pneg %p10820_p12 }
  0xa8   : > { %p10826_p13 = pnand %p10824_p3, %p10821_p2 }
  0xaa   : > { %10829 = shalt.err (!%p10826_p13)
}
  0xab   : > { %s10830_s22 = scalar_lea.vmem %s420_s28, 8192  ;;  %p10838_p6 = scmp.lt.s32.totalorder %s420_s28, %s420_s28 }
  0xac   : > { %p10831_p0 = scmp.ne.s32.totalorder %s420_s28, %s10830_s22  ;;  %p10839_p8 = scmp.lt.s32.totalorder %s10830_s22, %s10830_s22 }
  0xae   : > { %p10833_p1 = pnand %p10831_p0, %p11023_p7  ;;  %p10840_p9 = por %p10839_p8, %p10838_p6 }
  0xb0   : > { %p10834_p4 = pneg %p10833_p1 }
  0xb2   : > { %p10841_p10 = pnand %p10840_p9, %p10834_p4 }
  0xb4   : > { %10844 = shalt.err (!%p10841_p10)
}
  0xb5   : > { %s13259_s13 = smov 8   ;;  %s13260_s23 = smov 128  }
  0xb6   : > { %9878 = dma.hbm_to_vmem [thread:$0]  (!%p11009_p5), %s13200_s9, 8192, %s420_s28, [#allocation12], %s13260_s23, %s13260_s23, %s13259_s13  }
  0xb7   : > { %s10845_s15 = scalar_lea.hbm %s13201_s10, 32 }
  0xb8   : > { %p10846_p11 = scmp.ne.s32.totalorder %s13201_s10, %s10845_s15  ;;  %p10852_p3 = scmp.lt.u32.totalorder %s10845_s15, %s13201_s10 }
  0xba   : > { %p10848_p12 = pnand %p10846_p11, %p11023_p7 }
  0xbc   : > { %p10849_p2 = pneg %p10848_p12 }
  0xbe   : > { %p10854_p13 = pnand %p10852_p3, %p10849_p2 }
  0xc0   : > { %10857 = shalt.err (!%p10854_p13)
}
  0xc1   : > { %s10858_s28 = scalar_lea.vmem %s11146_s4, 32  ;;  %p10866_p6 = scmp.lt.s32.totalorder %s11146_s4, %s11146_s4 }
  0xc2   : > { %p10859_p0 = scmp.ne.s32.totalorder %s11146_s4, %s10858_s28  ;;  %p10867_p8 = scmp.lt.s32.totalorder %s10858_s28, %s10858_s28 }
  0xc4   : > { %p10861_p1 = pnand %p10859_p0, %p11023_p7  ;;  %p10868_p9 = por %p10867_p8, %p10866_p6 }
  0xc6   : > { %p10862_p4 = pneg %p10861_p1 }
  0xc8   : > { %p10869_p10 = pnand %p10868_p9, %p10862_p4 }
  0xca   : > { %10872 = shalt.err (!%p10869_p10)
}
  0xcb   : > { %9881 = dma.hbm_to_vmem [thread:$0]  (!%p11009_p5), %s13201_s10, 32, %s11146_s4, [#allocation15]  }
  0xcc   : > { %p13261_p11 = scmp.ne.s32.totalorder %s13253_s26, 0 }
  0xce   : > { %474 = sbr.rel (%p13261_p11) target bundleno = 2268 (0x8dc), region = 64 }
  0xd5   : > { %p13262_p12 = scmp.ne.s32.totalorder %s13252_s25, 0 }
  0xd7   : > { %10878 = dma.done.wait (%p13262_p12), [#allocation4], 2048  }
  0xd8   : > { %10880 = vsyncadd (%p13262_p12), [#allocation4], 4294965248 }
  0xd9   : > { %10882 = dma.done.wait (%p13262_p12), [#allocation6], 20480  }
  0xda   : > { %10884 = vsyncadd (%p13262_p12), [#allocation6], 4294946816 }
  0xdb   : > { %10886 = dma.done.wait (%p13262_p12), [#allocation9], 36896  }
  0xdc   : > { %10888 = vsyncadd (%p13262_p12), [#allocation9], 4294930400 }
  0xdd   : > { %10890 = dma.done.wait (%p13262_p12), [#allocation12], 8256  }
  0xde   : > { %10892 = vsyncadd (%p13262_p12), [#allocation12], 4294959040 }
  0xdf   : > { %10894 = dma.done.wait (%p13262_p12), [#allocation15], 32  }
  0xe0   : > { %10896 = vsyncadd (%p13262_p12), [#allocation15], 4294967264  ;;  %s13263_s26 = sadd.s32 4294967295, %s10899_s21   ;;  %v10916_v0 = vmov 0.0   ;;  %v9923_v1 = vld [vmem:[#allocation3] sm:$0xff]   ;;  %v9924_v2 = vld [vmem:[#allocation3 + $0x8] sm:$0xff]  }
  0xe1   : > { %s11216_s29 = sshll.u32 %s13263_s26, 1  ;;  %602 = vst [vmem:[#allocation2 + $0x30] sm:$0xff] %v10916_v0  ;;  %603 = vst [vmem:[#allocation2 + $0x38] sm:$0x3] %v10916_v0  ;;  %9313 = vmatprep.subr.bf16.mxu0 %v9923_v1  ;;  %v9925_v3 = vld [vmem:[#allocation3 + $0x10] sm:$0xff]   ;;  %v9926_v4 = vld [vmem:[#allocation3 + $0x18] sm:$0xff]  }
  0xe2   : > { %p563_p5 = scmp.lt.s32.totalorder %s11216_s29, 3  ;;  %596 = vst [vmem:[#allocation2] sm:$0xff] %v10916_v0  ;;  %597 = vst [vmem:[#allocation2 + $0x8] sm:$0x3] %v10916_v0  ;;  %9314 = vmatpush3.bf16.msra.mxu0 %v9923_v1  ;;  %v9927_v8 = vld [vmem:[#allocation3 + $0x20] sm:$0xff]   ;;  %v9928_v10 = vld [vmem:[#allocation3 + $0x28] sm:$0xff]  }
  0xe3   : > { %598 = vst [vmem:[#allocation2 + $0x10] sm:$0xff] %v10916_v0  ;;  %599 = vst [vmem:[#allocation2 + $0x18] sm:$0x3] %v10916_v0  ;;  %9315 = vmatprep.subr.bf16.mxu0 %v9924_v2  ;;  %v9931_v9 = vld [vmem:[#allocation7 + $0x40] sm:$0xff]   ;;  %v9935_v12 = vld [vmem:[#allocation7 + $0x48] sm:$0xff]   ;;  %vm958_vm0 = vcmask 1046528  }
  0xe4   : > { %600 = vst [vmem:[#allocation2 + $0x20] sm:$0xff] %v10916_v0  ;;  %601 = vst [vmem:[#allocation2 + $0x28] sm:$0x3] %v10916_v0  ;;  %s13318_s29 = smov (!%p563_p5, %s11216_s29), 3  ;;  %8753 = vmatprep.subr.bf16.mxu1 %v9931_v9  ;;  %v9933_v11 = vld [vmem:[#allocation7] sm:$0xff]   ;;  %v9929_v13 = vld [vmem:[#allocation3 + $0x30] sm:$0xff]  }
  0xe5   : > { %604 = vst [vmem:[#allocation2 + $0x40] sm:$0xff] %v10916_v0  ;;  %605 = vst [vmem:[#allocation2 + $0x48] sm:$0x3] %v10916_v0  ;;  %s8734_s25 = sshll.u32 %s13318_s29, 6  ;;  %8754 = vmatpush3.bf16.msra.mxu1 %v9933_v11  ;;  %v9937_v14 = vld [vmem:[#allocation7 + $0x8] sm:$0xff]   ;;  %v9939_v15 = vld [vmem:[#allocation7 + $0x50] sm:$0xff]  }
  0xe6   : > { %606 = vst [vmem:[#allocation2 + $0x50] sm:$0xff] %v10916_v0  ;;  %607 = vst [vmem:[#allocation2 + $0x58] sm:$0x3] %v10916_v0  ;;  %s11230_s22 = scalar_lea.vmem %s13191_s0, %s8734_s25  ;;  %9316 = vmatpush3.bf16.msra.mxu0 %v9924_v2  ;;  %8755 = vmatprep.subr.bf16.mxu1 %v9935_v12  ;;  %v9930_v16 = vld [vmem:[#allocation3 + $0x38] sm:$0xff]   ;;  %v9941_v17 = vld [vmem:[#allocation7 + $0x10] sm:$0xff]   ;;  %vm1031_vm1 = vcmask 1045504   ;;  %s12275_s16 = scalar_lea.vmem %s13202_s11, %s8734_s25 }
  0xe7   : > { %608 = vst [vmem:[#allocation2 + $0x60] sm:$0xff] %v10916_v0  ;;  %609 = vst [vmem:[#allocation2 + $0x68] sm:$0x3] %v10916_v0  ;;  %9317 = vmatprep.subr.bf16.mxu0 %v9925_v3  ;;  %v636_v5 = vld [vmem:[%s11230_s22] sm:$0xff]  ;;  %v637_v6 = vld [vmem:[%s11230_s22 + $0x8] sm:$0xff]  ;;  %s8197_s13 = sshll.u32 %s13318_s29, 1 }
  0xe8   : > { %610 = vst [vmem:[#allocation2 + $0x70] sm:$0xff] %v10916_v0  ;;  %611 = vst [vmem:[#allocation2 + $0x78] sm:$0x3] %v10916_v0  ;;  %v652_v7 = vpack.c.bf16 %v637_v6, %v636_v5  ;;  %v638_v18 = vld [vmem:[%s11230_s22 + $0x10] sm:$0xff]  ;;  %v639_v19 = vld [vmem:[%s11230_s22 + $0x18] sm:$0xff]  ;;  %s11733_s27 = scalar_lea.vmem %s13196_s5, %s8197_s13  ;;  %s11741_s15 = scalar_lea.vmem %s13197_s6, %s8197_s13 }
  0xe9   : > { %612 = vst [vmem:[#allocation2 + $0x80] sm:$0xff] %v10916_v0  ;;  %613 = vst [vmem:[#allocation2 + $0x88] sm:$0x3] %v10916_v0  ;;  %8756 = vmatpush3.bf16.msra.mxu1 %v9937_v14  ;;  %v640_v20 = vld [vmem:[%s11230_s22 + $0x20] sm:$0xff]  ;;  %v641_v21 = vld [vmem:[%s11230_s22 + $0x28] sm:$0xff]  ;;  %v653_v25 = vpack.c.bf16 %v639_v19, %v638_v18  ;;  %s8736_s17 = sshll.u32 %s13318_s29, 7 }
  0xea   : > { %615 = vst [vmem:[#allocation2 + $0x98] sm:$0x3] %v10916_v0  ;;  %617 = vst [vmem:[#allocation2 + $0xa8] sm:$0x3] %v10916_v0  ;;  %9318 = vmatpush3.bf16.msra.mxu0 %v9925_v3  ;;  %9329 = vmatprep.mubr.bf16.mxu0 %v652_v7  ;;  %v9943_v22 = vld [vmem:[#allocation7 + $0x58] sm:$0xff]   ;;  %v9932_v23 = vld [vmem:[#allocation7 + $0xc0] sm:$0xff]   ;;  %v654_v27 = vpack.c.bf16 %v641_v21, %v640_v20 }
  0xeb   : > { %618 = vst [vmem:[#allocation2 + $0xb0] sm:$0xff] %v10916_v0  ;;  %619 = vst [vmem:[#allocation2 + $0xb8] sm:$0x3] %v10916_v0  ;;  %9319 = vmatprep.subr.bf16.mxu0 %v9926_v4  ;;  %8757 = vmatprep.subr.bf16.mxu1 %v9939_v15  ;;  %v9934_v24 = vld [vmem:[#allocation7 + $0x80] sm:$0xff]   ;;  %v9936_v26 = vld [vmem:[#allocation7 + $0xc8] sm:$0xff]   ;;  %s13316_s24 = sld [smem:[#allocation48_spill]] }
  0xec   : > { %620 = vst [vmem:[#allocation2 + $0xc0] sm:$0xff] %v10916_v0  ;;  %621 = vst [vmem:[#allocation2 + $0xc8] sm:$0x3] %v10916_v0  ;;  %v642_v28 = vld [vmem:[%s11230_s22 + $0x30] sm:$0xff]  ;;  %v643_v29 = vld [vmem:[%s11230_s22 + $0x38] sm:$0xff] }
  0xed   : > { %622 = vst [vmem:[#allocation2 + $0xd0] sm:$0xff] %v10916_v0  ;;  %623 = vst [vmem:[#allocation2 + $0xd8] sm:$0x3] %v10916_v0  ;;  %8758 = vmatpush3.bf16.msra.mxu1 %v9941_v17  ;;  %v9938_v30 = vld [vmem:[#allocation7 + $0x88] sm:$0xff]   ;;  %v644_v31 = vld [vmem:[%s11230_s22 + $0x40] sm:$0xff]  ;;  %v655_v35 = vpack.c.bf16 %v643_v29, %v642_v28 }
  0xee   : > { %624 = vst [vmem:[#allocation2 + $0xe0] sm:$0xff] %v10916_v0  ;;  %625 = vst [vmem:[#allocation2 + $0xe8] sm:$0x3] %v10916_v0  ;;  %9320 = vmatpush3.bf16.msra.mxu0 %v9926_v4  ;;  %8759 = vmatprep.subr.bf16.mxu1 %v9943_v22  ;;  %v645_v32 = vld [vmem:[%s11230_s22 + $0x48] sm:$0xff]  ;;  %v9940_v33 = vld [vmem:[#allocation7 + $0xd0] sm:$0xff]  }
  0xef   : > { %626 = vst [vmem:[#allocation2 + $0xf0] sm:$0xff] %v10916_v0  ;;  %627 = vst [vmem:[#allocation2 + $0xf8] sm:$0x3] %v10916_v0  ;;  %9321 = vmatprep.subr.bf16.mxu0 %v9927_v8  ;;  %v9942_v34 = vld [vmem:[#allocation7 + $0x90] sm:$0xff]   ;;  %v9944_v36 = vld [vmem:[#allocation7 + $0xd8] sm:$0xff]   ;;  %v656_v37 = vpack.c.bf16 %v645_v32, %v644_v31 }
  0xf0   : > { %628 = vst [vmem:[#allocation2 + $0x100] sm:$0xff] %v10916_v0  ;;  %629 = vst [vmem:[#allocation2 + $0x108] sm:$0x3] %v10916_v0  ;;  %v646_v38 = vld [vmem:[%s11230_s22 + $0x50] sm:$0xff]  ;;  %v647_v39 = vld [vmem:[%s11230_s22 + $0x58] sm:$0xff] }
  0xf1   : > { %630 = vst [vmem:[#allocation2 + $0x110] sm:$0xff] %v10916_v0  ;;  %631 = vst [vmem:[#allocation2 + $0x118] sm:$0x3] %v10916_v0  ;;  %v648_v40 = vld [vmem:[%s11230_s22 + $0x60] sm:$0xff]  ;;  %v649_v41 = vld [vmem:[%s11230_s22 + $0x68] sm:$0xff]  ;;  %v657_v42 = vpack.c.bf16 %v647_v39, %v646_v38  ;;  %s13122_s26 = scalar_lea.vmem %s13316_s24, %s8736_s17 }
  0xf2   : > { %632 = vst [vmem:[#allocation2 + $0x120] sm:$0xff] %v10916_v0  ;;  %633 = vst [vmem:[#allocation2 + $0x128] sm:$0x3] %v10916_v0  ;;  %9322 = vmatpush3.bf16.msra.mxu0 %v9927_v8  ;;  %v658_v43 = vpack.c.bf16 %v649_v41, %v648_v40  ;;  %v650_v44 = vld [vmem:[%s11230_s22 + $0x70] sm:$0xff]  ;;  %v651_v45 = vld [vmem:[%s11230_s22 + $0x78] sm:$0xff] }
  0xf3   : > { %635 = vst [vmem:[#allocation2 + $0x138] sm:$0x3] %v10916_v0  ;;  %9323 = vmatprep.subr.bf16.mxu0 %v9928_v10  ;;  %v659_v46 = vpack.c.bf16 %v651_v45, %v650_v44  ;;  %v9946_v47 = vld [vmem:[#allocation7 + $0x98] sm:$0xff]   ;;  %v9948_v49 = vld [vmem:[#allocation7 + $0xe0] sm:$0xff]   ;;  %v9952_v53 = vld [vmem:[#allocation7 + $0xe8] sm:$0xff]  }
  0xf4   : > { %v9945_v48 = vld [vmem:[#allocation7 + $0x18] sm:$0xff]   ;;  %v9947_v50 = vld [vmem:[#allocation7 + $0x60] sm:$0xff]   ;;  %v9951_v54 = vld [vmem:[#allocation7 + $0x68] sm:$0xff]  }
  0xf5   : > { %8760 = vmatpush3.bf16.msra.mxu1 %v9945_v48  ;;  %v9950_v51 = vld [vmem:[#allocation7 + $0xa0] sm:$0xff]   ;;  %v9954_v55 = vld [vmem:[#allocation7 + $0xa8] sm:$0xff]   ;;  %v9956_v57 = vld [vmem:[#allocation7 + $0xf0] sm:$0xff]  }
  0xf6   : > { %9324 = vmatpush3.bf16.msra.mxu0 %v9928_v10  ;;  %v9949_v52 = vld [vmem:[#allocation7 + $0x20] sm:$0xff]   ;;  %8761 = vmatprep.subr.bf16.mxu1 %v9947_v50  ;;  %v9953_v56 = vld [vmem:[#allocation7 + $0x28] sm:$0xff]   ;;  %v9955_v58 = vld [vmem:[#allocation7 + $0x70] sm:$0xff]  }
  0xf7   : > { %9325 = vmatprep.subr.bf16.mxu0 %v9929_v13  ;;  %v9958_v59 = vld [vmem:[#allocation7 + $0xb0] sm:$0xff]   ;;  %v9960_v61 = vld [vmem:[#allocation7 + $0xf8] sm:$0xff]   ;;  %v9963_v1 = vld [vmem:[#allocation7 + $0x140] sm:$0xff]  }
  0xf8   : > { %v9957_v60 = vld [vmem:[#allocation7 + $0x30] sm:$0xff]   ;;  %v9959_v62 = vld [vmem:[#allocation7 + $0x78] sm:$0xff]   ;;  %v9972_v2 = vld [vmem:[#allocation7 + $0x1c0] sm:$0xff]  }
  0xf9   : > { %8762 = vmatpush3.bf16.msra.mxu1 %v9949_v52  ;;  %v9962_v63 = vld [vmem:[#allocation7 + $0xb8] sm:$0xff]   ;;  %v11248_v3 = vld [vmem:[#allocation5 + $0x10] sm:$0xff]  ;;  %v11250_v4 = vld [vmem:[#allocation5] sm:$0xff] }
  0xfa   : > { %9326 = vmatpush3.bf16.msra.mxu0 %v9929_v13  ;;  %8763 = vmatprep.subr.bf16.mxu1 %v9951_v54  ;;  %v9961_v0 = vld [vmem:[#allocation7 + $0x38] sm:$0xff]   ;;  %v11254_v6 = vld [vmem:[#allocation5 + $0x8] sm:$0xff]  ;;  %v11260_v17 = vld [vmem:[#allocation5 + $0x30] sm:$0xff] }
  0xfb   : > { %9327 = vmatprep.subr.bf16.mxu0 %v9930_v16  ;;  %v11252_v5 = vld [vmem:[#allocation5 + $0x18] sm:$0xff]  ;;  %v879_v18 = vld [vmem:[#allocation2 + $0x8] sm:$0x3]  ;;  %v11262_v20 = vld [vmem:[#allocation5 + $0x20] sm:$0xff] }
  0xfc   : > { %v11264_v22 = vld [vmem:[#allocation5 + $0x38] sm:$0xff]  ;;  %v960_v29 = vrot.slane %v879_v18, 1 }
  0xfd   : > { %8764 = vmatpush3.bf16.msra.mxu1 %v9953_v56  ;;  %v9964_v56 = vld [vmem:[#allocation7 + $0x100] sm:$0xff]  }
  0xfe   : > { %9328 = vmatpush3.bf16.msra.mxu0 %v9930_v16  ;;  %8765 = vmatprep.subr.bf16.mxu1 %v9955_v58 }
  0xff   : > { %8817 = vmatprep.subr.bf16.mxu0 %v9932_v23  ;;  %v11266_v23 = vld [vmem:[#allocation5 + $0x28] sm:$0xff] }
 0x101   : > { %9330 = vmatmul.mubr.bf16.vlgmr.msra.gmra.mrb[0].mxu0 %v653_v25  ;;  %8766 = vmatpush3.bf16.msra.mxu1 %v9957_v60 }
 0x102   : > { %9333 = vmatprep.mubr.bf16.mxu0 %v654_v27  ;;  %8818 = vmatpush3.bf16.msra.mxu0 %v9934_v24  ;;  %v11269_v27 = vld [vmem:[#allocation2] sm:$0xff] }
 0x103   : > { %8819 = vmatprep.subr.bf16.mxu0 %v9936_v26  ;;  %8767 = vmatprep.subr.bf16.mxu1 %v9959_v62  ;;  %v11272_v28 = vrot.slane %v11269_v27, 1  ;;  %v11276_v32 = vrot.slane %v11269_v27, 2 }
 0x105   : > { %8768 = vmatpush3.bf16.msra.mxu1 %v9961_v0  ;;  %v961_v44 = vsel %vm958_vm0, %v11272_v28, %v960_v29  ;;  %v9966_v29 = vld [vmem:[#allocation7 + $0x108] sm:$0xff]  }
 0x106   : > { %8820 = vmatpush3.bf16.msra.mxu0 %v9938_v30  ;;  %8881 = vmatprep.subr.bf16.mxu1 %v9963_v1 }
 0x107   : > { %8821 = vmatprep.subr.bf16.mxu0 %v9940_v33 }
 0x109   : > { %9334 = vmatmul.mubr.bf16.gmra.mrb[4].mxu0 %v655_v35 }
 0x10a   : > { %9337 = vmatprep.mubr.bf16.mxu0 %v656_v37  ;;  %8822 = vmatpush3.bf16.msra.mxu0 %v9942_v34 }
 0x10b   : > { %8823 = vmatprep.subr.bf16.mxu0 %v9944_v36  ;;  %v1033_v36 = vrot.slane %v879_v18, 2 }
 0x10e   : > { %8824 = vmatpush3.bf16.msra.mxu0 %v9946_v47 }
 0x10f   : > { %8825 = vmatprep.subr.bf16.mxu0 %v9948_v49 }
 0x111   : > { %9338 = vmatmul.mubr.bf16.gmra.mrb[8].mxu0 %v657_v42 }
 0x112   : > { %9341 = vmatprep.mubr.bf16.mxu0 %v658_v43  ;;  %8826 = vmatpush3.bf16.msra.mxu0 %v9950_v51 }
 0x113   : > { %8827 = vmatprep.subr.bf16.mxu0 %v9952_v53  ;;  %v1034_v53 = vsel %vm1031_vm1, %v11276_v32, %v1033_v36 }
 0x116   : > { %8828 = vmatpush3.bf16.msra.mxu0 %v9954_v55 }
 0x117   : > { %8829 = vmatprep.subr.bf16.mxu0 %v9956_v57 }
 0x119   : > { %9342 = vmatmul.mubr.bf16.gmra.mrb[12].mxu0 %v659_v46 }
 0x11a   : > { %8830 = vmatpush3.bf16.msra.mxu0 %v9958_v59 }
 0x11b   : > { %8831 = vmatprep.subr.bf16.mxu0 %v9960_v61 }
 0x11e   : > { %8832 = vmatpush3.bf16.msra.mxu0 %v9962_v63 }
 0x11f   : > { %8945 = vmatprep.subr.bf16.mxu0 %v9972_v2 }
 0x1d4   : > { %v9331_v7 = vpop.f32.mrb[0].mxu0 }
 0x1d5   : > { %v831_v8 = vadd.f32 %v9331_v7, %v11248_v3  ;;  %v758_v9 = vpop.f32.mrb[1].mxu0 }
 0x1d6   : > { %v829_v10 = vadd.f32 %v11250_v4, %v758_v9  ;;  %v9332_v11 = vpop.f32.mrb[2].mxu0 }
 0x1d7   : > { %v847_v12 = vmax.f32 %v831_v8, 0.0  ;;  %v832_v13 = vadd.f32 %v9332_v11, %v11252_v5  ;;  %v761_v14 = vpop.f32.mrb[3].mxu0  ;;  %v9965_v11 = vld [vmem:[#allocation7 + $0x148] sm:$0xff]  }
 0x1d8   : > { %v845_v15 = vmax.f32 %v829_v10, 0.0  ;;  %v830_v16 = vadd.f32 %v11254_v6, %v761_v14 }
 0x1d9   : > { %864 = vst [vmem:[#allocation2 + $0x31] sm:$0xff] %v847_v12  ;;  %v848_v19 = vmax.f32 %v832_v13, 0.0  ;;  %v9974_v13 = vld [vmem:[#allocation7 + $0x180] sm:$0xff]  }
 0x1da   : > { %862 = vst [vmem:[#allocation2 + $0x11] sm:$0xff] %v845_v15  ;;  %v846_v21 = vmax.f32 %v830_v16, 0.0 }
 0x1db   : > { %865 = vst [vmem:[#allocation2 + $0x41] sm:$0xff] %v848_v19 }
 0x1dc   : > { %863 = vst [vmem:[#allocation2 + $0x21] sm:$0xff] %v846_v21  ;;  %v9335_v24 = vpop.f32.mrb[4].mxu0 }
 0x1dd   : > { %v835_v25 = vadd.f32 %v9335_v24, %v11260_v17  ;;  %v774_v26 = vpop.f32.mrb[5].mxu0 }
 0x1de   : > { %v833_v30 = vadd.f32 %v11262_v20, %v774_v26  ;;  %v9336_v31 = vpop.f32.mrb[6].mxu0 }
 0x1df   : > { %v851_v33 = vmax.f32 %v835_v25, 0.0  ;;  %v836_v34 = vadd.f32 %v9336_v31, %v11264_v22  ;;  %v777_v35 = vpop.f32.mrb[7].mxu0  ;;  %v9975_v25 = vld [vmem:[#allocation7 + $0x1c8] sm:$0xff]  }
 0x1e0   : > { %v849_v37 = vmax.f32 %v833_v30, 0.0  ;;  %v834_v38 = vadd.f32 %v11266_v23, %v777_v35  ;;  %v11280_v39 = vld [vmem:[#allocation2 + $0x30] sm:$0xff]  ;;  %v11282_v40 = vld [vmem:[#allocation2 + $0x38] sm:$0x3] }
 0x1e1   : > { %868 = vst [vmem:[#allocation2 + $0x71] sm:$0xff] %v851_v33  ;;  %v852_v41 = vmax.f32 %v836_v34, 0.0  ;;  %v880_v42 = vld [vmem:[#allocation2 + $0x10] sm:$0xff]  ;;  %v881_v43 = vld [vmem:[#allocation2 + $0x18] sm:$0x3]  ;;  %v968_v45 = vrot.slane %v11280_v39, 1 }
 0x1e2   : > { %v969_v46 = vrot.slane %v11282_v40, 1  ;;  %866 = vst [vmem:[#allocation2 + $0x51] sm:$0xff] %v849_v37  ;;  %v850_v47 = vmax.f32 %v834_v38, 0.0  ;;  %v962_v48 = vrot.slane %v880_v42, 1  ;;  %v963_v49 = vrot.slane %v881_v43, 1  ;;  %v11292_v55 = vld [vmem:[#allocation2 + $0x40] sm:$0xff] }
 0x1e3   : > { %v1036_v50 = vrot.slane %v881_v43, 2  ;;  %869 = vst [vmem:[#allocation2 + $0x81] sm:$0xff] %v852_v41  ;;  %v11288_v51 = vld [vmem:[#allocation2 + $0x20] sm:$0xff]  ;;  %v883_v52 = vld [vmem:[#allocation2 + $0x28] sm:$0x3]  ;;  %v1035_v54 = vrot.slane %v880_v42, 2  ;;  %v918_v0 = vpack.c.bf16 %v880_v42, %v11269_v27  ;;  %v1105_v9 = vpack.c.bf16 %v11292_v55, %v11280_v39 }
 0x1e4   : > { %867 = vst [vmem:[#allocation2 + $0x61] sm:$0xff] %v850_v47  ;;  %v1104_v57 = vpack.c.bf16 %v11288_v51, %v880_v42  ;;  %v11296_v58 = vsel %vm958_vm0, %v962_v48, %v963_v49  ;;  %v965_v59 = vrot.slane %v11288_v51, 1  ;;  %v966_v60 = vrot.slane %v883_v52, 1  ;;  %v9339_v61 = vpop.f32.mrb[8].mxu0  ;;  %v11319_v18 = vld [vmem:[#allocation2 + $0x48] sm:$0x3] }
 0x1e5   : > { %v1023_v62 = vpack.c.bf16 %v11296_v58, %v961_v44  ;;  %v11301_v63 = vsel %vm1031_vm1, %v1035_v54, %v1036_v50  ;;  %v839_v1 = vadd.f32 %v9339_v61, %v11248_v3  ;;  %v790_v2 = vpop.f32.mrb[9].mxu0  ;;  %v11312_v10 = vsel %vm958_vm0, %v968_v45, %v969_v46 }
 0x1e6   : > { %1886 = vmatprep.mubr.bf16.mxu0 %v1104_v57  ;;  %v11306_v7 = vsel %vm958_vm0, %v965_v59, %v966_v60  ;;  %v1096_v8 = vpack.c.bf16 %v11301_v63, %v1034_v53  ;;  %v9340_v12 = vpop.f32.mrb[10].mxu0  ;;  %v1038_v15 = vrot.slane %v11288_v51, 2  ;;  %v1039_v16 = vrot.slane %v883_v52, 2  ;;  %v9968_v57 = vld [vmem:[#allocation7 + $0x110] sm:$0xff]  }
 0x1e7   : > { %1789 = vmatprep.mubr.bf16.mxu1 %v1023_v62  ;;  %v11316_v3 = vpack.c.bf16 %v11312_v10, %v11306_v7  ;;  %v855_v14 = vmax.f32 %v839_v1, 0.0  ;;  %v793_v19 = vpop.f32.mrb[11].mxu0  ;;  %v1041_v21 = vrot.slane %v11280_v39, 2  ;;  %v837_v24 = vadd.f32 %v11250_v4, %v790_v2  ;;  %v9969_v1 = vld [vmem:[#allocation7 + $0x158] sm:$0xff]  }
 0x1e8   : > { %1887 = vmatmul.mubr.bf16.vlgmr.msra.gmra.mrb[16].mxu0 %v1096_v8  ;;  %1790 = vmatmul.mubr.bf16.vlgmr.msra.gmra.mrb[0].mxu1 %v918_v0  ;;  %v1042_v26 = vrot.slane %v11282_v40, 2  ;;  %v840_v30 = vadd.f32 %v9340_v12, %v11252_v5  ;;  %v971_v34 = vrot.slane %v11292_v55, 1  ;;  %v838_v35 = vadd.f32 %v11254_v6, %v793_v19  ;;  %v9967_v40 = vld [vmem:[#allocation7 + $0x150] sm:$0xff]   ;;  %v9976_v6 = vld [vmem:[#allocation7 + $0x188] sm:$0xff]   ;;  %v11357_v54 = vld [vmem:[#allocation2 + $0x78] sm:$0x3] }
 0x1e9   : > { %1894 = vmatprep.mubr.bf16.mxu0 %v1105_v9  ;;  %8882 = vmatpush3.bf16.msra.mxu1 %v9964_v56  ;;  %872 = vst [vmem:[#allocation2 + $0xd1] sm:$0xff] %v855_v14  ;;  %v11325_v31 = vld [vmem:[#allocation2 + $0x50] sm:$0xff]  ;;  %v11327_v33 = vld [vmem:[#allocation2 + $0x58] sm:$0x3]  ;;  %v853_v4 = vmax.f32 %v837_v24, 0.0  ;;  %v972_v36 = vrot.slane %v11319_v18, 1  ;;  %v11336_v5 = vsel %vm1031_vm1, %v1038_v15, %v1039_v16  ;;  %v11348_v47 = vpack.c.bf16 %v11280_v39, %v11288_v51 }
 0x1ea   : > { %1797 = vmatprep.mubr.bf16.mxu1 %v11316_v3  ;;  %8883 = vmatprep.subr.bf16.mxu1 %v9965_v11  ;;  %v974_v37 = vrot.slane %v11325_v31, 1  ;;  %v975_v38 = vrot.slane %v11327_v33, 1  ;;  %v856_v41 = vmax.f32 %v840_v30, 0.0  ;;  %v854_v42 = vmax.f32 %v838_v35, 0.0  ;;  %v11353_v52 = vld [vmem:[#allocation2 + $0x70] sm:$0xff]  ;;  %v9981_v16 = vld [vmem:[#allocation7 + $0x1d8] sm:$0xff]  }
 0x1eb   : > { %v11338_v43 = vld [vmem:[#allocation2 + $0x60] sm:$0xff]  ;;  %8946 = vmatpush3.bf16.msra.mxu0 %v9974_v13  ;;  %870 = vst [vmem:[#allocation2 + $0xb1] sm:$0xff] %v853_v4  ;;  %v11344_v46 = vsel %vm1031_vm1, %v1041_v21, %v1042_v26  ;;  %v11355_v53 = vld [vmem:[#allocation2 + $0x68] sm:$0x3]  ;;  %v11364_v39 = vsel %vm958_vm0, %v971_v34, %v972_v36  ;;  %v1048_v62 = vrot.slane %v11327_v33, 2  ;;  %v9978_v8 = vld [vmem:[#allocation7 + $0x1d0] sm:$0xff]   ;;  %v11406_v36 = vpack.c.bf16 %v11325_v31, %v11292_v55 }
 0x1ec   : > { %v11341_v44 = vsel %vm958_vm0, %v974_v37, %v975_v38  ;;  %v9343_v45 = vpop.f32.mrb[12].mxu0  ;;  %8947 = vmatprep.subr.bf16.mxu0 %v9975_v25  ;;  %873 = vst [vmem:[#allocation2 + $0xe1] sm:$0xff] %v856_v41  ;;  %871 = vst [vmem:[#allocation2 + $0xc1] sm:$0xff] %v854_v42  ;;  %v1106_v49 = vpack.c.bf16 %v11338_v43, %v11325_v31  ;;  %v11361_v56 = vpack.c.bf16 %v11344_v46, %v11336_v5  ;;  %v9980_v13 = vld [vmem:[#allocation7 + $0x190] sm:$0xff]   ;;  %v11382_v19 = vld [vmem:[#allocation2 + $0x80] sm:$0xff] }
 0x1ed   : > { %8884 = vmatpush3.bf16.msra.mxu1 %v9966_v29  ;;  %v843_v48 = vadd.f32 %v9343_v45, %v11260_v17  ;;  %v806_v50 = vpop.f32.mrb[13].mxu0  ;;  %v1047_v17 = vrot.slane %v11325_v31, 2  ;;  %v11370_v60 = vpack.c.bf16 %v11341_v44, %v11364_v39  ;;  %v977_v0 = vrot.slane %v11338_v43, 1  ;;  %v9970_v21 = vld [vmem:[#allocation7 + $0x118] sm:$0xff]   ;;  %v11386_v26 = vld [vmem:[#allocation2 + $0xa8] sm:$0x3] }
 0x1ee   : > { %v841_v51 = vadd.f32 %v11262_v20, %v806_v50  ;;  %8885 = vmatprep.subr.bf16.mxu1 %v9967_v40  ;;  %v9344_v59 = vpop.f32.mrb[14].mxu0  ;;  %v978_v9 = vrot.slane %v11355_v53, 1  ;;  %v980_v11 = vrot.slane %v11353_v52, 1  ;;  %v981_v12 = vrot.slane %v11357_v54, 1  ;;  %v9973_v31 = vld [vmem:[#allocation7 + $0x120] sm:$0xff]  }
 0x1ef   : > { %v859_v61 = vmax.f32 %v843_v48, 0.0  ;;  %v809_v2 = vpop.f32.mrb[15].mxu0  ;;  %8948 = vmatpush3.bf16.msra.mxu0 %v9976_v6  ;;  %v1044_v14 = vrot.slane %v11292_v55, 2  ;;  %v1045_v15 = vrot.slane %v11319_v18, 2  ;;  %v844_v24 = vadd.f32 %v9344_v59, %v11264_v22  ;;  %v9971_v18 = vld [vmem:[#allocation7 + $0x160] sm:$0xff]   ;;  %v9982_v6 = vld [vmem:[#allocation7 + $0x198] sm:$0xff]  }
 0x1f0   : > { %1895 = vmatmul.mubr.bf16.gmra.mrb[20].mxu0 %v11361_v56  ;;  %1798 = vmatmul.mubr.bf16.gmra.mrb[4].mxu1 %v11348_v47  ;;  %v857_v20 = vmax.f32 %v841_v51, 0.0  ;;  %v842_v25 = vadd.f32 %v11266_v23, %v809_v2  ;;  %v11389_v29 = vsel %vm1031_vm1, %v1047_v17, %v1048_v62  ;;  %v11396_v34 = vsel %vm958_vm0, %v977_v0, %v978_v9  ;;  %v9977_v51 = vld [vmem:[#allocation7 + $0x168] sm:$0xff]   ;;  %v9984_v17 = vld [vmem:[#allocation7 + $0x1e0] sm:$0xff]   ;;  %v9983_v0 = vld [vmem:[#allocation7 + $0x170] sm:$0xff]  }
 0x1f1   : > { %1805 = vmatprep.mubr.bf16.mxu1 %v11370_v60  ;;  %876 = vst [vmem:[#allocation2 + $0x111] sm:$0xff] %v859_v61  ;;  %1902 = vmatprep.mubr.bf16.mxu0 %v1106_v49  ;;  %v11399_v35 = vsel %vm958_vm0, %v980_v11, %v981_v12  ;;  %v860_v22 = vmax.f32 %v844_v24, 0.0  ;;  %v11402_v4 = vsel %vm1031_vm1, %v1044_v14, %v1045_v15  ;;  %v984_v38 = vrot.slane %v11386_v26, 1  ;;  %v905_v14 = vld [vmem:[#allocation2 + $0xd8] sm:$0x3]  ;;  %v9987_v24 = vld [vmem:[#allocation7 + $0x1e8] sm:$0xff]  }
 0x1f2   : > { %874 = vst [vmem:[#allocation2 + $0xf1] sm:$0xff] %v857_v20  ;;  %8886 = vmatpush3.bf16.msra.mxu1 %v9968_v57  ;;  %v11391_v30 = vld [vmem:[#allocation2 + $0xb0] sm:$0xff]  ;;  %v11393_v33 = vld [vmem:[#allocation2 + $0xb8] sm:$0x3]  ;;  %8949 = vmatprep.subr.bf16.mxu0 %v9978_v8  ;;  %v858_v23 = vmax.f32 %v842_v25, 0.0  ;;  %v1107_v37 = vpack.c.bf16 %v11382_v19, %v11353_v52  ;;  %v11413_v40 = vpack.c.bf16 %v11389_v29, %v11402_v4  ;;  %v1050_v41 = vrot.slane %v11338_v43, 2 }
 0x1f3   : > { %8887 = vmatprep.subr.bf16.mxu1 %v9969_v1  ;;  %8950 = vmatpush3.bf16.msra.mxu0 %v9980_v13  ;;  %877 = vst [vmem:[#allocation2 + $0x121] sm:$0xff] %v860_v22  ;;  %v986_v42 = vrot.slane %v11391_v30, 1  ;;  %v987_v55 = vrot.slane %v11393_v33, 1  ;;  %v11420_v45 = vpack.c.bf16 %v11399_v35, %v11396_v34  ;;  %v1051_v48 = vrot.slane %v11355_v53, 2  ;;  %v11428_v57 = vld [vmem:[#allocation2 + $0xc0] sm:$0xff]  ;;  %v11442_v8 = vld [vmem:[#allocation2 + $0xd0] sm:$0xff] }
 0x1f4   : > { %8951 = vmatprep.subr.bf16.mxu0 %v9981_v16  ;;  %875 = vst [vmem:[#allocation2 + $0x101] sm:$0xff] %v858_v23  ;;  %v1053_v49 = vrot.slane %v11353_v52, 2  ;;  %v1054_v50 = vrot.slane %v11357_v54, 2  ;;  %v985_v59 = vsel %vm958_vm0, %v11272_v28, %v984_v38  ;;  %v9979_v54 = vld [vmem:[#allocation7 + $0x128] sm:$0xff]   ;;  %v9986_v1 = vld [vmem:[#allocation7 + $0x1a0] sm:$0xff]   ;;  %v1057_v2 = vrot.slane %v11386_v26, 2 }
 0x1f5   : > { %v11433_v53 = vsel %vm958_vm0, %v986_v42, %v987_v55  ;;  %v11436_v61 = vsel %vm1031_vm1, %v1050_v41, %v1051_v48  ;;  %v1108_v20 = vpack.c.bf16 %v11428_v57, %v11391_v30  ;;  %v1059_v11 = vrot.slane %v11391_v30, 2  ;;  %v903_v13 = vld [vmem:[#allocation2 + $0xc8] sm:$0x3]  ;;  %v9989_v26 = vld [vmem:[#allocation7 + $0x178] sm:$0xff]   ;;  %v11466_v41 = vld [vmem:[#allocation2 + $0xe0] sm:$0xff] }
 0x1f6   : > { %8888 = vmatpush3.bf16.msra.mxu1 %v9970_v21  ;;  %v11439_v62 = vsel %vm1031_vm1, %v1053_v49, %v1054_v50  ;;  %v1027_v9 = vpack.c.bf16 %v11433_v53, %v985_v59  ;;  %v1060_v12 = vrot.slane %v11393_v33, 2  ;;  %v11455_v16 = vpack.c.bf16 %v11353_v52, %v11338_v43  ;;  %v9985_v21 = vld [vmem:[#allocation7 + $0x130] sm:$0xff]   ;;  %v9988_v25 = vld [vmem:[#allocation7 + $0x1a8] sm:$0xff]   ;;  %v9991_v38 = vld [vmem:[#allocation7 + $0x138] sm:$0xff]  }
 0x1f7   : > { %8889 = vmatprep.subr.bf16.mxu1 %v9971_v18  ;;  %8952 = vmatpush3.bf16.msra.mxu0 %v9982_v6  ;;  %v11451_v15 = vpack.c.bf16 %v11439_v62, %v11436_v61  ;;  %v989_v33 = vrot.slane %v11428_v57, 1  ;;  %v990_v18 = vrot.slane %v903_v13, 1  ;;  %v992_v22 = vrot.slane %v11442_v8, 1  ;;  %v9992_v42 = vld [vmem:[#allocation7 + $0x1b0] sm:$0xff]   ;;  %v11468_v55 = vld [vmem:[#allocation7 + $0x200] sm:$0xff]  }
 0x1f8   : > { %1903 = vmatmul.mubr.bf16.gmra.mrb[24].mxu0 %v11413_v40  ;;  %1806 = vmatmul.mubr.bf16.gmra.mrb[8].mxu1 %v11406_v36  ;;  %v993_v23 = vrot.slane %v905_v14, 1  ;;  %v1058_v43 = vsel %vm1031_vm1, %v11276_v32, %v1057_v2  ;;  %v11464_v52 = vsel %vm1031_vm1, %v1059_v11, %v1060_v12  ;;  %v907_v49 = vld [vmem:[#allocation2 + $0xe8] sm:$0x3]  ;;  %v1109_v59 = vpack.c.bf16 %v11466_v41, %v11442_v8  ;;  %v9994_v11 = vld [vmem:[#allocation7 + $0x1b8] sm:$0xff]  }
 0x1f9   : > { %1910 = vmatprep.mubr.bf16.mxu0 %v1107_v37  ;;  %1813 = vmatprep.mubr.bf16.mxu1 %v11420_v45  ;;  %v9990_v37 = vld [vmem:[#allocation7 + $0x1f0] sm:$0xff]   ;;  %v11472_v6 = vsel %vm958_vm0, %v989_v33, %v990_v18  ;;  %v1063_v2 = vrot.slane %v903_v13, 2  ;;  %v996_v12 = vrot.slane %v907_v49, 1 }
 0x1fa   : > { %8890 = vmatpush3.bf16.msra.mxu1 %v9973_v31  ;;  %8953 = vmatprep.subr.bf16.mxu0 %v9984_v17  ;;  %v1100_v31 = vpack.c.bf16 %v11464_v52, %v1058_v43  ;;  %v11475_v48 = vsel %vm958_vm0, %v992_v22, %v993_v23  ;;  %v908_v50 = vld [vmem:[#allocation2 + $0xf0] sm:$0xff]  ;;  %v922_v17 = vpack.c.bf16 %v11391_v30, %v11269_v27  ;;  %v995_v30 = vrot.slane %v11466_v41, 1 }
 0x1fb   : > { %8891 = vmatprep.subr.bf16.mxu1 %v9977_v51  ;;  %8954 = vmatpush3.bf16.msra.mxu0 %v9986_v1  ;;  %v909_v51 = vld [vmem:[#allocation2 + $0xf8] sm:$0x3]  ;;  %v11484_v1 = vpack.c.bf16 %v11475_v48, %v11472_v6  ;;  %v912_v22 = vld [vmem:[#allocation2 + $0x110] sm:$0xff]  ;;  %v911_v23 = vld [vmem:[#allocation2 + $0x108] sm:$0x3] }
 0x1fc   : > { %8955 = vmatprep.subr.bf16.mxu0 %v9987_v24  ;;  %v999_v24 = vrot.slane %v909_v51, 1 }
 0x1fe   : > { %8892 = vmatpush3.bf16.msra.mxu1 %v9979_v54  ;;  %v1062_v54 = vrot.slane %v11428_v57, 2 }
 0x1ff   : > { %8893 = vmatprep.subr.bf16.mxu1 %v9983_v0  ;;  %8956 = vmatpush3.bf16.msra.mxu0 %v9988_v25  ;;  %v9993_v0 = vld [vmem:[#allocation7 + $0x1f8] sm:$0xff]   ;;  %v910_v25 = vld [vmem:[#allocation2 + $0x100] sm:$0xff] }
 0x200   : > { %1911 = vmatmul.mubr.bf16.gmra.mrb[28].mxu0 %v11451_v15  ;;  %1814 = vmatmul.mubr.bf16.gmra.mrb[12].mxu1 %v11455_v16  ;;  %v11491_v13 = vsel %vm1031_vm1, %v1062_v54, %v1063_v2  ;;  %v1110_v18 = vpack.c.bf16 %v910_v25, %v908_v50  ;;  %v1072_v54 = vrot.slane %v909_v51, 2  ;;  %v1002_v2 = vrot.slane %v911_v23, 1 }
 0x201   : > { %1918 = vmatprep.mubr.bf16.mxu0 %v1108_v20  ;;  %1821 = vmatprep.mubr.bf16.mxu1 %v1027_v9  ;;  %v1065_v20 = vrot.slane %v11442_v8, 2  ;;  %v1066_v9 = vrot.slane %v905_v14, 2 }
 0x202   : > { %8894 = vmatpush3.bf16.msra.mxu1 %v9985_v21  ;;  %8957 = vmatprep.subr.bf16.mxu0 %v9990_v37  ;;  %v998_v21 = vrot.slane %v908_v50, 1  ;;  %v913_v37 = vld [vmem:[#allocation2 + $0x118] sm:$0x3] }
 0x203   : > { %8895 = vmatprep.subr.bf16.mxu1 %v9989_v26  ;;  %8958 = vmatpush3.bf16.msra.mxu0 %v9992_v42  ;;  %v11494_v14 = vsel %vm1031_vm1, %v1065_v20, %v1066_v9  ;;  %v11497_v26 = vsel %vm958_vm0, %v995_v30, %v996_v12  ;;  %v1068_v42 = vrot.slane %v11466_v41, 2  ;;  %v1004_v20 = vrot.slane %v912_v22, 1 }
 0x204   : > { %8959 = vmatprep.subr.bf16.mxu0 %v9993_v0  ;;  %v11500_v33 = vsel %vm958_vm0, %v998_v21, %v999_v24  ;;  %v11504_v43 = vpack.c.bf16 %v11494_v14, %v11491_v13  ;;  %v1001_v0 = vrot.slane %v910_v25, 1  ;;  %v1005_v9 = vrot.slane %v913_v37, 1 }
 0x205   : > { %v11537_v12 = vpack.c.bf16 %v908_v50, %v11466_v41  ;;  %v1074_v24 = vrot.slane %v910_v25, 2 }
 0x206   : > { %8896 = vmatpush3.bf16.msra.mxu1 %v9991_v38  ;;  %v11508_v38 = vpack.c.bf16 %v11442_v8, %v11428_v57  ;;  %v11527_v51 = vsel %vm958_vm0, %v1001_v0, %v1002_v2  ;;  %v1124_v0 = vpack.c.bf16 %v11306_v7, %v11296_v58  ;;  %v9996_v2 = vld [vmem:[#allocation7 + $0x208] sm:$0xff]   ;;  %v1125_v58 = vpack.c.bf16 %v11364_v39, %v11312_v10  ;;  %v9999_v10 = vld [vmem:[#allocation7 + $0x220] sm:$0xff]  }
 0x207   : > { %9345 = vmatprep.subr.bf16.mxu1 %v11468_v55  ;;  %8960 = vmatpush3.bf16.msra.mxu0 %v9994_v11  ;;  %v11530_v11 = vsel %vm958_vm0, %v1004_v20, %v1005_v9  ;;  %v1142_v7 = vpack.c.bf16 %v11436_v61, %v11389_v29  ;;  %v1126_v61 = vpack.c.bf16 %v11396_v34, %v11341_v44  ;;  %v10000_v9 = vld [vmem:[#allocation7 + $0x228] sm:$0xff]  }
 0x208   : > { %1919 = vmatmul.mubr.bf16.gmra.mrb[32].mxu0 %v1100_v31  ;;  %1822 = vmatmul.mubr.bf16.gmra.mrb[16].mxu1 %v922_v17  ;;  %v11513_v31 = vpack.c.bf16 %v11500_v33, %v11497_v26  ;;  %v1069_v17 = vrot.slane %v907_v49, 2  ;;  %v11524_v49 = vld [vmem:[#allocation2 + $0x120] sm:$0xff]  ;;  %v1144_v34 = vpack.c.bf16 %v11491_v13, %v11464_v52  ;;  %v915_v52 = vld [vmem:[#allocation2 + $0x128] sm:$0x3] }
 0x209   : > { %1926 = vmatprep.mubr.bf16.mxu0 %v1109_v59  ;;  %1829 = vmatprep.mubr.bf16.mxu1 %v11484_v1  ;;  %v1071_v59 = vrot.slane %v908_v50, 2  ;;  %v1111_v21 = vpack.c.bf16 %v11524_v49, %v912_v22 }
 0x20a   : > { %v11519_v57 = vsel %vm1031_vm1, %v1068_v42, %v1069_v17  ;;  %v1075_v42 = vrot.slane %v911_v23, 2  ;;  %v1077_v17 = vrot.slane %v912_v22, 2  ;;  %v11557_v23 = vpack.c.bf16 %v912_v22, %v910_v25 }
 0x20b   : > { %v11522_v8 = vsel %vm1031_vm1, %v1071_v59, %v1072_v54  ;;  %v1078_v59 = vrot.slane %v913_v37, 2  ;;  %v1140_v37 = vpack.c.bf16 %v11336_v5, %v11301_v63  ;;  %v1141_v25 = vpack.c.bf16 %v11402_v4, %v11344_v46  ;;  %v9997_v63 = vld [vmem:[#allocation7 + $0x210] sm:$0xff]   ;;  %v11571_v5 = vld [vmem:[#allocation2 + $0x98] sm:$0x3] }
 0x20c   : > { %v11534_v30 = vpack.c.bf16 %v11522_v8, %v11519_v57  ;;  %v11548_v41 = vsel %vm1031_vm1, %v1074_v24, %v1075_v42  ;;  %v1155_v46 = vrot.slane %v11571_v5, 1  ;;  %v1148_v24 = vpack.c.bf16 %v11269_v27, %v11382_v19 }
 0x20d   : > { %v11551_v50 = vsel %vm1031_vm1, %v1077_v17, %v1078_v59  ;;  %v1146_v13 = vpack.c.bf16 %v11548_v41, %v11522_v8  ;;  %v10008_v59 = vld [vmem:[#allocation3 + $0x68] sm:$0xff]  }
 0x20e   : > { %v11555_v54 = vpack.c.bf16 %v11551_v50, %v11548_v41  ;;  %v1156_v29 = vsel %vm958_vm0, %v11272_v28, %v1155_v46 }
 0x210   : > { %1927 = vmatmul.mubr.bf16.gmra.mrb[36].mxu0 %v11504_v43  ;;  %1830 = vmatmul.mubr.bf16.gmra.mrb[20].mxu1 %v11508_v38 }
 0x211   : > { %1837 = vmatprep.mubr.bf16.mxu1 %v11513_v31  ;;  %1934 = vmatprep.mubr.bf16.mxu0 %v1110_v18  ;;  %v11542_v18 = vpack.c.bf16 %v11530_v11, %v11527_v51 }
 0x218   : > { %1935 = vmatmul.mubr.bf16.gmra.mrb[40].mxu0 %v11534_v30  ;;  %1838 = vmatmul.mubr.bf16.gmra.mrb[24].mxu1 %v11537_v12 }
 0x219   : > { %1942 = vmatprep.mubr.bf16.mxu0 %v1111_v21  ;;  %1845 = vmatprep.mubr.bf16.mxu1 %v11542_v18  ;;  %v10001_v21 = vld [vmem:[#allocation7 + $0x230] sm:$0xff]  }
 0x220   : > { %1943 = vmatmul.mubr.bf16.gmra.mrb[44].mxu0 %v11555_v54  ;;  %1846 = vmatmul.mubr.bf16.gmra.mrb[28].mxu1 %v11557_v23 }
 0x221   : > { %2080 = vmatprep.mubr.bf16.mxu0 %v11316_v3  ;;  %1983 = vmatprep.mubr.bf16.mxu1 %v1140_v37  ;;  %v895_v3 = vld [vmem:[#allocation2 + $0x88] sm:$0x3] }
 0x222   : > { %v1117_v4 = vrot.slane %v895_v3, 1  ;;  %v1133_v22 = vrot.slane %v895_v3, 2 }
 0x228   : > { %2081 = vmatmul.mubr.bf16.vlgmr.msra.gmra.mrb[48].mxu0 %v11348_v47  ;;  %1984 = vmatmul.mubr.bf16.vlgmr.msra.gmra.mrb[32].mxu1 %v1124_v0  ;;  %v9998_v47 = vld [vmem:[#allocation7 + $0x218] sm:$0xff]  }
 0x229   : > { %2088 = vmatprep.mubr.bf16.mxu0 %v11370_v60  ;;  %9346 = vmatpush3.bf16.msra.mxu1 %v11468_v55  ;;  %v1116_v60 = vrot.slane %v11382_v19, 1  ;;  %v1132_v55 = vrot.slane %v11382_v19, 2  ;;  %v1145_v19 = vpack.c.bf16 %v11519_v57, %v11494_v14  ;;  %v1135_v14 = vrot.slane %v11524_v49, 2 }
 0x22a   : > { %1991 = vmatprep.mubr.bf16.mxu1 %v1141_v25  ;;  %9347 = vmatprep.subr.bf16.mxu1 %v9996_v2  ;;  %v1130_v57 = vpack.c.bf16 %v11527_v51, %v11500_v33 }
 0x22b   : > { %v1118_v39 = vsel %vm958_vm0, %v1116_v60, %v1117_v4 }
 0x22c   : > { %v1162_v20 = vpack.c.bf16 %v1156_v29, %v1118_v39  ;;  %v1127_v44 = vpack.c.bf16 %v1118_v39, %v11399_v35  ;;  %v917_v35 = vld [vmem:[#allocation2 + $0x138] sm:$0x3]  ;;  %v10009_v39 = vld [vmem:[#allocation3 + $0x70] sm:$0xff]  }
 0x22d   : > { %9348 = vmatpush3.bf16.msra.mxu1 %v9996_v2  ;;  %v1158_v42 = vrot.slane %v917_v35, 1 }
 0x22e   : > { %9349 = vmatprep.subr.bf16.mxu1 %v9997_v63 }
 0x230   : > { %2089 = vmatmul.mubr.bf16.gmra.mrb[52].mxu0 %v11406_v36  ;;  %1992 = vmatmul.mubr.bf16.gmra.mrb[36].mxu1 %v1125_v58  ;;  %v11586_v36 = vsel %vm1031_vm1, %v1132_v55, %v1133_v22 }
 0x231   : > { %2096 = vmatprep.mubr.bf16.mxu0 %v11420_v45  ;;  %1999 = vmatprep.mubr.bf16.mxu1 %v1142_v7  ;;  %v1143_v45 = vpack.c.bf16 %v11586_v36, %v11439_v62  ;;  %v10002_v62 = vld [vmem:[#allocation7 + $0x238] sm:$0xff]  }
 0x232   : > { %9350 = vmatpush3.bf16.msra.mxu1 %v9997_v63 }
 0x233   : > { %9351 = vmatprep.subr.bf16.mxu1 %v9998_v47 }
 0x236   : > { %9352 = vmatpush3.bf16.msra.mxu1 %v9998_v47 }
 0x237   : > { %9353 = vmatprep.subr.bf16.mxu1 %v9999_v10 }
 0x238   : > { %2097 = vmatmul.mubr.bf16.gmra.mrb[56].mxu0 %v11455_v16  ;;  %2000 = vmatmul.mubr.bf16.gmra.mrb[40].mxu1 %v1126_v61  ;;  %v1128_v16 = vpack.c.bf16 %v11472_v6, %v11433_v53  ;;  %v1119_v53 = vrot.slane %v11524_v49, 1  ;;  %v1120_v6 = vrot.slane %v915_v52, 1 }
 0x239   : > { %2104 = vmatprep.mubr.bf16.mxu0 %v1162_v20  ;;  %2007 = vmatprep.mubr.bf16.mxu1 %v1143_v45 }
 0x23a   : > { %9354 = vmatpush3.bf16.msra.mxu1 %v9999_v10 }
 0x23b   : > { %9355 = vmatprep.subr.bf16.mxu1 %v10000_v9 }
 0x23e   : > { %9356 = vmatpush3.bf16.msra.mxu1 %v10000_v9 }
 0x23f   : > { %9357 = vmatprep.subr.bf16.mxu1 %v10001_v21 }
 0x240   : > { %2105 = vmatmul.mubr.bf16.gmra.mrb[60].mxu0 %v1148_v24  ;;  %2008 = vmatmul.mubr.bf16.gmra.mrb[44].mxu1 %v1127_v44 }
 0x241   : > { %2112 = vmatprep.mubr.bf16.mxu0 %v11484_v1  ;;  %2015 = vmatprep.mubr.bf16.mxu1 %v1144_v34  ;;  %v1129_v1 = vpack.c.bf16 %v11497_v26, %v11475_v48  ;;  %v1159_v48 = vsel %vm958_vm0, %v11272_v28, %v1158_v42  ;;  %v1165_v28 = vrot.slane %v11571_v5, 2 }
 0x242   : > { %9358 = vmatpush3.bf16.msra.mxu1 %v10001_v21 }
 0x243   : > { %9359 = vmatprep.subr.bf16.mxu1 %v10002_v62  ;;  %v1166_v33 = vsel %vm1031_vm1, %v11276_v32, %v1165_v28 }
 0x244   : > { %v1172_v51 = vpack.c.bf16 %v1166_v33, %v11586_v36 }
 0x246   : > { %9360 = vmatpush3.bf16.msra.mxu1 %v10002_v62 }
 0x248   : > { %2113 = vmatmul.mubr.bf16.gmra.mrb[64].mxu0 %v11508_v38  ;;  %2016 = vmatmul.mubr.bf16.gmra.mrb[48].mxu1 %v1128_v16  ;;  %v1136_v38 = vrot.slane %v915_v52, 2  ;;  %v10010_v16 = vld [vmem:[#allocation3 + $0x78] sm:$0xff]  }
 0x249   : > { %2120 = vmatprep.mubr.bf16.mxu0 %v11513_v31  ;;  %2023 = vmatprep.mubr.bf16.mxu1 %v1145_v19  ;;  %v1121_v31 = vsel %vm958_vm0, %v1119_v53, %v1120_v6 }
 0x24a   : > { %v1137_v26 = vsel %vm1031_vm1, %v1135_v14, %v1136_v38  ;;  %v1163_v8 = vpack.c.bf16 %v1159_v48, %v1121_v31  ;;  %v1131_v17 = vpack.c.bf16 %v1121_v31, %v11530_v11  ;;  %v10005_v11 = vld [vmem:[#allocation3 + $0x50] sm:$0xff]  }
 0x250   : > { %2121 = vmatmul.mubr.bf16.gmra.mrb[68].mxu0 %v11537_v12  ;;  %2024 = vmatmul.mubr.bf16.gmra.mrb[52].mxu1 %v1129_v1  ;;  %v1147_v12 = vpack.c.bf16 %v1137_v26, %v11551_v50 }
 0x251   : > { %2128 = vmatprep.mubr.bf16.mxu0 %v11542_v18  ;;  %2031 = vmatprep.mubr.bf16.mxu1 %v1146_v13  ;;  %v1149_v18 = vpack.c.bf16 %v11269_v27, %v11524_v49  ;;  %v1168_v27 = vrot.slane %v917_v35, 2 }
 0x258   : > { %2129 = vmatmul.mubr.bf16.gmra.mrb[72].mxu0 %v11557_v23  ;;  %2032 = vmatmul.mubr.bf16.gmra.mrb[56].mxu1 %v1130_v57 }
 0x259   : > { %2136 = vmatprep.mubr.bf16.mxu0 %v1163_v8  ;;  %2039 = vmatprep.mubr.bf16.mxu1 %v1147_v12 }
 0x260   : > { %2137 = vmatmul.mubr.bf16.gmra.mrb[76].mxu0 %v1149_v18  ;;  %2040 = vmatmul.mubr.bf16.gmra.mrb[60].mxu1 %v1131_v17 }
 0x261   : > { %9361 = vmatprep.mubr.bf16.mxu1 %v11361_v56  ;;  %v1169_v56 = vsel %vm1031_vm1, %v11276_v32, %v1168_v27 }
 0x262   : > { %v1173_v49 = vpack.c.bf16 %v1169_v56, %v1137_v26 }
 0x268   : > { %9362 = vmatmul.mubr.bf16.vlgmr.msra.gmra.mrb[64].mxu1 %v11413_v40  ;;  %v10003_v40 = vld [vmem:[#allocation3 + $0x40] sm:$0xff]  }
 0x269   : > { %9365 = vmatprep.mubr.bf16.mxu1 %v11451_v15  ;;  %9377 = vmatprep.subr.bf16.mxu0 %v10003_v40  ;;  %v10004_v15 = vld [vmem:[#allocation3 + $0x48] sm:$0xff]  }
 0x26a   : > { %9378 = vmatpush3.bf16.msra.mxu0 %v10003_v40 }
 0x26b   : > { %9379 = vmatprep.subr.bf16.mxu0 %v10004_v15 }
 0x26e   : > { %9380 = vmatpush3.bf16.msra.mxu0 %v10004_v15 }
 0x26f   : > { %9381 = vmatprep.subr.bf16.mxu0 %v10005_v11 }
 0x270   : > { %9366 = vmatmul.mubr.bf16.gmra.mrb[68].mxu1 %v1172_v51 }
 0x271   : > { %9369 = vmatprep.mubr.bf16.mxu1 %v11504_v43  ;;  %v10006_v43 = vld [vmem:[#allocation3 + $0x58] sm:$0xff]  }
 0x272   : > { %9382 = vmatpush3.bf16.msra.mxu0 %v10005_v11 }
 0x273   : > { %9383 = vmatprep.subr.bf16.mxu0 %v10006_v43 }
 0x276   : > { %9384 = vmatpush3.bf16.msra.mxu0 %v10006_v43 }
 0x278   : > { %9370 = vmatmul.mubr.bf16.gmra.mrb[72].mxu1 %v11534_v30  ;;  %v10007_v30 = vld [vmem:[#allocation3 + $0x60] sm:$0xff]  }
 0x279   : > { %9373 = vmatprep.mubr.bf16.mxu1 %v11555_v54  ;;  %9385 = vmatprep.subr.bf16.mxu0 %v10007_v30  ;;  %v11636_v54 = vld [vmem:[#allocation8] ss:$0 sm:$0xff] }
 0x27a   : > { %9386 = vmatpush3.bf16.msra.mxu0 %v10007_v30 }
 0x27b   : > { %9387 = vmatprep.subr.bf16.mxu0 %v10008_v59 }
 0x27e   : > { %9388 = vmatpush3.bf16.msra.mxu0 %v10008_v59 }
 0x27f   : > { %9389 = vmatprep.subr.bf16.mxu0 %v10009_v39 }
 0x280   : > { %9374 = vmatmul.mubr.bf16.gmra.mrb[76].mxu1 %v1173_v49 }
 0x282   : > { %9390 = vmatpush3.bf16.msra.mxu0 %v10009_v39 }
 0x283   : > { %9391 = vmatprep.subr.bf16.mxu0 %v10010_v16 }
 0x286   : > { %9392 = vmatpush3.bf16.msra.mxu0 %v10010_v16 }
 0x2bb   : > { %v8833_v32 = vpop.f32.mrb[16].mxu0  ;;  %v8769_v41 = vpop.f32.mrb[0].mxu1 }
 0x2bc   : > { %v8834_v50 = vpop.f32.mrb[17].mxu0  ;;  %v8770_v23 = vpop.f32.mrb[1].mxu1 }
 0x2bd   : > { %v8835_v37 = vadd.f32 %v8834_v50, %v8833_v32  ;;  %v8771_v0 = vadd.f32 %v8770_v23, %v8769_v41  ;;  %v8836_v2 = vpop.f32.mrb[18].mxu0  ;;  %v8772_v25 = vpop.f32.mrb[2].mxu1 }
 0x2be   : > { %v8837_v63 = vpop.f32.mrb[19].mxu0  ;;  %v8773_v5 = vpop.f32.mrb[3].mxu1 }
 0x2bf   : > { %v1792_v3 = vadd.f32 %v8771_v0, %v11636_v54  ;;  %v8838_v58 = vadd.f32 %v8837_v63, %v8836_v2  ;;  %v8774_v7 = vadd.f32 %v8773_v5, %v8772_v25 }
 0x2c1   : > { %v1795_v46 = vadd.f32 %v8774_v7, %v11636_v54  ;;  %v11640_v47 = vadd.f32 %v8835_v37, %v1792_v3 }
 0x2c3   : > { %v8839_v60 = vpop.f32.mrb[20].mxu0  ;;  %v8775_v4 = vpop.f32.mrb[4].mxu1  ;;  %v11642_v55 = vadd.f32 %v8838_v58, %v1795_v46 }
 0x2c4   : > { %v8840_v22 = vpop.f32.mrb[21].mxu0  ;;  %v8776_v10 = vpop.f32.mrb[5].mxu1 }
 0x2c5   : > { %v8841_v29 = vadd.f32 %v8840_v22, %v8839_v60  ;;  %v8777_v36 = vadd.f32 %v8776_v10, %v8775_v4  ;;  %v8842_v61 = vpop.f32.mrb[22].mxu0  ;;  %v8778_v20 = vpop.f32.mrb[6].mxu1 }
 0x2c6   : > { %v8843_v45 = vpop.f32.mrb[23].mxu0  ;;  %v8779_v9 = vpop.f32.mrb[7].mxu1 }
 0x2c7   : > { %v1800_v21 = vadd.f32 %v8777_v36, %v11636_v54  ;;  %v8844_v24 = vadd.f32 %v8843_v45, %v8842_v61  ;;  %v8780_v44 = vadd.f32 %v8779_v9, %v8778_v20  ;;  %v10011_v45 = vld [vmem:[#allocation7 + $0x280] sm:$0xff]  }
 0x2c8   : > { %v10012_v9 = vld [vmem:[#allocation7 + $0x300] sm:$0xff]   ;;  %9041 = vmatprep.subr.bf16.mxu1 %v10011_v45 }
 0x2c9   : > { %v1803_v34 = vadd.f32 %v8780_v44, %v11636_v54  ;;  %v11646_v62 = vadd.f32 %v8841_v29, %v1800_v21  ;;  %v10013_v21 = vld [vmem:[#allocation7 + $0x240] sm:$0xff]   ;;  %9105 = vmatprep.subr.bf16.mxu0 %v10012_v9 }
 0x2ca   : > { %9042 = vmatpush3.bf16.msra.mxu1 %v10013_v21 }
 0x2cb   : > { %v8845_v19 = vpop.f32.mrb[24].mxu0  ;;  %v8781_v35 = vpop.f32.mrb[8].mxu1  ;;  %v11648_v52 = vadd.f32 %v8844_v24, %v1803_v34 }
 0x2cc   : > { %v8846_v1 = vpop.f32.mrb[25].mxu0  ;;  %v8782_v13 = vpop.f32.mrb[9].mxu1 }
 0x2cd   : > { %v8847_v42 = vadd.f32 %v8846_v1, %v8845_v19  ;;  %v8783_v53 = vadd.f32 %v8782_v13, %v8781_v35  ;;  %v8848_v6 = vpop.f32.mrb[26].mxu0  ;;  %v8784_v14 = vpop.f32.mrb[10].mxu1  ;;  %v10015_v19 = vld [vmem:[#allocation7 + $0x288] sm:$0xff]  }
 0x2ce   : > { %v8849_v38 = vpop.f32.mrb[27].mxu0  ;;  %v8785_v31 = vpop.f32.mrb[11].mxu1  ;;  %9043 = vmatprep.subr.bf16.mxu1 %v10015_v19 }
 0x2cf   : > { %v1808_v48 = vadd.f32 %v8783_v53, %v11636_v54  ;;  %v8850_v26 = vadd.f32 %v8849_v38, %v8848_v6  ;;  %v8786_v57 = vadd.f32 %v8785_v31, %v8784_v14  ;;  %v10017_v6 = vld [vmem:[#allocation7 + $0x248] sm:$0xff]   ;;  %v10019_v14 = vld [vmem:[#allocation7 + $0x290] sm:$0xff]  }
 0x2d0   : > { %9044 = vmatpush3.bf16.msra.mxu1 %v10017_v6 }
 0x2d1   : > { %v1811_v8 = vadd.f32 %v8786_v57, %v11636_v54  ;;  %v11652_v12 = vadd.f32 %v8847_v42, %v1808_v48  ;;  %9045 = vmatprep.subr.bf16.mxu1 %v10019_v14 }
 0x2d3   : > { %v8851_v18 = vpop.f32.mrb[28].mxu0  ;;  %v8787_v17 = vpop.f32.mrb[12].mxu1  ;;  %v11654_v28 = vadd.f32 %v8850_v26, %v1811_v8  ;;  %v10021_v8 = vld [vmem:[#allocation7 + $0x250] sm:$0xff]  }
 0x2d4   : > { %v8852_v33 = vpop.f32.mrb[29].mxu0  ;;  %v8788_v51 = vpop.f32.mrb[13].mxu1  ;;  %9046 = vmatpush3.bf16.msra.mxu1 %v10021_v8 }
 0x2d5   : > { %v8853_v27 = vadd.f32 %v8852_v33, %v8851_v18  ;;  %v8789_v56 = vadd.f32 %v8788_v51, %v8787_v17  ;;  %v8854_v49 = vpop.f32.mrb[30].mxu0  ;;  %v8790_v40 = vpop.f32.mrb[14].mxu1  ;;  %v10023_v33 = vld [vmem:[#allocation7 + $0x298] sm:$0xff]  }
 0x2d6   : > { %v8855_v15 = vpop.f32.mrb[31].mxu0  ;;  %v8791_v11 = vpop.f32.mrb[15].mxu1  ;;  %9047 = vmatprep.subr.bf16.mxu1 %v10023_v33 }
 0x2d7   : > { %v1816_v43 = vadd.f32 %v8789_v56, %v11636_v54  ;;  %v8856_v30 = vadd.f32 %v8855_v15, %v8854_v49  ;;  %v8792_v59 = vadd.f32 %v8791_v11, %v8790_v40 }
 0x2d9   : > { %v1819_v32 = vadd.f32 %v8792_v59, %v11636_v54  ;;  %v11658_v41 = vadd.f32 %v8853_v27, %v1816_v43 }
 0x2db   : > { %v8857_v50 = vpop.f32.mrb[32].mxu0  ;;  %v8793_v23 = vpop.f32.mrb[16].mxu1  ;;  %v11660_v37 = vadd.f32 %v8856_v30, %v1819_v32 }
 0x2dc   : > { %v8858_v0 = vpop.f32.mrb[33].mxu0  ;;  %v8794_v2 = vpop.f32.mrb[17].mxu1 }
 0x2dd   : > { %v8859_v25 = vadd.f32 %v8858_v0, %v8857_v50  ;;  %v8795_v63 = vadd.f32 %v8794_v2, %v8793_v23  ;;  %v8860_v5 = vpop.f32.mrb[34].mxu0  ;;  %v8796_v3 = vpop.f32.mrb[18].mxu1 }
 0x2de   : > { %v8861_v58 = vpop.f32.mrb[35].mxu0  ;;  %v8797_v7 = vpop.f32.mrb[19].mxu1 }
 0x2df   : > { %v1824_v46 = vadd.f32 %v8795_v63, %v11636_v54  ;;  %v8862_v60 = vadd.f32 %v8861_v58, %v8860_v5  ;;  %v8798_v4 = vadd.f32 %v8797_v7, %v8796_v3 }
 0x2e1   : > { %v1827_v22 = vadd.f32 %v8798_v4, %v11636_v54  ;;  %v11664_v10 = vadd.f32 %v8859_v25, %v1824_v46 }
 0x2e3   : > { %v8863_v39 = vpop.f32.mrb[36].mxu0  ;;  %v8799_v29 = vpop.f32.mrb[20].mxu1  ;;  %v11666_v36 = vadd.f32 %v8862_v60, %v1827_v22 }
 0x2e4   : > { %v8864_v61 = vpop.f32.mrb[37].mxu0  ;;  %v8800_v20 = vpop.f32.mrb[21].mxu1 }
 0x2e5   : > { %v8865_v24 = vadd.f32 %v8864_v61, %v8863_v39  ;;  %v8801_v44 = vadd.f32 %v8800_v20, %v8799_v29  ;;  %v8866_v34 = vpop.f32.mrb[38].mxu0  ;;  %v8802_v16 = vpop.f32.mrb[22].mxu1 }
 0x2e6   : > { %v8867_v35 = vpop.f32.mrb[39].mxu0  ;;  %v8803_v1 = vpop.f32.mrb[23].mxu1 }
 0x2e7   : > { %v1832_v13 = vadd.f32 %v8801_v44, %v11636_v54  ;;  %v8868_v42 = vadd.f32 %v8867_v35, %v8866_v34  ;;  %v8804_v53 = vadd.f32 %v8803_v1, %v8802_v16 }
 0x2e9   : > { %v1835_v38 = vadd.f32 %v8804_v53, %v11636_v54  ;;  %v11670_v31 = vadd.f32 %v8865_v24, %v1832_v13 }
 0x2eb   : > { %v8869_v48 = vpop.f32.mrb[40].mxu0  ;;  %v8805_v26 = vpop.f32.mrb[24].mxu1  ;;  %v11672_v57 = vadd.f32 %v8868_v42, %v1835_v38 }
 0x2ec   : > { %v8870_v18 = vpop.f32.mrb[41].mxu0  ;;  %v8806_v17 = vpop.f32.mrb[25].mxu1 }
 0x2ed   : > { %v8871_v51 = vadd.f32 %v8870_v18, %v8869_v48  ;;  %v8807_v27 = vadd.f32 %v8806_v17, %v8805_v26  ;;  %v8872_v56 = vpop.f32.mrb[42].mxu0  ;;  %v8808_v49 = vpop.f32.mrb[26].mxu1 }
 0x2ee   : > { %v8873_v40 = vpop.f32.mrb[43].mxu0  ;;  %v8809_v15 = vpop.f32.mrb[27].mxu1 }
 0x2ef   : > { %v1840_v11 = vadd.f32 %v8807_v27, %v11636_v54  ;;  %v8874_v43 = vadd.f32 %v8873_v40, %v8872_v56  ;;  %v8810_v30 = vadd.f32 %v8809_v15, %v8808_v49 }
 0x2f1   : > { %v1843_v59 = vadd.f32 %v8810_v30, %v11636_v54  ;;  %v11676_v32 = vadd.f32 %v8871_v51, %v1840_v11 }
 0x2f3   : > { %v8875_v50 = vpop.f32.mrb[44].mxu0  ;;  %v8811_v23 = vpop.f32.mrb[28].mxu1  ;;  %v11678_v0 = vadd.f32 %v8874_v43, %v1843_v59 }
 0x2f4   : > { %v8876_v2 = vpop.f32.mrb[45].mxu0  ;;  %v8812_v25 = vpop.f32.mrb[29].mxu1 }
 0x2f5   : > { %v8877_v63 = vadd.f32 %v8876_v2, %v8875_v50  ;;  %v8813_v5 = vadd.f32 %v8812_v25, %v8811_v23  ;;  %v8878_v3 = vpop.f32.mrb[46].mxu0  ;;  %v8814_v58 = vpop.f32.mrb[30].mxu1 }
 0x2f6   : > { %v8879_v7 = vpop.f32.mrb[47].mxu0  ;;  %v8815_v46 = vpop.f32.mrb[31].mxu1 }
 0x2f7   : > { %v1848_v60 = vadd.f32 %v8813_v5, %v11636_v54  ;;  %v8880_v4 = vadd.f32 %v8879_v7, %v8878_v3  ;;  %v8816_v22 = vadd.f32 %v8815_v46, %v8814_v58 }
 0x2f9   : > { %v1851_v39 = vadd.f32 %v8816_v22, %v11636_v54  ;;  %v11682_v29 = vadd.f32 %v8877_v63, %v1848_v60 }
 0x2fb   : > { %v8961_v61 = vpop.f32.mrb[48].mxu0  ;;  %v8897_v20 = vpop.f32.mrb[32].mxu1  ;;  %v11684_v45 = vadd.f32 %v8880_v4, %v1851_v39 }
 0x2fc   : > { %v8962_v9 = vpop.f32.mrb[49].mxu0  ;;  %v8898_v21 = vpop.f32.mrb[33].mxu1 }
 0x2fd   : > { %v8963_v24 = vadd.f32 %v8962_v9, %v8961_v61  ;;  %v8899_v44 = vadd.f32 %v8898_v21, %v8897_v20  ;;  %v8964_v34 = vpop.f32.mrb[50].mxu0  ;;  %v8900_v16 = vpop.f32.mrb[34].mxu1 }
 0x2fe   : > { %v8965_v19 = vpop.f32.mrb[51].mxu0  ;;  %v8901_v35 = vpop.f32.mrb[35].mxu1 }
 0x2ff   : > { %v1986_v1 = vadd.f32 %v8899_v44, %v11640_v47  ;;  %v8966_v13 = vadd.f32 %v8965_v19, %v8964_v34  ;;  %v8902_v42 = vadd.f32 %v8901_v35, %v8900_v16 }
 0x301   : > { %v1989_v54 = vadd.f32 %v8902_v42, %v11642_v55  ;;  %v11688_v53 = vadd.f32 %v8963_v24, %v1986_v1 }
 0x303   : > { %v8967_v6 = vpop.f32.mrb[52].mxu0  ;;  %v8903_v14 = vpop.f32.mrb[36].mxu1  ;;  %v11690_v38 = vadd.f32 %v8966_v13, %v1989_v54 }
 0x304   : > { %v8968_v48 = vpop.f32.mrb[53].mxu0  ;;  %v8904_v26 = vpop.f32.mrb[37].mxu1 }
 0x305   : > { %v8969_v8 = vadd.f32 %v8968_v48, %v8967_v6  ;;  %v8905_v18 = vadd.f32 %v8904_v26, %v8903_v14  ;;  %v8970_v17 = vpop.f32.mrb[54].mxu0  ;;  %v8906_v33 = vpop.f32.mrb[38].mxu1 }
 0x306   : > { %v8971_v51 = vpop.f32.mrb[55].mxu0  ;;  %v8907_v27 = vpop.f32.mrb[39].mxu1 }
 0x307   : > { %v1994_v47 = vadd.f32 %v8905_v18, %v11646_v62  ;;  %v8972_v56 = vadd.f32 %v8971_v51, %v8970_v17  ;;  %v8908_v49 = vadd.f32 %v8907_v27, %v8906_v33 }
 0x309   : > { %v1997_v55 = vadd.f32 %v8908_v49, %v11648_v52  ;;  %v11694_v40 = vadd.f32 %v8969_v8, %v1994_v47 }
 0x30b   : > { %v8973_v15 = vpop.f32.mrb[56].mxu0  ;;  %v8909_v11 = vpop.f32.mrb[40].mxu1  ;;  %v11696_v43 = vadd.f32 %v8972_v56, %v1997_v55 }
 0x30c   : > { %v8974_v30 = vpop.f32.mrb[57].mxu0  ;;  %v8910_v59 = vpop.f32.mrb[41].mxu1 }
 0x30d   : > { %v8975_v50 = vadd.f32 %v8974_v30, %v8973_v15  ;;  %v8911_v23 = vadd.f32 %v8910_v59, %v8909_v11  ;;  %v8976_v2 = vpop.f32.mrb[58].mxu0  ;;  %v8912_v25 = vpop.f32.mrb[42].mxu1 }
 0x30e   : > { %v8977_v63 = vpop.f32.mrb[59].mxu0  ;;  %v8913_v5 = vpop.f32.mrb[43].mxu1 }
 0x30f   : > { %v2002_v62 = vadd.f32 %v8911_v23, %v11652_v12  ;;  %v8978_v3 = vadd.f32 %v8977_v63, %v8976_v2  ;;  %v8914_v58 = vadd.f32 %v8913_v5, %v8912_v25 }
 0x311   : > { %v2005_v52 = vadd.f32 %v8914_v58, %v11654_v28  ;;  %v11700_v7 = vadd.f32 %v8975_v50, %v2002_v62 }
 0x313   : > { %v8979_v46 = vpop.f32.mrb[60].mxu0  ;;  %v8915_v60 = vpop.f32.mrb[44].mxu1  ;;  %v11702_v4 = vadd.f32 %v8978_v3, %v2005_v52 }
 0x314   : > { %v8980_v22 = vpop.f32.mrb[61].mxu0  ;;  %v8916_v39 = vpop.f32.mrb[45].mxu1 }
 0x315   : > { %v8981_v61 = vadd.f32 %v8980_v22, %v8979_v46  ;;  %v8917_v20 = vadd.f32 %v8916_v39, %v8915_v60  ;;  %v8982_v9 = vpop.f32.mrb[62].mxu0  ;;  %v8918_v21 = vpop.f32.mrb[46].mxu1 }
 0x316   : > { %v8983_v24 = vpop.f32.mrb[63].mxu0  ;;  %v8919_v44 = vpop.f32.mrb[47].mxu1 }
 0x317   : > { %v2010_v12 = vadd.f32 %v8917_v20, %v11658_v41  ;;  %v8984_v34 = vadd.f32 %v8983_v24, %v8982_v9  ;;  %v8920_v16 = vadd.f32 %v8919_v44, %v8918_v21 }
 0x319   : > { %v2013_v28 = vadd.f32 %v8920_v16, %v11660_v37  ;;  %v11706_v19 = vadd.f32 %v8981_v61, %v2010_v12 }
 0x31b   : > { %v8985_v35 = vpop.f32.mrb[64].mxu0  ;;  %v8921_v1 = vpop.f32.mrb[48].mxu1  ;;  %v11708_v13 = vadd.f32 %v8984_v34, %v2013_v28 }
 0x31c   : > { %v8986_v42 = vpop.f32.mrb[65].mxu0  ;;  %v8922_v54 = vpop.f32.mrb[49].mxu1 }
 0x31d   : > { %v8987_v6 = vadd.f32 %v8986_v42, %v8985_v35  ;;  %v8923_v14 = vadd.f32 %v8922_v54, %v8921_v1  ;;  %v8988_v48 = vpop.f32.mrb[66].mxu0  ;;  %v8924_v26 = vpop.f32.mrb[50].mxu1 }
 0x31e   : > { %v8989_v8 = vpop.f32.mrb[67].mxu0  ;;  %v8925_v18 = vpop.f32.mrb[51].mxu1 }
 0x31f   : > { %v2018_v41 = vadd.f32 %v8923_v14, %v11664_v10  ;;  %v8990_v17 = vadd.f32 %v8989_v8, %v8988_v48  ;;  %v8926_v33 = vadd.f32 %v8925_v18, %v8924_v26 }
 0x321   : > { %v2021_v37 = vadd.f32 %v8926_v33, %v11666_v36  ;;  %v11712_v51 = vadd.f32 %v8987_v6, %v2018_v41 }
 0x323   : > { %v8991_v27 = vpop.f32.mrb[68].mxu0  ;;  %v8927_v47 = vpop.f32.mrb[52].mxu1  ;;  %v11714_v56 = vadd.f32 %v8990_v17, %v2021_v37  ;;  %v8289_v37 = vld [vmem:[%s11741_s15] ss:$0 sm:$0xff] }
 0x324   : > { %v8992_v49 = vpop.f32.mrb[69].mxu0  ;;  %v8928_v55 = vpop.f32.mrb[53].mxu1 }
 0x325   : > { %v8993_v15 = vadd.f32 %v8992_v49, %v8991_v27  ;;  %v8929_v11 = vadd.f32 %v8928_v55, %v8927_v47  ;;  %v8994_v30 = vpop.f32.mrb[70].mxu0  ;;  %v8930_v59 = vpop.f32.mrb[54].mxu1 }
 0x326   : > { %v8995_v50 = vpop.f32.mrb[71].mxu0  ;;  %v8931_v23 = vpop.f32.mrb[55].mxu1 }
 0x327   : > { %v2026_v10 = vadd.f32 %v8929_v11, %v11670_v31  ;;  %v8996_v2 = vadd.f32 %v8995_v50, %v8994_v30  ;;  %v8932_v25 = vadd.f32 %v8931_v23, %v8930_v59 }
 0x329   : > { %v2029_v36 = vadd.f32 %v8932_v25, %v11672_v57  ;;  %v11718_v63 = vadd.f32 %v8993_v15, %v2026_v10 }
 0x32b   : > { %v8997_v5 = vpop.f32.mrb[72].mxu0  ;;  %v8933_v62 = vpop.f32.mrb[56].mxu1  ;;  %v11720_v3 = vadd.f32 %v8996_v2, %v2029_v36 }
 0x32c   : > { %v8998_v58 = vpop.f32.mrb[73].mxu0  ;;  %v8934_v52 = vpop.f32.mrb[57].mxu1 }
 0x32d   : > { %v8999_v46 = vadd.f32 %v8998_v58, %v8997_v5  ;;  %v8935_v60 = vadd.f32 %v8934_v52, %v8933_v62  ;;  %v9000_v22 = vpop.f32.mrb[74].mxu0  ;;  %v8936_v39 = vpop.f32.mrb[58].mxu1 }
 0x32e   : > { %v9001_v61 = vpop.f32.mrb[75].mxu0  ;;  %v8937_v20 = vpop.f32.mrb[59].mxu1 }
 0x32f   : > { %v2034_v31 = vadd.f32 %v8935_v60, %v11676_v32  ;;  %v9002_v9 = vadd.f32 %v9001_v61, %v9000_v22  ;;  %v8938_v21 = vadd.f32 %v8937_v20, %v8936_v39 }
 0x331   : > { %v2037_v57 = vadd.f32 %v8938_v21, %v11678_v0  ;;  %v11724_v24 = vadd.f32 %v8999_v46, %v2034_v31  ;;  %v10612_v46 = vld [vmem:[#allocation2 + $0x31] sm:$0xff] }
 0x332   : > { %v10614_v21 = vld [vmem:[#allocation2 + $0x11] sm:$0xff] }
 0x333   : > { %v9003_v44 = vpop.f32.mrb[76].mxu0  ;;  %v8939_v12 = vpop.f32.mrb[60].mxu1  ;;  %v11726_v34 = vadd.f32 %v9002_v9, %v2037_v57 }
 0x334   : > { %v9004_v16 = vpop.f32.mrb[77].mxu0  ;;  %v8940_v28 = vpop.f32.mrb[61].mxu1 }
 0x335   : > { %v9005_v35 = vadd.f32 %v9004_v16, %v9003_v44  ;;  %v8941_v1 = vadd.f32 %v8940_v28, %v8939_v12  ;;  %v9006_v42 = vpop.f32.mrb[78].mxu0  ;;  %v8942_v54 = vpop.f32.mrb[62].mxu1 }
 0x336   : > { %v9007_v6 = vpop.f32.mrb[79].mxu0  ;;  %v8943_v14 = vpop.f32.mrb[63].mxu1 }
 0x337   : > { %v2042_v32 = vadd.f32 %v8941_v1, %v11682_v29  ;;  %v9008_v48 = vadd.f32 %v9007_v6, %v9006_v42  ;;  %v8944_v26 = vadd.f32 %v8943_v14, %v8942_v54  ;;  %v8287_v29 = vld [vmem:[%s11733_s27] ss:$0 sm:$0xff] }
 0x338   : > { %v10014_v42 = vld [vmem:[#allocation7 + $0x2c0] sm:$0xff]  }
 0x339   : > { %v2045_v0 = vadd.f32 %v8944_v26, %v11684_v45  ;;  %v11736_v8 = vadd.f32 %v9005_v35, %v2042_v32 }
 0x33b   : > { %v9363_v18 = vpop.f32.mrb[64].mxu1  ;;  %v11744_v41 = vadd.f32 %v9008_v48, %v2045_v0 }
 0x33c   : > { %v2188_v17 = vadd.f32 %v9363_v18, %v11694_v40  ;;  %v2179_v33 = vpop.f32.mrb[65].mxu1 }
 0x33d   : > { %v2180_v27 = vadd.f32 %v2179_v33, %v11688_v53  ;;  %v9364_v47 = vpop.f32.mrb[66].mxu1  ;;  %v11760_v33 = vld [vmem:[%s11741_s15 + $0x2] ss:$0 sm:$0xff] }
 0x33e   : > { %v2258_v45 = vmul.f32 %v8287_v29, %v2188_v17  ;;  %v2191_v49 = vadd.f32 %v9364_v47, %v11696_v43  ;;  %v2182_v55 = vpop.f32.mrb[67].mxu1  ;;  %v10018_v47 = vld [vmem:[#allocation7 + $0x2c8] sm:$0xff]  }
 0x33f   : > { %v2256_v15 = vmul.f32 %v8287_v29, %v2180_v27  ;;  %v2183_v11 = vadd.f32 %v2182_v55, %v11690_v38  ;;  %v10613_v38 = vld [vmem:[#allocation2 + $0x41] sm:$0xff]  ;;  %v10616_v55 = vld [vmem:[#allocation2 + $0x71] sm:$0xff] }
 0x340   : > { %v2288_v30 = vadd.f32 %v8289_v37, %v2258_v45  ;;  %v2259_v59 = vmul.f32 %v8287_v29, %v2191_v49 }
 0x341   : > { %v2286_v50 = vadd.f32 %v8289_v37, %v2256_v15  ;;  %v2257_v23 = vmul.f32 %v8287_v29, %v2183_v11  ;;  %v10617_v11 = vld [vmem:[#allocation2 + $0x81] sm:$0xff] }
 0x342   : > { %v2304_v10 = vmax.f32 %v2288_v30, 0.0  ;;  %v2289_v2 = vadd.f32 %v8289_v37, %v2259_v59 }
 0x343   : > { %v2302_v25 = vmax.f32 %v2286_v50, 0.0  ;;  %v2287_v40 = vadd.f32 %v8289_v37, %v2257_v23  ;;  %v9367_v36 = vpop.f32.mrb[68].mxu1  ;;  %v10618_v23 = vld [vmem:[#allocation2 + $0x51] sm:$0xff] }
 0x344   : > { %v2305_v5 = vmax.f32 %v2289_v2, 0.0  ;;  %v2204_v53 = vadd.f32 %v9367_v36, %v11706_v19  ;;  %v2195_v62 = vpop.f32.mrb[69].mxu1  ;;  %v2320_v60 = vadd.f32 %v10612_v46, %v2304_v10  ;;  %v10615_v19 = vld [vmem:[#allocation2 + $0x21] sm:$0xff] }
 0x345   : > { %v2303_v58 = vmax.f32 %v2287_v40, 0.0  ;;  %v2196_v43 = vadd.f32 %v2195_v62, %v11700_v7  ;;  %v9368_v52 = vpop.f32.mrb[70].mxu1  ;;  %v2318_v57 = vadd.f32 %v10614_v21, %v2302_v25  ;;  %v10619_v10 = vld [vmem:[#allocation2 + $0x61] sm:$0xff]  ;;  %v10022_v62 = vld [vmem:[#allocation7 + $0x2d0] sm:$0xff]  }
 0x346   : > { %v2321_v22 = vadd.f32 %v10613_v38, %v2305_v5  ;;  %v2262_v39 = vmul.f32 %v8287_v29, %v2204_v53  ;;  %v2207_v61 = vadd.f32 %v9368_v52, %v11708_v13  ;;  %v2198_v20 = vpop.f32.mrb[71].mxu1  ;;  %v10016_v13 = vld [vmem:[#allocation7 + $0x308] sm:$0xff]  }
 0x347   : > { %v2260_v31 = vmul.f32 %v8287_v29, %v2196_v43  ;;  %v2199_v9 = vadd.f32 %v2198_v20, %v11702_v4  ;;  %v2319_v44 = vadd.f32 %v10615_v19, %v2303_v58  ;;  %v11756_v4 = vld [vmem:[%s11733_s27 + $0x2] ss:$0 sm:$0xff]  ;;  %v10620_v19 = vld [vmem:[#allocation2 + $0xd1] sm:$0xff] }
 0x348   : > { %v2335_v12 = vpack.c.bf16 %v2321_v22, %v2320_v60  ;;  %v2292_v16 = vadd.f32 %v8289_v37, %v2262_v39  ;;  %v2263_v7 = vmul.f32 %v8287_v29, %v2207_v61 }
 0x349   : > { %v2290_v28 = vadd.f32 %v8289_v37, %v2260_v31  ;;  %v2261_v35 = vmul.f32 %v8287_v29, %v2199_v9  ;;  %v2334_v1 = vpack.c.bf16 %v2319_v44, %v2318_v57 }
 0x34a   : > { %v2308_v54 = vmax.f32 %v2292_v16, 0.0  ;;  %v2293_v6 = vadd.f32 %v8289_v37, %v2263_v7 }
 0x34b   : > { %v2306_v14 = vmax.f32 %v2290_v28, 0.0  ;;  %v2291_v32 = vadd.f32 %v8289_v37, %v2261_v35  ;;  %v9371_v48 = vpop.f32.mrb[72].mxu1  ;;  %9393 = vmatprep.mubr.bf16.mxu0 %v2334_v1  ;;  %v10622_v28 = vld [vmem:[#allocation2 + $0xb1] sm:$0xff]  ;;  %v10623_v1 = vld [vmem:[#allocation2 + $0xc1] sm:$0xff] }
 0x34c   : > { %v2309_v26 = vmax.f32 %v2293_v6, 0.0  ;;  %v2220_v0 = vadd.f32 %v9371_v48, %v11718_v63  ;;  %v2211_v18 = vpop.f32.mrb[73].mxu1  ;;  %9394 = vmatmul.mubr.bf16.vlgmr.msra.gmra.mrb[80].mxu0 %v2335_v12  ;;  %v2324_v15 = vadd.f32 %v10616_v55, %v2308_v54  ;;  %v10020_v63 = vld [vmem:[#allocation7 + $0x310] sm:$0xff]   ;;  %v10621_v12 = vld [vmem:[#allocation2 + $0xe1] sm:$0xff] }
 0x34d   : > { %v2307_v17 = vmax.f32 %v2291_v32, 0.0  ;;  %v2212_v29 = vadd.f32 %v2211_v18, %v11712_v51  ;;  %v9372_v27 = vpop.f32.mrb[74].mxu1  ;;  %9106 = vmatpush3.bf16.msra.mxu0 %v10014_v42  ;;  %v2322_v51 = vadd.f32 %v10618_v23, %v2306_v14  ;;  %v10031_v23 = vld [vmem:[#allocation7 + $0x2a8] sm:$0xff]  }
 0x34e   : > { %v2266_v45 = vmul.f32 %v11756_v4, %v2220_v0  ;;  %v2223_v37 = vadd.f32 %v9372_v27, %v11720_v3  ;;  %v2214_v49 = vpop.f32.mrb[75].mxu1  ;;  %v2325_v30 = vadd.f32 %v10617_v11, %v2309_v26  ;;  %9107 = vmatprep.subr.bf16.mxu0 %v10016_v13  ;;  %v10625_v27 = vld [vmem:[#allocation2 + $0x121] sm:$0xff]  ;;  %v10025_v11 = vld [vmem:[#allocation7 + $0x258] sm:$0xff]  }
 0x34f   : > { %v2264_v59 = vmul.f32 %v11756_v4, %v2212_v29  ;;  %v2215_v50 = vadd.f32 %v2214_v49, %v11714_v56  ;;  %v2323_v2 = vadd.f32 %v10619_v10, %v2307_v17  ;;  %v10024_v56 = vld [vmem:[#allocation7 + $0x318] sm:$0xff]   ;;  %v10627_v49 = vld [vmem:[#allocation2 + $0x101] sm:$0xff]  ;;  %9048 = vmatpush3.bf16.msra.mxu1 %v10025_v11 }
 0x350   : > { %v2296_v25 = vadd.f32 %v11760_v33, %v2266_v45  ;;  %v2267_v40 = vmul.f32 %v11756_v4, %v2223_v37  ;;  %v2337_v3 = vpack.c.bf16 %v2325_v30, %v2324_v15  ;;  %v10624_v17 = vld [vmem:[#allocation2 + $0x111] sm:$0xff]  ;;  %v10033_v10 = vld [vmem:[#allocation7 + $0x268] sm:$0xff]  }
 0x351   : > { %v2294_v36 = vadd.f32 %v11760_v33, %v2264_v59  ;;  %v2265_v5 = vmul.f32 %v11756_v4, %v2215_v50  ;;  %v2336_v53 = vpack.c.bf16 %v2323_v2, %v2322_v51  ;;  %9108 = vmatpush3.bf16.msra.mxu0 %v10018_v47  ;;  %v10626_v45 = vld [vmem:[#allocation2 + $0xf1] sm:$0xff]  ;;  %v10029_v59 = vld [vmem:[#allocation7 + $0x260] sm:$0xff]   ;;  %v10032_v51 = vld [vmem:[#allocation7 + $0x328] sm:$0xff]  }
 0x352   : > { %v2312_v58 = vmax.f32 %v2296_v25, 0.0  ;;  %v2297_v43 = vadd.f32 %v11760_v33, %v2267_v40  ;;  %9109 = vmatprep.subr.bf16.mxu0 %v10020_v63  ;;  %v10026_v30 = vld [vmem:[#allocation7 + $0x2d8] sm:$0xff]   ;;  %v10028_v63 = vld [vmem:[#allocation7 + $0x320] sm:$0xff]   ;;  %v10034_v2 = vld [vmem:[#allocation7 + $0x2e8] sm:$0xff]  }
 0x353   : > { %v2310_v52 = vmax.f32 %v2294_v36, 0.0  ;;  %v2295_v46 = vadd.f32 %v11760_v33, %v2265_v5  ;;  %v9375_v60 = vpop.f32.mrb[76].mxu1  ;;  %9397 = vmatprep.mubr.bf16.mxu0 %v2336_v53  ;;  %v10030_v50 = vld [vmem:[#allocation7 + $0x2e0] sm:$0xff]   ;;  %v10035_v25 = vld [vmem:[#allocation7 + $0x2b0] sm:$0xff]   ;;  %v10039_v5 = vld [vmem:[#allocation7 + $0x2b8] sm:$0xff]  }
 0x354   : > { %v2313_v38 = vmax.f32 %v2297_v43, 0.0  ;;  %v2236_v22 = vadd.f32 %v9375_v60, %v11736_v8  ;;  %v2227_v39 = vpop.f32.mrb[77].mxu1  ;;  %9398 = vmatmul.mubr.bf16.gmra.mrb[84].mxu0 %v2337_v3  ;;  %v2328_v44 = vadd.f32 %v10620_v19, %v2312_v58  ;;  %v10036_v40 = vld [vmem:[#allocation7 + $0x330] sm:$0xff]   ;;  %v10040_v53 = vld [vmem:[#allocation7 + $0x338] sm:$0xff]   ;;  %v10043_v43 = vld [vmem:[#allocation7 + $0x380] sm:$0xff]  }
 0x355   : > { %v2311_v61 = vmax.f32 %v2295_v46, 0.0  ;;  %v2228_v20 = vadd.f32 %v2227_v39, %v11724_v24  ;;  %v9376_v31 = vpop.f32.mrb[78].mxu1  ;;  %9110 = vmatpush3.bf16.msra.mxu0 %v10022_v62  ;;  %v2326_v35 = vadd.f32 %v10622_v28, %v2310_v52  ;;  %v10037_v3 = vld [vmem:[#allocation7 + $0x270] sm:$0xff]   ;;  %v10041_v62 = vld [vmem:[#allocation7 + $0x278] sm:$0xff]   ;;  %v11787_v46 = vld [vmem:[#allocation5 + $0x40] sm:$0xff] }
 0x356   : > { %v2270_v9 = vmul.f32 %v11756_v4, %v2236_v22  ;;  %v2239_v21 = vadd.f32 %v9376_v31, %v11744_v41  ;;  %v2230_v57 = vpop.f32.mrb[79].mxu1  ;;  %v2329_v16 = vadd.f32 %v10621_v12, %v2313_v38  ;;  %9111 = vmatprep.subr.bf16.mxu0 %v10024_v56  ;;  %v10038_v36 = vld [vmem:[#allocation7 + $0x2f0] sm:$0xff]   ;;  %v10042_v58 = vld [vmem:[#allocation7 + $0x2f8] sm:$0xff]   ;;  %v10052_v56 = vld [vmem:[#allocation7 + $0x400] sm:$0xff]  }
 0x357   : > { %v2268_v7 = vmul.f32 %v11756_v4, %v2228_v20  ;;  %v2231_v8 = vadd.f32 %v2230_v57, %v11726_v34  ;;  %v2327_v24 = vadd.f32 %v10623_v1, %v2311_v61  ;;  %v11785_v52 = vld [vmem:[#allocation5 + $0x50] sm:$0xff]  ;;  %v11789_v38 = vld [vmem:[#allocation5 + $0x58] sm:$0xff]  ;;  %v11792_v61 = vld [vmem:[#allocation5 + $0x48] sm:$0xff] }
 0x358   : > { %v2300_v42 = vadd.f32 %v11760_v33, %v2270_v9  ;;  %v2271_v54 = vmul.f32 %v11756_v4, %v2239_v21  ;;  %v2339_v6 = vpack.c.bf16 %v2329_v16, %v2328_v44  ;;  %v11799_v28 = vld [vmem:[#allocation5 + $0x60] sm:$0xff]  ;;  %v11801_v1 = vld [vmem:[#allocation5 + $0x78] sm:$0xff] }
 0x359   : > { %v2298_v41 = vadd.f32 %v11760_v33, %v2268_v7  ;;  %v2269_v13 = vmul.f32 %v11756_v4, %v2231_v8  ;;  %v2338_v14 = vpack.c.bf16 %v2327_v24, %v2326_v35  ;;  %9112 = vmatpush3.bf16.msra.mxu0 %v10026_v30  ;;  %v11797_v7 = vld [vmem:[#allocation5 + $0x70] sm:$0xff]  ;;  %v2562_v8 = vld [vmem:[#allocation2 + $0x8] sm:$0x3] }
 0x35a   : > { %v2316_v32 = vmax.f32 %v2300_v42, 0.0  ;;  %v2301_v48 = vadd.f32 %v11760_v33, %v2271_v54  ;;  %9113 = vmatprep.subr.bf16.mxu0 %v10028_v63  ;;  %v11804_v54 = vld [vmem:[#allocation5 + $0x68] sm:$0xff] }
 0x35b   : > { %v2314_v26 = vmax.f32 %v2298_v41, 0.0  ;;  %v2299_v34 = vadd.f32 %v11760_v33, %v2269_v13  ;;  %9401 = vmatprep.mubr.bf16.mxu0 %v2338_v14  ;;  %v10027_v33 = vld [vmem:[#allocation7 + $0x2a0] sm:$0xff]   ;;  %v2642_v13 = vrot.slane %v2562_v8, 1 }
 0x35c   : > { %v2317_v0 = vmax.f32 %v2301_v48, 0.0  ;;  %9402 = vmatmul.mubr.bf16.gmra.mrb[88].mxu0 %v2339_v6  ;;  %v2332_v29 = vadd.f32 %v10624_v17, %v2316_v32  ;;  %9049 = vmatprep.subr.bf16.mxu1 %v10027_v33  ;;  %v11806_v6 = vld [vmem:[#allocation2] sm:$0xff] }
 0x35d   : > { %v2315_v18 = vmax.f32 %v2299_v34, 0.0  ;;  %v2330_v37 = vadd.f32 %v10626_v45, %v2314_v26  ;;  %9050 = vmatpush3.bf16.msra.mxu1 %v10029_v59  ;;  %9114 = vmatpush3.bf16.msra.mxu0 %v10030_v50  ;;  %v11809_v41 = vrot.slane %v11806_v6, 1 }
 0x35e   : > { %v2333_v47 = vadd.f32 %v10625_v27, %v2317_v0  ;;  %9051 = vmatprep.subr.bf16.mxu1 %v10031_v23  ;;  %9115 = vmatprep.subr.bf16.mxu0 %v10032_v51  ;;  %v11814_v0 = vrot.slane %v11806_v6, 2 }
 0x35f   : > { %v2331_v55 = vadd.f32 %v10627_v49, %v2315_v18  ;;  %v2714_v18 = vrot.slane %v2562_v8, 2  ;;  %v10054_v8 = vld [vmem:[#allocation7 + $0x3c0] sm:$0xff]  }
 0x360   : > { %v2341_v4 = vpack.c.bf16 %v2333_v47, %v2332_v29 }
 0x361   : > { %v2340_v15 = vpack.c.bf16 %v2331_v55, %v2330_v37  ;;  %9052 = vmatpush3.bf16.msra.mxu1 %v10033_v10  ;;  %9116 = vmatpush3.bf16.msra.mxu0 %v10034_v2  ;;  %v2643_v55 = vsel %vm958_vm0, %v11809_v41, %v2642_v13  ;;  %v2715_v51 = vsel %vm1031_vm1, %v11814_v0, %v2714_v18  ;;  %v10046_v13 = vld [vmem:[#allocation7 + $0x348] sm:$0xff]  }
 0x362   : > { %9053 = vmatprep.subr.bf16.mxu1 %v10035_v25  ;;  %9117 = vmatprep.subr.bf16.mxu0 %v10036_v40 }
 0x363   : > { %9405 = vmatprep.mubr.bf16.mxu0 %v2340_v15 }
 0x364   : > { %9406 = vmatmul.mubr.bf16.gmra.mrb[92].mxu0 %v2341_v4 }
 0x365   : > { %9054 = vmatpush3.bf16.msra.mxu1 %v10037_v3  ;;  %9118 = vmatpush3.bf16.msra.mxu0 %v10038_v36 }
 0x366   : > { %9055 = vmatprep.subr.bf16.mxu1 %v10039_v5  ;;  %9119 = vmatprep.subr.bf16.mxu0 %v10040_v53 }
 0x369   : > { %9056 = vmatpush3.bf16.msra.mxu1 %v10041_v62  ;;  %9120 = vmatpush3.bf16.msra.mxu0 %v10042_v58 }
 0x36a   : > { %9169 = vmatprep.subr.bf16.mxu1 %v10043_v43  ;;  %9233 = vmatprep.subr.bf16.mxu0 %v10052_v56 }
 0x41f   : > { %v9395_v60 = vpop.f32.mrb[80].mxu0 }
 0x420   : > { %v2515_v22 = vadd.f32 %v9395_v60, %v11785_v52  ;;  %v2441_v39 = vpop.f32.mrb[81].mxu0  ;;  %v10044_v60 = vld [vmem:[#allocation7 + $0x340] sm:$0xff]  }
 0x421   : > { %v2513_v20 = vadd.f32 %v11787_v46, %v2441_v39  ;;  %v9396_v31 = vpop.f32.mrb[82].mxu0 }
 0x422   : > { %v2531_v9 = vmax.f32 %v2515_v22, 0.0  ;;  %v2516_v21 = vadd.f32 %v9396_v31, %v11789_v38  ;;  %v2444_v57 = vpop.f32.mrb[83].mxu0 }
 0x423   : > { %v2529_v19 = vmax.f32 %v2513_v20, 0.0  ;;  %v2514_v44 = vadd.f32 %v11792_v61, %v2444_v57 }
 0x424   : > { %2547 = vst [vmem:[#allocation2 + $0x31] sm:$0xff] %v2531_v9  ;;  %v2532_v12 = vmax.f32 %v2516_v21, 0.0  ;;  %v10045_v21 = vld [vmem:[#allocation7 + $0x388] sm:$0xff]  }
 0x425   : > { %2545 = vst [vmem:[#allocation2 + $0x11] sm:$0xff] %v2529_v19  ;;  %v2530_v16 = vmax.f32 %v2514_v44, 0.0 }
 0x426   : > { %2548 = vst [vmem:[#allocation2 + $0x41] sm:$0xff] %v2532_v12 }
 0x427   : > { %2546 = vst [vmem:[#allocation2 + $0x21] sm:$0xff] %v2530_v16  ;;  %v9399_v35 = vpop.f32.mrb[84].mxu0 }
 0x428   : > { %v2519_v24 = vadd.f32 %v9399_v35, %v11797_v7  ;;  %v2457_v42 = vpop.f32.mrb[85].mxu0 }
 0x429   : > { %v2517_v14 = vadd.f32 %v11799_v28, %v2457_v42  ;;  %v9400_v32 = vpop.f32.mrb[86].mxu0 }
 0x42a   : > { %v2535_v48 = vmax.f32 %v2519_v24, 0.0  ;;  %v2520_v26 = vadd.f32 %v9400_v32, %v11801_v1  ;;  %v2460_v34 = vpop.f32.mrb[87].mxu0 }
 0x42b   : > { %v2533_v17 = vmax.f32 %v2517_v14, 0.0  ;;  %v2518_v29 = vadd.f32 %v11804_v54, %v2460_v34  ;;  %v11817_v27 = vld [vmem:[#allocation2 + $0x30] sm:$0xff]  ;;  %v11819_v47 = vld [vmem:[#allocation2 + $0x38] sm:$0x3]  ;;  %v10055_v14 = vld [vmem:[#allocation7 + $0x408] sm:$0xff]  }
 0x42c   : > { %2551 = vst [vmem:[#allocation2 + $0x71] sm:$0xff] %v2535_v48  ;;  %v2536_v45 = vmax.f32 %v2520_v26, 0.0  ;;  %v2563_v37 = vld [vmem:[#allocation2 + $0x10] sm:$0xff]  ;;  %v2564_v49 = vld [vmem:[#allocation2 + $0x18] sm:$0x3]  ;;  %v2650_v4 = vrot.slane %v11817_v27, 1 }
 0x42d   : > { %v2651_v15 = vrot.slane %v11819_v47, 1  ;;  %2549 = vst [vmem:[#allocation2 + $0x51] sm:$0xff] %v2533_v17  ;;  %v2534_v11 = vmax.f32 %v2518_v29, 0.0  ;;  %v2716_v30 = vrot.slane %v2563_v37, 2  ;;  %v2644_v33 = vrot.slane %v2563_v37, 1  ;;  %v11825_v59 = vld [vmem:[#allocation2 + $0x40] sm:$0xff] }
 0x42e   : > { %v2645_v63 = vrot.slane %v2564_v49, 1  ;;  %2552 = vst [vmem:[#allocation2 + $0x81] sm:$0xff] %v2536_v45  ;;  %v11827_v50 = vld [vmem:[#allocation2 + $0x20] sm:$0xff]  ;;  %v2717_v23 = vrot.slane %v2564_v49, 2  ;;  %v2601_v10 = vpack.c.bf16 %v2563_v37, %v11806_v6  ;;  %v2786_v2 = vpack.c.bf16 %v11825_v59, %v11817_v27  ;;  %v2566_v25 = vld [vmem:[#allocation2 + $0x28] sm:$0x3] }
 0x42f   : > { %2550 = vst [vmem:[#allocation2 + $0x61] sm:$0xff] %v2534_v11  ;;  %v9403_v40 = vpop.f32.mrb[88].mxu0  ;;  %v2785_v3 = vpack.c.bf16 %v11827_v50, %v2563_v37  ;;  %v2647_v5 = vrot.slane %v11827_v50, 1  ;;  %v2648_v53 = vrot.slane %v2566_v25, 1  ;;  %v11845_v22 = vsel %vm958_vm0, %v2650_v4, %v2651_v15  ;;  %v11858_v16 = vld [vmem:[#allocation2 + $0x48] sm:$0x3] }
 0x430   : > { %v11836_v36 = vsel %vm958_vm0, %v2644_v33, %v2645_v63  ;;  %v2523_v62 = vadd.f32 %v9403_v40, %v11785_v52  ;;  %v2473_v58 = vpop.f32.mrb[89].mxu0  ;;  %v11842_v56 = vsel %vm1031_vm1, %v2716_v30, %v2717_v23  ;;  %v2719_v52 = vrot.slane %v11827_v50, 2  ;;  %v10047_v45 = vld [vmem:[#allocation7 + $0x390] sm:$0xff]   ;;  %v10056_v49 = vld [vmem:[#allocation7 + $0x3c8] sm:$0xff]  }
 0x431   : > { %v2705_v43 = vpack.c.bf16 %v11836_v36, %v2643_v55  ;;  %v2521_v39 = vadd.f32 %v11787_v46, %v2473_v58  ;;  %v9404_v20 = vpop.f32.mrb[90].mxu0  ;;  %3569 = vmatprep.mubr.bf16.mxu0 %v2785_v3  ;;  %v2777_v31 = vpack.c.bf16 %v11842_v56, %v2715_v51  ;;  %v11850_v9 = vsel %vm958_vm0, %v2647_v5, %v2648_v53  ;;  %v10048_v23 = vld [vmem:[#allocation7 + $0x350] sm:$0xff]  }
 0x432   : > { %v2539_v57 = vmax.f32 %v2523_v62, 0.0  ;;  %v2524_v19 = vadd.f32 %v9404_v20, %v11789_v38  ;;  %v2476_v44 = vpop.f32.mrb[91].mxu0  ;;  %v11856_v12 = vpack.c.bf16 %v11845_v22, %v11850_v9  ;;  %v2720_v46 = vrot.slane %v2566_v25, 2  ;;  %v10060_v3 = vld [vmem:[#allocation7 + $0x3d0] sm:$0xff]  }
 0x433   : > { %3472 = vmatprep.mubr.bf16.mxu1 %v2705_v43  ;;  %v2537_v35 = vmax.f32 %v2521_v39, 0.0  ;;  %v2522_v24 = vadd.f32 %v11792_v61, %v2476_v44  ;;  %3570 = vmatmul.mubr.bf16.vlgmr.msra.gmra.mrb[96].mxu0 %v2777_v31  ;;  %v2722_v42 = vrot.slane %v11817_v27, 2  ;;  %v2723_v32 = vrot.slane %v11819_v47, 2  ;;  %v11907_v43 = vld [vmem:[#allocation2 + $0x70] sm:$0xff] }
 0x434   : > { %3473 = vmatmul.mubr.bf16.vlgmr.msra.gmra.mrb[80].mxu1 %v2601_v10  ;;  %2555 = vst [vmem:[#allocation2 + $0xd1] sm:$0xff] %v2539_v57  ;;  %v2540_v38 = vmax.f32 %v2524_v19, 0.0  ;;  %3577 = vmatprep.mubr.bf16.mxu0 %v2786_v2  ;;  %v11863_v48 = vld [vmem:[#allocation2 + $0x50] sm:$0xff]  ;;  %v11865_v26 = vld [vmem:[#allocation2 + $0x58] sm:$0x3]  ;;  %v2653_v34 = vrot.slane %v11825_v59, 1  ;;  %v11873_v47 = vsel %vm1031_vm1, %v2719_v52, %v2720_v46  ;;  %v11886_v33 = vpack.c.bf16 %v11817_v27, %v11827_v50 }
 0x435   : > { %9170 = vmatpush3.bf16.msra.mxu1 %v10044_v60  ;;  %2553 = vst [vmem:[#allocation2 + $0xb1] sm:$0xff] %v2537_v35  ;;  %v2538_v61 = vmax.f32 %v2522_v24, 0.0  ;;  %3480 = vmatprep.mubr.bf16.mxu1 %v11856_v12  ;;  %v2654_v18 = vrot.slane %v11858_v16, 1  ;;  %v2656_v17 = vrot.slane %v11863_v48, 1  ;;  %v2657_v29 = vrot.slane %v11865_v26, 1  ;;  %v10049_v27 = vld [vmem:[#allocation7 + $0x398] sm:$0xff]  }
 0x436   : > { %9171 = vmatprep.subr.bf16.mxu1 %v10045_v21  ;;  %2556 = vst [vmem:[#allocation2 + $0xe1] sm:$0xff] %v2540_v38  ;;  %v11875_v37 = vld [vmem:[#allocation2 + $0x60] sm:$0xff]  ;;  %9234 = vmatpush3.bf16.msra.mxu0 %v10054_v8  ;;  %v11882_v30 = vsel %vm1031_vm1, %v2722_v42, %v2723_v32  ;;  %v2728_v63 = vrot.slane %v11863_v48, 2  ;;  %v11889_v51 = vld [vmem:[#allocation2 + $0x68] sm:$0x3]  ;;  %v10058_v50 = vld [vmem:[#allocation7 + $0x410] sm:$0xff]  }
 0x437   : > { %2554 = vst [vmem:[#allocation2 + $0xc1] sm:$0xff] %v2538_v61  ;;  %v9407_v55 = vpop.f32.mrb[92].mxu0  ;;  %v11878_v4 = vsel %vm958_vm0, %v2656_v17, %v2657_v29  ;;  %9235 = vmatprep.subr.bf16.mxu0 %v10055_v14  ;;  %v2787_v25 = vpack.c.bf16 %v11875_v37, %v11863_v48  ;;  %v11899_v40 = vsel %vm958_vm0, %v2653_v34, %v2654_v18  ;;  %v2729_v58 = vrot.slane %v11865_v26, 2  ;;  %v11909_v60 = vld [vmem:[#allocation2 + $0x78] sm:$0x3]  ;;  %v10051_v24 = vld [vmem:[#allocation7 + $0x3a0] sm:$0xff]  }
 0x438   : > { %v2527_v15 = vadd.f32 %v9407_v55, %v11797_v7  ;;  %v2489_v11 = vpop.f32.mrb[93].mxu0  ;;  %v11894_v7 = vpack.c.bf16 %v11882_v30, %v11873_v47  ;;  %v2660_v31 = vrot.slane %v11889_v51, 1  ;;  %v10061_v52 = vld [vmem:[#allocation7 + $0x418] sm:$0xff]   ;;  %v2725_v57 = vrot.slane %v11825_v59, 2  ;;  %v11934_v32 = vld [vmem:[#allocation2 + $0xa8] sm:$0x3] }
 0x439   : > { %9172 = vmatpush3.bf16.msra.mxu1 %v10046_v13  ;;  %v2525_v10 = vadd.f32 %v11799_v28, %v2489_v11  ;;  %v9408_v2 = vpop.f32.mrb[94].mxu0  ;;  %v11904_v28 = vpack.c.bf16 %v11878_v4, %v11899_v40  ;;  %v2726_v19 = vrot.slane %v11858_v16, 2  ;;  %v2662_v44 = vrot.slane %v11907_v43, 1  ;;  %v10050_v8 = vld [vmem:[#allocation7 + $0x358] sm:$0xff]   ;;  %v11924_v13 = vld [vmem:[#allocation2 + $0x80] sm:$0xff] }
 0x43a   : > { %9173 = vmatprep.subr.bf16.mxu1 %v10047_v45  ;;  %v2543_v5 = vmax.f32 %v2527_v15, 0.0  ;;  %v2528_v53 = vadd.f32 %v9408_v2, %v11801_v1  ;;  %v2492_v62 = vpop.f32.mrb[95].mxu0  ;;  %9236 = vmatpush3.bf16.msra.mxu0 %v10056_v49  ;;  %v2659_v1 = vrot.slane %v11875_v37, 1  ;;  %v2663_v46 = vrot.slane %v11909_v60, 1  ;;  %v10062_v42 = vld [vmem:[#allocation7 + $0x3d8] sm:$0xff]   ;;  %v10053_v17 = vld [vmem:[#allocation7 + $0x360] sm:$0xff]  }
 0x43b   : > { %v2541_v39 = vmax.f32 %v2525_v10, 0.0  ;;  %v2526_v20 = vadd.f32 %v11804_v54, %v2492_v62  ;;  %3578 = vmatmul.mubr.bf16.gmra.mrb[100].mxu0 %v11894_v7  ;;  %9237 = vmatprep.subr.bf16.mxu0 %v10058_v50  ;;  %v11922_v35 = vsel %vm1031_vm1, %v2728_v63, %v2729_v58  ;;  %v11930_v14 = vsel %vm1031_vm1, %v2725_v57, %v2726_v19  ;;  %v10064_v29 = vld [vmem:[#allocation7 + $0x420] sm:$0xff]   ;;  %v10067_v10 = vld [vmem:[#allocation7 + $0x428] sm:$0xff]   ;;  %v10063_v50 = vld [vmem:[#allocation7 + $0x3b0] sm:$0xff]  }
 0x43c   : > { %3481 = vmatmul.mubr.bf16.gmra.mrb[84].mxu1 %v11886_v33  ;;  %2559 = vst [vmem:[#allocation2 + $0x111] sm:$0xff] %v2543_v5  ;;  %v2544_v21 = vmax.f32 %v2528_v53, 0.0  ;;  %3585 = vmatprep.mubr.bf16.mxu0 %v2787_v25  ;;  %v11927_v16 = vsel %vm958_vm0, %v2659_v1, %v2660_v31  ;;  %v11932_v38 = vld [vmem:[#allocation2 + $0xb0] sm:$0xff]  ;;  %v11936_v26 = vld [vmem:[#allocation2 + $0xb8] sm:$0x3]  ;;  %v11940_v34 = vpack.c.bf16 %v11922_v35, %v11930_v14  ;;  %v2731_v55 = vrot.slane %v11875_v37, 2 }
 0x43d   : > { %3488 = vmatprep.mubr.bf16.mxu1 %v11904_v28  ;;  %2557 = vst [vmem:[#allocation2 + $0xf1] sm:$0xff] %v2541_v39  ;;  %v2542_v54 = vmax.f32 %v2526_v20, 0.0  ;;  %9174 = vmatpush3.bf16.msra.mxu1 %v10048_v23  ;;  %v11944_v61 = vpack.c.bf16 %v11863_v48, %v11825_v59  ;;  %v11947_v18 = vsel %vm958_vm0, %v2662_v44, %v2663_v46  ;;  %v2732_v15 = vrot.slane %v11889_v51, 2  ;;  %v10057_v59 = vld [vmem:[#allocation7 + $0x3a8] sm:$0xff]   ;;  %v10066_v48 = vld [vmem:[#allocation7 + $0x3e0] sm:$0xff]   ;;  %v10065_v31 = vld [vmem:[#allocation7 + $0x370] sm:$0xff]  }
 0x43e   : > { %2560 = vst [vmem:[#allocation2 + $0x121] sm:$0xff] %v2544_v21  ;;  %9175 = vmatprep.subr.bf16.mxu1 %v10049_v27  ;;  %9238 = vmatpush3.bf16.msra.mxu0 %v10060_v3  ;;  %v2788_v45 = vpack.c.bf16 %v11924_v13, %v11907_v43  ;;  %v11953_v49 = vpack.c.bf16 %v11947_v18, %v11927_v16  ;;  %v2666_v11 = vrot.slane %v11934_v32, 1  ;;  %v2668_v63 = vrot.slane %v11932_v38, 1  ;;  %v10059_v25 = vld [vmem:[#allocation7 + $0x368] sm:$0xff]   ;;  %v11968_v5 = vld [vmem:[#allocation2 + $0xc0] sm:$0xff]  ;;  %v10070_v21 = vld [vmem:[#allocation7 + $0x430] sm:$0xff]  }
 0x43f   : > { %2558 = vst [vmem:[#allocation2 + $0x101] sm:$0xff] %v2542_v54  ;;  %9239 = vmatprep.subr.bf16.mxu0 %v10061_v52  ;;  %v2669_v23 = vrot.slane %v11936_v26, 1  ;;  %v2734_v51 = vrot.slane %v11907_v43, 2  ;;  %v2735_v2 = vrot.slane %v11909_v60, 2  ;;  %v11966_v27 = vsel %vm1031_vm1, %v2731_v55, %v2732_v15  ;;  %v10068_v3 = vld [vmem:[#allocation7 + $0x3e8] sm:$0xff]   ;;  %v10069_v52 = vld [vmem:[#allocation7 + $0x3b8] sm:$0xff]  }
 0x440   : > { %v2667_v53 = vsel %vm958_vm0, %v11809_v41, %v2666_v11  ;;  %v11978_v60 = vld [vmem:[#allocation2 + $0xc8] sm:$0x3]  ;;  %v11986_v20 = vpack.c.bf16 %v11907_v43, %v11875_v37  ;;  %v2738_v1 = vrot.slane %v11934_v32, 2  ;;  %v2789_v57 = vpack.c.bf16 %v11968_v5, %v11932_v38  ;;  %v2587_v46 = vld [vmem:[#allocation2 + $0xd0] sm:$0xff]  ;;  %v10074_v55 = vld [vmem:[#allocation7 + $0x3f8] sm:$0xff]  }
 0x441   : > { %9176 = vmatpush3.bf16.msra.mxu1 %v10050_v8  ;;  %v11973_v62 = vsel %vm958_vm0, %v2668_v63, %v2669_v23  ;;  %v11976_v58 = vsel %vm1031_vm1, %v2734_v51, %v2735_v2  ;;  %v2740_v54 = vrot.slane %v11932_v38, 2  ;;  %v2741_v44 = vrot.slane %v11936_v26, 2  ;;  %v2588_v8 = vld [vmem:[#allocation2 + $0xd8] sm:$0x3]  ;;  %v10072_v37 = vld [vmem:[#allocation7 + $0x3f0] sm:$0xff]   ;;  %v12003_v15 = vld [vmem:[#allocation7 + $0x440] sm:$0xff]  }
 0x442   : > { %9177 = vmatprep.subr.bf16.mxu1 %v10051_v24  ;;  %9240 = vmatpush3.bf16.msra.mxu0 %v10062_v42  ;;  %v11982_v39 = vpack.c.bf16 %v11976_v58, %v11966_v27  ;;  %v2709_v19 = vpack.c.bf16 %v11973_v62, %v2667_v53  ;;  %v2671_v43 = vrot.slane %v11968_v5, 1  ;;  %v2672_v24 = vrot.slane %v11978_v60, 1  ;;  %v10073_v42 = vld [vmem:[#allocation7 + $0x438] sm:$0xff]   ;;  %v2590_v53 = vld [vmem:[#allocation2 + $0xe8] sm:$0x3] }
 0x443   : > { %3586 = vmatmul.mubr.bf16.gmra.mrb[104].mxu0 %v11940_v34  ;;  %9241 = vmatprep.subr.bf16.mxu0 %v10064_v29  ;;  %v2674_v32 = vrot.slane %v2587_v46, 1  ;;  %v10071_v26 = vld [vmem:[#allocation7 + $0x378] sm:$0xff]   ;;  %v2739_v29 = vsel %vm1031_vm1, %v11814_v0, %v2738_v1 }
 0x444   : > { %3489 = vmatmul.mubr.bf16.gmra.mrb[88].mxu1 %v11944_v61  ;;  %3593 = vmatprep.mubr.bf16.mxu0 %v2788_v45  ;;  %v12001_v45 = vsel %vm1031_vm1, %v2740_v54, %v2741_v44  ;;  %v2591_v11 = vld [vmem:[#allocation2 + $0xf0] sm:$0xff]  ;;  %v2592_v63 = vld [vmem:[#allocation2 + $0xf8] sm:$0x3] }
 0x445   : > { %3496 = vmatprep.mubr.bf16.mxu1 %v11953_v49  ;;  %9178 = vmatpush3.bf16.msra.mxu1 %v10053_v17  ;;  %v2675_v17 = vrot.slane %v2588_v8, 1  ;;  %v2781_v23 = vpack.c.bf16 %v12001_v45, %v2739_v29  ;;  %v2681_v1 = vrot.slane %v2592_v63, 1  ;;  %v2595_v29 = vld [vmem:[#allocation2 + $0x110] sm:$0xff] }
 0x446   : > { %9179 = vmatprep.subr.bf16.mxu1 %v10057_v59  ;;  %9242 = vmatpush3.bf16.msra.mxu0 %v10066_v48  ;;  %v2589_v59 = vld [vmem:[#allocation2 + $0xe0] sm:$0xff]  ;;  %v12006_v48 = vsel %vm958_vm0, %v2671_v43, %v2672_v24  ;;  %v12036_v24 = vpack.c.bf16 %v2587_v46, %v11968_v5 }
 0x447   : > { %9243 = vmatprep.subr.bf16.mxu0 %v10067_v10  ;;  %v2605_v10 = vpack.c.bf16 %v11932_v38, %v11806_v6  ;;  %v12012_v51 = vsel %vm958_vm0, %v2674_v32, %v2675_v17  ;;  %v2790_v2 = vpack.c.bf16 %v2589_v59, %v2587_v46  ;;  %v2680_v38 = vrot.slane %v2591_v11, 1  ;;  %v2593_v54 = vld [vmem:[#allocation2 + $0x100] sm:$0xff] }
 0x448   : > { %v2752_v17 = vrot.slane %v2591_v11, 2 }
 0x449   : > { %9180 = vmatpush3.bf16.msra.mxu1 %v10059_v25  ;;  %v12016_v25 = vpack.c.bf16 %v12012_v51, %v12006_v48 }
 0x44a   : > { %9181 = vmatprep.subr.bf16.mxu1 %v10063_v50  ;;  %9244 = vmatpush3.bf16.msra.mxu0 %v10068_v3  ;;  %v2743_v50 = vrot.slane %v11968_v5, 2  ;;  %v2744_v3 = vrot.slane %v11978_v60, 2  ;;  %v12026_v60 = vsel %vm958_vm0, %v2680_v38, %v2681_v1  ;;  %v2749_v5 = vrot.slane %v2589_v59, 2  ;;  %v12051_v38 = vld [vmem:[#allocation2 + $0x120] sm:$0xff] }
 0x44b   : > { %3594 = vmatmul.mubr.bf16.gmra.mrb[108].mxu0 %v11982_v39  ;;  %9245 = vmatprep.subr.bf16.mxu0 %v10070_v21  ;;  %v2677_v21 = vrot.slane %v2589_v59, 1 }
 0x44c   : > { %3497 = vmatmul.mubr.bf16.gmra.mrb[92].mxu1 %v11986_v20  ;;  %3601 = vmatprep.mubr.bf16.mxu0 %v2789_v57  ;;  %v2678_v57 = vrot.slane %v2590_v53, 1 }
 0x44d   : > { %3504 = vmatprep.mubr.bf16.mxu1 %v2709_v19  ;;  %9182 = vmatpush3.bf16.msra.mxu1 %v10065_v31  ;;  %v2746_v31 = vrot.slane %v2587_v46, 2  ;;  %v12023_v19 = vsel %vm1031_vm1, %v2743_v50, %v2744_v3  ;;  %v2750_v46 = vrot.slane %v2590_v53, 2 }
 0x44e   : > { %9183 = vmatprep.subr.bf16.mxu1 %v10069_v52  ;;  %9246 = vmatpush3.bf16.msra.mxu0 %v10072_v37  ;;  %v2747_v52 = vrot.slane %v2588_v8, 2  ;;  %v2594_v37 = vld [vmem:[#allocation2 + $0x108] sm:$0x3]  ;;  %v12039_v8 = vsel %vm958_vm0, %v2677_v21, %v2678_v57  ;;  %v2792_v21 = vpack.c.bf16 %v12051_v38, %v2595_v29 }
 0x44f   : > { %9247 = vmatprep.subr.bf16.mxu0 %v10073_v42  ;;  %v2791_v42 = vpack.c.bf16 %v2593_v54, %v2591_v11  ;;  %v12043_v32 = vpack.c.bf16 %v12026_v60, %v12039_v8  ;;  %v12057_v1 = vsel %vm1031_vm1, %v2749_v5, %v2750_v46  ;;  %v2821_v5 = vpack.c.bf16 %v11873_v47, %v11842_v56  ;;  %v10076_v46 = vld [vmem:[#allocation7 + $0x448] sm:$0xff]   ;;  %v10077_v56 = vld [vmem:[#allocation7 + $0x450] sm:$0xff]   ;;  %v12100_v47 = vld [vmem:[#allocation2 + $0x98] sm:$0x3] }
 0x450   : > { %v12029_v44 = vsel %vm1031_vm1, %v2746_v31, %v2747_v52  ;;  %v12063_v52 = vpack.c.bf16 %v2591_v11, %v2589_v59  ;;  %v2758_v59 = vrot.slane %v2595_v29, 2 }
 0x451   : > { %9184 = vmatpush3.bf16.msra.mxu1 %v10071_v26  ;;  %v12033_v43 = vpack.c.bf16 %v12029_v44, %v12023_v19  ;;  %v2753_v26 = vrot.slane %v2592_v63, 2 }
 0x452   : > { %9248 = vmatpush3.bf16.msra.mxu0 %v10074_v55  ;;  %9409 = vmatprep.subr.bf16.mxu1 %v12003_v15  ;;  %v2596_v55 = vld [vmem:[#allocation2 + $0x118] sm:$0x3] }
 0x453   : > { %3602 = vmatmul.mubr.bf16.gmra.mrb[112].mxu0 %v2781_v23  ;;  %v2683_v23 = vrot.slane %v2593_v54, 1  ;;  %v2687_v50 = vrot.slane %v2596_v55, 1  ;;  %v12049_v3 = vsel %vm1031_vm1, %v2752_v17, %v2753_v26  ;;  %v2756_v17 = vrot.slane %v2594_v37, 2 }
 0x454   : > { %3505 = vmatmul.mubr.bf16.gmra.mrb[96].mxu1 %v2605_v10  ;;  %3609 = vmatprep.mubr.bf16.mxu0 %v2790_v2  ;;  %v2684_v10 = vrot.slane %v2594_v37, 1  ;;  %v2686_v2 = vrot.slane %v2595_v29, 1  ;;  %v12061_v31 = vpack.c.bf16 %v12049_v3, %v12057_v1  ;;  %v2759_v11 = vrot.slane %v2596_v55, 2 }
 0x455   : > { %3512 = vmatprep.mubr.bf16.mxu1 %v12016_v25  ;;  %v12086_v37 = vpack.c.bf16 %v2595_v29, %v2593_v54  ;;  %v2805_v55 = vpack.c.bf16 %v11850_v9, %v11836_v36  ;;  %v2806_v36 = vpack.c.bf16 %v11899_v40, %v11845_v22  ;;  %v2823_v9 = vpack.c.bf16 %v11966_v27, %v11922_v35  ;;  %v10079_v22 = vld [vmem:[#allocation7 + $0x460] sm:$0xff]  }
 0x456   : > { %v12054_v63 = vsel %vm958_vm0, %v2683_v23, %v2684_v10  ;;  %v12066_v53 = vsel %vm958_vm0, %v2686_v2, %v2687_v50  ;;  %v12080_v23 = vsel %vm1031_vm1, %v2758_v59, %v2759_v11  ;;  %v2807_v27 = vpack.c.bf16 %v11927_v16, %v11878_v4  ;;  %v10080_v50 = vld [vmem:[#allocation7 + $0x468] sm:$0xff]   ;;  %v10086_v11 = vld [vmem:[#allocation10 + $0x20] ss:$16 sps:$4 sm:$0xff]  }
 0x457   : > { %v12071_v57 = vpack.c.bf16 %v12066_v53, %v12054_v63  ;;  %v2825_v16 = vpack.c.bf16 %v12023_v19, %v12001_v45  ;;  %v2598_v45 = vld [vmem:[#allocation2 + $0x128] sm:$0x3] }
 0x45b   : > { %3610 = vmatmul.mubr.bf16.gmra.mrb[116].mxu0 %v12033_v43 }
 0x45c   : > { %3513 = vmatmul.mubr.bf16.gmra.mrb[100].mxu1 %v12036_v24  ;;  %3617 = vmatprep.mubr.bf16.mxu0 %v2791_v42  ;;  %v2755_v42 = vrot.slane %v2593_v54, 2  ;;  %v2822_v54 = vpack.c.bf16 %v11930_v14, %v11882_v30  ;;  %v2836_v30 = vrot.slane %v12100_v47, 1 }
 0x45d   : > { %3520 = vmatprep.mubr.bf16.mxu1 %v12043_v32 }
 0x45e   : > { %v12077_v26 = vsel %vm1031_vm1, %v2755_v42, %v2756_v17  ;;  %v2837_v35 = vsel %vm958_vm0, %v11809_v41, %v2836_v30  ;;  %v2829_v42 = vpack.c.bf16 %v11806_v6, %v11924_v13  ;;  %v10115_v30 = vld [vmem:[#allocation10 + $0x124] ss:$16 sps:$4 sm:$0xff]  }
 0x45f   : > { %v12084_v10 = vpack.c.bf16 %v12080_v23, %v12077_v26  ;;  %v2827_v19 = vpack.c.bf16 %v12077_v26, %v12049_v3  ;;  %v2811_v3 = vpack.c.bf16 %v12054_v63, %v12026_v60  ;;  %v10089_v26 = vld [vmem:[#allocation10 + $0x40] ss:$16 sps:$4 sm:$0xff]  }
 0x463   : > { %3618 = vmatmul.mubr.bf16.gmra.mrb[120].mxu0 %v12061_v31 }
 0x464   : > { %3521 = vmatmul.mubr.bf16.gmra.mrb[104].mxu1 %v12063_v52  ;;  %3625 = vmatprep.mubr.bf16.mxu0 %v2792_v21  ;;  %v10081_v21 = vld [vmem:[#allocation7 + $0x470] sm:$0xff]  }
 0x465   : > { %3528 = vmatprep.mubr.bf16.mxu1 %v12071_v57 }
 0x46b   : > { %3626 = vmatmul.mubr.bf16.gmra.mrb[124].mxu0 %v12084_v10 }
 0x46c   : > { %3529 = vmatmul.mubr.bf16.gmra.mrb[108].mxu1 %v12086_v37  ;;  %3763 = vmatprep.mubr.bf16.mxu0 %v11856_v12  ;;  %v2578_v12 = vld [vmem:[#allocation2 + $0x88] sm:$0x3] }
 0x46d   : > { %3666 = vmatprep.mubr.bf16.mxu1 %v2821_v5  ;;  %v2798_v14 = vrot.slane %v2578_v12, 1  ;;  %v2814_v29 = vrot.slane %v2578_v12, 2  ;;  %v10098_v5 = vld [vmem:[#allocation10 + $0xa0] ss:$16 sps:$4 sm:$0xff]   ;;  %v10109_v12 = vld [vmem:[#allocation10 + $0x104] ss:$16 sps:$4 sm:$0xff]  }
 0x473   : > { %3764 = vmatmul.mubr.bf16.vlgmr.msra.gmra.mrb[128].mxu0 %v11886_v33  ;;  %v10078_v33 = vld [vmem:[#allocation7 + $0x458] sm:$0xff]  }
 0x474   : > { %3667 = vmatmul.mubr.bf16.vlgmr.msra.gmra.mrb[112].mxu1 %v2805_v55  ;;  %3771 = vmatprep.mubr.bf16.mxu0 %v11904_v28  ;;  %v2797_v28 = vrot.slane %v11924_v13, 1  ;;  %v10101_v55 = vld [vmem:[#allocation10 + $0xc0] ss:$16 sps:$4 sm:$0xff]  }
 0x475   : > { %9410 = vmatpush3.bf16.msra.mxu1 %v12003_v15  ;;  %3674 = vmatprep.mubr.bf16.mxu1 %v2822_v54  ;;  %v2813_v15 = vrot.slane %v11924_v13, 2  ;;  %v2826_v13 = vpack.c.bf16 %v12057_v1, %v12029_v44  ;;  %v2816_v44 = vrot.slane %v12051_v38, 2  ;;  %v10106_v54 = vld [vmem:[#allocation10 + $0xe4] ss:$16 sps:$4 sm:$0xff]  }
 0x476   : > { %9411 = vmatprep.subr.bf16.mxu1 %v10076_v46  ;;  %v2799_v40 = vsel %vm958_vm0, %v2797_v28, %v2798_v14  ;;  %v10118_v28 = vld [vmem:[#allocation10 + $0x824] ss:$16 sps:$4 sm:$0xff]  }
 0x477   : > { %v2843_v2 = vpack.c.bf16 %v2837_v35, %v2799_v40  ;;  %v2808_v4 = vpack.c.bf16 %v2799_v40, %v11947_v18  ;;  %v2600_v18 = vld [vmem:[#allocation2 + $0x138] sm:$0x3]  ;;  %v12165_v40 = vld [vmem:[#allocation8 + $0x1] ss:$0 sm:$0xff] }
 0x478   : > { %v2839_v17 = vrot.slane %v2600_v18, 1 }
 0x479   : > { %9412 = vmatpush3.bf16.msra.mxu1 %v10076_v46  ;;  %v10103_v46 = vld [vmem:[#allocation10 + $0xc4] ss:$16 sps:$4 sm:$0xff]  }
 0x47a   : > { %9413 = vmatprep.subr.bf16.mxu1 %v10077_v56 }
 0x47b   : > { %3772 = vmatmul.mubr.bf16.gmra.mrb[132].mxu0 %v11944_v61  ;;  %v12115_v61 = vsel %vm1031_vm1, %v2813_v15, %v2814_v29  ;;  %v10116_v29 = vld [vmem:[#allocation10 + $0x820] ss:$16 sps:$4 sm:$0xff]  }
 0x47c   : > { %3675 = vmatmul.mubr.bf16.gmra.mrb[116].mxu1 %v2806_v36  ;;  %3779 = vmatprep.mubr.bf16.mxu0 %v11953_v49  ;;  %v2824_v49 = vpack.c.bf16 %v12115_v61, %v11976_v58  ;;  %v10082_v58 = vld [vmem:[#allocation7 + $0x478] sm:$0xff]   ;;  %v10110_v36 = vld [vmem:[#allocation10 + $0x800] ss:$16 sps:$4 sm:$0xff]  }
 0x47d   : > { %3682 = vmatprep.mubr.bf16.mxu1 %v2823_v9  ;;  %9414 = vmatpush3.bf16.msra.mxu1 %v10077_v56  ;;  %v10104_v56 = vld [vmem:[#allocation10 + $0xe0] ss:$16 sps:$4 sm:$0xff]   ;;  %v10112_v9 = vld [vmem:[#allocation10 + $0x804] ss:$16 sps:$4 sm:$0xff]  }
 0x47e   : > { %9415 = vmatprep.subr.bf16.mxu1 %v10078_v33 }
 0x481   : > { %9416 = vmatpush3.bf16.msra.mxu1 %v10078_v33  ;;  %v10113_v33 = vld [vmem:[#allocation10 + $0x120] ss:$16 sps:$4 sm:$0xff]  }
 0x482   : > { %9417 = vmatprep.subr.bf16.mxu1 %v10079_v22 }
 0x483   : > { %3780 = vmatmul.mubr.bf16.gmra.mrb[136].mxu0 %v11986_v20  ;;  %v2809_v20 = vpack.c.bf16 %v12006_v48, %v11973_v62  ;;  %v2800_v62 = vrot.slane %v12051_v38, 1  ;;  %v2801_v48 = vrot.slane %v2598_v45, 1 }
 0x484   : > { %3683 = vmatmul.mubr.bf16.gmra.mrb[120].mxu1 %v2807_v27  ;;  %3787 = vmatprep.mubr.bf16.mxu0 %v2843_v2 }
 0x485   : > { %3690 = vmatprep.mubr.bf16.mxu1 %v2824_v49  ;;  %9418 = vmatpush3.bf16.msra.mxu1 %v10079_v22 }
 0x486   : > { %9419 = vmatprep.subr.bf16.mxu1 %v10080_v50 }
 0x489   : > { %9420 = vmatpush3.bf16.msra.mxu1 %v10080_v50 }
 0x48a   : > { %9421 = vmatprep.subr.bf16.mxu1 %v10081_v21 }
 0x48b   : > { %3788 = vmatmul.mubr.bf16.gmra.mrb[140].mxu0 %v2829_v42 }
 0x48c   : > { %3691 = vmatmul.mubr.bf16.gmra.mrb[124].mxu1 %v2808_v4  ;;  %3795 = vmatprep.mubr.bf16.mxu0 %v12016_v25  ;;  %v2810_v25 = vpack.c.bf16 %v12039_v8, %v12012_v51  ;;  %v2840_v51 = vsel %vm958_vm0, %v11809_v41, %v2839_v17  ;;  %v2846_v41 = vrot.slane %v12100_v47, 2  ;;  %v10107_v47 = vld [vmem:[#allocation10 + $0x100] ss:$16 sps:$4 sm:$0xff]  }
 0x48d   : > { %3698 = vmatprep.mubr.bf16.mxu1 %v2825_v16  ;;  %9422 = vmatpush3.bf16.msra.mxu1 %v10081_v21 }
 0x48e   : > { %9423 = vmatprep.subr.bf16.mxu1 %v10082_v58  ;;  %v2847_v60 = vsel %vm1031_vm1, %v11814_v0, %v2846_v41 }
 0x48f   : > { %v2853_v63 = vpack.c.bf16 %v2847_v60, %v12115_v61  ;;  %v10124_v60 = vld [vmem:[#allocation10 + $0x844] ss:$16 sps:$4 sm:$0xff]  }
 0x491   : > { %9424 = vmatpush3.bf16.msra.mxu1 %v10082_v58 }
 0x492   : > { %6547 = vmatprep.subr.bf16.mxu1 %v10112_v9  ;;  %v10136_v9 = vld [vmem:[#allocation10 + $0x884] ss:$16 sps:$4 sm:$0xff]  }
 0x493   : > { %3796 = vmatmul.mubr.bf16.gmra.mrb[144].mxu0 %v12036_v24  ;;  %v2817_v24 = vrot.slane %v2598_v45, 2 }
 0x494   : > { %3699 = vmatmul.mubr.bf16.gmra.mrb[128].mxu1 %v2809_v20  ;;  %3803 = vmatprep.mubr.bf16.mxu0 %v12043_v32  ;;  %v2802_v32 = vsel %vm958_vm0, %v2800_v62, %v2801_v48 }
 0x495   : > { %3706 = vmatprep.mubr.bf16.mxu1 %v2826_v13  ;;  %v2818_v8 = vsel %vm1031_vm1, %v2816_v44, %v2817_v24  ;;  %v2844_v1 = vpack.c.bf16 %v2840_v51, %v2802_v32  ;;  %v2812_v59 = vpack.c.bf16 %v2802_v32, %v12066_v53  ;;  %v10088_v53 = vld [vmem:[#allocation10 + $0x24] ss:$16 sps:$4 sm:$0xff]  }
 0x49b   : > { %3804 = vmatmul.mubr.bf16.gmra.mrb[148].mxu0 %v12063_v52  ;;  %v2828_v52 = vpack.c.bf16 %v2818_v8, %v12080_v23  ;;  %v10094_v23 = vld [vmem:[#allocation10 + $0x64] ss:$16 sps:$4 sm:$0xff]  }
 0x49c   : > { %3707 = vmatmul.mubr.bf16.gmra.mrb[132].mxu1 %v2810_v25  ;;  %3811 = vmatprep.mubr.bf16.mxu0 %v12071_v57  ;;  %v2830_v57 = vpack.c.bf16 %v11806_v6, %v12051_v38  ;;  %v2849_v6 = vrot.slane %v2600_v18, 2 }
 0x49d   : > { %3714 = vmatprep.mubr.bf16.mxu1 %v2827_v19 }
 0x4a3   : > { %3812 = vmatmul.mubr.bf16.gmra.mrb[152].mxu0 %v12086_v37  ;;  %v10100_v37 = vld [vmem:[#allocation10 + $0xa4] ss:$16 sps:$4 sm:$0xff]  }
 0x4a4   : > { %3715 = vmatmul.mubr.bf16.gmra.mrb[136].mxu1 %v2811_v3  ;;  %3819 = vmatprep.mubr.bf16.mxu0 %v2844_v1  ;;  %v10119_v1 = vld [vmem:[#allocation10 + $0x140] ss:$16 sps:$4 sm:$0xff]  }
 0x4a5   : > { %3722 = vmatprep.mubr.bf16.mxu1 %v2828_v52  ;;  %v10121_v52 = vld [vmem:[#allocation10 + $0x144] ss:$16 sps:$4 sm:$0xff]  }
 0x4ab   : > { %3820 = vmatmul.mubr.bf16.gmra.mrb[156].mxu0 %v2830_v57  ;;  %v10122_v57 = vld [vmem:[#allocation10 + $0x840] ss:$16 sps:$4 sm:$0xff]  }
 0x4ac   : > { %3723 = vmatmul.mubr.bf16.gmra.mrb[140].mxu1 %v2812_v59 }
 0x4ad   : > { %9425 = vmatprep.mubr.bf16.mxu1 %v11894_v7  ;;  %v2850_v7 = vsel %vm1031_vm1, %v11814_v0, %v2849_v6  ;;  %v10097_v0 = vld [vmem:[#allocation10 + $0x84] ss:$16 sps:$4 sm:$0xff]  }
 0x4ae   : > { %v2854_v38 = vpack.c.bf16 %v2850_v7, %v2818_v8  ;;  %v10130_v6 = vld [vmem:[#allocation10 + $0x864] ss:$16 sps:$4 sm:$0xff]  }
 0x4b4   : > { %9426 = vmatmul.mubr.bf16.vlgmr.msra.gmra.mrb[144].mxu1 %v11940_v34  ;;  %v10083_v34 = vld [vmem:[#allocation10] ss:$16 sps:$4 sm:$0xff]  }
 0x4b5   : > { %9429 = vmatprep.mubr.bf16.mxu1 %v11982_v39  ;;  %v10085_v39 = vld [vmem:[#allocation10 + $0x4] ss:$16 sps:$4 sm:$0xff]   ;;  %6548 = vmatpush1.bf16.msra.mxu1 %v10110_v36 }
 0x4b6   : > { %6095 = vmatprep.subr.bf16.mxu0 %v10085_v39  ;;  %6549 = vmatprep.subr.bf16.mxu1 %v10118_v28  ;;  %v10125_v39 = vld [vmem:[#allocation10 + $0x160] ss:$16 sps:$4 sm:$0xff]  }
 0x4b7   : > { %6096 = vmatpush1.bf16.msra.mxu0 %v10083_v34 }
 0x4b8   : > { %6097 = vmatprep.subr.bf16.mxu0 %v10088_v53 }
 0x4b9   : > { %6550 = vmatpush1.bf16.msra.mxu1 %v10116_v29  ;;  %v10137_v29 = vld [vmem:[#allocation10 + $0x1a0] ss:$16 sps:$4 sm:$0xff]  }
 0x4ba   : > { %6551 = vmatprep.subr.bf16.mxu1 %v10124_v60 }
 0x4bb   : > { %6098 = vmatpush1.bf16.msra.mxu0 %v10086_v11 }
 0x4bc   : > { %9430 = vmatmul.mubr.bf16.gmra.mrb[148].mxu1 %v2853_v63  ;;  %v10127_v63 = vld [vmem:[#allocation10 + $0x164] ss:$16 sps:$4 sm:$0xff]  }
 0x4bd   : > { %9433 = vmatprep.mubr.bf16.mxu1 %v12033_v43  ;;  %v10091_v43 = vld [vmem:[#allocation10 + $0x44] ss:$16 sps:$4 sm:$0xff]   ;;  %6552 = vmatpush1.bf16.msra.mxu1 %v10122_v57 }
 0x4be   : > { %6099 = vmatprep.subr.bf16.mxu0 %v10091_v43  ;;  %6553 = vmatprep.subr.bf16.mxu1 %v10130_v6 }
 0x4bf   : > { %6100 = vmatpush1.bf16.msra.mxu0 %v10089_v26  ;;  %v10128_v26 = vld [vmem:[#allocation10 + $0x860] ss:$16 sps:$4 sm:$0xff]  }
 0x4c0   : > { %6101 = vmatprep.subr.bf16.mxu0 %v10094_v23 }
 0x4c1   : > { %6554 = vmatpush1.bf16.msra.mxu1 %v10128_v26 }
 0x4c2   : > { %6555 = vmatprep.subr.bf16.mxu1 %v10136_v9 }
 0x4c4   : > { %9434 = vmatmul.mubr.bf16.gmra.mrb[152].mxu1 %v12061_v31  ;;  %v10092_v31 = vld [vmem:[#allocation10 + $0x60] ss:$16 sps:$4 sm:$0xff]  }
 0x4c5   : > { %9437 = vmatprep.mubr.bf16.mxu1 %v12084_v10  ;;  %6102 = vmatpush1.bf16.msra.mxu0 %v10092_v31  ;;  %v10095_v10 = vld [vmem:[#allocation10 + $0x80] ss:$16 sps:$4 sm:$0xff]  }
 0x4c6   : > { %6103 = vmatprep.subr.bf16.mxu0 %v10097_v0 }
 0x4c9   : > { %6104 = vmatpush1.bf16.msra.mxu0 %v10095_v10 }
 0x4ca   : > { %6105 = vmatprep.subr.bf16.mxu0 %v10100_v37 }
 0x4cc   : > { %9438 = vmatmul.mubr.bf16.gmra.mrb[156].mxu1 %v2854_v38 }
 0x4cd   : > { %6106 = vmatpush1.bf16.msra.mxu0 %v10098_v5 }
 0x4ce   : > { %6107 = vmatprep.subr.bf16.mxu0 %v10103_v46 }
 0x4d1   : > { %6108 = vmatpush1.bf16.msra.mxu0 %v10101_v55 }
 0x4d2   : > { %6109 = vmatprep.subr.bf16.mxu0 %v10106_v54  ;;  %v10131_v54 = vld [vmem:[#allocation10 + $0x180] ss:$16 sps:$4 sm:$0xff]  }
 0x4d5   : > { %6110 = vmatpush1.bf16.msra.mxu0 %v10104_v56  ;;  %v10133_v56 = vld [vmem:[#allocation10 + $0x184] ss:$16 sps:$4 sm:$0xff]  }
 0x4d6   : > { %6111 = vmatprep.subr.bf16.mxu0 %v10109_v12 }
 0x4d9   : > { %6112 = vmatpush1.bf16.msra.mxu0 %v10107_v47  ;;  %v10134_v47 = vld [vmem:[#allocation10 + $0x880] ss:$16 sps:$4 sm:$0xff]  }
 0x4da   : > { %6113 = vmatprep.subr.bf16.mxu0 %v10115_v30  ;;  %v10139_v30 = vld [vmem:[#allocation10 + $0x1a4] ss:$16 sps:$4 sm:$0xff]   ;;  %6556 = vmatpush1.bf16.msra.mxu1 %v10134_v47 }
 0x4dd   : > { %6114 = vmatpush1.bf16.msra.mxu0 %v10113_v33  ;;  %v10142_v33 = vld [vmem:[#allocation10 + $0x8a4] ss:$16 sps:$4 sm:$0xff]  }
 0x4de   : > { %6115 = vmatprep.subr.bf16.mxu0 %v10121_v52  ;;  %6557 = vmatprep.subr.bf16.mxu1 %v10142_v33  ;;  %v10152_v52 = vld [vmem:[#allocation10 + $0x8e0] ss:$16 sps:$4 sm:$0xff]  }
 0x4e1   : > { %6116 = vmatpush1.bf16.msra.mxu0 %v10119_v1 }
 0x4e2   : > { %6117 = vmatprep.subr.bf16.mxu0 %v10127_v63 }
 0x4e5   : > { %6118 = vmatpush1.bf16.msra.mxu0 %v10125_v39 }
 0x4e6   : > { %6119 = vmatprep.subr.bf16.mxu0 %v10133_v56 }
 0x4e9   : > { %6120 = vmatpush1.bf16.msra.mxu0 %v10131_v54 }
 0x4ea   : > { %6121 = vmatprep.subr.bf16.mxu0 %v10139_v30 }
 0x4ed   : > { %6122 = vmatpush1.bf16.msra.mxu0 %v10137_v29 }
 0x506   : > { %v9121_v14 = vpop.f32.mrb[96].mxu0 }
 0x507   : > { %v9057_v15 = vpop.f32.mrb[80].mxu1  ;;  %v9122_v22 = vpop.f32.mrb[97].mxu0 }
 0x508   : > { %v9058_v35 = vpop.f32.mrb[81].mxu1  ;;  %v9123_v61 = vadd.f32 %v9122_v22, %v9121_v14  ;;  %v9124_v2 = vpop.f32.mrb[98].mxu0 }
 0x509   : > { %v9059_v27 = vadd.f32 %v9058_v35, %v9057_v15  ;;  %v9060_v49 = vpop.f32.mrb[82].mxu1  ;;  %v9125_v50 = vpop.f32.mrb[99].mxu0 }
 0x50a   : > { %v9061_v21 = vpop.f32.mrb[83].mxu1  ;;  %v9126_v4 = vadd.f32 %v9125_v50, %v9124_v2 }
 0x50b   : > { %v3475_v42 = vadd.f32 %v9059_v27, %v12165_v40  ;;  %v9062_v16 = vadd.f32 %v9061_v21, %v9060_v49 }
 0x50d   : > { %v3478_v58 = vadd.f32 %v9062_v16, %v12165_v40  ;;  %v12169_v20 = vadd.f32 %v9123_v61, %v3475_v42  ;;  %v10140_v61 = vld [vmem:[#allocation10 + $0x8a0] ss:$16 sps:$4 sm:$0xff]  }
 0x50e   : > { %v9127_v13 = vpop.f32.mrb[100].mxu0  ;;  %6558 = vmatpush1.bf16.msra.mxu1 %v10140_v61 }
 0x50f   : > { %v9063_v18 = vpop.f32.mrb[84].mxu1  ;;  %v12171_v45 = vadd.f32 %v9126_v4, %v3478_v58  ;;  %v9128_v25 = vpop.f32.mrb[101].mxu0 }
 0x510   : > { %v9064_v19 = vpop.f32.mrb[85].mxu1  ;;  %v9129_v17 = vadd.f32 %v9128_v25, %v9127_v13  ;;  %v9130_v48 = vpop.f32.mrb[102].mxu0  ;;  %v10143_v13 = vld [vmem:[#allocation10 + $0x1c0] ss:$16 sps:$4 sm:$0xff]  }
 0x511   : > { %v9065_v62 = vadd.f32 %v9064_v19, %v9063_v18  ;;  %v9066_v44 = vpop.f32.mrb[86].mxu1  ;;  %v9131_v24 = vpop.f32.mrb[103].mxu0  ;;  %v10145_v18 = vld [vmem:[#allocation10 + $0x1c4] ss:$16 sps:$4 sm:$0xff]   ;;  %v10146_v25 = vld [vmem:[#allocation10 + $0x8c0] ss:$16 sps:$4 sm:$0xff]  }
 0x512   : > { %v9067_v32 = vpop.f32.mrb[87].mxu1  ;;  %v9132_v8 = vadd.f32 %v9131_v24, %v9130_v48  ;;  %v10151_v48 = vld [vmem:[#allocation10 + $0x1e4] ss:$16 sps:$4 sm:$0xff]   ;;  %6123 = vmatprep.subr.bf16.mxu0 %v10145_v18 }
 0x513   : > { %v3483_v51 = vadd.f32 %v9065_v62, %v12165_v40  ;;  %v9068_v3 = vadd.f32 %v9067_v32, %v9066_v44  ;;  %v10148_v62 = vld [vmem:[#allocation10 + $0x8c4] ss:$16 sps:$4 sm:$0xff]   ;;  %6124 = vmatpush1.bf16.msra.mxu0 %v10143_v13 }
 0x514   : > { %v10154_v44 = vld [vmem:[#allocation10 + $0x8e4] ss:$16 sps:$4 sm:$0xff]   ;;  %6559 = vmatprep.subr.bf16.mxu1 %v10148_v62  ;;  %6125 = vmatprep.subr.bf16.mxu0 %v10151_v48 }
 0x515   : > { %v3486_v59 = vadd.f32 %v9068_v3, %v12165_v40  ;;  %v12175_v41 = vadd.f32 %v9129_v17, %v3483_v51  ;;  %6560 = vmatpush1.bf16.msra.mxu1 %v10146_v25 }
 0x516   : > { %v9133_v7 = vpop.f32.mrb[104].mxu0  ;;  %6561 = vmatprep.subr.bf16.mxu1 %v10154_v44 }
 0x517   : > { %v9069_v38 = vpop.f32.mrb[88].mxu1  ;;  %v12177_v34 = vadd.f32 %v9132_v8, %v3486_v59  ;;  %v9134_v53 = vpop.f32.mrb[105].mxu0  ;;  %v10149_v8 = vld [vmem:[#allocation10 + $0x1e0] ss:$16 sps:$4 sm:$0xff]  }
 0x518   : > { %v9070_v11 = vpop.f32.mrb[89].mxu1  ;;  %v9135_v43 = vadd.f32 %v9134_v53, %v9133_v7  ;;  %v9136_v31 = vpop.f32.mrb[106].mxu0  ;;  %6126 = vmatpush1.bf16.msra.mxu0 %v10149_v8 }
 0x519   : > { %v9071_v23 = vadd.f32 %v9070_v11, %v9069_v38  ;;  %v9072_v10 = vpop.f32.mrb[90].mxu1  ;;  %v9137_v0 = vpop.f32.mrb[107].mxu0  ;;  %6562 = vmatpush1.bf16.msra.mxu1 %v10152_v52 }
 0x51a   : > { %v9073_v37 = vpop.f32.mrb[91].mxu1  ;;  %v9138_v55 = vadd.f32 %v9137_v0, %v9136_v31  ;;  %v10160_v31 = vld [vmem:[#allocation10 + $0xc] ss:$16 sps:$4 sm:$0xff]  }
 0x51b   : > { %v3491_v5 = vadd.f32 %v9071_v23, %v12165_v40  ;;  %v9074_v46 = vadd.f32 %v9073_v37, %v9072_v10  ;;  %v13214_v23 = vmov 0   ;;  %6660 = vmatprep.subr.bf16.mxu1 %v10160_v31 }
 0x51c   : > { %6579 = vmatprep.mubr.bf16.mxu1 %v13214_v23 }
 0x51d   : > { %v3494_v12 = vadd.f32 %v9074_v46, %v12165_v40  ;;  %v12181_v36 = vadd.f32 %v9135_v43, %v3491_v5  ;;  %v10157_v43 = vld [vmem:[#allocation10 + $0x204] ss:$16 sps:$4 sm:$0xff]  }
 0x51e   : > { %v9139_v28 = vpop.f32.mrb[108].mxu0  ;;  %6208 = vmatprep.subr.bf16.mxu0 %v10157_v43 }
 0x51f   : > { %v9075_v14 = vpop.f32.mrb[92].mxu1  ;;  %v12183_v15 = vadd.f32 %v9138_v55, %v3494_v12  ;;  %v9140_v22 = vpop.f32.mrb[109].mxu0 }
 0x520   : > { %v9076_v35 = vpop.f32.mrb[93].mxu1  ;;  %v9141_v27 = vadd.f32 %v9140_v22, %v9139_v28  ;;  %v9142_v49 = vpop.f32.mrb[110].mxu0 }
 0x521   : > { %v9077_v2 = vadd.f32 %v9076_v35, %v9075_v14  ;;  %v9078_v50 = vpop.f32.mrb[94].mxu1  ;;  %v9143_v21 = vpop.f32.mrb[111].mxu0 }
 0x522   : > { %v9079_v42 = vpop.f32.mrb[95].mxu1  ;;  %v9144_v16 = vadd.f32 %v9143_v21, %v9142_v49 }
 0x523   : > { %v3499_v4 = vadd.f32 %v9077_v2, %v12165_v40  ;;  %v9080_v58 = vadd.f32 %v9079_v42, %v9078_v50 }
 0x525   : > { %v3502_v19 = vadd.f32 %v9080_v58, %v12165_v40  ;;  %v12187_v17 = vadd.f32 %v9141_v27, %v3499_v4 }
 0x526   : > { %v9145_v24 = vpop.f32.mrb[112].mxu0 }
 0x527   : > { %v9081_v32 = vpop.f32.mrb[96].mxu1  ;;  %v12189_v51 = vadd.f32 %v9144_v16, %v3502_v19  ;;  %v9146_v3 = vpop.f32.mrb[113].mxu0 }
 0x528   : > { %v9082_v1 = vpop.f32.mrb[97].mxu1  ;;  %v9147_v57 = vadd.f32 %v9146_v3, %v9145_v24  ;;  %v9148_v60 = vpop.f32.mrb[114].mxu0 }
 0x529   : > { %v9083_v59 = vadd.f32 %v9082_v1, %v9081_v32  ;;  %v9084_v63 = vpop.f32.mrb[98].mxu1  ;;  %v9149_v6 = vpop.f32.mrb[115].mxu0 }
 0x52a   : > { %v9085_v7 = vpop.f32.mrb[99].mxu1  ;;  %v9150_v39 = vadd.f32 %v9149_v6, %v9148_v60 }
 0x52b   : > { %v3507_v38 = vadd.f32 %v9083_v59, %v12165_v40  ;;  %v9086_v53 = vadd.f32 %v9085_v7, %v9084_v63 }
 0x52d   : > { %v3510_v11 = vadd.f32 %v9086_v53, %v12165_v40  ;;  %v12193_v26 = vadd.f32 %v9147_v57, %v3507_v38 }
 0x52e   : > { %v9151_v10 = vpop.f32.mrb[116].mxu0 }
 0x52f   : > { %v9087_v0 = vpop.f32.mrb[100].mxu1  ;;  %v12196_v37 = vadd.f32 %v9150_v39, %v3510_v11  ;;  %v9152_v5 = vpop.f32.mrb[117].mxu0 }
 0x530   : > { %v9088_v55 = vpop.f32.mrb[101].mxu1  ;;  %v9153_v46 = vadd.f32 %v9152_v5, %v9151_v10  ;;  %v9154_v56 = vpop.f32.mrb[118].mxu0 }
 0x531   : > { %v9089_v54 = vadd.f32 %v9088_v55, %v9087_v0  ;;  %v9090_v47 = vpop.f32.mrb[102].mxu1  ;;  %v9155_v12 = vpop.f32.mrb[119].mxu0 }
 0x532   : > { %v9091_v9 = vpop.f32.mrb[103].mxu1  ;;  %v9156_v33 = vadd.f32 %v9155_v12, %v9154_v56 }
 0x533   : > { %v3515_v30 = vadd.f32 %v9089_v54, %v12165_v40  ;;  %v9092_v28 = vadd.f32 %v9091_v9, %v9090_v47 }
 0x535   : > { %v3518_v14 = vadd.f32 %v9092_v28, %v12165_v40  ;;  %v12200_v29 = vadd.f32 %v9153_v46, %v3515_v30 }
 0x536   : > { %v9157_v22 = vpop.f32.mrb[120].mxu0 }
 0x537   : > { %v9093_v35 = vpop.f32.mrb[104].mxu1  ;;  %v12202_v61 = vadd.f32 %v9156_v33, %v3518_v14  ;;  %v9158_v27 = vpop.f32.mrb[121].mxu0 }
 0x538   : > { %v9094_v2 = vpop.f32.mrb[105].mxu1  ;;  %v9159_v49 = vadd.f32 %v9158_v27, %v9157_v22  ;;  %v9160_v21 = vpop.f32.mrb[122].mxu0 }
 0x539   : > { %v9095_v50 = vadd.f32 %v9094_v2, %v9093_v35  ;;  %v9096_v42 = vpop.f32.mrb[106].mxu1  ;;  %v9161_v4 = vpop.f32.mrb[123].mxu0 }
 0x53a   : > { %v9097_v16 = vpop.f32.mrb[107].mxu1  ;;  %v9162_v13 = vadd.f32 %v9161_v4, %v9160_v21 }
 0x53b   : > { %v3523_v58 = vadd.f32 %v9095_v50, %v12165_v40  ;;  %v9098_v18 = vadd.f32 %v9097_v16, %v9096_v42 }
 0x53d   : > { %v3526_v25 = vadd.f32 %v9098_v18, %v12165_v40  ;;  %v12206_v19 = vadd.f32 %v9159_v49, %v3523_v58 }
 0x53e   : > { %v9163_v62 = vpop.f32.mrb[124].mxu0 }
 0x53f   : > { %v9099_v48 = vpop.f32.mrb[108].mxu1  ;;  %v12208_v44 = vadd.f32 %v9162_v13, %v3526_v25  ;;  %v9164_v24 = vpop.f32.mrb[125].mxu0 }
 0x540   : > { %v9100_v32 = vpop.f32.mrb[109].mxu1  ;;  %v9165_v8 = vadd.f32 %v9164_v24, %v9163_v62  ;;  %v9166_v1 = vpop.f32.mrb[126].mxu0 }
 0x541   : > { %v9101_v3 = vadd.f32 %v9100_v32, %v9099_v48  ;;  %v9102_v52 = vpop.f32.mrb[110].mxu1  ;;  %v9167_v57 = vpop.f32.mrb[127].mxu0 }
 0x542   : > { %v9103_v59 = vpop.f32.mrb[111].mxu1  ;;  %v9168_v63 = vadd.f32 %v9167_v57, %v9166_v1 }
 0x543   : > { %v3531_v60 = vadd.f32 %v9101_v3, %v12165_v40  ;;  %v9104_v6 = vadd.f32 %v9103_v59, %v9102_v52 }
 0x545   : > { %v3534_v7 = vadd.f32 %v9104_v6, %v12165_v40  ;;  %v12212_v38 = vadd.f32 %v9165_v8, %v3531_v60 }
 0x546   : > { %v9249_v39 = vpop.f32.mrb[128].mxu0 }
 0x547   : > { %v9185_v53 = vpop.f32.mrb[112].mxu1  ;;  %v12214_v11 = vadd.f32 %v9168_v63, %v3534_v7  ;;  %v9250_v43 = vpop.f32.mrb[129].mxu0 }
 0x548   : > { %v9186_v31 = vpop.f32.mrb[113].mxu1  ;;  %v9251_v10 = vadd.f32 %v9250_v43, %v9249_v39  ;;  %v9252_v5 = vpop.f32.mrb[130].mxu0 }
 0x549   : > { %v9187_v0 = vadd.f32 %v9186_v31, %v9185_v53  ;;  %v9188_v55 = vpop.f32.mrb[114].mxu1  ;;  %v9253_v46 = vpop.f32.mrb[131].mxu0 }
 0x54a   : > { %v9189_v54 = vpop.f32.mrb[115].mxu1  ;;  %v9254_v47 = vadd.f32 %v9253_v46, %v9252_v5 }
 0x54b   : > { %v3669_v56 = vadd.f32 %v9187_v0, %v12169_v20  ;;  %v9190_v12 = vadd.f32 %v9189_v54, %v9188_v55 }
 0x54d   : > { %v3672_v40 = vadd.f32 %v9190_v12, %v12171_v45  ;;  %v12218_v9 = vadd.f32 %v9251_v10, %v3669_v56 }
 0x54e   : > { %v9255_v30 = vpop.f32.mrb[132].mxu0 }
 0x54f   : > { %v9191_v33 = vpop.f32.mrb[116].mxu1  ;;  %v12220_v28 = vadd.f32 %v9254_v47, %v3672_v40  ;;  %v9256_v14 = vpop.f32.mrb[133].mxu0 }
 0x550   : > { %v9192_v22 = vpop.f32.mrb[117].mxu1  ;;  %v9257_v35 = vadd.f32 %v9256_v14, %v9255_v30  ;;  %v9258_v2 = vpop.f32.mrb[134].mxu0 }
 0x551   : > { %v9193_v27 = vadd.f32 %v9192_v22, %v9191_v33  ;;  %v9194_v49 = vpop.f32.mrb[118].mxu1  ;;  %v9259_v50 = vpop.f32.mrb[135].mxu0 }
 0x552   : > { %v9195_v21 = vpop.f32.mrb[119].mxu1  ;;  %v9260_v42 = vadd.f32 %v9259_v50, %v9258_v2 }
 0x553   : > { %v3677_v20 = vadd.f32 %v9193_v27, %v12175_v41  ;;  %v9196_v4 = vadd.f32 %v9195_v21, %v9194_v49 }
 0x555   : > { %v3680_v45 = vadd.f32 %v9196_v4, %v12177_v34  ;;  %v12224_v16 = vadd.f32 %v9257_v35, %v3677_v20 }
 0x556   : > { %v9261_v58 = vpop.f32.mrb[136].mxu0 }
 0x557   : > { %v9197_v13 = vpop.f32.mrb[120].mxu1  ;;  %v12226_v18 = vadd.f32 %v9260_v42, %v3680_v45  ;;  %v9262_v25 = vpop.f32.mrb[137].mxu0 }
 0x558   : > { %v9198_v62 = vpop.f32.mrb[121].mxu1  ;;  %v9263_v48 = vadd.f32 %v9262_v25, %v9261_v58  ;;  %v9264_v32 = vpop.f32.mrb[138].mxu0 }
 0x559   : > { %v9199_v24 = vadd.f32 %v9198_v62, %v9197_v13  ;;  %v9200_v8 = vpop.f32.mrb[122].mxu1  ;;  %v9265_v3 = vpop.f32.mrb[139].mxu0 }
 0x55a   : > { %v9201_v1 = vpop.f32.mrb[123].mxu1  ;;  %v9266_v52 = vadd.f32 %v9265_v3, %v9264_v32 }
 0x55b   : > { %v3685_v41 = vadd.f32 %v9199_v24, %v12181_v36  ;;  %v9202_v57 = vadd.f32 %v9201_v1, %v9200_v8 }
 0x55d   : > { %v3688_v34 = vadd.f32 %v9202_v57, %v12183_v15  ;;  %v12230_v59 = vadd.f32 %v9263_v48, %v3685_v41 }
 0x55e   : > { %v9267_v60 = vpop.f32.mrb[140].mxu0 }
 0x55f   : > { %v9203_v63 = vpop.f32.mrb[124].mxu1  ;;  %v12232_v6 = vadd.f32 %v9266_v52, %v3688_v34  ;;  %v9268_v7 = vpop.f32.mrb[141].mxu0 }
 0x560   : > { %v9204_v39 = vpop.f32.mrb[125].mxu1  ;;  %v9269_v53 = vadd.f32 %v9268_v7, %v9267_v60  ;;  %v9270_v31 = vpop.f32.mrb[142].mxu0 }
 0x561   : > { %v9205_v43 = vadd.f32 %v9204_v39, %v9203_v63  ;;  %v9206_v10 = vpop.f32.mrb[126].mxu1  ;;  %v9271_v0 = vpop.f32.mrb[143].mxu0 }
 0x562   : > { %v9207_v5 = vpop.f32.mrb[127].mxu1  ;;  %v9272_v55 = vadd.f32 %v9271_v0, %v9270_v31 }
 0x563   : > { %v3693_v36 = vadd.f32 %v9205_v43, %v12187_v17  ;;  %v9208_v46 = vadd.f32 %v9207_v5, %v9206_v10 }
 0x565   : > { %v3696_v15 = vadd.f32 %v9208_v46, %v12189_v51  ;;  %v12236_v54 = vadd.f32 %v9269_v53, %v3693_v36 }
 0x566   : > { %v9273_v56 = vpop.f32.mrb[144].mxu0 }
 0x567   : > { %v9209_v47 = vpop.f32.mrb[128].mxu1  ;;  %v12238_v12 = vadd.f32 %v9272_v55, %v3696_v15  ;;  %v9274_v40 = vpop.f32.mrb[145].mxu0 }
 0x568   : > { %v9210_v30 = vpop.f32.mrb[129].mxu1  ;;  %v9275_v33 = vadd.f32 %v9274_v40, %v9273_v56  ;;  %v9276_v22 = vpop.f32.mrb[146].mxu0 }
 0x569   : > { %v9211_v14 = vadd.f32 %v9210_v30, %v9209_v47  ;;  %v9212_v35 = vpop.f32.mrb[130].mxu1  ;;  %v9277_v27 = vpop.f32.mrb[147].mxu0 }
 0x56a   : > { %v9213_v2 = vpop.f32.mrb[131].mxu1  ;;  %v9278_v49 = vadd.f32 %v9277_v27, %v9276_v22 }
 0x56b   : > { %v3701_v17 = vadd.f32 %v9211_v14, %v12193_v26  ;;  %v9214_v50 = vadd.f32 %v9213_v2, %v9212_v35 }
 0x56d   : > { %v3704_v51 = vadd.f32 %v9214_v50, %v12196_v37  ;;  %v12242_v21 = vadd.f32 %v9275_v33, %v3701_v17 }
 0x56e   : > { %v9279_v20 = vpop.f32.mrb[148].mxu0 }
 0x56f   : > { %v9215_v42 = vpop.f32.mrb[132].mxu1  ;;  %v12244_v4 = vadd.f32 %v9278_v49, %v3704_v51  ;;  %v9280_v45 = vpop.f32.mrb[149].mxu0  ;;  %v8374_v49 = vld [vmem:[%s11733_s27 + $0x1] ss:$0 sm:$0xff] }
 0x570   : > { %v9216_v58 = vpop.f32.mrb[133].mxu1  ;;  %v9281_v13 = vadd.f32 %v9280_v45, %v9279_v20  ;;  %v9282_v62 = vpop.f32.mrb[150].mxu0 }
 0x571   : > { %v9217_v25 = vadd.f32 %v9216_v58, %v9215_v42  ;;  %v9218_v48 = vpop.f32.mrb[134].mxu1  ;;  %v9283_v24 = vpop.f32.mrb[151].mxu0  ;;  %v8378_v42 = vld [vmem:[%s11741_s15 + $0x1] ss:$0 sm:$0xff] }
 0x572   : > { %v9219_v32 = vpop.f32.mrb[135].mxu1  ;;  %v9284_v8 = vadd.f32 %v9283_v24, %v9282_v62 }
 0x573   : > { %v3709_v26 = vadd.f32 %v9217_v25, %v12200_v29  ;;  %v9220_v3 = vadd.f32 %v9219_v32, %v9218_v48 }
 0x575   : > { %v3712_v37 = vadd.f32 %v9220_v3, %v12202_v61  ;;  %v12248_v1 = vadd.f32 %v9281_v13, %v3709_v26 }
 0x576   : > { %v9285_v41 = vpop.f32.mrb[152].mxu0 }
 0x577   : > { %v9221_v52 = vpop.f32.mrb[136].mxu1  ;;  %v12250_v57 = vadd.f32 %v9284_v8, %v3712_v37  ;;  %v9286_v34 = vpop.f32.mrb[153].mxu0  ;;  %v10629_v37 = vld [vmem:[#allocation2 + $0x31] sm:$0xff] }
 0x578   : > { %v9222_v60 = vpop.f32.mrb[137].mxu1  ;;  %v9287_v63 = vadd.f32 %v9286_v34, %v9285_v41  ;;  %v9288_v39 = vpop.f32.mrb[154].mxu0 }
 0x579   : > { %v9223_v7 = vadd.f32 %v9222_v60, %v9221_v52  ;;  %v9224_v53 = vpop.f32.mrb[138].mxu1  ;;  %v9289_v43 = vpop.f32.mrb[155].mxu0  ;;  %v10630_v60 = vld [vmem:[#allocation2 + $0x11] sm:$0xff] }
 0x57a   : > { %v9225_v31 = vpop.f32.mrb[139].mxu1  ;;  %v9290_v10 = vadd.f32 %v9289_v43, %v9288_v39  ;;  %v10631_v43 = vld [vmem:[#allocation2 + $0x41] sm:$0xff] }
 0x57b   : > { %v3717_v29 = vadd.f32 %v9223_v7, %v12206_v19  ;;  %v9226_v0 = vadd.f32 %v9225_v31, %v9224_v53 }
 0x57d   : > { %v3720_v61 = vadd.f32 %v9226_v0, %v12208_v44  ;;  %v12254_v5 = vadd.f32 %v9287_v63, %v3717_v29 }
 0x57e   : > { %v9291_v36 = vpop.f32.mrb[156].mxu0 }
 0x57f   : > { %v9227_v55 = vpop.f32.mrb[140].mxu1  ;;  %v12256_v46 = vadd.f32 %v9290_v10, %v3720_v61  ;;  %v9292_v15 = vpop.f32.mrb[157].mxu0 }
 0x580   : > { %v9228_v56 = vpop.f32.mrb[141].mxu1  ;;  %v9293_v47 = vadd.f32 %v9292_v15, %v9291_v36  ;;  %v9294_v30 = vpop.f32.mrb[158].mxu0  ;;  %v12283_v15 = vld [vmem:[#allocation2 + $0x8] sm:$0x3] }
 0x581   : > { %v9229_v40 = vadd.f32 %v9228_v56, %v9227_v55  ;;  %v9230_v33 = vpop.f32.mrb[142].mxu1  ;;  %v9295_v14 = vpop.f32.mrb[159].mxu0 }
 0x582   : > { %v9231_v19 = vpop.f32.mrb[143].mxu1  ;;  %v9296_v35 = vadd.f32 %v9295_v14, %v9294_v30 }
 0x583   : > { %v3725_v22 = vadd.f32 %v9229_v40, %v12212_v38  ;;  %v9232_v44 = vadd.f32 %v9231_v19, %v9230_v33  ;;  %v12287_v33 = vld [vmem:[#allocation2] sm:$0xff] }
 0x584   : > { %v12290_v14 = vrot.slane %v12287_v33, 1 }
 0x585   : > { %v3728_v27 = vadd.f32 %v9232_v44, %v12214_v11  ;;  %v12260_v2 = vadd.f32 %v9293_v47, %v3725_v22  ;;  %v12294_v44 = vld [vmem:[%s11733_s27 + $0x3] ss:$0 sm:$0xff] }
 0x587   : > { %v9427_v17 = vpop.f32.mrb[144].mxu1  ;;  %v12263_v50 = vadd.f32 %v9296_v35, %v3728_v27  ;;  %v10634_v27 = vld [vmem:[#allocation2 + $0x71] sm:$0xff] }
 0x588   : > { %v3871_v51 = vadd.f32 %v9427_v17, %v12224_v16  ;;  %v3862_v20 = vpop.f32.mrb[145].mxu1 }
 0x589   : > { %v3863_v45 = vadd.f32 %v3862_v20, %v12218_v9  ;;  %v9428_v58 = vpop.f32.mrb[146].mxu1 }
 0x58a   : > { %v3942_v13 = vmul.f32 %v8374_v49, %v3871_v51  ;;  %v3874_v38 = vadd.f32 %v9428_v58, %v12226_v18  ;;  %v3865_v25 = vpop.f32.mrb[147].mxu1  ;;  %v10635_v58 = vld [vmem:[#allocation2 + $0x51] sm:$0xff] }
 0x58b   : > { %v3940_v62 = vmul.f32 %v8374_v49, %v3863_v45  ;;  %v3866_v11 = vadd.f32 %v3865_v25, %v12220_v28  ;;  %v12298_v45 = vrot.slane %v12287_v33, 2  ;;  %v12301_v25 = vld [vmem:[%s11741_s15 + $0x3] ss:$0 sm:$0xff] }
 0x58c   : > { %v3973_v48 = vadd.f32 %v8378_v42, %v3942_v13  ;;  %v3943_v24 = vmul.f32 %v8374_v49, %v3874_v38 }
 0x58d   : > { %v3971_v32 = vadd.f32 %v8378_v42, %v3940_v62  ;;  %v3941_v26 = vmul.f32 %v8374_v49, %v3866_v11  ;;  %13264 = vst [vmem:[#allocation21_spill] sm:$0xff] %v12298_v45  ;;  %v4204_v11 = vrot.slane %v12283_v15, 2 }
 0x58e   : > { %v3989_v8 = vmax.f32 %v3973_v48, 0.0  ;;  %v3974_v3 = vadd.f32 %v8378_v42, %v3943_v24 }
 0x58f   : > { %v3987_v9 = vmax.f32 %v3971_v32, 0.0  ;;  %v3972_v16 = vadd.f32 %v8378_v42, %v3941_v26  ;;  %v9431_v18 = vpop.f32.mrb[148].mxu1 }
 0x590   : > { %v4005_v41 = vadd.f32 %v10629_v37, %v3989_v8  ;;  %v3990_v28 = vmax.f32 %v3974_v3, 0.0  ;;  %v3887_v52 = vadd.f32 %v9431_v18, %v12236_v54  ;;  %v3878_v34 = vpop.f32.mrb[149].mxu1  ;;  %v10632_v54 = vld [vmem:[#allocation2 + $0x21] sm:$0xff] }
 0x591   : > { %v4003_v63 = vadd.f32 %v10630_v60, %v3987_v9  ;;  %v3988_v7 = vmax.f32 %v3972_v16, 0.0  ;;  %v3879_v39 = vadd.f32 %v3878_v34, %v12230_v59  ;;  %v9432_v53 = vpop.f32.mrb[150].mxu1  ;;  %v10637_v16 = vld [vmem:[#allocation2 + $0x61] sm:$0xff] }
 0x592   : > { %4021 = vst [vmem:[%s12275_s16 + $0x10] sm:$0xff] %v4005_v41  ;;  %4037 = vst [vmem:[#allocation2 + $0x31] sm:$0xff] %v4005_v41  ;;  %v4006_v31 = vadd.f32 %v10631_v43, %v3990_v28  ;;  %v3946_v29 = vmul.f32 %v8374_v49, %v3887_v52  ;;  %v3890_v10 = vadd.f32 %v9432_v53, %v12238_v12  ;;  %v3881_v0 = vpop.f32.mrb[151].mxu1 }
 0x593   : > { %4019 = vst [vmem:[%s12275_s16] sm:$0xff] %v4003_v63  ;;  %4035 = vst [vmem:[#allocation2 + $0x11] sm:$0xff] %v4003_v63  ;;  %v4004_v61 = vadd.f32 %v10632_v54, %v3988_v7  ;;  %v3944_v36 = vmul.f32 %v8374_v49, %v3879_v39  ;;  %v3882_v55 = vadd.f32 %v3881_v0, %v12232_v6  ;;  %v4132_v6 = vrot.slane %v12283_v15, 1  ;;  %v10182_v15 = vld [vmem:[#allocation10 + $0x88] ss:$16 sps:$4 sm:$0xff]  }
 0x594   : > { %4022 = vst [vmem:[%s12275_s16 + $0x18] sm:$0xff] %v4006_v31  ;;  %4038 = vst [vmem:[#allocation2 + $0x41] sm:$0xff] %v4006_v31  ;;  %v3977_v59 = vadd.f32 %v8378_v42, %v3946_v29  ;;  %v3947_v56 = vmul.f32 %v8374_v49, %v3890_v10 }
 0x595   : > { %4020 = vst [vmem:[%s12275_s16 + $0x8] sm:$0xff] %v4004_v61  ;;  %4036 = vst [vmem:[#allocation2 + $0x21] sm:$0xff] %v4004_v61  ;;  %v3975_v47 = vadd.f32 %v8378_v42, %v3944_v36  ;;  %v3945_v40 = vmul.f32 %v8374_v49, %v3882_v55 }
 0x596   : > { %v3993_v12 = vmax.f32 %v3977_v59, 0.0  ;;  %v3978_v30 = vadd.f32 %v8378_v42, %v3947_v56 }
 0x597   : > { %v3991_v19 = vmax.f32 %v3975_v47, 0.0  ;;  %v3976_v22 = vadd.f32 %v8378_v42, %v3945_v40  ;;  %v9435_v35 = vpop.f32.mrb[152].mxu1  ;;  %v10638_v47 = vld [vmem:[#allocation2 + $0xd1] sm:$0xff] }
 0x598   : > { %v4009_v17 = vadd.f32 %v10634_v27, %v3993_v12  ;;  %v3994_v51 = vmax.f32 %v3978_v30, 0.0  ;;  %v3903_v49 = vadd.f32 %v9435_v35, %v12248_v1  ;;  %v3894_v20 = vpop.f32.mrb[153].mxu1  ;;  %v10636_v1 = vld [vmem:[#allocation2 + $0x81] sm:$0xff]  ;;  %v10639_v35 = vld [vmem:[#allocation2 + $0xb1] sm:$0xff] }
 0x599   : > { %v4007_v13 = vadd.f32 %v10635_v58, %v3991_v19  ;;  %v3992_v38 = vmax.f32 %v3976_v22, 0.0  ;;  %v3895_v42 = vadd.f32 %v3894_v20, %v12242_v21  ;;  %v9436_v62 = vpop.f32.mrb[154].mxu1  ;;  %v12305_v48 = vld [vmem:[#allocation2 + $0x30] sm:$0xff]  ;;  %v4133_v21 = vsel %vm958_vm0, %v12290_v14, %v4132_v6  ;;  %v4058_v56 = vld [vmem:[#allocation2 + $0x38] sm:$0x3] }
 0x59a   : > { %13265 = vst [vmem:[#allocation22_spill] sm:$0xff] %v12305_v48  ;;  %4025 = vst [vmem:[%s12275_s16 + $0x30] sm:$0xff] %v4009_v17  ;;  %v4010_v24 = vadd.f32 %v10636_v1, %v3994_v51  ;;  %v3950_v32 = vmul.f32 %v12294_v44, %v3903_v49  ;;  %v3906_v26 = vadd.f32 %v9436_v62, %v12250_v57  ;;  %v3897_v8 = vpop.f32.mrb[155].mxu1  ;;  %v12310_v3 = vld [vmem:[#allocation2 + $0x10] sm:$0xff]  ;;  %v12312_v9 = vld [vmem:[#allocation2 + $0x18] sm:$0x3] }
 0x59b   : > { %4041 = vst [vmem:[#allocation2 + $0x71] sm:$0xff] %v4009_v17  ;;  %4023 = vst [vmem:[%s12275_s16 + $0x20] sm:$0xff] %v4007_v13  ;;  %v4008_v18 = vadd.f32 %v10637_v16, %v3992_v38  ;;  %v3948_v37 = vmul.f32 %v12294_v44, %v3895_v42  ;;  %v3898_v41 = vadd.f32 %v3897_v8, %v12244_v4  ;;  %v4134_v28 = vrot.slane %v12310_v3, 1  ;;  %v10155_v22 = vld [vmem:[#allocation10 + $0x200] ss:$16 sps:$4 sm:$0xff]  }
 0x59c   : > { %4039 = vst [vmem:[#allocation2 + $0x51] sm:$0xff] %v4007_v13  ;;  %4026 = vst [vmem:[%s12275_s16 + $0x38] sm:$0xff] %v4010_v24  ;;  %v3981_v57 = vadd.f32 %v12301_v25, %v3950_v32  ;;  %v3951_v52 = vmul.f32 %v12294_v44, %v3906_v26  ;;  %v12323_v34 = vld [vmem:[#allocation2 + $0x20] sm:$0xff]  ;;  %v12325_v60 = vld [vmem:[#allocation2 + $0x28] sm:$0x3]  ;;  %v4135_v63 = vrot.slane %v12312_v9, 1  ;;  %v12348_v20 = vpack.c.bf16 %v12310_v3, %v12287_v33 }
 0x59d   : > { %4042 = vst [vmem:[#allocation2 + $0x81] sm:$0xff] %v4010_v24  ;;  %13266 = vst [vmem:[#allocation23_spill] sm:$0xff] %v12323_v34  ;;  %v4140_v7 = vrot.slane %v12305_v48, 1  ;;  %v3979_v4 = vadd.f32 %v12301_v25, %v3948_v37  ;;  %v3949_v39 = vmul.f32 %v12294_v44, %v3898_v41  ;;  %v4137_v53 = vrot.slane %v12323_v34, 1  ;;  %v10163_v58 = vld [vmem:[#allocation10 + $0x224] ss:$16 sps:$4 sm:$0xff]  }
 0x59e   : > { %4024 = vst [vmem:[%s12275_s16 + $0x28] sm:$0xff] %v4008_v18  ;;  %4040 = vst [vmem:[#allocation2 + $0x61] sm:$0xff] %v4008_v18  ;;  %v4138_v43 = vrot.slane %v12325_v60, 1  ;;  %v3997_v31 = vmax.f32 %v3981_v57, 0.0  ;;  %v3982_v29 = vadd.f32 %v12301_v25, %v3951_v52  ;;  %v4136_v10 = vsel %vm958_vm0, %v4134_v28, %v4135_v63  ;;  %v10161_v37 = vld [vmem:[#allocation10 + $0x220] ss:$16 sps:$4 sm:$0xff]  }
 0x59f   : > { %v4210_v0 = vrot.slane %v12325_v60, 2  ;;  %v3995_v54 = vmax.f32 %v3979_v4, 0.0  ;;  %v3980_v61 = vadd.f32 %v12301_v25, %v3949_v39  ;;  %v9439_v36 = vpop.f32.mrb[156].mxu1  ;;  %v12339_v59 = vpack.c.bf16 %v4136_v10, %v4133_v21  ;;  %13269 = vst [vmem:[#allocation26_spill] sm:$0xff] %v12348_v20  ;;  %v12364_v41 = vld [vmem:[#allocation2 + $0x40] sm:$0xff] }
 0x5a0   : > { %v4139_v55 = vsel %vm958_vm0, %v4137_v53, %v4138_v43  ;;  %v4013_v40 = vadd.f32 %v10638_v47, %v3997_v31  ;;  %v3998_v12 = vmax.f32 %v3982_v29, 0.0  ;;  %v3919_v30 = vadd.f32 %v9439_v36, %v12260_v2  ;;  %v3910_v6 = vpop.f32.mrb[157].mxu1  ;;  %v10640_v2 = vld [vmem:[#allocation2 + $0xe1] sm:$0xff]  ;;  %13270 = vst [vmem:[#allocation27_spill] sm:$0xff] %v12364_v41  ;;  %v10158_v39 = vld [vmem:[#allocation10 + $0x8] ss:$16 sps:$4 sm:$0xff]  }
 0x5a1   : > { %13267 = vst [vmem:[#allocation24_spill] sm:$0xff] %v12339_v59  ;;  %v12342_v19 = vpack.c.bf16 %v4139_v55, %v4136_v10  ;;  %v4011_v27 = vadd.f32 %v10639_v35, %v3995_v54  ;;  %v3996_v17 = vmax.f32 %v3980_v61, 0.0  ;;  %v3911_v51 = vadd.f32 %v3910_v6, %v12254_v5  ;;  %6127 = vmatprep.mubr.bf16.mxu0 %v12339_v59  ;;  %v9440_v49 = vpop.f32.mrb[158].mxu1  ;;  %v10641_v5 = vld [vmem:[#allocation2 + $0xc1] sm:$0xff]  ;;  %v10643_v6 = vld [vmem:[#allocation2 + $0xf1] sm:$0xff] }
 0x5a2   : > { %4029 = vst [vmem:[%s12275_s16 + $0x50] sm:$0xff] %v4013_v40  ;;  %4045 = vst [vmem:[#allocation2 + $0xd1] sm:$0xff] %v4013_v40  ;;  %v4014_v13 = vadd.f32 %v10640_v2, %v3998_v12  ;;  %v3954_v38 = vmul.f32 %v12294_v44, %v3919_v30  ;;  %v3922_v42 = vadd.f32 %v9440_v49, %v12263_v50  ;;  %v3913_v62 = vpop.f32.mrb[159].mxu1  ;;  %v4141_v1 = vrot.slane %v4058_v56, 1  ;;  %v10169_v60 = vld [vmem:[#allocation10 + $0x244] ss:$16 sps:$4 sm:$0xff]  }
 0x5a3   : > { %13268 = vst [vmem:[#allocation25_spill] sm:$0xff] %v12342_v19  ;;  %4027 = vst [vmem:[%s12275_s16 + $0x40] sm:$0xff] %v4011_v27  ;;  %v4012_v24 = vadd.f32 %v10641_v5, %v3996_v17  ;;  %v3952_v32 = vmul.f32 %v12294_v44, %v3911_v51  ;;  %6128 = vmatmul.mubr.bf16.vlgmr.msra.gmra.mrb[160].mxu0 %v12348_v20  ;;  %v3914_v26 = vadd.f32 %v3913_v62, %v12256_v46  ;;  %v12373_v63 = vld [vmem:[#allocation2 + $0x48] sm:$0x3]  ;;  %v4062_v31 = vld [vmem:[#allocation2 + $0x58] sm:$0x3] }
 0x5a4   : > { %4043 = vst [vmem:[#allocation2 + $0xb1] sm:$0xff] %v4011_v27  ;;  %v4213_v8 = vrot.slane %v4058_v56, 2  ;;  %4030 = vst [vmem:[%s12275_s16 + $0x58] sm:$0xff] %v4014_v13  ;;  %v3985_v21 = vadd.f32 %v12301_v25, %v3954_v38  ;;  %v3955_v50 = vmul.f32 %v12294_v44, %v3922_v42  ;;  %v12361_v16 = vsel %vm958_vm0, %v4140_v7, %v4141_v1  ;;  %v10166_v61 = vld [vmem:[#allocation10 + $0x2c] ss:$16 sps:$4 sm:$0xff]  }
 0x5a5   : > { %4046 = vst [vmem:[#allocation2 + $0xe1] sm:$0xff] %v4014_v13  ;;  %6209 = vmatpush1.bf16.msra.mxu0 %v10155_v22  ;;  %v4209_v18 = vrot.slane %v12323_v34, 2  ;;  %4028 = vst [vmem:[%s12275_s16 + $0x48] sm:$0xff] %v4012_v24  ;;  %v3983_v46 = vadd.f32 %v12301_v25, %v3952_v32  ;;  %v3953_v28 = vmul.f32 %v12294_v44, %v3914_v26  ;;  %v4212_v52 = vrot.slane %v12305_v48, 2  ;;  %v12383_v44 = vld [vmem:[#allocation2 + $0x50] sm:$0xff]  ;;  %v12399_v51 = vld [vmem:[#allocation2 + $0x60] sm:$0xff] }
 0x5a6   : > { %4044 = vst [vmem:[#allocation2 + $0xc1] sm:$0xff] %v4012_v24  ;;  %v12370_v57 = vpack.c.bf16 %v12361_v16, %v4139_v55  ;;  %6210 = vmatprep.subr.bf16.mxu0 %v10163_v58  ;;  %v4001_v7 = vmax.f32 %v3985_v21, 0.0  ;;  %v3986_v4 = vadd.f32 %v12301_v25, %v3955_v50  ;;  %v12381_v43 = vpack.c.bf16 %v12305_v48, %v12323_v34  ;;  %v10167_v36 = vld [vmem:[#allocation10 + $0x240] ss:$16 sps:$4 sm:$0xff]   ;;  %v10175_v12 = vld [vmem:[#allocation10 + $0x264] ss:$16 sps:$4 sm:$0xff]  }
 0x5a7   : > { %v12377_v53 = vsel %vm1031_vm1, %v4209_v18, %v4210_v0  ;;  %13273 = vst [vmem:[#allocation30_spill] sm:$0xff] %v12383_v44  ;;  %v3999_v29 = vmax.f32 %v3983_v46, 0.0  ;;  %v3984_v10 = vadd.f32 %v12301_v25, %v3953_v28  ;;  %v12388_v54 = vsel %vm1031_vm1, %v4212_v52, %v4213_v8  ;;  %v10642_v55 = vld [vmem:[#allocation2 + $0x111] sm:$0xff]  ;;  %v12396_v30 = vld [vmem:[#allocation2 + $0xa8] sm:$0x3]  ;;  %13275 = vst [vmem:[#allocation32_spill] sm:$0xff] %v12399_v51 }
 0x5a8   : > { %13271 = vst [vmem:[#allocation28_spill] sm:$0xff] %v12370_v57  ;;  %13272 = vst [vmem:[#allocation29_spill] sm:$0xff] %v12381_v43  ;;  %6137 = vmatprep.mubr.bf16.mxu0 %v12370_v57  ;;  %v4143_v0 = vrot.slane %v12364_v41, 1  ;;  %v4017_v56 = vadd.f32 %v10642_v55, %v4001_v7  ;;  %v4002_v47 = vmax.f32 %v3986_v4, 0.0  ;;  %v12393_v40 = vpack.c.bf16 %v12388_v54, %v12377_v53  ;;  %v12401_v49 = vld [vmem:[#allocation2 + $0x70] sm:$0xff]  ;;  %v10644_v58 = vld [vmem:[#allocation2 + $0x121] sm:$0xff] }
 0x5a9   : > { %6211 = vmatpush1.bf16.msra.mxu0 %v10161_v37  ;;  %v4144_v25 = vrot.slane %v12373_v63, 1  ;;  %v4015_v22 = vadd.f32 %v10643_v6, %v3999_v29  ;;  %v4000_v35 = vmax.f32 %v3984_v10, 0.0  ;;  %v4146_v27 = vrot.slane %v12383_v44, 1  ;;  %13276 = vst [vmem:[#allocation33_spill] sm:$0xff] %v12401_v49  ;;  %v12410_v62 = vld [vmem:[#allocation2 + $0x68] sm:$0x3] }
 0x5aa   : > { %13274 = vst [vmem:[#allocation31_spill] sm:$0xff] %v12393_v40  ;;  %6212 = vmatprep.subr.bf16.mxu0 %v10169_v60  ;;  %v4147_v17 = vrot.slane %v4062_v31, 1  ;;  %4033 = vst [vmem:[%s12275_s16 + $0x70] sm:$0xff] %v4017_v56  ;;  %v4018_v2 = vadd.f32 %v10644_v58, %v4002_v47  ;;  %6580 = vmatmul.mubr.bf16.vlgmr.msra.gmra.mrb[160].mxu1 %v12393_v40  ;;  %v4215_v38 = vrot.slane %v12364_v41, 2  ;;  %v4216_v42 = vrot.slane %v12373_v63, 2  ;;  %v10645_v5 = vld [vmem:[#allocation2 + $0x101] sm:$0xff] }
 0x5ab   : > { %4049 = vst [vmem:[#allocation2 + $0x111] sm:$0xff] %v4017_v56  ;;  %v12406_v13 = vsel %vm958_vm0, %v4143_v0, %v4144_v25  ;;  %v12412_v1 = vld [vmem:[#allocation2 + $0x78] sm:$0x3]  ;;  %4031 = vst [vmem:[%s12275_s16 + $0x60] sm:$0xff] %v4015_v22  ;;  %v4016_v24 = vadd.f32 %v10645_v5, %v4000_v35  ;;  %6661 = vmatpush1.bf16.msra.mxu1 %v10158_v39  ;;  %v10164_v32 = vld [vmem:[#allocation10 + $0x28] ss:$16 sps:$4 sm:$0xff]   ;;  %6138 = vmatmul.mubr.bf16.gmra.mrb[164].mxu0 %v12381_v43 }
 0x5ac   : > { %4047 = vst [vmem:[#allocation2 + $0xf1] sm:$0xff] %v4015_v22  ;;  %v12417_v26 = vsel %vm958_vm0, %v4146_v27, %v4147_v17  ;;  %v4218_v8 = vrot.slane %v12383_v44, 2  ;;  %v4219_v21 = vrot.slane %v4062_v31, 2  ;;  %v12420_v50 = vld [vmem:[#allocation2 + $0x98] sm:$0x3]  ;;  %4034 = vst [vmem:[%s12275_s16 + $0x78] sm:$0xff] %v4018_v2  ;;  %6662 = vmatprep.subr.bf16.mxu1 %v10166_v61  ;;  %6589 = vmatprep.mubr.bf16.mxu1 %v13214_v23 }
 0x5ad   : > { %4050 = vst [vmem:[#allocation2 + $0x121] sm:$0xff] %v4018_v2  ;;  %v10172_v18 = vld [vmem:[#allocation10 + $0x4c] ss:$16 sps:$4 sm:$0xff]   ;;  %v12426_v37 = vpack.c.bf16 %v12417_v26, %v12406_v13  ;;  %v10173_v46 = vld [vmem:[#allocation10 + $0x260] ss:$16 sps:$4 sm:$0xff]   ;;  %v4149_v28 = vrot.slane %v12399_v51, 1  ;;  %6213 = vmatpush1.bf16.msra.mxu0 %v10167_v36  ;;  %v12443_v0 = vsel %vm1031_vm1, %v4215_v38, %v4216_v42  ;;  %v12469_v2 = vpack.c.bf16 %v12383_v44, %v12364_v41 }
 0x5ae   : > { %v4156_v52 = vrot.slane %v12396_v30, 1  ;;  %4032 = vst [vmem:[%s12275_s16 + $0x68] sm:$0xff] %v4016_v24  ;;  %4048 = vst [vmem:[#allocation2 + $0x101] sm:$0xff] %v4016_v24  ;;  %v10170_v60 = vld [vmem:[#allocation10 + $0x48] ss:$16 sps:$4 sm:$0xff]   ;;  %v12432_v63 = vsel %vm1031_vm1, %v4218_v8, %v4219_v21  ;;  %v4150_v4 = vrot.slane %v12410_v62, 1  ;;  %6214 = vmatprep.subr.bf16.mxu0 %v10175_v12  ;;  %v12503_v19 = vsel %vm1031_vm1, %v12298_v45, %v4204_v11 }
 0x5af   : > { %13277 = vst [vmem:[#allocation34_spill] sm:$0xff] %v12426_v37  ;;  %v10181_v7 = vld [vmem:[#allocation10 + $0x284] ss:$16 sps:$4 sm:$0xff]   ;;  %v4152_v39 = vrot.slane %v12401_v49, 1  ;;  %v4153_v31 = vrot.slane %v12412_v1, 1  ;;  %6147 = vmatprep.mubr.bf16.mxu0 %v12426_v37  ;;  %v4336_v10 = vrot.slane %v12420_v50, 2  ;;  %6663 = vmatpush1.bf16.msra.mxu1 %v10164_v32  ;;  %v12457_v6 = vpack.c.bf16 %v12432_v63, %v12443_v0 }
 0x5b0   : > { %v10178_v29 = vld [vmem:[#allocation10 + $0x6c] ss:$16 sps:$4 sm:$0xff]   ;;  %v12439_v61 = vld [vmem:[#allocation2 + $0x138] sm:$0x3]  ;;  %v4326_v36 = vrot.slane %v12420_v50, 1  ;;  %v12446_v55 = vsel %vm958_vm0, %v4149_v28, %v4150_v4  ;;  %v4228_v12 = vrot.slane %v12396_v30, 2  ;;  %6664 = vmatprep.subr.bf16.mxu1 %v10172_v18 }
 0x5b1   : > { %13278 = vst [vmem:[#allocation35_spill] sm:$0xff] %v12439_v61  ;;  %v12448_v56 = vld [vmem:[#allocation2 + $0xb0] sm:$0xff]  ;;  %v12450_v47 = vld [vmem:[#allocation2 + $0xb8] sm:$0x3]  ;;  %v12452_v25 = vld [vmem:[#allocation2 + $0x88] sm:$0x3]  ;;  %6215 = vmatpush1.bf16.msra.mxu0 %v10173_v46  ;;  %v12472_v38 = vsel %vm958_vm0, %v4152_v39, %v4153_v31 }
 0x5b2   : > { %13279 = vst [vmem:[#allocation36_spill] sm:$0xff] %v12457_v6  ;;  %v4221_v22 = vrot.slane %v12399_v51, 2  ;;  %v4222_v35 = vrot.slane %v12410_v62, 2  ;;  %v12461_v27 = vld [vmem:[#allocation2 + $0x80] sm:$0xff]  ;;  %v12465_v58 = vld [vmem:[#allocation2 + $0xc8] sm:$0x3]  ;;  %6590 = vmatmul.mubr.bf16.gmra.mrb[164].mxu1 %v12457_v6  ;;  %6216 = vmatprep.subr.bf16.mxu0 %v10181_v7  ;;  %v12479_v24 = vpack.c.bf16 %v12472_v38, %v12446_v55 }
 0x5b3   : > { %v12463_v17 = vld [vmem:[#allocation2 + $0xc0] sm:$0xff]  ;;  %13280 = vst [vmem:[#allocation37_spill] sm:$0xff] %v12469_v2  ;;  %v4224_v42 = vrot.slane %v12401_v49, 2  ;;  %v4329_v62 = vrot.slane %v12439_v61, 1  ;;  %v4225_v32 = vrot.slane %v12412_v1, 2  ;;  %v4158_v8 = vrot.slane %v12448_v56, 1  ;;  %6665 = vmatpush1.bf16.msra.mxu1 %v10170_v60  ;;  %6148 = vmatmul.mubr.bf16.gmra.mrb[168].mxu0 %v12469_v2 }
 0x5b4   : > { %v10179_v30 = vld [vmem:[#allocation10 + $0x280] ss:$16 sps:$4 sm:$0xff]   ;;  %v10187_v5 = vld [vmem:[#allocation10 + $0x2a4] ss:$16 sps:$4 sm:$0xff]   ;;  %13281 = vst [vmem:[#allocation38_spill] sm:$0xff] %v12479_v24  ;;  %v4159_v21 = vrot.slane %v12450_v47, 1  ;;  %6666 = vmatprep.subr.bf16.mxu1 %v10178_v29  ;;  %6599 = vmatprep.mubr.bf16.mxu1 %v13214_v23  ;;  %v12495_v31 = vsel %vm1031_vm1, %v4221_v22, %v4222_v35  ;;  %v4157_v60 = vsel %vm958_vm0, %v12290_v14, %v4156_v52 }
 0x5b5   : > { %v12484_v50 = vld [vmem:[#allocation2 + $0xd0] sm:$0xff]  ;;  %v12486_v18 = vld [vmem:[#allocation2 + $0xd8] sm:$0x3]  ;;  %v10176_v46 = vld [vmem:[#allocation10 + $0x68] ss:$16 sps:$4 sm:$0xff]   ;;  %v4303_v28 = vrot.slane %v12461_v27, 2  ;;  %6157 = vmatprep.mubr.bf16.mxu0 %v12479_v24  ;;  %6217 = vmatpush1.bf16.msra.mxu0 %v10179_v30  ;;  %v4337_v29 = vsel %vm1031_vm1, %v12298_v45, %v4336_v10  ;;  %v12512_v52 = vsel %vm958_vm0, %v12290_v14, %v4326_v36  ;;  %v12515_v35 = vsel %vm1031_vm1, %v4224_v42, %v4225_v32 }
 0x5b6   : > { %v4304_v7 = vrot.slane %v12452_v25, 2  ;;  %v4161_v4 = vrot.slane %v12463_v17, 1  ;;  %v4162_v1 = vrot.slane %v12465_v58, 1  ;;  %v10184_v39 = vld [vmem:[#allocation10 + $0x8c] ss:$16 sps:$4 sm:$0xff]   ;;  %v4164_v23 = vrot.slane %v12484_v50, 1  ;;  %6218 = vmatprep.subr.bf16.mxu0 %v10187_v5 }
 0x5b7   : > { %v10185_v2 = vld [vmem:[#allocation10 + $0x2a0] ss:$16 sps:$4 sm:$0xff]   ;;  %v4165_v22 = vrot.slane %v12486_v18, 1  ;;  %v10190_v11 = vld [vmem:[#allocation10 + $0xac] ss:$16 sps:$4 sm:$0xff]   ;;  %v12518_v30 = vsel %vm958_vm0, %v4158_v8, %v4159_v21  ;;  %v12522_v10 = vsel %vm1031_vm1, %v12298_v45, %v4228_v12  ;;  %v12526_v6 = vsel %vm958_vm0, %v12290_v14, %v4329_v62  ;;  %6667 = vmatpush1.bf16.msra.mxu1 %v10176_v46 }
 0x5b8   : > { %v10193_v24 = vld [vmem:[#allocation10 + $0x2c4] ss:$16 sps:$4 sm:$0xff]   ;;  %13282 = vst [vmem:[#allocation39_spill] sm:$0xff] %v12526_v6  ;;  %v12531_v42 = vpack.c.bf16 %v12515_v35, %v12495_v31  ;;  %v10191_v5 = vld [vmem:[#allocation10 + $0x2c0] ss:$16 sps:$4 sm:$0xff]   ;;  %v12534_v32 = vsel %vm1031_vm1, %v4303_v28, %v4304_v7  ;;  %v12537_v8 = vsel %vm958_vm0, %v4161_v4, %v4162_v1  ;;  %6668 = vmatprep.subr.bf16.mxu1 %v10184_v39  ;;  %v4233_v14 = vrot.slane %v12463_v17, 2 }
 0x5b9   : > { %v12539_v12 = vld [vmem:[#allocation2 + $0xe0] sm:$0xff]  ;;  %v4080_v21 = vld [vmem:[#allocation2 + $0xe8] sm:$0x3]  ;;  %v12541_v37 = vld [vmem:[#allocation2 + $0xf0] sm:$0xff]  ;;  %v4234_v62 = vrot.slane %v12465_v58, 2  ;;  %v4236_v46 = vrot.slane %v12484_v50, 2  ;;  %6219 = vmatpush1.bf16.msra.mxu0 %v10185_v2  ;;  %v12549_v7 = vpack.c.bf16 %v12401_v49, %v12399_v51  ;;  %v12552_v4 = vpack.c.bf16 %v12518_v30, %v4157_v60 }
 0x5ba   : > { %13283 = vst [vmem:[#allocation40_spill] sm:$0xff] %v12531_v42  ;;  %13284 = vst [vmem:[#allocation41_spill] sm:$0xff] %v12539_v12  ;;  %v4237_v36 = vrot.slane %v12486_v18, 2  ;;  %v4082_v43 = vld [vmem:[#allocation2 + $0xf8] sm:$0x3]  ;;  %v12556_v39 = vpack.c.bf16 %v12448_v56, %v12287_v33  ;;  %v12559_v58 = vsel %vm958_vm0, %v4164_v23, %v4165_v22  ;;  %v12561_v40 = vld [vmem:[#allocation2 + $0x110] sm:$0xff]  ;;  %6600 = vmatmul.mubr.bf16.gmra.mrb[168].mxu1 %v12531_v42  ;;  %6220 = vmatprep.subr.bf16.mxu0 %v10193_v24 }
 0x5bb   : > { %13285 = vst [vmem:[#allocation42_spill] sm:$0xff] %v12541_v37  ;;  %v10188_v28 = vld [vmem:[#allocation10 + $0xa8] ss:$16 sps:$4 sm:$0xff]   ;;  %13286 = vst [vmem:[#allocation43_spill] sm:$0xff] %v12549_v7  ;;  %v10199_v1 = vld [vmem:[#allocation10 + $0x2e4] ss:$16 sps:$4 sm:$0xff]   ;;  %v12567_v2 = vpack.c.bf16 %v4337_v29, %v12534_v32  ;;  %v12571_v60 = vpack.c.bf16 %v12559_v58, %v12537_v8  ;;  %6669 = vmatpush1.bf16.msra.mxu1 %v10182_v15  ;;  %6158 = vmatmul.mubr.bf16.gmra.mrb[172].mxu0 %v12549_v7 }
 0x5bc   : > { %13287 = vst [vmem:[#allocation44_spill] sm:$0xff] %v12552_v4  ;;  %v12563_v18 = vld [vmem:[#allocation2 + $0x118] sm:$0x3]  ;;  %v4167_v33 = vrot.slane %v12539_v12, 1  ;;  %v4168_v49 = vrot.slane %v4080_v21, 1  ;;  %v12574_v51 = vld [vmem:[#allocation2 + $0x100] sm:$0xff]  ;;  %6670 = vmatprep.subr.bf16.mxu1 %v10190_v11  ;;  %v12585_v48 = vsel %vm1031_vm1, %v4233_v14, %v4234_v62  ;;  %v12588_v59 = vsel %vm1031_vm1, %v4236_v46, %v4237_v36  ;;  %6167 = vmatprep.mubr.bf16.mxu0 %v12552_v4 }
 0x5bd   : > { %13288 = vst [vmem:[#allocation45_spill] sm:$0xff] %v12574_v51  ;;  %v4084_v23 = vld [vmem:[#allocation2 + $0x108] sm:$0x3]  ;;  %v12576_v22 = vld [vmem:[#allocation2 + $0x120] sm:$0xff]  ;;  %v4170_v24 = vrot.slane %v12541_v37, 1  ;;  %v4171_v42 = vrot.slane %v4082_v43, 1  ;;  %6221 = vmatpush1.bf16.msra.mxu0 %v10191_v5 }
 0x5be   : > { %v4239_v29 = vrot.slane %v12539_v12, 2  ;;  %v4240_v44 = vrot.slane %v4080_v21, 2  ;;  %v12581_v57 = vld [vmem:[#allocation2 + $0x128] sm:$0x3]  ;;  %v13289_v20 = vmov 0   ;;  %v4242_v15 = vrot.slane %v12541_v37, 2  ;;  %6222 = vmatprep.subr.bf16.mxu0 %v10199_v1 }
 0x5bf   : > { %6609 = vmatprep.mubr.bf16.mxu1 %v13289_v20  ;;  %v10196_v41 = vld [vmem:[#allocation10 + $0xcc] ss:$16 sps:$4 sm:$0xff]   ;;  %v4243_v7 = vrot.slane %v4082_v43, 2  ;;  %v10197_v45 = vld [vmem:[#allocation10 + $0x2e0] ss:$16 sps:$4 sm:$0xff]   ;;  %v4173_v21 = vrot.slane %v12574_v51, 1  ;;  %6671 = vmatpush1.bf16.msra.mxu1 %v10188_v28  ;;  %v12599_v5 = vsel %vm958_vm0, %v4167_v33, %v4168_v49  ;;  %v12602_v4 = vsel %vm958_vm0, %v4170_v24, %v4171_v42 }
 0x5c0   : > { %v4174_v34 = vrot.slane %v4084_v23, 1  ;;  %v4245_v11 = vrot.slane %v12574_v51, 2  ;;  %v4246_v61 = vrot.slane %v4084_v23, 2  ;;  %v10205_v12 = vld [vmem:[#allocation10 + $0x304] ss:$16 sps:$4 sm:$0xff]   ;;  %v4248_v14 = vrot.slane %v12561_v40, 2  ;;  %6672 = vmatprep.subr.bf16.mxu1 %v10196_v41 }
 0x5c1   : > { %v4249_v36 = vrot.slane %v12563_v18, 2  ;;  %v4306_v62 = vrot.slane %v12576_v22, 2  ;;  %v4307_v43 = vrot.slane %v12581_v57, 2  ;;  %v10194_v46 = vld [vmem:[#allocation10 + $0xc8] ss:$16 sps:$4 sm:$0xff]   ;;  %v12605_v23 = vsel %vm1031_vm1, %v4239_v29, %v4240_v44  ;;  %6223 = vmatpush1.bf16.msra.mxu0 %v10197_v45 }
 0x5c2   : > { %v4206_v1 = vrot.slane %v12310_v3, 2  ;;  %v10202_v51 = vld [vmem:[#allocation10 + $0xec] ss:$16 sps:$4 sm:$0xff]   ;;  %v12609_v37 = vsel %vm1031_vm1, %v4242_v15, %v4243_v7  ;;  %v4176_v6 = vrot.slane %v12561_v40, 1  ;;  %v4177_v28 = vrot.slane %v12563_v18, 1  ;;  %6610 = vmatmul.mubr.bf16.gmra.mrb[172].mxu1 %v12567_v2  ;;  %6224 = vmatprep.subr.bf16.mxu0 %v10205_v12 }
 0x5c3   : > { %v4230_v49 = vrot.slane %v12448_v56, 2  ;;  %v10203_v33 = vld [vmem:[#allocation10 + $0x300] ss:$16 sps:$4 sm:$0xff]   ;;  %v12615_v42 = vsel %vm958_vm0, %v4173_v21, %v4174_v34  ;;  %v12618_v44 = vsel %vm1031_vm1, %v4245_v11, %v4246_v61  ;;  %v13290_v41 = vrot.slane %v12312_v9, 2  ;;  %v10211_v18 = vld [vmem:[#allocation10 + $0x324] ss:$16 sps:$4 sm:$0xff]   ;;  %6673 = vmatpush1.bf16.msra.mxu1 %v10194_v46  ;;  %6168 = vmatmul.mubr.bf16.gmra.mrb[176].mxu0 %v12556_v39 }
 0x5c4   : > { %v4231_v7 = vrot.slane %v12450_v47, 2  ;;  %v12626_v29 = vsel %vm1031_vm1, %v4248_v14, %v4249_v36  ;;  %v12629_v45 = vsel %vm1031_vm1, %v4306_v62, %v4307_v43  ;;  %v4287_v61 = vrot.slane %v12461_v27, 1  ;;  %v10200_v9 = vld [vmem:[#allocation10 + $0xe8] ss:$16 sps:$4 sm:$0xff]   ;;  %6674 = vmatprep.subr.bf16.mxu1 %v10202_v51  ;;  %6619 = vmatprep.mubr.bf16.mxu1 %v13289_v20  ;;  %v10209_v51 = vld [vmem:[#allocation10 + $0x320] ss:$16 sps:$4 sm:$0xff]  }
 0x5c5   : > { %v4208_v24 = vsel %vm1031_vm1, %v4206_v1, %v13290_v41  ;;  %v12642_v15 = vpack.c.bf16 %v12443_v0, %v12388_v54  ;;  %v4288_v21 = vrot.slane %v12452_v25, 1  ;;  %v12651_v14 = vpack.c.bf16 %v12406_v13, %v12361_v16  ;;  %6177 = vmatprep.mubr.bf16.mxu0 %v12571_v60  ;;  %6225 = vmatpush1.bf16.msra.mxu0 %v10203_v33  ;;  %v10214_v36 = vld [vmem:[#allocation10 + $0x12c] ss:$16 sps:$4 sm:$0xff]   ;;  %v10215_v1 = vld [vmem:[#allocation10 + $0x340] ss:$16 sps:$4 sm:$0xff]  }
 0x5c6   : > { %v12632_v34 = vpack.c.bf16 %v4208_v24, %v12503_v19  ;;  %v4232_v47 = vsel %vm1031_vm1, %v4230_v49, %v4231_v7  ;;  %v12638_v12 = vpack.c.bf16 %v12377_v53, %v4208_v24  ;;  %v10208_v19 = vld [vmem:[#allocation10 + $0x10c] ss:$16 sps:$4 sm:$0xff]   ;;  %v12655_v53 = vpack.c.bf16 %v12495_v31, %v12432_v63  ;;  %6226 = vmatprep.subr.bf16.mxu0 %v10211_v18  ;;  %v10217_v63 = vld [vmem:[#allocation10 + $0x344] ss:$16 sps:$4 sm:$0xff]   ;;  %v10218_v7 = vld [vmem:[#allocation10 + $0x148] ss:$16 sps:$4 sm:$0xff]  }
 0x5c7   : > { %v12647_v11 = vpack.c.bf16 %v4232_v47, %v12522_v10  ;;  %v4290_v54 = vrot.slane %v12576_v22, 1  ;;  %v12661_v0 = vpack.c.bf16 %v12446_v55, %v12417_v26  ;;  %v12665_v25 = vpack.c.bf16 %v12534_v32, %v12515_v35  ;;  %6675 = vmatpush1.bf16.msra.mxu1 %v10200_v9  ;;  %v10206_v35 = vld [vmem:[#allocation10 + $0x108] ss:$16 sps:$4 sm:$0xff]   ;;  %v10229_v24 = vld [vmem:[#allocation10 + $0x384] ss:$16 sps:$4 sm:$0xff]  }
 0x5c8   : > { %v4289_v16 = vsel %vm958_vm0, %v4287_v61, %v4288_v21  ;;  %v4291_v13 = vrot.slane %v12581_v57, 1  ;;  %v12673_v10 = vpack.c.bf16 %v12585_v48, %v4232_v47  ;;  %v12677_v26 = vpack.c.bf16 %v12537_v8, %v12518_v30  ;;  %6676 = vmatprep.subr.bf16.mxu1 %v10208_v19  ;;  %v13291_v33 = vld [vmem:[#allocation39_spill] sm:$0xff]  ;;  %v10227_v47 = vld [vmem:[#allocation10 + $0x380] ss:$16 sps:$4 sm:$0xff]  }
 0x5c9   : > { %v12670_v31 = vpack.c.bf16 %v4289_v16, %v12472_v38  ;;  %v12681_v55 = vpack.c.bf16 %v12605_v23, %v12588_v59  ;;  %v12685_v57 = vpack.c.bf16 %v12599_v5, %v12559_v58  ;;  %v12689_v38 = vpack.c.bf16 %v12618_v44, %v12609_v37  ;;  %6227 = vmatpush1.bf16.msra.mxu0 %v10209_v51  ;;  %v10226_v61 = vld [vmem:[#allocation10 + $0x16c] ss:$16 sps:$4 sm:$0xff]   ;;  %v10235_v21 = vld [vmem:[#allocation10 + $0x3a4] ss:$16 sps:$4 sm:$0xff]   ;;  %v10224_v19 = vld [vmem:[#allocation10 + $0x168] ss:$16 sps:$4 sm:$0xff]  }
 0x5ca   : > { %v12693_v32 = vpack.c.bf16 %v12615_v42, %v12602_v4  ;;  %v12697_v30 = vpack.c.bf16 %v12629_v45, %v12626_v29  ;;  %v12701_v8 = vpack.c.bf16 %v12588_v59, %v12585_v48  ;;  %v4178_v58 = vsel %vm958_vm0, %v4176_v6, %v4177_v28  ;;  %6228 = vmatprep.subr.bf16.mxu0 %v10217_v63  ;;  %v10223_v48 = vld [vmem:[#allocation10 + $0x364] ss:$16 sps:$4 sm:$0xff]   ;;  %v10212_v59 = vld [vmem:[#allocation10 + $0x128] ss:$16 sps:$4 sm:$0xff]   ;;  %v10221_v28 = vld [vmem:[#allocation10 + $0x360] ss:$16 sps:$4 sm:$0xff]  }
 0x5cb   : > { %v4292_v62 = vsel %vm958_vm0, %v4290_v54, %v4291_v13  ;;  %v12706_v43 = vpack.c.bf16 %v12512_v52, %v4289_v16  ;;  %v12710_v46 = vpack.c.bf16 %v12484_v50, %v12463_v17  ;;  %6677 = vmatpush1.bf16.msra.mxu1 %v10206_v35  ;;  %v12721_v6 = vpack.c.bf16 %v12602_v4, %v12599_v5  ;;  %v10220_v52 = vld [vmem:[#allocation10 + $0x14c] ss:$16 sps:$4 sm:$0xff]   ;;  %v10241_v51 = vld [vmem:[#allocation10 + $0x3c4] ss:$16 sps:$4 sm:$0xff]   ;;  %v10230_v16 = vld [vmem:[#allocation10 + $0x188] ss:$16 sps:$4 sm:$0xff]  }
 0x5cc   : > { %v12712_v49 = vpack.c.bf16 %v4292_v62, %v4178_v58  ;;  %v12715_v41 = vpack.c.bf16 %v13291_v33, %v4292_v62  ;;  %6620 = vmatmul.mubr.bf16.gmra.mrb[176].mxu1 %v12701_v8  ;;  %6678 = vmatprep.subr.bf16.mxu1 %v10214_v36  ;;  %v12727_v18 = vpack.c.bf16 %v12609_v37, %v12605_v23  ;;  %v13292_v4 = vld [vmem:[#allocation41_spill] sm:$0xff]  ;;  %v13293_v5 = vld [vmem:[#allocation42_spill] sm:$0xff] }
 0x5cd   : > { %6178 = vmatmul.mubr.bf16.gmra.mrb[180].mxu0 %v12710_v46  ;;  %6629 = vmatprep.mubr.bf16.mxu1 %v13289_v20  ;;  %v12731_v9 = vpack.c.bf16 %v13293_v5, %v13292_v4  ;;  %v12736_v54 = vpack.c.bf16 %v4178_v58, %v12615_v42  ;;  %v10232_v37 = vld [vmem:[#allocation10 + $0x18c] ss:$16 sps:$4 sm:$0xff]   ;;  %v10233_v23 = vld [vmem:[#allocation10 + $0x3a0] ss:$16 sps:$4 sm:$0xff]   ;;  %v12742_v13 = vpack.c.bf16 %v12626_v29, %v12618_v44  ;;  %v10236_v33 = vld [vmem:[#allocation10 + $0x1a8] ss:$16 sps:$4 sm:$0xff]  }
 0x5ce   : > { %6187 = vmatprep.mubr.bf16.mxu0 %v12721_v6  ;;  %6229 = vmatpush1.bf16.msra.mxu0 %v10215_v1  ;;  %v10238_v63 = vld [vmem:[#allocation10 + $0x1ac] ss:$16 sps:$4 sm:$0xff]   ;;  %v10239_v36 = vld [vmem:[#allocation10 + $0x3c0] ss:$16 sps:$4 sm:$0xff]   ;;  %v10247_v1 = vld [vmem:[#allocation10 + $0x3e4] ss:$16 sps:$4 sm:$0xff]  }
 0x5cf   : > { %6230 = vmatprep.subr.bf16.mxu0 %v10223_v48  ;;  %6679 = vmatpush1.bf16.msra.mxu1 %v10212_v59  ;;  %v13294_v42 = vld [vmem:[#allocation45_spill] sm:$0xff]  ;;  %v13295_v58 = vld [vmem:[#allocation35_spill] sm:$0xff] }
 0x5d0   : > { %6680 = vmatprep.subr.bf16.mxu1 %v10220_v52  ;;  %v12746_v35 = vpack.c.bf16 %v12561_v40, %v13294_v42  ;;  %v4339_v62 = vrot.slane %v13295_v58, 2  ;;  %v13296_v44 = vld [vmem:[#allocation23_spill] sm:$0xff]  ;;  %v13297_v59 = vld [vmem:[#allocation21_spill] sm:$0xff] }
 0x5d1   : > { %v12753_v29 = vpack.c.bf16 %v13296_v44, %v12310_v3  ;;  %v10244_v48 = vld [vmem:[#allocation10 + $0x1cc] ss:$16 sps:$4 sm:$0xff]   ;;  %v10254_v58 = vld [vmem:[#allocation10 + $0x208] ss:$16 sps:$4 sm:$0xff]   ;;  %v10271_v44 = vld [vmem:[#allocation10 + $0x464] ss:$16 sps:$4 sm:$0xff]  }
 0x5d2   : > { %6231 = vmatpush1.bf16.msra.mxu0 %v10221_v28  ;;  %v4340_v52 = vsel %vm1031_vm1, %v13297_v59, %v4339_v62  ;;  %v10245_v28 = vld [vmem:[#allocation10 + $0x3e0] ss:$16 sps:$4 sm:$0xff]   ;;  %v10250_v3 = vld [vmem:[#allocation10 + $0x1ec] ss:$16 sps:$4 sm:$0xff]   ;;  %v10260_v59 = vld [vmem:[#allocation10 + $0x228] ss:$16 sps:$4 sm:$0xff]  }
 0x5d3   : > { %6232 = vmatprep.subr.bf16.mxu0 %v10229_v24  ;;  %6681 = vmatpush1.bf16.msra.mxu1 %v10218_v7  ;;  %v10253_v24 = vld [vmem:[#allocation10 + $0x404] ss:$16 sps:$4 sm:$0xff]   ;;  %v10242_v7 = vld [vmem:[#allocation10 + $0x1c8] ss:$16 sps:$4 sm:$0xff]   ;;  %v10262_v62 = vld [vmem:[#allocation10 + $0x22c] ss:$16 sps:$4 sm:$0xff]  }
 0x5d4   : > { %6630 = vmatmul.mubr.bf16.gmra.mrb[180].mxu1 %v12727_v18  ;;  %6682 = vmatprep.subr.bf16.mxu1 %v10226_v61  ;;  %v12760_v61 = vpack.c.bf16 %v4340_v52, %v12629_v45  ;;  %v10256_v45 = vld [vmem:[#allocation10 + $0x20c] ss:$16 sps:$4 sm:$0xff]  }
 0x5d5   : > { %6188 = vmatmul.mubr.bf16.gmra.mrb[184].mxu0 %v12731_v9  ;;  %6639 = vmatprep.mubr.bf16.mxu1 %v13289_v20  ;;  %v13303_v52 = vld [vmem:[#allocation30_spill] sm:$0xff] }
 0x5d6   : > { %6197 = vmatprep.mubr.bf16.mxu0 %v12736_v54  ;;  %6233 = vmatpush1.bf16.msra.mxu0 %v10227_v47  ;;  %v10251_v47 = vld [vmem:[#allocation10 + $0x400] ss:$16 sps:$4 sm:$0xff]  }
 0x5d7   : > { %6234 = vmatprep.subr.bf16.mxu0 %v10235_v21  ;;  %6683 = vmatpush1.bf16.msra.mxu1 %v10224_v19  ;;  %v10259_v21 = vld [vmem:[#allocation10 + $0x424] ss:$16 sps:$4 sm:$0xff]  }
 0x5d8   : > { %6684 = vmatprep.subr.bf16.mxu1 %v10232_v37  ;;  %v13298_v19 = vld [vmem:[#allocation24_spill] sm:$0xff]  ;;  %v10248_v37 = vld [vmem:[#allocation10 + $0x1e8] ss:$16 sps:$4 sm:$0xff]  }
 0x5da   : > { %6235 = vmatpush1.bf16.msra.mxu0 %v10233_v23  ;;  %v13299_v23 = vld [vmem:[#allocation22_spill] sm:$0xff] }
 0x5db   : > { %6236 = vmatprep.subr.bf16.mxu0 %v10241_v51  ;;  %6685 = vmatpush1.bf16.msra.mxu1 %v10230_v16  ;;  %v13300_v51 = vld [vmem:[#allocation27_spill] sm:$0xff] }
 0x5dc   : > { %6640 = vmatmul.mubr.bf16.gmra.mrb[184].mxu1 %v12742_v13  ;;  %6686 = vmatprep.subr.bf16.mxu1 %v10238_v63  ;;  %v12766_v16 = vpack.c.bf16 %v13300_v51, %v13299_v23  ;;  %v10257_v63 = vld [vmem:[#allocation10 + $0x420] ss:$16 sps:$4 sm:$0xff]   ;;  %v13306_v51 = vld [vmem:[#allocation29_spill] sm:$0xff] }
 0x5dd   : > { %6198 = vmatmul.mubr.bf16.gmra.mrb[188].mxu0 %v12746_v35  ;;  %6649 = vmatprep.mubr.bf16.mxu1 %v13289_v20  ;;  %v10275_v23 = vld [vmem:[#allocation10 + $0x480] ss:$16 sps:$4 sm:$0xff]  }
 0x5de   : > { %6237 = vmatpush1.bf16.msra.mxu0 %v10239_v36  ;;  %6240 = vmatprep.mubr.bf16.mxu0 %v12753_v29  ;;  %v10265_v36 = vld [vmem:[#allocation10 + $0x444] ss:$16 sps:$4 sm:$0xff]  }
 0x5df   : > { %6238 = vmatprep.subr.bf16.mxu0 %v10247_v1  ;;  %6687 = vmatpush1.bf16.msra.mxu1 %v10236_v33  ;;  %v10263_v1 = vld [vmem:[#allocation10 + $0x440] ss:$16 sps:$4 sm:$0xff]  }
 0x5e0   : > { %6688 = vmatprep.subr.bf16.mxu1 %v10244_v48  ;;  %v13301_v33 = vld [vmem:[#allocation26_spill] sm:$0xff]  ;;  %v13302_v48 = vld [vmem:[#allocation28_spill] sm:$0xff] }
 0x5e2   : > { %6239 = vmatpush1.bf16.msra.mxu0 %v10245_v28  ;;  %v13304_v28 = vld [vmem:[#allocation32_spill] sm:$0xff] }
 0x5e3   : > { %6321 = vmatprep.subr.bf16.mxu0 %v10253_v24  ;;  %6689 = vmatpush1.bf16.msra.mxu1 %v10242_v7  ;;  %v12774_v24 = vpack.c.bf16 %v13304_v28, %v13303_v52  ;;  %v13305_v7 = vld [vmem:[#allocation31_spill] sm:$0xff] }
 0x5e4   : > { %6650 = vmatmul.mubr.bf16.gmra.mrb[188].mxu1 %v12760_v61  ;;  %6690 = vmatprep.subr.bf16.mxu1 %v10250_v3  ;;  %v10268_v3 = vld [vmem:[#allocation10 + $0x24c] ss:$16 sps:$4 sm:$0xff]   ;;  %v10278_v52 = vld [vmem:[#allocation10 + $0x288] ss:$16 sps:$4 sm:$0xff]  }
 0x5e5   : > { %6692 = vmatprep.mubr.bf16.mxu1 %v13298_v19  ;;  %6241 = vmatmul.mubr.bf16.vlgmr.msra.gmra.mrb[160].mxu0 %v12632_v34  ;;  %v10266_v19 = vld [vmem:[#allocation10 + $0x248] ss:$16 sps:$4 sm:$0xff]   ;;  %v10286_v28 = vld [vmem:[#allocation10 + $0x2ac] ss:$16 sps:$4 sm:$0xff]  }
 0x5e6   : > { %6250 = vmatprep.mubr.bf16.mxu0 %v12766_v16  ;;  %6322 = vmatpush1.bf16.msra.mxu0 %v10251_v47  ;;  %v10269_v47 = vld [vmem:[#allocation10 + $0x460] ss:$16 sps:$4 sm:$0xff]  }
 0x5e7   : > { %6323 = vmatprep.subr.bf16.mxu0 %v10259_v21  ;;  %6691 = vmatpush1.bf16.msra.mxu1 %v10248_v37  ;;  %v10277_v21 = vld [vmem:[#allocation10 + $0x484] ss:$16 sps:$4 sm:$0xff]   ;;  %v10274_v37 = vld [vmem:[#allocation10 + $0x26c] ss:$16 sps:$4 sm:$0xff]  }
 0x5e8   : > { %6773 = vmatprep.subr.bf16.mxu1 %v10256_v45  ;;  %v10283_v45 = vld [vmem:[#allocation10 + $0x4a4] ss:$16 sps:$4 sm:$0xff]  }
 0x5ea   : > { %6324 = vmatpush1.bf16.msra.mxu0 %v10257_v63  ;;  %v13307_v63 = vld [vmem:[#allocation34_spill] sm:$0xff] }
 0x5eb   : > { %6325 = vmatprep.subr.bf16.mxu0 %v10265_v36  ;;  %v10272_v36 = vld [vmem:[#allocation10 + $0x268] ss:$16 sps:$4 sm:$0xff]  }
 0x5ec   : > { %6693 = vmatmul.mubr.bf16.vlgmr.msra.gmra.mrb[192].mxu1 %v13301_v33  ;;  %v10280_v33 = vld [vmem:[#allocation10 + $0x28c] ss:$16 sps:$4 sm:$0xff]  }
 0x5ed   : > { %6774 = vmatpush1.bf16.msra.mxu1 %v10254_v58  ;;  %6702 = vmatprep.mubr.bf16.mxu1 %v13302_v48  ;;  %v13308_v58 = vld [vmem:[#allocation33_spill] sm:$0xff] }
 0x5ee   : > { %6775 = vmatprep.subr.bf16.mxu1 %v10262_v62  ;;  %6251 = vmatmul.mubr.bf16.gmra.mrb[164].mxu0 %v13305_v7  ;;  %v12782_v62 = vpack.c.bf16 %v12461_v27, %v13308_v58  ;;  %v10295_v27 = vld [vmem:[#allocation10 + $0x4e4] ss:$16 sps:$4 sm:$0xff]  }
 0x5ef   : > { %6260 = vmatprep.mubr.bf16.mxu0 %v12774_v24  ;;  %6326 = vmatpush1.bf16.msra.mxu0 %v10263_v1  ;;  %v13309_v1 = vld [vmem:[#allocation36_spill] sm:$0xff] }
 0x5f0   : > { %6327 = vmatprep.subr.bf16.mxu0 %v10271_v44  ;;  %v10281_v44 = vld [vmem:[#allocation10 + $0x4a0] ss:$16 sps:$4 sm:$0xff]   ;;  %v10301_v58 = vld [vmem:[#allocation10 + $0x504] ss:$16 sps:$4 sm:$0xff]  }
 0x5f1   : > { %6776 = vmatpush1.bf16.msra.mxu1 %v10260_v59  ;;  %v10289_v59 = vld [vmem:[#allocation10 + $0x4c4] ss:$16 sps:$4 sm:$0xff]  }
 0x5f2   : > { %6777 = vmatprep.subr.bf16.mxu1 %v10268_v3  ;;  %v10287_v3 = vld [vmem:[#allocation10 + $0x4c0] ss:$16 sps:$4 sm:$0xff]  }
 0x5f3   : > { %6328 = vmatpush1.bf16.msra.mxu0 %v10269_v47  ;;  %v13310_v47 = vld [vmem:[#allocation37_spill] sm:$0xff] }
 0x5f4   : > { %6703 = vmatmul.mubr.bf16.gmra.mrb[196].mxu1 %v13306_v51  ;;  %6329 = vmatprep.subr.bf16.mxu0 %v10277_v21  ;;  %v13311_v21 = vld [vmem:[#allocation38_spill] sm:$0xff] }
 0x5f5   : > { %6778 = vmatpush1.bf16.msra.mxu1 %v10266_v19  ;;  %6712 = vmatprep.mubr.bf16.mxu1 %v13307_v63  ;;  %v10284_v19 = vld [vmem:[#allocation10 + $0x2a8] ss:$16 sps:$4 sm:$0xff]  }
 0x5f6   : > { %6779 = vmatprep.subr.bf16.mxu1 %v10274_v37  ;;  %6261 = vmatmul.mubr.bf16.gmra.mrb[168].mxu0 %v13309_v1  ;;  %v12790_v37 = vpack.c.bf16 %v12463_v17, %v12448_v56  ;;  %v10307_v56 = vld [vmem:[#allocation10 + $0x524] ss:$16 sps:$4 sm:$0xff]  }
 0x5f7   : > { %6270 = vmatprep.mubr.bf16.mxu0 %v12782_v62  ;;  %6330 = vmatpush1.bf16.msra.mxu0 %v10275_v23  ;;  %v13312_v23 = vld [vmem:[#allocation40_spill] sm:$0xff] }
 0x5f8   : > { %6331 = vmatprep.subr.bf16.mxu0 %v10283_v45  ;;  %v10292_v45 = vld [vmem:[#allocation10 + $0x2cc] ss:$16 sps:$4 sm:$0xff]  }
 0x5f9   : > { %6780 = vmatpush1.bf16.msra.mxu1 %v10272_v36  ;;  %v10293_v36 = vld [vmem:[#allocation10 + $0x4e0] ss:$16 sps:$4 sm:$0xff]  }
 0x5fa   : > { %6781 = vmatprep.subr.bf16.mxu1 %v10280_v33  ;;  %v10290_v33 = vld [vmem:[#allocation10 + $0x2c8] ss:$16 sps:$4 sm:$0xff]   ;;  %v13314_v17 = vld [vmem:[#allocation44_spill] sm:$0xff] }
 0x5fb   : > { %6332 = vmatpush1.bf16.msra.mxu0 %v10281_v44  ;;  %v10298_v44 = vld [vmem:[#allocation10 + $0x2ec] ss:$16 sps:$4 sm:$0xff]  }
 0x5fc   : > { %6713 = vmatmul.mubr.bf16.gmra.mrb[200].mxu1 %v13310_v47  ;;  %6333 = vmatprep.subr.bf16.mxu0 %v10289_v59  ;;  %v10299_v59 = vld [vmem:[#allocation10 + $0x500] ss:$16 sps:$4 sm:$0xff]  }
 0x5fd   : > { %6782 = vmatpush1.bf16.msra.mxu1 %v10278_v52  ;;  %6722 = vmatprep.mubr.bf16.mxu1 %v13311_v21  ;;  %v13313_v52 = vld [vmem:[#allocation43_spill] sm:$0xff] }
 0x5fe   : > { %6783 = vmatprep.subr.bf16.mxu1 %v10286_v28  ;;  %6271 = vmatmul.mubr.bf16.gmra.mrb[172].mxu0 %v13312_v23  ;;  %v10296_v28 = vld [vmem:[#allocation10 + $0x2e8] ss:$16 sps:$4 sm:$0xff]  }
 0x5ff   : > { %6280 = vmatprep.mubr.bf16.mxu0 %v12790_v37  ;;  %6334 = vmatpush1.bf16.msra.mxu0 %v10287_v3  ;;  %v12798_v3 = vpack.c.bf16 %v13292_v4, %v12484_v50  ;;  %v10319_v50 = vld [vmem:[#allocation10 + $0x564] ss:$16 sps:$4 sm:$0xff]   ;;  %v10308_v4 = vld [vmem:[#allocation10 + $0x328] ss:$16 sps:$4 sm:$0xff]  }
 0x600   : > { %6335 = vmatprep.subr.bf16.mxu0 %v10295_v27  ;;  %v10304_v27 = vld [vmem:[#allocation10 + $0x30c] ss:$16 sps:$4 sm:$0xff]  }
 0x601   : > { %6784 = vmatpush1.bf16.msra.mxu1 %v10284_v19  ;;  %v10305_v19 = vld [vmem:[#allocation10 + $0x520] ss:$16 sps:$4 sm:$0xff]  }
 0x602   : > { %6785 = vmatprep.subr.bf16.mxu1 %v10292_v45  ;;  %v10313_v45 = vld [vmem:[#allocation10 + $0x544] ss:$16 sps:$4 sm:$0xff]  }
 0x603   : > { %6336 = vmatpush1.bf16.msra.mxu0 %v10293_v36  ;;  %v10302_v36 = vld [vmem:[#allocation10 + $0x308] ss:$16 sps:$4 sm:$0xff]  }
 0x604   : > { %6723 = vmatmul.mubr.bf16.gmra.mrb[204].mxu1 %v13313_v52  ;;  %6337 = vmatprep.subr.bf16.mxu0 %v10301_v58  ;;  %v10310_v58 = vld [vmem:[#allocation10 + $0x32c] ss:$16 sps:$4 sm:$0xff]  }
 0x605   : > { %6786 = vmatpush1.bf16.msra.mxu1 %v10290_v33  ;;  %6732 = vmatprep.mubr.bf16.mxu1 %v13314_v17  ;;  %v10311_v33 = vld [vmem:[#allocation10 + $0x540] ss:$16 sps:$4 sm:$0xff]   ;;  %v10314_v17 = vld [vmem:[#allocation10 + $0x348] ss:$16 sps:$4 sm:$0xff]  }
 0x606   : > { %6787 = vmatprep.subr.bf16.mxu1 %v10298_v44  ;;  %6281 = vmatmul.mubr.bf16.gmra.mrb[176].mxu0 %v12647_v11  ;;  %v12806_v44 = vpack.c.bf16 %v13294_v42, %v13293_v5  ;;  %v10331_v5 = vld [vmem:[#allocation10 + $0x5a4] ss:$16 sps:$4 sm:$0xff]   ;;  %v10320_v42 = vld [vmem:[#allocation10 + $0x368] ss:$16 sps:$4 sm:$0xff]  }
 0x607   : > { %6290 = vmatprep.mubr.bf16.mxu0 %v12798_v3  ;;  %6338 = vmatpush1.bf16.msra.mxu0 %v10299_v59  ;;  %v10316_v59 = vld [vmem:[#allocation10 + $0x34c] ss:$16 sps:$4 sm:$0xff]  }
 0x608   : > { %6339 = vmatprep.subr.bf16.mxu0 %v10307_v56  ;;  %v10317_v56 = vld [vmem:[#allocation10 + $0x560] ss:$16 sps:$4 sm:$0xff]  }
 0x609   : > { %6788 = vmatpush1.bf16.msra.mxu1 %v10296_v28  ;;  %v10322_v28 = vld [vmem:[#allocation10 + $0x36c] ss:$16 sps:$4 sm:$0xff]  }
 0x60a   : > { %6789 = vmatprep.subr.bf16.mxu1 %v10304_v27  ;;  %v10323_v27 = vld [vmem:[#allocation10 + $0x580] ss:$16 sps:$4 sm:$0xff]  }
 0x60b   : > { %6340 = vmatpush1.bf16.msra.mxu0 %v10305_v19  ;;  %v12814_v19 = vpack.c.bf16 %v12576_v22, %v12561_v40  ;;  %v10343_v40 = vld [vmem:[#allocation10 + $0x5e4] ss:$16 sps:$4 sm:$0xff]   ;;  %v10332_v22 = vld [vmem:[#allocation10 + $0x3a8] ss:$16 sps:$4 sm:$0xff]  }
 0x60c   : > { %6733 = vmatmul.mubr.bf16.gmra.mrb[208].mxu1 %v12556_v39  ;;  %6341 = vmatprep.subr.bf16.mxu0 %v10313_v45  ;;  %v10325_v39 = vld [vmem:[#allocation10 + $0x584] ss:$16 sps:$4 sm:$0xff]   ;;  %v10328_v45 = vld [vmem:[#allocation10 + $0x38c] ss:$16 sps:$4 sm:$0xff]  }
 0x60d   : > { %6790 = vmatpush1.bf16.msra.mxu1 %v10302_v36  ;;  %6742 = vmatprep.mubr.bf16.mxu1 %v12571_v60  ;;  %v10329_v36 = vld [vmem:[#allocation10 + $0x5a0] ss:$16 sps:$4 sm:$0xff]  }
 0x60e   : > { %6791 = vmatprep.subr.bf16.mxu1 %v10310_v58  ;;  %6291 = vmatmul.mubr.bf16.gmra.mrb[180].mxu0 %v12701_v8  ;;  %v10337_v58 = vld [vmem:[#allocation10 + $0x5c4] ss:$16 sps:$4 sm:$0xff]  }
 0x60f   : > { %6300 = vmatprep.mubr.bf16.mxu0 %v12806_v44  ;;  %6342 = vmatpush1.bf16.msra.mxu0 %v10311_v33  ;;  %v10326_v33 = vld [vmem:[#allocation10 + $0x388] ss:$16 sps:$4 sm:$0xff]  }
 0x610   : > { %6343 = vmatprep.subr.bf16.mxu0 %v10319_v50  ;;  %v10334_v50 = vld [vmem:[#allocation10 + $0x3ac] ss:$16 sps:$4 sm:$0xff]  }
 0x611   : > { %6792 = vmatpush1.bf16.msra.mxu1 %v10308_v4  ;;  %v10335_v4 = vld [vmem:[#allocation10 + $0x5c0] ss:$16 sps:$4 sm:$0xff]  }
 0x612   : > { %6793 = vmatprep.subr.bf16.mxu1 %v10316_v59  ;;  %v10340_v59 = vld [vmem:[#allocation10 + $0x3cc] ss:$16 sps:$4 sm:$0xff]  }
 0x613   : > { %6344 = vmatpush1.bf16.msra.mxu0 %v10317_v56  ;;  %v10341_v56 = vld [vmem:[#allocation10 + $0x5e0] ss:$16 sps:$4 sm:$0xff]  }
 0x614   : > { %6743 = vmatmul.mubr.bf16.gmra.mrb[212].mxu1 %v12710_v46  ;;  %6345 = vmatprep.subr.bf16.mxu0 %v10325_v39  ;;  %v10349_v39 = vld [vmem:[#allocation10 + $0x604] ss:$16 sps:$4 sm:$0xff]  }
 0x615   : > { %6794 = vmatpush1.bf16.msra.mxu1 %v10314_v17  ;;  %6752 = vmatprep.mubr.bf16.mxu1 %v12721_v6  ;;  %v10338_v17 = vld [vmem:[#allocation10 + $0x3c8] ss:$16 sps:$4 sm:$0xff]  }
 0x616   : > { %6795 = vmatprep.subr.bf16.mxu1 %v10322_v28  ;;  %6301 = vmatmul.mubr.bf16.gmra.mrb[184].mxu0 %v12727_v18  ;;  %v10346_v28 = vld [vmem:[#allocation10 + $0x3ec] ss:$16 sps:$4 sm:$0xff]  }
 0x617   : > { %6310 = vmatprep.mubr.bf16.mxu0 %v12814_v19  ;;  %6346 = vmatpush1.bf16.msra.mxu0 %v10323_v27  ;;  %v10347_v27 = vld [vmem:[#allocation10 + $0x600] ss:$16 sps:$4 sm:$0xff]  }
 0x618   : > { %6347 = vmatprep.subr.bf16.mxu0 %v10331_v5  ;;  %v10355_v5 = vld [vmem:[#allocation10 + $0x624] ss:$16 sps:$4 sm:$0xff]  }
 0x619   : > { %6796 = vmatpush1.bf16.msra.mxu1 %v10320_v42  ;;  %v10344_v42 = vld [vmem:[#allocation10 + $0x3e8] ss:$16 sps:$4 sm:$0xff]  }
 0x61a   : > { %6797 = vmatprep.subr.bf16.mxu1 %v10328_v45  ;;  %v13315_v45 = vld [vmem:[#allocation25_spill] sm:$0xff] }
 0x61b   : > { %6348 = vmatpush1.bf16.msra.mxu0 %v10329_v36  ;;  %v10352_v36 = vld [vmem:[#allocation10 + $0x40c] ss:$16 sps:$4 sm:$0xff]  }
 0x61c   : > { %6753 = vmatmul.mubr.bf16.gmra.mrb[216].mxu1 %v12731_v9  ;;  %6349 = vmatprep.subr.bf16.mxu0 %v10337_v58  ;;  %v10353_v58 = vld [vmem:[#allocation10 + $0x620] ss:$16 sps:$4 sm:$0xff]  }
 0x61d   : > { %6798 = vmatpush1.bf16.msra.mxu1 %v10326_v33  ;;  %6762 = vmatprep.mubr.bf16.mxu1 %v12736_v54  ;;  %v10361_v33 = vld [vmem:[#allocation10 + $0x644] ss:$16 sps:$4 sm:$0xff]  }
 0x61e   : > { %6799 = vmatprep.subr.bf16.mxu1 %v10334_v50  ;;  %6311 = vmatmul.mubr.bf16.gmra.mrb[188].mxu0 %v12742_v13  ;;  %v10350_v50 = vld [vmem:[#allocation10 + $0x408] ss:$16 sps:$4 sm:$0xff]  }
 0x61f   : > { %6350 = vmatpush1.bf16.msra.mxu0 %v10335_v4  ;;  %6353 = vmatprep.mubr.bf16.mxu0 %v12638_v12  ;;  %v10358_v4 = vld [vmem:[#allocation10 + $0x42c] ss:$16 sps:$4 sm:$0xff]  }
 0x620   : > { %6351 = vmatprep.subr.bf16.mxu0 %v10343_v40  ;;  %v10359_v40 = vld [vmem:[#allocation10 + $0x640] ss:$16 sps:$4 sm:$0xff]  }
 0x621   : > { %6800 = vmatpush1.bf16.msra.mxu1 %v10332_v22  ;;  %v10356_v22 = vld [vmem:[#allocation10 + $0x428] ss:$16 sps:$4 sm:$0xff]  }
 0x622   : > { %6801 = vmatprep.subr.bf16.mxu1 %v10340_v59  ;;  %v10364_v59 = vld [vmem:[#allocation10 + $0x44c] ss:$16 sps:$4 sm:$0xff]  }
 0x623   : > { %6352 = vmatpush1.bf16.msra.mxu0 %v10341_v56  ;;  %v10365_v56 = vld [vmem:[#allocation10 + $0x660] ss:$16 sps:$4 sm:$0xff]  }
 0x624   : > { %6763 = vmatmul.mubr.bf16.gmra.mrb[220].mxu1 %v12746_v35  ;;  %6434 = vmatprep.subr.bf16.mxu0 %v10349_v39  ;;  %v10373_v39 = vld [vmem:[#allocation10 + $0x684] ss:$16 sps:$4 sm:$0xff]  }
 0x625   : > { %6802 = vmatpush1.bf16.msra.mxu1 %v10338_v17  ;;  %6805 = vmatprep.mubr.bf16.mxu1 %v12753_v29  ;;  %v10367_v29 = vld [vmem:[#allocation10 + $0x664] ss:$16 sps:$4 sm:$0xff]   ;;  %v10362_v17 = vld [vmem:[#allocation10 + $0x448] ss:$16 sps:$4 sm:$0xff]  }
 0x626   : > { %6803 = vmatprep.subr.bf16.mxu1 %v10346_v28  ;;  %6354 = vmatmul.mubr.bf16.vlgmr.msra.gmra.mrb[160].mxu0 %v13315_v45  ;;  %v10371_v28 = vld [vmem:[#allocation10 + $0x680] ss:$16 sps:$4 sm:$0xff]  }
 0x627   : > { %6363 = vmatprep.mubr.bf16.mxu0 %v12642_v15  ;;  %6435 = vmatpush1.bf16.msra.mxu0 %v10347_v27  ;;  %v10368_v27 = vld [vmem:[#allocation10 + $0x468] ss:$16 sps:$4 sm:$0xff]  }
 0x628   : > { %6436 = vmatprep.subr.bf16.mxu0 %v10355_v5  ;;  %v10376_v5 = vld [vmem:[#allocation10 + $0x48c] ss:$16 sps:$4 sm:$0xff]  }
 0x629   : > { %6804 = vmatpush1.bf16.msra.mxu1 %v10344_v42  ;;  %v10377_v42 = vld [vmem:[#allocation10 + $0x6a0] ss:$16 sps:$4 sm:$0xff]  }
 0x62a   : > { %6886 = vmatprep.subr.bf16.mxu1 %v10352_v36  ;;  %v10385_v36 = vld [vmem:[#allocation10 + $0x6c4] ss:$16 sps:$4 sm:$0xff]  }
 0x62b   : > { %6437 = vmatpush1.bf16.msra.mxu0 %v10353_v58  ;;  %v10374_v58 = vld [vmem:[#allocation10 + $0x488] ss:$16 sps:$4 sm:$0xff]  }
 0x62c   : > { %6806 = vmatmul.mubr.bf16.vlgmr.msra.gmra.mrb[192].mxu1 %v12632_v34  ;;  %6438 = vmatprep.subr.bf16.mxu0 %v10361_v33  ;;  %v10370_v34 = vld [vmem:[#allocation10 + $0x46c] ss:$16 sps:$4 sm:$0xff]  }
 0x62d   : > { %6887 = vmatpush1.bf16.msra.mxu1 %v10350_v50  ;;  %6815 = vmatprep.mubr.bf16.mxu1 %v12766_v16  ;;  %v10379_v16 = vld [vmem:[#allocation10 + $0x6a4] ss:$16 sps:$4 sm:$0xff]   ;;  %v10382_v33 = vld [vmem:[#allocation10 + $0x4ac] ss:$16 sps:$4 sm:$0xff]   ;;  %v10383_v50 = vld [vmem:[#allocation10 + $0x6c0] ss:$16 sps:$4 sm:$0xff]  }
 0x62e   : > { %6888 = vmatprep.subr.bf16.mxu1 %v10358_v4  ;;  %6364 = vmatmul.mubr.bf16.gmra.mrb[164].mxu0 %v12651_v14  ;;  %v10380_v4 = vld [vmem:[#allocation10 + $0x4a8] ss:$16 sps:$4 sm:$0xff]  }
 0x62f   : > { %6373 = vmatprep.mubr.bf16.mxu0 %v12655_v53  ;;  %6439 = vmatpush1.bf16.msra.mxu0 %v10359_v40  ;;  %v10388_v40 = vld [vmem:[#allocation10 + $0x4cc] ss:$16 sps:$4 sm:$0xff]  }
 0x630   : > { %6440 = vmatprep.subr.bf16.mxu0 %v10367_v29  ;;  %v10389_v29 = vld [vmem:[#allocation10 + $0x6e0] ss:$16 sps:$4 sm:$0xff]  }
 0x631   : > { %6889 = vmatpush1.bf16.msra.mxu1 %v10356_v22  ;;  %v10397_v22 = vld [vmem:[#allocation10 + $0x704] ss:$16 sps:$4 sm:$0xff]  }
 0x632   : > { %6890 = vmatprep.subr.bf16.mxu1 %v10364_v59  ;;  %v10386_v59 = vld [vmem:[#allocation10 + $0x4c8] ss:$16 sps:$4 sm:$0xff]  }
 0x633   : > { %6441 = vmatpush1.bf16.msra.mxu0 %v10365_v56  ;;  %v10394_v56 = vld [vmem:[#allocation10 + $0x4ec] ss:$16 sps:$4 sm:$0xff]  }
 0x634   : > { %6816 = vmatmul.mubr.bf16.gmra.mrb[196].mxu1 %v13305_v7  ;;  %6442 = vmatprep.subr.bf16.mxu0 %v10373_v39  ;;  %v10395_v39 = vld [vmem:[#allocation10 + $0x700] ss:$16 sps:$4 sm:$0xff]  }
 0x635   : > { %6891 = vmatpush1.bf16.msra.mxu1 %v10362_v17  ;;  %6825 = vmatprep.mubr.bf16.mxu1 %v12774_v24  ;;  %v10391_v24 = vld [vmem:[#allocation10 + $0x6e4] ss:$16 sps:$4 sm:$0xff]   ;;  %v10392_v17 = vld [vmem:[#allocation10 + $0x4e8] ss:$16 sps:$4 sm:$0xff]  }
 0x636   : > { %6892 = vmatprep.subr.bf16.mxu1 %v10370_v34  ;;  %6374 = vmatmul.mubr.bf16.gmra.mrb[168].mxu0 %v12661_v0  ;;  %v10400_v34 = vld [vmem:[#allocation10 + $0x50c] ss:$16 sps:$4 sm:$0xff]  }
 0x637   : > { %6383 = vmatprep.mubr.bf16.mxu0 %v12665_v25  ;;  %6443 = vmatpush1.bf16.msra.mxu0 %v10371_v28  ;;  %v10401_v28 = vld [vmem:[#allocation10 + $0x720] ss:$16 sps:$4 sm:$0xff]  }
 0x638   : > { %6444 = vmatprep.subr.bf16.mxu0 %v10379_v16  ;;  %v10409_v16 = vld [vmem:[#allocation10 + $0x744] ss:$16 sps:$4 sm:$0xff]  }
 0x639   : > { %6893 = vmatpush1.bf16.msra.mxu1 %v10368_v27  ;;  %v10398_v27 = vld [vmem:[#allocation10 + $0x508] ss:$16 sps:$4 sm:$0xff]  }
 0x63a   : > { %6894 = vmatprep.subr.bf16.mxu1 %v10376_v5  ;;  %v10406_v5 = vld [vmem:[#allocation10 + $0x52c] ss:$16 sps:$4 sm:$0xff]  }
 0x63b   : > { %6445 = vmatpush1.bf16.msra.mxu0 %v10377_v42  ;;  %v10407_v42 = vld [vmem:[#allocation10 + $0x740] ss:$16 sps:$4 sm:$0xff]  }
 0x63c   : > { %6826 = vmatmul.mubr.bf16.gmra.mrb[200].mxu1 %v13309_v1  ;;  %6446 = vmatprep.subr.bf16.mxu0 %v10385_v36  ;;  %v10404_v36 = vld [vmem:[#allocation10 + $0x528] ss:$16 sps:$4 sm:$0xff]  }
 0x63d   : > { %6895 = vmatpush1.bf16.msra.mxu1 %v10374_v58  ;;  %6835 = vmatprep.mubr.bf16.mxu1 %v12782_v62  ;;  %v10403_v62 = vld [vmem:[#allocation10 + $0x724] ss:$16 sps:$4 sm:$0xff]   ;;  %v10412_v58 = vld [vmem:[#allocation10 + $0x54c] ss:$16 sps:$4 sm:$0xff]  }
 0x63e   : > { %6896 = vmatprep.subr.bf16.mxu1 %v10382_v33  ;;  %6384 = vmatmul.mubr.bf16.gmra.mrb[172].mxu0 %v12670_v31  ;;  %v10413_v33 = vld [vmem:[#allocation10 + $0x760] ss:$16 sps:$4 sm:$0xff]  }
 0x63f   : > { %6393 = vmatprep.mubr.bf16.mxu0 %v12673_v10  ;;  %6447 = vmatpush1.bf16.msra.mxu0 %v10383_v50  ;;  %v10421_v50 = vld [vmem:[#allocation10 + $0x784] ss:$16 sps:$4 sm:$0xff]  }
 0x640   : > { %6448 = vmatprep.subr.bf16.mxu0 %v10391_v24  ;;  %v10410_v24 = vld [vmem:[#allocation10 + $0x548] ss:$16 sps:$4 sm:$0xff]  }
 0x641   : > { %6897 = vmatpush1.bf16.msra.mxu1 %v10380_v4  ;;  %v10419_v4 = vld [vmem:[#allocation10 + $0x780] ss:$16 sps:$4 sm:$0xff]  }
 0x642   : > { %6898 = vmatprep.subr.bf16.mxu1 %v10388_v40  ;;  %v10416_v40 = vld [vmem:[#allocation10 + $0x568] ss:$16 sps:$4 sm:$0xff]  }
 0x643   : > { %6449 = vmatpush1.bf16.msra.mxu0 %v10389_v29  ;;  %v10424_v29 = vld [vmem:[#allocation10 + $0x58c] ss:$16 sps:$4 sm:$0xff]  }
 0x644   : > { %6836 = vmatmul.mubr.bf16.gmra.mrb[204].mxu1 %v13312_v23  ;;  %6450 = vmatprep.subr.bf16.mxu0 %v10397_v22  ;;  %v10425_v22 = vld [vmem:[#allocation10 + $0x7a0] ss:$16 sps:$4 sm:$0xff]  }
 0x645   : > { %6899 = vmatpush1.bf16.msra.mxu1 %v10386_v59  ;;  %6845 = vmatprep.mubr.bf16.mxu1 %v12790_v37  ;;  %v10415_v37 = vld [vmem:[#allocation10 + $0x764] ss:$16 sps:$4 sm:$0xff]  }
 0x646   : > { %6900 = vmatprep.subr.bf16.mxu1 %v10394_v56  ;;  %6394 = vmatmul.mubr.bf16.gmra.mrb[176].mxu0 %v12677_v26  ;;  %v10433_v59 = vld [vmem:[#allocation10 + $0x7c4] ss:$16 sps:$4 sm:$0xff]   ;;  %v10422_v56 = vld [vmem:[#allocation10 + $0x588] ss:$16 sps:$4 sm:$0xff]  }
 0x647   : > { %6403 = vmatprep.mubr.bf16.mxu0 %v12681_v55  ;;  %6451 = vmatpush1.bf16.msra.mxu0 %v10395_v39  ;;  %v10430_v39 = vld [vmem:[#allocation10 + $0x5ac] ss:$16 sps:$4 sm:$0xff]  }
 0x648   : > { %6452 = vmatprep.subr.bf16.mxu0 %v10403_v62  ;;  %v10431_v62 = vld [vmem:[#allocation10 + $0x7c0] ss:$16 sps:$4 sm:$0xff]  }
 0x649   : > { %6901 = vmatpush1.bf16.msra.mxu1 %v10392_v17  ;;  %v10428_v17 = vld [vmem:[#allocation10 + $0x5a8] ss:$16 sps:$4 sm:$0xff]  }
 0x64a   : > { %6902 = vmatprep.subr.bf16.mxu1 %v10400_v34  ;;  %v10436_v34 = vld [vmem:[#allocation10 + $0x5cc] ss:$16 sps:$4 sm:$0xff]  }
 0x64b   : > { %6453 = vmatpush1.bf16.msra.mxu0 %v10401_v28  ;;  %v10437_v28 = vld [vmem:[#allocation10 + $0x7e0] ss:$16 sps:$4 sm:$0xff]  }
 0x64c   : > { %6846 = vmatmul.mubr.bf16.gmra.mrb[208].mxu1 %v12647_v11  ;;  %6454 = vmatprep.subr.bf16.mxu0 %v10409_v16  ;;  %v10418_v11 = vld [vmem:[#allocation10 + $0x56c] ss:$16 sps:$4 sm:$0xff]   ;;  %v10434_v16 = vld [vmem:[#allocation10 + $0x5c8] ss:$16 sps:$4 sm:$0xff]  }
 0x64d   : > { %6903 = vmatpush1.bf16.msra.mxu1 %v10398_v27  ;;  %6855 = vmatprep.mubr.bf16.mxu1 %v12798_v3  ;;  %v10427_v3 = vld [vmem:[#allocation10 + $0x7a4] ss:$16 sps:$4 sm:$0xff]   ;;  %v10442_v27 = vld [vmem:[#allocation10 + $0x5ec] ss:$16 sps:$4 sm:$0xff]  }
 0x64e   : > { %6904 = vmatprep.subr.bf16.mxu1 %v10406_v5  ;;  %6404 = vmatmul.mubr.bf16.gmra.mrb[180].mxu0 %v12685_v57  ;;  %v10445_v5 = vld [vmem:[#allocation10 + $0x60c] ss:$16 sps:$4 sm:$0xff]  }
 0x64f   : > { %6413 = vmatprep.mubr.bf16.mxu0 %v12689_v38  ;;  %6455 = vmatpush1.bf16.msra.mxu0 %v10407_v42  ;;  %v10443_v42 = vld [vmem:[#allocation10 + $0x608] ss:$16 sps:$4 sm:$0xff]  }
 0x650   : > { %6456 = vmatprep.subr.bf16.mxu0 %v10415_v37  ;;  %v10448_v37 = vld [vmem:[#allocation10 + $0x62c] ss:$16 sps:$4 sm:$0xff]  }
 0x651   : > { %6905 = vmatpush1.bf16.msra.mxu1 %v10404_v36  ;;  %v10446_v36 = vld [vmem:[#allocation10 + $0x628] ss:$16 sps:$4 sm:$0xff]  }
 0x652   : > { %6906 = vmatprep.subr.bf16.mxu1 %v10412_v58  ;;  %v10449_v58 = vld [vmem:[#allocation10 + $0x648] ss:$16 sps:$4 sm:$0xff]  }
 0x653   : > { %6457 = vmatpush1.bf16.msra.mxu0 %v10413_v33  ;;  %v10454_v33 = vld [vmem:[#allocation10 + $0x66c] ss:$16 sps:$4 sm:$0xff]  }
 0x654   : > { %6856 = vmatmul.mubr.bf16.gmra.mrb[212].mxu1 %v12701_v8  ;;  %6458 = vmatprep.subr.bf16.mxu0 %v10421_v50  ;;  %v10455_v50 = vld [vmem:[#allocation10 + $0x688] ss:$16 sps:$4 sm:$0xff]  }
 0x655   : > { %6907 = vmatpush1.bf16.msra.mxu1 %v10410_v24  ;;  %6865 = vmatprep.mubr.bf16.mxu1 %v12806_v44  ;;  %v10439_v44 = vld [vmem:[#allocation10 + $0x7e4] ss:$16 sps:$4 sm:$0xff]   ;;  %v10460_v24 = vld [vmem:[#allocation10 + $0x6ac] ss:$16 sps:$4 sm:$0xff]  }
 0x656   : > { %6908 = vmatprep.subr.bf16.mxu1 %v10418_v11  ;;  %6414 = vmatmul.mubr.bf16.gmra.mrb[184].mxu0 %v12693_v32  ;;  %v12867_v11 = vld [vmem:[#allocation2] sm:$0xff] }
 0x657   : > { %6423 = vmatprep.mubr.bf16.mxu0 %v12697_v30  ;;  %6459 = vmatpush1.bf16.msra.mxu0 %v10419_v4  ;;  %v10647_v4 = vld [vmem:[#allocation2 + $0x80] sm:$0xff] }
 0x658   : > { %6460 = vmatprep.subr.bf16.mxu0 %v10427_v3  ;;  %v10463_v3 = vld [vmem:[#allocation10 + $0x6cc] ss:$16 sps:$4 sm:$0xff]  }
 0x659   : > { %6909 = vmatpush1.bf16.msra.mxu1 %v10416_v40 }
 0x65a   : > { %6910 = vmatprep.subr.bf16.mxu1 %v10424_v29 }
 0x65b   : > { %6461 = vmatpush1.bf16.msra.mxu0 %v10425_v22  ;;  %v10461_v22 = vld [vmem:[#allocation10 + $0x6c8] ss:$16 sps:$4 sm:$0xff]  }
 0x65c   : > { %6866 = vmatmul.mubr.bf16.gmra.mrb[216].mxu1 %v12727_v18  ;;  %6462 = vmatprep.subr.bf16.mxu0 %v10433_v59 }
 0x65d   : > { %6911 = vmatpush1.bf16.msra.mxu1 %v10422_v56  ;;  %6875 = vmatprep.mubr.bf16.mxu1 %v12814_v19  ;;  %v10440_v19 = vld [vmem:[#allocation10 + $0x5e8] ss:$16 sps:$4 sm:$0xff]   ;;  %v10466_v56 = vld [vmem:[#allocation10 + $0x6ec] ss:$16 sps:$4 sm:$0xff]  }
 0x65e   : > { %6912 = vmatprep.subr.bf16.mxu1 %v10430_v39  ;;  %6424 = vmatmul.mubr.bf16.gmra.mrb[188].mxu0 %v12712_v49  ;;  %v10515_v39 = vld [vmem:[#allocation13] ss:$8 sps:$4 sm:$0xff]  }
 0x65f   : > { %6463 = vmatpush1.bf16.msra.mxu0 %v10431_v62  ;;  %6466 = vmatprep.mubr.bf16.mxu0 %v13302_v48  ;;  %v10517_v62 = vld [vmem:[#allocation13 + $0x4] ss:$8 sps:$4 sm:$0xff]  }
 0x660   : > { %6464 = vmatprep.subr.bf16.mxu0 %v10439_v44  ;;  %v10469_v44 = vld [vmem:[#allocation10 + $0x70c] ss:$16 sps:$4 sm:$0xff]  }
 0x661   : > { %6913 = vmatpush1.bf16.msra.mxu1 %v10428_v17 }
 0x662   : > { %6914 = vmatprep.subr.bf16.mxu1 %v10436_v34 }
 0x663   : > { %6465 = vmatpush1.bf16.msra.mxu0 %v10437_v28  ;;  %v10467_v28 = vld [vmem:[#allocation10 + $0x708] ss:$16 sps:$4 sm:$0xff]  }
 0x664   : > { %6876 = vmatmul.mubr.bf16.gmra.mrb[220].mxu1 %v12742_v13  ;;  %7717 = vmatprep.subr.bf16.mxu0 %v10517_v62  ;;  %v10648_v62 = vld [vmem:[#allocation2 + $0x120] sm:$0xff] }
 0x665   : > { %6915 = vmatpush1.bf16.msra.mxu1 %v10434_v16  ;;  %6918 = vmatprep.mubr.bf16.mxu1 %v12638_v12  ;;  %v10451_v12 = vld [vmem:[#allocation10 + $0x64c] ss:$16 sps:$4 sm:$0xff]  }
 0x666   : > { %6916 = vmatprep.subr.bf16.mxu1 %v10442_v27  ;;  %6467 = vmatmul.mubr.bf16.vlgmr.msra.gmra.mrb[160].mxu0 %v13306_v51  ;;  %v10472_v16 = vld [vmem:[#allocation10 + $0x72c] ss:$16 sps:$4 sm:$0xff]  }
 0x667   : > { %6476 = vmatprep.mubr.bf16.mxu0 %v13307_v63  ;;  %7718 = vmatpush1.bf16.msra.mxu0 %v10515_v39  ;;  %v10518_v27 = vld [vmem:[#allocation13 + $0x10] ss:$8 sps:$4 sm:$0xff]  }
 0x668   : > { %v10484_v39 = vld [vmem:[#allocation10 + $0x7ac] ss:$16 sps:$4 sm:$0xff]  }
 0x669   : > { %6917 = vmatpush1.bf16.msra.mxu1 %v10440_v19  ;;  %v10520_v19 = vld [vmem:[#allocation13 + $0x14] ss:$8 sps:$4 sm:$0xff]  }
 0x66a   : > { %6999 = vmatprep.subr.bf16.mxu1 %v10445_v5  ;;  %v10470_v5 = vld [vmem:[#allocation10 + $0x728] ss:$16 sps:$4 sm:$0xff]   ;;  %7719 = vmatprep.subr.bf16.mxu0 %v10520_v19 }
 0x66b   : > { %7720 = vmatpush1.bf16.msra.mxu0 %v10518_v27  ;;  %v10482_v27 = vld [vmem:[#allocation10 + $0x7a8] ss:$16 sps:$4 sm:$0xff]  }
 0x66c   : > { %6919 = vmatmul.mubr.bf16.vlgmr.msra.gmra.mrb[192].mxu1 %v13315_v45  ;;  %v10452_v45 = vld [vmem:[#allocation10 + $0x668] ss:$16 sps:$4 sm:$0xff]  }
 0x66d   : > { %7000 = vmatpush1.bf16.msra.mxu1 %v10443_v42  ;;  %6928 = vmatprep.mubr.bf16.mxu1 %v12642_v15  ;;  %v10457_v15 = vld [vmem:[#allocation10 + $0x68c] ss:$16 sps:$4 sm:$0xff]   ;;  %v10523_v42 = vld [vmem:[#allocation13 + $0x24] ss:$8 sps:$4 sm:$0xff]  }
 0x66e   : > { %7001 = vmatprep.subr.bf16.mxu1 %v10448_v37  ;;  %6477 = vmatmul.mubr.bf16.gmra.mrb[164].mxu0 %v13310_v47  ;;  %v10475_v37 = vld [vmem:[#allocation10 + $0x74c] ss:$16 sps:$4 sm:$0xff]   ;;  %v10535_v19 = vld [vmem:[#allocation13 + $0x64] ss:$8 sps:$4 sm:$0xff]  }
 0x66f   : > { %6486 = vmatprep.mubr.bf16.mxu0 %v13311_v21  ;;  %7721 = vmatprep.subr.bf16.mxu0 %v10523_v42 }
 0x671   : > { %7002 = vmatpush1.bf16.msra.mxu1 %v10446_v36 }
 0x672   : > { %7003 = vmatprep.subr.bf16.mxu1 %v10451_v12 }
 0x674   : > { %6929 = vmatmul.mubr.bf16.gmra.mrb[196].mxu1 %v12651_v14  ;;  %v12870_v14 = vpack.c.bf16 %v12867_v11, %v10647_v4  ;;  %v10529_v4 = vld [vmem:[#allocation13 + $0x44] ss:$8 sps:$4 sm:$0xff]  }
 0x675   : > { %7004 = vmatpush1.bf16.msra.mxu1 %v10449_v58  ;;  %6938 = vmatprep.mubr.bf16.mxu1 %v12655_v53  ;;  %v10458_v53 = vld [vmem:[#allocation10 + $0x6a8] ss:$16 sps:$4 sm:$0xff]  }
 0x676   : > { %7005 = vmatprep.subr.bf16.mxu1 %v10454_v33  ;;  %6487 = vmatmul.mubr.bf16.gmra.mrb[168].mxu0 %v13313_v52  ;;  %v10473_v33 = vld [vmem:[#allocation10 + $0x748] ss:$16 sps:$4 sm:$0xff]  }
 0x677   : > { %6496 = vmatprep.mubr.bf16.mxu0 %v12706_v43 }
 0x679   : > { %7006 = vmatpush1.bf16.msra.mxu1 %v10452_v45  ;;  %v10478_v45 = vld [vmem:[#allocation10 + $0x76c] ss:$16 sps:$4 sm:$0xff]  }
 0x67a   : > { %7007 = vmatprep.subr.bf16.mxu1 %v10457_v15  ;;  %v10524_v15 = vld [vmem:[#allocation13 + $0x30] ss:$8 sps:$4 sm:$0xff]  }
 0x67c   : > { %6939 = vmatmul.mubr.bf16.gmra.mrb[200].mxu1 %v12661_v0 }
 0x67d   : > { %7008 = vmatpush1.bf16.msra.mxu1 %v10455_v50  ;;  %6948 = vmatprep.mubr.bf16.mxu1 %v12665_v25  ;;  %v12874_v40 = vpop.f32.mrb[160].mxu1  ;;  %v10464_v25 = vld [vmem:[#allocation10 + $0x6e8] ss:$16 sps:$4 sm:$0xff]  }
 0x67e   : > { %7009 = vmatprep.subr.bf16.mxu1 %v10460_v24  ;;  %6497 = vmatmul.mubr.bf16.gmra.mrb[172].mxu0 %v12870_v14  ;;  %v12877_v29 = vpop.f32.mrb[161].mxu1  ;;  %v10526_v50 = vld [vmem:[#allocation13 + $0x34] ss:$8 sps:$4 sm:$0xff]  }
 0x67f   : > { %6506 = vmatprep.mubr.bf16.mxu0 %v12571_v60  ;;  %v12879_v0 = vpop.f32.mrb[162].mxu1  ;;  %v10476_v24 = vld [vmem:[#allocation10 + $0x768] ss:$16 sps:$4 sm:$0xff]  }
 0x680   : > { %v12881_v59 = vpop.f32.mrb[163].mxu1 }
 0x681   : > { %7010 = vmatpush1.bf16.msra.mxu1 %v10458_v53  ;;  %v10481_v53 = vld [vmem:[#allocation10 + $0x78c] ss:$16 sps:$4 sm:$0xff]  }
 0x682   : > { %7011 = vmatprep.subr.bf16.mxu1 %v10463_v3 }
 0x684   : > { %6949 = vmatmul.mubr.bf16.gmra.mrb[204].mxu1 %v12670_v31 }
 0x685   : > { %7012 = vmatpush1.bf16.msra.mxu1 %v10461_v22  ;;  %6958 = vmatprep.mubr.bf16.mxu1 %v12673_v10  ;;  %v12886_v17 = vpop.f32.mrb[164].mxu1 }
 0x686   : > { %7013 = vmatprep.subr.bf16.mxu1 %v10466_v56  ;;  %6507 = vmatmul.mubr.bf16.gmra.mrb[176].mxu0 %v12710_v46  ;;  %v12889_v34 = vpop.f32.mrb[165].mxu1 }
 0x687   : > { %6516 = vmatprep.mubr.bf16.mxu0 %v12721_v6  ;;  %v12891_v31 = vpop.f32.mrb[166].mxu1 }
 0x688   : > { %v12893_v10 = vpop.f32.mrb[167].mxu1 }
 0x689   : > { %7014 = vmatpush1.bf16.msra.mxu1 %v10464_v25  ;;  %v10479_v25 = vld [vmem:[#allocation10 + $0x788] ss:$16 sps:$4 sm:$0xff]  }
 0x68a   : > { %7015 = vmatprep.subr.bf16.mxu1 %v10469_v44  ;;  %v12921_v44 = vpack.c.bf16 %v12867_v11, %v10648_v62  ;;  %v10533_v11 = vld [vmem:[#allocation13 + $0x60] ss:$8 sps:$4 sm:$0xff]  }
 0x68c   : > { %6959 = vmatmul.mubr.bf16.gmra.mrb[208].mxu1 %v12677_v26  ;;  %v10521_v26 = vld [vmem:[#allocation13 + $0x20] ss:$8 sps:$4 sm:$0xff]  }
 0x68d   : > { %7016 = vmatpush1.bf16.msra.mxu1 %v10467_v28  ;;  %6968 = vmatprep.mubr.bf16.mxu1 %v12681_v55  ;;  %v12898_v36 = vpop.f32.mrb[168].mxu1  ;;  %v10530_v28 = vld [vmem:[#allocation13 + $0x50] ss:$8 sps:$4 sm:$0xff]  }
 0x68e   : > { %7017 = vmatprep.subr.bf16.mxu1 %v10472_v16  ;;  %6517 = vmatmul.mubr.bf16.gmra.mrb[180].mxu0 %v12731_v9  ;;  %v12901_v12 = vpop.f32.mrb[169].mxu1  ;;  %v10532_v16 = vld [vmem:[#allocation13 + $0x54] ss:$8 sps:$4 sm:$0xff]  }
 0x68f   : > { %6526 = vmatprep.mubr.bf16.mxu0 %v12736_v54  ;;  %v12903_v58 = vpop.f32.mrb[170].mxu1  ;;  %7722 = vmatpush1.bf16.msra.mxu0 %v10521_v26  ;;  %v10485_v26 = vld [vmem:[#allocation10 + $0x7c8] ss:$16 sps:$4 sm:$0xff]  }
 0x690   : > { %v12905_v55 = vpop.f32.mrb[171].mxu1  ;;  %7723 = vmatprep.subr.bf16.mxu0 %v10526_v50  ;;  %v10488_v50 = vld [vmem:[#allocation10 + $0x7e8] ss:$16 sps:$4 sm:$0xff]  }
 0x691   : > { %7018 = vmatpush1.bf16.msra.mxu1 %v10470_v5  ;;  %v10487_v5 = vld [vmem:[#allocation10 + $0x7cc] ss:$16 sps:$4 sm:$0xff]  }
 0x692   : > { %7019 = vmatprep.subr.bf16.mxu1 %v10475_v37 }
 0x693   : > { %7724 = vmatpush1.bf16.msra.mxu0 %v10524_v15  ;;  %v10538_v15 = vld [vmem:[#allocation13 + $0x74] ss:$8 sps:$4 sm:$0xff]  }
 0x694   : > { %6969 = vmatmul.mubr.bf16.gmra.mrb[212].mxu1 %v12685_v57  ;;  %v10527_v57 = vld [vmem:[#allocation13 + $0x40] ss:$8 sps:$4 sm:$0xff]   ;;  %7725 = vmatprep.subr.bf16.mxu0 %v10529_v4 }
 0x695   : > { %7020 = vmatpush1.bf16.msra.mxu1 %v10473_v33  ;;  %6978 = vmatprep.mubr.bf16.mxu1 %v12689_v38  ;;  %v12910_v3 = vpop.f32.mrb[172].mxu1  ;;  %v10493_v4 = vld [vmem:[#allocation10 + $0x80c] ss:$16 sps:$4 sm:$0xff]  }
 0x696   : > { %7021 = vmatprep.subr.bf16.mxu1 %v10478_v45  ;;  %6527 = vmatmul.mubr.bf16.gmra.mrb[184].mxu0 %v12746_v35  ;;  %v12913_v22 = vpop.f32.mrb[173].mxu1  ;;  %v10536_v45 = vld [vmem:[#allocation13 + $0x70] ss:$8 sps:$4 sm:$0xff]  }
 0x697   : > { %6536 = vmatprep.mubr.bf16.mxu0 %v12715_v41  ;;  %v12915_v56 = vpop.f32.mrb[174].mxu1  ;;  %7726 = vmatpush1.bf16.msra.mxu0 %v10527_v57 }
 0x698   : > { %v12917_v38 = vpop.f32.mrb[175].mxu1  ;;  %7727 = vmatprep.subr.bf16.mxu0 %v10532_v16  ;;  %v10542_v16 = vld [vmem:[#allocation13 + $0x90] ss:$8 sps:$4 sm:$0xff]  }
 0x699   : > { %7022 = vmatpush1.bf16.msra.mxu1 %v10476_v24  ;;  %v10541_v24 = vld [vmem:[#allocation13 + $0x84] ss:$8 sps:$4 sm:$0xff]  }
 0x69a   : > { %7023 = vmatprep.subr.bf16.mxu1 %v10481_v53 }
 0x69b   : > { %7728 = vmatpush1.bf16.msra.mxu0 %v10530_v28  ;;  %v10544_v28 = vld [vmem:[#allocation13 + $0x94] ss:$8 sps:$4 sm:$0xff]  }
 0x69c   : > { %6979 = vmatmul.mubr.bf16.gmra.mrb[216].mxu1 %v12693_v32  ;;  %7729 = vmatprep.subr.bf16.mxu0 %v10535_v19  ;;  %v10547_v19 = vld [vmem:[#allocation13 + $0xa4] ss:$8 sps:$4 sm:$0xff]  }
 0x69d   : > { %7024 = vmatpush1.bf16.msra.mxu1 %v10479_v25  ;;  %6988 = vmatprep.mubr.bf16.mxu1 %v12697_v30  ;;  %v10490_v30 = vld [vmem:[#allocation10 + $0x7ec] ss:$16 sps:$4 sm:$0xff]  }
 0x69e   : > { %7025 = vmatprep.subr.bf16.mxu1 %v10484_v39  ;;  %6537 = vmatmul.mubr.bf16.gmra.mrb[188].mxu0 %v12921_v44  ;;  %v10539_v25 = vld [vmem:[#allocation13 + $0x80] ss:$8 sps:$4 sm:$0xff]  }
 0x69f   : > { %v12925_v42 = vpop.f32.mrb[176].mxu1  ;;  %7730 = vmatpush1.bf16.msra.mxu0 %v10533_v11 }
 0x6a0   : > { %v12927_v32 = vpop.f32.mrb[177].mxu1  ;;  %7731 = vmatprep.subr.bf16.mxu0 %v10538_v15 }
 0x6a1   : > { %7026 = vmatpush1.bf16.msra.mxu1 %v10482_v27  ;;  %v12929_v37 = vpop.f32.mrb[178].mxu1  ;;  %v10494_v27 = vld [vmem:[#allocation10 + $0x828] ss:$16 sps:$4 sm:$0xff]  }
 0x6a2   : > { %v12931_v33 = vpop.f32.mrb[179].mxu1  ;;  %7027 = vmatprep.subr.bf16.mxu1 %v10487_v5  ;;  %v10499_v5 = vld [vmem:[#allocation10 + $0x84c] ss:$16 sps:$4 sm:$0xff]  }
 0x6a3   : > { %7732 = vmatpush1.bf16.msra.mxu0 %v10536_v45 }
 0x6a4   : > { %6989 = vmatmul.mubr.bf16.gmra.mrb[220].mxu1 %v12712_v49  ;;  %v10491_v49 = vld [vmem:[#allocation10 + $0x808] ss:$16 sps:$4 sm:$0xff]   ;;  %7733 = vmatprep.subr.bf16.mxu0 %v10541_v24  ;;  %v10548_v24 = vld [vmem:[#allocation13 + $0xb0] ss:$8 sps:$4 sm:$0xff]  }
 0x6a5   : > { %7028 = vmatpush1.bf16.msra.mxu1 %v10485_v26  ;;  %7031 = vmatprep.mubr.bf16.mxu1 %v13302_v48  ;;  %v10496_v48 = vld [vmem:[#allocation10 + $0x82c] ss:$16 sps:$4 sm:$0xff]  }
 0x6a6   : > { %7029 = vmatprep.subr.bf16.mxu1 %v10490_v30  ;;  %v10545_v30 = vld [vmem:[#allocation13 + $0xa0] ss:$8 sps:$4 sm:$0xff]  }
 0x6a7   : > { %v12935_v53 = vpop.f32.mrb[180].mxu1  ;;  %7734 = vmatpush1.bf16.msra.mxu0 %v10539_v25  ;;  %v10553_v25 = vld [vmem:[#allocation13 + $0xc4] ss:$8 sps:$4 sm:$0xff]  }
 0x6a8   : > { %v12937_v57 = vpop.f32.mrb[181].mxu1  ;;  %7735 = vmatprep.subr.bf16.mxu0 %v10544_v28 }
 0x6a9   : > { %7030 = vmatpush1.bf16.msra.mxu1 %v10488_v50  ;;  %v12939_v39 = vpop.f32.mrb[182].mxu1  ;;  %v10550_v50 = vld [vmem:[#allocation13 + $0xb4] ss:$8 sps:$4 sm:$0xff]  }
 0x6aa   : > { %v12941_v62 = vpop.f32.mrb[183].mxu1  ;;  %7112 = vmatprep.subr.bf16.mxu1 %v10493_v4  ;;  %v10500_v4 = vld [vmem:[#allocation10 + $0x868] ss:$16 sps:$4 sm:$0xff]  }
 0x6ab   : > { %7736 = vmatpush1.bf16.msra.mxu0 %v10542_v16  ;;  %v10551_v16 = vld [vmem:[#allocation13 + $0xc0] ss:$8 sps:$4 sm:$0xff]  }
 0x6ac   : > { %7032 = vmatmul.mubr.bf16.vlgmr.msra.gmra.mrb[192].mxu1 %v13306_v51  ;;  %v10497_v51 = vld [vmem:[#allocation10 + $0x848] ss:$16 sps:$4 sm:$0xff]   ;;  %7737 = vmatprep.subr.bf16.mxu0 %v10547_v19 }
 0x6ad   : > { %7113 = vmatpush1.bf16.msra.mxu1 %v10491_v49  ;;  %7041 = vmatprep.mubr.bf16.mxu1 %v13307_v63  ;;  %v10502_v63 = vld [vmem:[#allocation10 + $0x86c] ss:$16 sps:$4 sm:$0xff]  }
 0x6ae   : > { %7114 = vmatprep.subr.bf16.mxu1 %v10496_v48  ;;  %v10505_v49 = vld [vmem:[#allocation10 + $0x88c] ss:$16 sps:$4 sm:$0xff]  }
 0x6af   : > { %v12945_v11 = vpop.f32.mrb[184].mxu1  ;;  %7738 = vmatpush1.bf16.msra.mxu0 %v10545_v30  ;;  %v10511_v30 = vld [vmem:[#allocation10 + $0x8cc] ss:$16 sps:$4 sm:$0xff]  }
 0x6b0   : > { %v12947_v26 = vpop.f32.mrb[185].mxu1  ;;  %7739 = vmatprep.subr.bf16.mxu0 %v10550_v50  ;;  %v10509_v50 = vld [vmem:[#allocation10 + $0x8c8] ss:$16 sps:$4 sm:$0xff]  }
 0x6b1   : > { %v12949_v45 = vpop.f32.mrb[186].mxu1  ;;  %7115 = vmatpush1.bf16.msra.mxu1 %v10494_v27 }
 0x6b2   : > { %v12951_v15 = vpop.f32.mrb[187].mxu1  ;;  %7116 = vmatprep.subr.bf16.mxu1 %v10499_v5  ;;  %v10506_v5 = vld [vmem:[#allocation10 + $0x8a8] ss:$16 sps:$4 sm:$0xff]  }
 0x6b3   : > { %7740 = vmatpush1.bf16.msra.mxu0 %v10548_v24  ;;  %v10514_v24 = vld [vmem:[#allocation10 + $0x8ec] ss:$16 sps:$4 sm:$0xff]  }
 0x6b4   : > { %7042 = vmatmul.mubr.bf16.gmra.mrb[196].mxu1 %v13310_v47  ;;  %v10503_v47 = vld [vmem:[#allocation10 + $0x888] ss:$16 sps:$4 sm:$0xff]   ;;  %7741 = vmatprep.subr.bf16.mxu0 %v10553_v25 }
 0x6b5   : > { %7051 = vmatprep.mubr.bf16.mxu1 %v13311_v21  ;;  %7117 = vmatpush1.bf16.msra.mxu1 %v10497_v51  ;;  %v10508_v21 = vld [vmem:[#allocation10 + $0x8ac] ss:$16 sps:$4 sm:$0xff]   ;;  %v10559_v25 = vld [vmem:[#allocation13 + $0xe4] ss:$8 sps:$4 sm:$0xff]  }
 0x6b6   : > { %7118 = vmatprep.subr.bf16.mxu1 %v10502_v63  ;;  %v10554_v51 = vld [vmem:[#allocation13 + $0xd0] ss:$8 sps:$4 sm:$0xff]   ;;  %v10556_v63 = vld [vmem:[#allocation13 + $0xd4] ss:$8 sps:$4 sm:$0xff]  }
 0x6b7   : > { %v12955_v48 = vpop.f32.mrb[188].mxu1  ;;  %7742 = vmatpush1.bf16.msra.mxu0 %v10551_v16 }
 0x6b8   : > { %v12957_v28 = vpop.f32.mrb[189].mxu1  ;;  %7743 = vmatprep.subr.bf16.mxu0 %v10556_v63 }
 0x6b9   : > { %v12959_v27 = vpop.f32.mrb[190].mxu1  ;;  %7119 = vmatpush1.bf16.msra.mxu1 %v10500_v4  ;;  %v10557_v4 = vld [vmem:[#allocation13 + $0xe0] ss:$8 sps:$4 sm:$0xff]  }
 0x6ba   : > { %v12961_v19 = vpop.f32.mrb[191].mxu1  ;;  %7120 = vmatprep.subr.bf16.mxu1 %v10505_v49  ;;  %v10562_v49 = vld [vmem:[#allocation13 + $0xf4] ss:$8 sps:$4 sm:$0xff]  }
 0x6bb   : > { %7744 = vmatpush1.bf16.msra.mxu0 %v10554_v51 }
 0x6bc   : > { %7052 = vmatmul.mubr.bf16.gmra.mrb[200].mxu1 %v13313_v52  ;;  %7745 = vmatprep.subr.bf16.mxu0 %v10559_v25  ;;  %v10560_v52 = vld [vmem:[#allocation13 + $0xf0] ss:$8 sps:$4 sm:$0xff]  }
 0x6bd   : > { %7061 = vmatprep.mubr.bf16.mxu1 %v12706_v43  ;;  %7121 = vmatpush1.bf16.msra.mxu1 %v10503_v47  ;;  %v10512_v43 = vld [vmem:[#allocation10 + $0x8e8] ss:$16 sps:$4 sm:$0xff]  }
 0x6be   : > { %7122 = vmatprep.subr.bf16.mxu1 %v10508_v21 }
 0x6bf   : > { %7746 = vmatpush1.bf16.msra.mxu0 %v10557_v4 }
 0x6c0   : > { %7747 = vmatprep.subr.bf16.mxu0 %v10562_v49 }
 0x6c1   : > { %7123 = vmatpush1.bf16.msra.mxu1 %v10506_v5 }
 0x6c2   : > { %7124 = vmatprep.subr.bf16.mxu1 %v10511_v30 }
 0x6c3   : > { %7748 = vmatpush1.bf16.msra.mxu0 %v10560_v52 }
 0x6c4   : > { %7062 = vmatmul.mubr.bf16.gmra.mrb[204].mxu1 %v12870_v14 }
 0x6c5   : > { %7071 = vmatprep.mubr.bf16.mxu1 %v12571_v60  ;;  %7125 = vmatpush1.bf16.msra.mxu1 %v10509_v50  ;;  %v10565_v60 = vld [vmem:[#allocation13 + $0x104] ss:$8 sps:$4 sm:$0xff]  }
 0x6c6   : > { %7126 = vmatprep.subr.bf16.mxu1 %v10514_v24  ;;  %7830 = vmatprep.subr.bf16.mxu0 %v10565_v60 }
 0x6c9   : > { %7127 = vmatpush1.bf16.msra.mxu1 %v10512_v43 }
 0x6cc   : > { %7072 = vmatmul.mubr.bf16.gmra.mrb[208].mxu1 %v12710_v46  ;;  %v4635_v46 = vlaneseq }
 0x6cd   : > { %7081 = vmatprep.mubr.bf16.mxu1 %v12721_v6  ;;  %v12993_v6 = vld [vmem:[#allocation11] sm:$0xf] }
 0x6d4   : > { %7082 = vmatmul.mubr.bf16.gmra.mrb[212].mxu1 %v12731_v9 }
 0x6d5   : > { %7091 = vmatprep.mubr.bf16.mxu1 %v12736_v54 }
 0x6dc   : > { %7092 = vmatmul.mubr.bf16.gmra.mrb[216].mxu1 %v12746_v35 }
 0x6dd   : > { %7101 = vmatprep.mubr.bf16.mxu1 %v12715_v41  ;;  %v12990_v41 = vshrl.u32 %v4635_v46, 7 }
 0x6e4   : > { %7102 = vmatmul.mubr.bf16.gmra.mrb[220].mxu1 %v12921_v44 }
 0x6e5   : > { %7144 = vmatprep.mubr.bf16.mxu1 %v13289_v20 }
 0x6ec   : > { %7145 = vmatmul.mubr.bf16.vlgmr.msra.gmra.mrb[192].mxu1 %v13305_v7 }
 0x6ed   : > { %7154 = vmatprep.mubr.bf16.mxu1 %v13289_v20 }
 0x6f4   : > { %7155 = vmatmul.mubr.bf16.gmra.mrb[196].mxu1 %v13309_v1 }
 0x6f5   : > { %7164 = vmatprep.mubr.bf16.mxu1 %v13289_v20 }
 0x6fc   : > { %7165 = vmatmul.mubr.bf16.gmra.mrb[200].mxu1 %v13312_v23 }
 0x6fd   : > { %7174 = vmatprep.mubr.bf16.mxu1 %v13289_v20 }
 0x704   : > { %7175 = vmatmul.mubr.bf16.gmra.mrb[204].mxu1 %v12567_v2  ;;  %v4637_v2 = vsub.s32 0, %v12990_v41 }
 0x705   : > { %7184 = vmatprep.mubr.bf16.mxu1 %v13289_v20 }
 0x70c   : > { %7185 = vmatmul.mubr.bf16.gmra.mrb[208].mxu1 %v12701_v8  ;;  %v4641_v8 = vsub.s32 1, %v12990_v41 }
 0x70d   : > { %7194 = vmatprep.mubr.bf16.mxu1 %v13289_v20 }
 0x714   : > { %7195 = vmatmul.mubr.bf16.gmra.mrb[212].mxu1 %v12727_v18  ;;  %v12999_v18 = vrot.slane %v12993_v6, %v4637_v2 }
 0x715   : > { %7204 = vmatprep.mubr.bf16.mxu1 %v13289_v20 }
 0x71c   : > { %7205 = vmatmul.mubr.bf16.gmra.mrb[216].mxu1 %v12742_v13 }
 0x71d   : > { %7214 = vmatprep.mubr.bf16.mxu1 %v13289_v20  ;;  %v13004_v20 = vrot.slane %v12993_v6, %v4641_v8 }
 0x724   : > { %7215 = vmatmul.mubr.bf16.gmra.mrb[220].mxu1 %v12760_v61 }
 0x739   : > { %v6468_v9 = vpop.f32.mrb[160].mxu0 }
 0x73a   : > { %v9441_v54 = vadd.f32 %v6468_v9, %v12999_v18  ;;  %v6470_v13 = vpop.f32.mrb[161].mxu0 }
 0x73b   : > { %v9443_v35 = vadd.f32 %v6470_v13, %v13004_v20  ;;  %v6472_v61 = vpop.f32.mrb[162].mxu0  ;;  %v10566_v13 = vld [vmem:[#allocation13 + $0x110] ss:$8 sps:$4 sm:$0xff]  }
 0x73c   : > { %v9442_v7 = vadd.f32 %v9441_v54, %v12874_v40  ;;  %v9445_v1 = vadd.f32 %v6472_v61, %v12999_v18  ;;  %v6474_v23 = vpop.f32.mrb[163].mxu0 }
 0x73d   : > { %v9444_v14 = vadd.f32 %v9443_v35, %v12877_v29  ;;  %v9447_v44 = vadd.f32 %v6474_v23, %v13004_v20  ;;  %v10563_v29 = vld [vmem:[#allocation13 + $0x100] ss:$8 sps:$4 sm:$0xff]  }
 0x73e   : > { %v9446_v16 = vadd.f32 %v9445_v1, %v12879_v0  ;;  %v7225_v21 = vmax.f32 %v9442_v7, 0.0 }
 0x73f   : > { %v9448_v47 = vadd.f32 %v9447_v44, %v12881_v59  ;;  %v7226_v30 = vmax.f32 %v9444_v14, 0.0  ;;  %v10568_v59 = vld [vmem:[#allocation13 + $0x114] ss:$8 sps:$4 sm:$0xff]  }
 0x740   : > { %v7229_v5 = vmax.f32 %v9446_v16, 0.0 }
 0x741   : > { %v7230_v51 = vmax.f32 %v9448_v47, 0.0  ;;  %v6478_v63 = vpop.f32.mrb[164].mxu0 }
 0x742   : > { %v7289_v50 = vpack.c.bf16 %v7229_v5, %v7225_v21  ;;  %v9449_v24 = vadd.f32 %v6478_v63, %v12999_v18  ;;  %v6480_v40 = vpop.f32.mrb[165].mxu0  ;;  %v10569_v21 = vld [vmem:[#allocation13 + $0x120] ss:$8 sps:$4 sm:$0xff]  }
 0x743   : > { %v9451_v4 = vadd.f32 %v6480_v40, %v13004_v20  ;;  %v6482_v25 = vpop.f32.mrb[166].mxu0  ;;  %v7290_v43 = vpack.c.bf16 %v7230_v51, %v7226_v30  ;;  %v10574_v51 = vld [vmem:[#allocation13 + $0x134] ss:$8 sps:$4 sm:$0xff]  }
 0x744   : > { %v9450_v52 = vadd.f32 %v9449_v24, %v12886_v17  ;;  %v9453_v0 = vadd.f32 %v6482_v25, %v12999_v18  ;;  %v6484_v49 = vpop.f32.mrb[167].mxu0  ;;  %v10571_v17 = vld [vmem:[#allocation13 + $0x124] ss:$8 sps:$4 sm:$0xff]  }
 0x745   : > { %v9452_v60 = vadd.f32 %v9451_v4, %v12889_v34  ;;  %v9455_v46 = vadd.f32 %v6484_v49, %v13004_v20  ;;  %7749 = vmatprep.mubr.bf16.mxu0 %v7290_v43  ;;  %v10572_v4 = vld [vmem:[#allocation13 + $0x130] ss:$8 sps:$4 sm:$0xff]  }
 0x746   : > { %v9454_v9 = vadd.f32 %v9453_v0, %v12891_v31  ;;  %7750 = vmatmul.mubr.bf16.vlgmr.msra.gmra.mrb[192].mxu0 %v7289_v50  ;;  %v7233_v35 = vmax.f32 %v9450_v52, 0.0 }
 0x747   : > { %v9456_v54 = vadd.f32 %v9455_v46, %v12893_v10  ;;  %7831 = vmatpush1.bf16.msra.mxu0 %v10563_v29  ;;  %v7234_v7 = vmax.f32 %v9452_v60, 0.0 }
 0x748   : > { %v7237_v61 = vmax.f32 %v9454_v9, 0.0  ;;  %7832 = vmatprep.subr.bf16.mxu0 %v10568_v59  ;;  %v10575_v9 = vld [vmem:[#allocation13 + $0x140] ss:$8 sps:$4 sm:$0xff]  }
 0x749   : > { %v7238_v1 = vmax.f32 %v9456_v54, 0.0  ;;  %v6488_v23 = vpop.f32.mrb[168].mxu0 }
 0x74a   : > { %v9457_v14 = vadd.f32 %v6488_v23, %v12999_v18  ;;  %v6490_v34 = vpop.f32.mrb[169].mxu0  ;;  %v7293_v44 = vpack.c.bf16 %v7237_v61, %v7233_v35  ;;  %v10580_v35 = vld [vmem:[#allocation13 + $0x154] ss:$8 sps:$4 sm:$0xff]   ;;  %v10578_v23 = vld [vmem:[#allocation13 + $0x150] ss:$8 sps:$4 sm:$0xff]  }
 0x74b   : > { %v9459_v16 = vadd.f32 %v6490_v34, %v13004_v20  ;;  %v6492_v47 = vpop.f32.mrb[170].mxu0  ;;  %v7294_v31 = vpack.c.bf16 %v7238_v1, %v7234_v7  ;;  %7833 = vmatpush1.bf16.msra.mxu0 %v10566_v13 }
 0x74c   : > { %v9458_v10 = vadd.f32 %v9457_v14, %v12898_v36  ;;  %v9461_v5 = vadd.f32 %v6492_v47, %v12999_v18  ;;  %v6494_v30 = vpop.f32.mrb[171].mxu0  ;;  %7834 = vmatprep.subr.bf16.mxu0 %v10571_v17  ;;  %v10577_v36 = vld [vmem:[#allocation13 + $0x144] ss:$8 sps:$4 sm:$0xff]  }
 0x74d   : > { %v9460_v63 = vadd.f32 %v9459_v16, %v12901_v12  ;;  %v9463_v50 = vadd.f32 %v6494_v30, %v13004_v20  ;;  %7759 = vmatprep.mubr.bf16.mxu0 %v7294_v31  ;;  %v10581_v30 = vld [vmem:[#allocation13 + $0x160] ss:$8 sps:$4 sm:$0xff]  }
 0x74e   : > { %v9462_v24 = vadd.f32 %v9461_v5, %v12903_v58  ;;  %7760 = vmatmul.mubr.bf16.gmra.mrb[196].mxu0 %v7293_v44  ;;  %v7241_v25 = vmax.f32 %v9458_v10, 0.0 }
 0x74f   : > { %v9464_v40 = vadd.f32 %v9463_v50, %v12905_v55  ;;  %7835 = vmatpush1.bf16.msra.mxu0 %v10569_v21  ;;  %v7242_v29 = vmax.f32 %v9460_v63, 0.0  ;;  %v10586_v50 = vld [vmem:[#allocation13 + $0x174] ss:$8 sps:$4 sm:$0xff]  }
 0x750   : > { %v7245_v43 = vmax.f32 %v9462_v24, 0.0  ;;  %7836 = vmatprep.subr.bf16.mxu0 %v10574_v51 }
 0x751   : > { %v7246_v52 = vmax.f32 %v9464_v40, 0.0  ;;  %v6498_v0 = vpop.f32.mrb[172].mxu0 }
 0x752   : > { %v9465_v49 = vadd.f32 %v6498_v0, %v12999_v18  ;;  %v6500_v12 = vpop.f32.mrb[173].mxu0  ;;  %v7297_v59 = vpack.c.bf16 %v7245_v43, %v7241_v25  ;;  %v10584_v43 = vld [vmem:[#allocation13 + $0x170] ss:$8 sps:$4 sm:$0xff]  }
 0x753   : > { %v9467_v60 = vadd.f32 %v6500_v12, %v13004_v20  ;;  %v6502_v46 = vpop.f32.mrb[174].mxu0  ;;  %v7298_v58 = vpack.c.bf16 %v7246_v52, %v7242_v29  ;;  %7837 = vmatpush1.bf16.msra.mxu0 %v10572_v4 }
 0x754   : > { %v9466_v55 = vadd.f32 %v9465_v49, %v12910_v3  ;;  %v9469_v54 = vadd.f32 %v6502_v46, %v12999_v18  ;;  %v6504_v13 = vpop.f32.mrb[175].mxu0  ;;  %7838 = vmatprep.subr.bf16.mxu0 %v10577_v36  ;;  %v10583_v3 = vld [vmem:[#allocation13 + $0x164] ss:$8 sps:$4 sm:$0xff]  }
 0x755   : > { %v9468_v61 = vadd.f32 %v9467_v60, %v12913_v22  ;;  %v9471_v17 = vadd.f32 %v6504_v13, %v13004_v20  ;;  %7769 = vmatprep.mubr.bf16.mxu0 %v7298_v58  ;;  %v10587_v58 = vld [vmem:[#allocation13 + $0x180] ss:$8 sps:$4 sm:$0xff]  }
 0x756   : > { %v9470_v7 = vadd.f32 %v9469_v54, %v12915_v56  ;;  %7770 = vmatmul.mubr.bf16.gmra.mrb[200].mxu0 %v7297_v59  ;;  %v7249_v14 = vmax.f32 %v9466_v55, 0.0  ;;  %v10592_v54 = vld [vmem:[#allocation13 + $0x194] ss:$8 sps:$4 sm:$0xff]  }
 0x757   : > { %v9472_v1 = vadd.f32 %v9471_v17, %v12917_v38  ;;  %7839 = vmatpush1.bf16.msra.mxu0 %v10575_v9  ;;  %v7250_v44 = vmax.f32 %v9468_v61, 0.0 }
 0x758   : > { %v7253_v34 = vmax.f32 %v9470_v7, 0.0  ;;  %7840 = vmatprep.subr.bf16.mxu0 %v10580_v35  ;;  %v10590_v7 = vld [vmem:[#allocation13 + $0x190] ss:$8 sps:$4 sm:$0xff]  }
 0x759   : > { %v7254_v16 = vmax.f32 %v9472_v1, 0.0  ;;  %v6508_v47 = vpop.f32.mrb[176].mxu0 }
 0x75a   : > { %v9473_v31 = vadd.f32 %v6508_v47, %v12999_v18  ;;  %v6510_v22 = vpop.f32.mrb[177].mxu0  ;;  %v7301_v21 = vpack.c.bf16 %v7253_v34, %v7249_v14 }
 0x75b   : > { %v9475_v10 = vadd.f32 %v6510_v22, %v13004_v20  ;;  %v6512_v5 = vpop.f32.mrb[178].mxu0  ;;  %v7302_v56 = vpack.c.bf16 %v7254_v16, %v7250_v44  ;;  %7841 = vmatpush1.bf16.msra.mxu0 %v10578_v23  ;;  %v10593_v22 = vld [vmem:[#allocation13 + $0x1a0] ss:$8 sps:$4 sm:$0xff]  }
 0x75c   : > { %v9474_v38 = vadd.f32 %v9473_v31, %v12925_v42  ;;  %v9477_v51 = vadd.f32 %v6512_v5, %v12999_v18  ;;  %v6514_v63 = vpop.f32.mrb[179].mxu0  ;;  %7842 = vmatprep.subr.bf16.mxu0 %v10583_v3  ;;  %v10589_v42 = vld [vmem:[#allocation13 + $0x184] ss:$8 sps:$4 sm:$0xff]   ;;  %v10598_v5 = vld [vmem:[#allocation13 + $0x1b4] ss:$8 sps:$4 sm:$0xff]  }
 0x75d   : > { %v9476_v24 = vadd.f32 %v9475_v10, %v12927_v32  ;;  %v9479_v40 = vadd.f32 %v6514_v63, %v13004_v20  ;;  %7779 = vmatprep.mubr.bf16.mxu0 %v7302_v56  ;;  %v10596_v63 = vld [vmem:[#allocation13 + $0x1b0] ss:$8 sps:$4 sm:$0xff]  }
 0x75e   : > { %v9478_v4 = vadd.f32 %v9477_v51, %v12929_v37  ;;  %7780 = vmatmul.mubr.bf16.gmra.mrb[204].mxu0 %v7301_v21  ;;  %v7257_v36 = vmax.f32 %v9474_v38, 0.0 }
 0x75f   : > { %v9480_v25 = vadd.f32 %v9479_v40, %v12931_v33  ;;  %7843 = vmatpush1.bf16.msra.mxu0 %v10581_v30  ;;  %v7258_v52 = vmax.f32 %v9476_v24, 0.0 }
 0x760   : > { %v7261_v29 = vmax.f32 %v9478_v4, 0.0  ;;  %7844 = vmatprep.subr.bf16.mxu0 %v10586_v50 }
 0x761   : > { %v7262_v0 = vmax.f32 %v9480_v25, 0.0  ;;  %v6518_v49 = vpop.f32.mrb[180].mxu0 }
 0x762   : > { %v9481_v12 = vadd.f32 %v6518_v49, %v12999_v18  ;;  %v6520_v32 = vpop.f32.mrb[181].mxu0  ;;  %v7305_v59 = vpack.c.bf16 %v7261_v29, %v7257_v36 }
 0x763   : > { %v9483_v60 = vadd.f32 %v6520_v32, %v13004_v20  ;;  %v6522_v46 = vpop.f32.mrb[182].mxu0  ;;  %v7306_v37 = vpack.c.bf16 %v7262_v0, %v7258_v52  ;;  %7845 = vmatpush1.bf16.msra.mxu0 %v10584_v43  ;;  %v10599_v52 = vld [vmem:[#allocation13 + $0x1c0] ss:$8 sps:$4 sm:$0xff]  }
 0x764   : > { %v9482_v33 = vadd.f32 %v9481_v12, %v12935_v53  ;;  %v9485_v9 = vadd.f32 %v6522_v46, %v12999_v18  ;;  %v6524_v55 = vpop.f32.mrb[183].mxu0  ;;  %7846 = vmatprep.subr.bf16.mxu0 %v10589_v42  ;;  %v10595_v53 = vld [vmem:[#allocation13 + $0x1a4] ss:$8 sps:$4 sm:$0xff]   ;;  %v10604_v12 = vld [vmem:[#allocation13 + $0x1d4] ss:$8 sps:$4 sm:$0xff]  }
 0x765   : > { %v9484_v13 = vadd.f32 %v9483_v60, %v12937_v57  ;;  %v9487_v35 = vadd.f32 %v6524_v55, %v13004_v20  ;;  %7789 = vmatprep.mubr.bf16.mxu0 %v7306_v37  ;;  %v10602_v37 = vld [vmem:[#allocation13 + $0x1d0] ss:$8 sps:$4 sm:$0xff]  }
 0x766   : > { %v9486_v61 = vadd.f32 %v9485_v9, %v12939_v39  ;;  %7790 = vmatmul.mubr.bf16.gmra.mrb[208].mxu0 %v7305_v59  ;;  %v7265_v1 = vmax.f32 %v9482_v33, 0.0 }
 0x767   : > { %v9488_v17 = vadd.f32 %v9487_v35, %v12941_v62  ;;  %7847 = vmatpush1.bf16.msra.mxu0 %v10587_v58  ;;  %v7266_v14 = vmax.f32 %v9484_v13, 0.0  ;;  %v4649_v13 = vsub.s32 3, %v12990_v41 }
 0x768   : > { %v7269_v23 = vmax.f32 %v9486_v61, 0.0  ;;  %7848 = vmatprep.subr.bf16.mxu0 %v10592_v54 }
 0x769   : > { %v7270_v34 = vmax.f32 %v9488_v17, 0.0  ;;  %v6528_v3 = vpop.f32.mrb[184].mxu0  ;;  %v13076_v61 = vrot.slane %v12993_v6, %v4649_v13 }
 0x76a   : > { %v9489_v44 = vadd.f32 %v6528_v3, %v12999_v18  ;;  %v6530_v57 = vpop.f32.mrb[185].mxu0  ;;  %v7309_v16 = vpack.c.bf16 %v7269_v23, %v7265_v1 }
 0x76b   : > { %v9491_v47 = vadd.f32 %v6530_v57, %v13004_v20  ;;  %v6532_v31 = vpop.f32.mrb[186].mxu0  ;;  %v7310_v39 = vpack.c.bf16 %v7270_v34, %v7266_v14  ;;  %7849 = vmatpush1.bf16.msra.mxu0 %v10590_v7 }
 0x76c   : > { %v9490_v62 = vadd.f32 %v9489_v44, %v12945_v11  ;;  %v9493_v21 = vadd.f32 %v6532_v31, %v12999_v18  ;;  %v6534_v10 = vpop.f32.mrb[187].mxu0  ;;  %7850 = vmatprep.subr.bf16.mxu0 %v10595_v53  ;;  %v10601_v11 = vld [vmem:[#allocation13 + $0x1c4] ss:$8 sps:$4 sm:$0xff]  }
 0x76d   : > { %v9492_v56 = vadd.f32 %v9491_v47, %v12947_v26  ;;  %v9495_v30 = vadd.f32 %v6534_v10, %v13004_v20  ;;  %7799 = vmatprep.mubr.bf16.mxu0 %v7310_v39 }
 0x76e   : > { %v9494_v38 = vadd.f32 %v9493_v21, %v12949_v45  ;;  %7800 = vmatmul.mubr.bf16.gmra.mrb[212].mxu0 %v7309_v16  ;;  %v7273_v50 = vmax.f32 %v9490_v62, 0.0 }
 0x76f   : > { %v9496_v51 = vadd.f32 %v9495_v30, %v12951_v15  ;;  %7851 = vmatpush1.bf16.msra.mxu0 %v10593_v22  ;;  %v7274_v40 = vmax.f32 %v9492_v56, 0.0 }
 0x770   : > { %v7277_v24 = vmax.f32 %v9494_v38, 0.0  ;;  %7852 = vmatprep.subr.bf16.mxu0 %v10598_v5 }
 0x771   : > { %v7278_v4 = vmax.f32 %v9496_v51, 0.0  ;;  %v6538_v25 = vpop.f32.mrb[188].mxu0 }
 0x772   : > { %v9497_v43 = vadd.f32 %v6538_v25, %v12999_v18  ;;  %v6540_v26 = vpop.f32.mrb[189].mxu0  ;;  %v7313_v36 = vpack.c.bf16 %v7277_v24, %v7273_v50 }
 0x773   : > { %v9499_v29 = vadd.f32 %v6540_v26, %v13004_v20  ;;  %v6542_v42 = vpop.f32.mrb[190].mxu0  ;;  %v7314_v45 = vpack.c.bf16 %v7278_v4, %v7274_v40  ;;  %7853 = vmatpush1.bf16.msra.mxu0 %v10596_v63 }
 0x774   : > { %v9498_v15 = vadd.f32 %v9497_v43, %v12955_v48  ;;  %v9501_v0 = vadd.f32 %v6542_v42, %v12999_v18  ;;  %v6544_v49 = vpop.f32.mrb[191].mxu0  ;;  %7854 = vmatprep.subr.bf16.mxu0 %v10601_v11  ;;  %v10607_v48 = vld [vmem:[#allocation13 + $0x1e4] ss:$8 sps:$4 sm:$0xff]  }
 0x775   : > { %v9500_v32 = vadd.f32 %v9499_v29, %v12957_v28  ;;  %v9503_v59 = vadd.f32 %v6544_v49, %v13004_v20  ;;  %7809 = vmatprep.mubr.bf16.mxu0 %v7314_v45  ;;  %v10605_v28 = vld [vmem:[#allocation13 + $0x1e0] ss:$8 sps:$4 sm:$0xff]   ;;  %v10610_v20 = vld [vmem:[#allocation13 + $0x1f4] ss:$8 sps:$4 sm:$0xff]  }
 0x776   : > { %v9502_v60 = vadd.f32 %v9501_v0, %v12959_v27  ;;  %7810 = vmatmul.mubr.bf16.gmra.mrb[216].mxu0 %v7313_v36  ;;  %v7281_v58 = vmax.f32 %v9498_v15, 0.0  ;;  %v10608_v27 = vld [vmem:[#allocation13 + $0x1f0] ss:$8 sps:$4 sm:$0xff]  }
 0x777   : > { %v9504_v46 = vadd.f32 %v9503_v59, %v12961_v19  ;;  %7855 = vmatpush1.bf16.msra.mxu0 %v10599_v52  ;;  %v7282_v18 = vmax.f32 %v9500_v32, 0.0  ;;  %v4645_v19 = vsub.s32 2, %v12990_v41 }
 0x778   : > { %v7285_v33 = vmax.f32 %v9502_v60, 0.0  ;;  %7856 = vmatprep.subr.bf16.mxu0 %v10604_v12 }
 0x779   : > { %v7286_v9 = vmax.f32 %v9504_v46, 0.0  ;;  %v13073_v35 = vrot.slane %v12993_v6, %v4645_v19 }
 0x77a   : > { %v7317_v55 = vpack.c.bf16 %v7285_v33, %v7281_v58 }
 0x77b   : > { %v7318_v54 = vpack.c.bf16 %v7286_v9, %v7282_v18  ;;  %7857 = vmatpush1.bf16.msra.mxu0 %v10602_v37 }
 0x77c   : > { %7858 = vmatprep.subr.bf16.mxu0 %v10607_v48 }
 0x77d   : > { %7819 = vmatprep.mubr.bf16.mxu0 %v7318_v54 }
 0x77e   : > { %7820 = vmatmul.mubr.bf16.gmra.mrb[220].mxu0 %v7317_v55 }
 0x77f   : > { %7859 = vmatpush1.bf16.msra.mxu0 %v10605_v28 }
 0x780   : > { %7860 = vmatprep.subr.bf16.mxu0 %v10610_v20 }
 0x783   : > { %7861 = vmatpush1.bf16.msra.mxu0 %v10608_v27 }
 0x7bf   : > { %v7146_v17 = vpop.f32.mrb[192].mxu1 }
 0x7c0   : > { %v9505_v7 = vadd.f32 %v7146_v17, %v13073_v35  ;;  %v7148_v1 = vpop.f32.mrb[193].mxu1 }
 0x7c1   : > { %v9506_v23 = vadd.f32 %v7148_v1, %v13076_v61  ;;  %v7150_v53 = vpop.f32.mrb[194].mxu1 }
 0x7c2   : > { %v9507_v14 = vadd.f32 %v7150_v53, %v13073_v35  ;;  %v7152_v34 = vpop.f32.mrb[195].mxu1  ;;  %v7227_v44 = vmax.f32 %v9505_v7, 0.0 }
 0x7c3   : > { %v9508_v3 = vadd.f32 %v7152_v34, %v13076_v61  ;;  %v7228_v16 = vmax.f32 %v9506_v23, 0.0 }
 0x7c4   : > { %v7231_v57 = vmax.f32 %v9507_v14, 0.0 }
 0x7c5   : > { %v7232_v47 = vmax.f32 %v9508_v3, 0.0 }
 0x7c6   : > { %v7291_v31 = vpack.c.bf16 %v7231_v57, %v7227_v44 }
 0x7c7   : > { %v7292_v39 = vpack.c.bf16 %v7232_v47, %v7228_v16  ;;  %v7156_v6 = vpop.f32.mrb[196].mxu1 }
 0x7c8   : > { %v9509_v22 = vadd.f32 %v7156_v6, %v13073_v35  ;;  %v7158_v62 = vpop.f32.mrb[197].mxu1 }
 0x7c9   : > { %v9510_v21 = vadd.f32 %v7158_v62, %v13076_v61  ;;  %v7160_v10 = vpop.f32.mrb[198].mxu1  ;;  %7862 = vmatprep.mubr.bf16.mxu0 %v7292_v39 }
 0x7ca   : > { %v9511_v5 = vadd.f32 %v7160_v10, %v13073_v35  ;;  %v7162_v56 = vpop.f32.mrb[199].mxu1  ;;  %7863 = vmatmul.mubr.bf16.vlgmr.msra.gmra.mrb[192].mxu0 %v7291_v31  ;;  %v7235_v38 = vmax.f32 %v9509_v22, 0.0 }
 0x7cb   : > { %v9512_v30 = vadd.f32 %v7162_v56, %v13076_v61  ;;  %v7236_v63 = vmax.f32 %v9510_v21, 0.0 }
 0x7cc   : > { %v7239_v51 = vmax.f32 %v9511_v5, 0.0 }
 0x7cd   : > { %v7240_v50 = vmax.f32 %v9512_v30, 0.0 }
 0x7ce   : > { %v7295_v24 = vpack.c.bf16 %v7239_v51, %v7235_v38 }
 0x7cf   : > { %v7296_v11 = vpack.c.bf16 %v7240_v50, %v7236_v63  ;;  %v7166_v40 = vpop.f32.mrb[200].mxu1 }
 0x7d0   : > { %v9513_v4 = vadd.f32 %v7166_v40, %v13073_v35  ;;  %v7168_v25 = vpop.f32.mrb[201].mxu1 }
 0x7d1   : > { %v9514_v43 = vadd.f32 %v7168_v25, %v13076_v61  ;;  %v7170_v26 = vpop.f32.mrb[202].mxu1  ;;  %7872 = vmatprep.mubr.bf16.mxu0 %v7296_v11 }
 0x7d2   : > { %v9515_v36 = vadd.f32 %v7170_v26, %v13073_v35  ;;  %v7172_v29 = vpop.f32.mrb[203].mxu1  ;;  %7873 = vmatmul.mubr.bf16.gmra.mrb[196].mxu0 %v7295_v24  ;;  %v7243_v45 = vmax.f32 %v9513_v4, 0.0 }
 0x7d3   : > { %v9516_v42 = vadd.f32 %v7172_v29, %v13076_v61  ;;  %v7244_v15 = vmax.f32 %v9514_v43, 0.0 }
 0x7d4   : > { %v7247_v52 = vmax.f32 %v9515_v36, 0.0 }
 0x7d5   : > { %v7248_v0 = vmax.f32 %v9516_v42, 0.0 }
 0x7d6   : > { %v7299_v49 = vpack.c.bf16 %v7247_v52, %v7243_v45 }
 0x7d7   : > { %v7300_v12 = vpack.c.bf16 %v7248_v0, %v7244_v15  ;;  %v7176_v32 = vpop.f32.mrb[204].mxu1 }
 0x7d8   : > { %v9517_v59 = vadd.f32 %v7176_v32, %v13073_v35  ;;  %v7178_v60 = vpop.f32.mrb[205].mxu1 }
 0x7d9   : > { %v9518_v46 = vadd.f32 %v7178_v60, %v13076_v61  ;;  %v7180_v37 = vpop.f32.mrb[206].mxu1  ;;  %7882 = vmatprep.mubr.bf16.mxu0 %v7300_v12 }
 0x7da   : > { %v9519_v58 = vadd.f32 %v7180_v37, %v13073_v35  ;;  %v7182_v33 = vpop.f32.mrb[207].mxu1  ;;  %7883 = vmatmul.mubr.bf16.gmra.mrb[200].mxu0 %v7299_v49  ;;  %v7251_v18 = vmax.f32 %v9517_v59, 0.0 }
 0x7db   : > { %v9520_v48 = vadd.f32 %v7182_v33, %v13076_v61  ;;  %v7252_v55 = vmax.f32 %v9518_v46, 0.0 }
 0x7dc   : > { %v7255_v9 = vmax.f32 %v9519_v58, 0.0 }
 0x7dd   : > { %v7256_v54 = vmax.f32 %v9520_v48, 0.0 }
 0x7de   : > { %v7303_v28 = vpack.c.bf16 %v7255_v9, %v7251_v18 }
 0x7df   : > { %v7304_v20 = vpack.c.bf16 %v7256_v54, %v7252_v55  ;;  %v7186_v27 = vpop.f32.mrb[208].mxu1  ;;  %v7385_v54 = vld [vmem:[#allocation14] sm:$0x3] }
 0x7e0   : > { %v9521_v19 = vadd.f32 %v7186_v27, %v13073_v35  ;;  %v7188_v13 = vpop.f32.mrb[209].mxu1 }
 0x7e1   : > { %v9522_v17 = vadd.f32 %v7188_v13, %v13076_v61  ;;  %v7190_v7 = vpop.f32.mrb[210].mxu1  ;;  %7892 = vmatprep.mubr.bf16.mxu0 %v7304_v20 }
 0x7e2   : > { %v9523_v1 = vadd.f32 %v7190_v7, %v13073_v35  ;;  %v7192_v23 = vpop.f32.mrb[211].mxu1  ;;  %7893 = vmatmul.mubr.bf16.gmra.mrb[204].mxu0 %v7303_v28  ;;  %v7259_v14 = vmax.f32 %v9521_v19, 0.0  ;;  %v13113_v28 = vrot.slane %v7385_v54, %v4637_v2 }
 0x7e3   : > { %v9524_v53 = vadd.f32 %v7192_v23, %v13076_v61  ;;  %v7260_v3 = vmax.f32 %v9522_v17, 0.0 }
 0x7e4   : > { %v7263_v34 = vmax.f32 %v9523_v1, 0.0 }
 0x7e5   : > { %v7264_v44 = vmax.f32 %v9524_v53, 0.0 }
 0x7e6   : > { %v7307_v57 = vpack.c.bf16 %v7263_v34, %v7259_v14 }
 0x7e7   : > { %v7308_v16 = vpack.c.bf16 %v7264_v44, %v7260_v3  ;;  %v7196_v47 = vpop.f32.mrb[212].mxu1 }
 0x7e8   : > { %v9525_v31 = vadd.f32 %v7196_v47, %v13073_v35  ;;  %v7198_v39 = vpop.f32.mrb[213].mxu1 }
 0x7e9   : > { %v9526_v6 = vadd.f32 %v7198_v39, %v13076_v61  ;;  %v7200_v22 = vpop.f32.mrb[214].mxu1  ;;  %7902 = vmatprep.mubr.bf16.mxu0 %v7308_v16 }
 0x7ea   : > { %v9527_v62 = vadd.f32 %v7200_v22, %v13073_v35  ;;  %v7202_v21 = vpop.f32.mrb[215].mxu1  ;;  %7903 = vmatmul.mubr.bf16.gmra.mrb[208].mxu0 %v7307_v57  ;;  %v7267_v5 = vmax.f32 %v9525_v31, 0.0 }
 0x7eb   : > { %v9528_v10 = vadd.f32 %v7202_v21, %v13076_v61  ;;  %v7268_v30 = vmax.f32 %v9526_v6, 0.0 }
 0x7ec   : > { %v7271_v56 = vmax.f32 %v9527_v62, 0.0 }
 0x7ed   : > { %v7272_v38 = vmax.f32 %v9528_v10, 0.0 }
 0x7ee   : > { %v7311_v51 = vpack.c.bf16 %v7271_v56, %v7267_v5 }
 0x7ef   : > { %v7312_v63 = vpack.c.bf16 %v7272_v38, %v7268_v30  ;;  %v7206_v50 = vpop.f32.mrb[216].mxu1 }
 0x7f0   : > { %v9529_v24 = vadd.f32 %v7206_v50, %v13073_v35  ;;  %v7208_v11 = vpop.f32.mrb[217].mxu1 }
 0x7f1   : > { %v9530_v40 = vadd.f32 %v7208_v11, %v13076_v61  ;;  %v7210_v4 = vpop.f32.mrb[218].mxu1  ;;  %7912 = vmatprep.mubr.bf16.mxu0 %v7312_v63 }
 0x7f2   : > { %v9531_v25 = vadd.f32 %v7210_v4, %v13073_v35  ;;  %v7212_v43 = vpop.f32.mrb[219].mxu1  ;;  %7913 = vmatmul.mubr.bf16.gmra.mrb[212].mxu0 %v7311_v51  ;;  %v7275_v36 = vmax.f32 %v9529_v24, 0.0 }
 0x7f3   : > { %v9532_v26 = vadd.f32 %v7212_v43, %v13076_v61  ;;  %v7276_v42 = vmax.f32 %v9530_v40, 0.0 }
 0x7f4   : > { %v7279_v29 = vmax.f32 %v9531_v25, 0.0 }
 0x7f5   : > { %v7280_v45 = vmax.f32 %v9532_v26, 0.0 }
 0x7f6   : > { %v7315_v52 = vpack.c.bf16 %v7279_v29, %v7275_v36 }
 0x7f7   : > { %v7316_v15 = vpack.c.bf16 %v7280_v45, %v7276_v42  ;;  %v7216_v0 = vpop.f32.mrb[220].mxu1 }
 0x7f8   : > { %v9533_v49 = vadd.f32 %v7216_v0, %v13073_v35  ;;  %v7218_v12 = vpop.f32.mrb[221].mxu1 }
 0x7f9   : > { %v9534_v32 = vadd.f32 %v7218_v12, %v13076_v61  ;;  %v7220_v59 = vpop.f32.mrb[222].mxu1  ;;  %7922 = vmatprep.mubr.bf16.mxu0 %v7316_v15 }
 0x7fa   : > { %v9535_v60 = vadd.f32 %v7220_v59, %v13073_v35  ;;  %v7222_v46 = vpop.f32.mrb[223].mxu1  ;;  %7923 = vmatmul.mubr.bf16.gmra.mrb[216].mxu0 %v7315_v52  ;;  %v7283_v58 = vmax.f32 %v9533_v49, 0.0  ;;  %v13117_v35 = vrot.slane %v7385_v54, %v4641_v8 }
 0x7fb   : > { %v9536_v37 = vadd.f32 %v7222_v46, %v13076_v61  ;;  %v7284_v48 = vmax.f32 %v9534_v32, 0.0 }
 0x7fc   : > { %v7287_v33 = vmax.f32 %v9535_v60, 0.0 }
 0x7fd   : > { %v7288_v18 = vmax.f32 %v9536_v37, 0.0 }
 0x7fe   : > { %v7319_v9 = vpack.c.bf16 %v7287_v33, %v7283_v58 }
 0x7ff   : > { %v7320_v55 = vpack.c.bf16 %v7288_v18, %v7284_v48 }
 0x801   : > { %7932 = vmatprep.mubr.bf16.mxu0 %v7320_v55 }
 0x802   : > { %7933 = vmatmul.mubr.bf16.gmra.mrb[220].mxu0 %v7319_v9 }
 0x89d   : > { %v7864_v61 = vpop.f32.mrb[192].mxu0 }
 0x89e   : > { %v9537_v20 = vadd.f32 %v7864_v61, %v13113_v28  ;;  %v7866_v27 = vpop.f32.mrb[193].mxu0 }
 0x89f   : > { %v9538_v2 = vadd.f32 %v7866_v27, %v13117_v35  ;;  %v7868_v19 = vpop.f32.mrb[194].mxu0 }
 0x8a0   : > { %7943 = vst [vmem:[%s13122_s26] sm:$0xff] %v9537_v20  ;;  %v9539_v41 = vadd.f32 %v7868_v19, %v13113_v28  ;;  %v7870_v8 = vpop.f32.mrb[195].mxu0 }
 0x8a1   : > { %7944 = vst [vmem:[%s13122_s26 + $0x8] sm:$0xff] %v9538_v2  ;;  %v9540_v13 = vadd.f32 %v7870_v8, %v13117_v35 }
 0x8a2   : > { %7945 = vst [vmem:[%s13122_s26 + $0x10] sm:$0xff] %v9539_v41 }
 0x8a3   : > { %7946 = vst [vmem:[%s13122_s26 + $0x18] sm:$0xff] %v9540_v13 }
 0x8a5   : > { %v7874_v17 = vpop.f32.mrb[196].mxu0 }
 0x8a6   : > { %v9541_v7 = vadd.f32 %v7874_v17, %v13113_v28  ;;  %v7876_v1 = vpop.f32.mrb[197].mxu0 }
 0x8a7   : > { %v9542_v23 = vadd.f32 %v7876_v1, %v13117_v35  ;;  %v7878_v53 = vpop.f32.mrb[198].mxu0 }
 0x8a8   : > { %7947 = vst [vmem:[%s13122_s26 + $0x20] sm:$0xff] %v9541_v7  ;;  %v9543_v14 = vadd.f32 %v7878_v53, %v13113_v28  ;;  %v7880_v34 = vpop.f32.mrb[199].mxu0 }
 0x8a9   : > { %7948 = vst [vmem:[%s13122_s26 + $0x28] sm:$0xff] %v9542_v23  ;;  %v9544_v3 = vadd.f32 %v7880_v34, %v13117_v35 }
 0x8aa   : > { %7949 = vst [vmem:[%s13122_s26 + $0x30] sm:$0xff] %v9543_v14 }
 0x8ab   : > { %7950 = vst [vmem:[%s13122_s26 + $0x38] sm:$0xff] %v9544_v3 }
 0x8ad   : > { %v7884_v44 = vpop.f32.mrb[200].mxu0 }
 0x8ae   : > { %v9545_v57 = vadd.f32 %v7884_v44, %v13113_v28  ;;  %v7886_v16 = vpop.f32.mrb[201].mxu0 }
 0x8af   : > { %v9546_v47 = vadd.f32 %v7886_v16, %v13117_v35  ;;  %v7888_v31 = vpop.f32.mrb[202].mxu0 }
 0x8b0   : > { %7951 = vst [vmem:[%s13122_s26 + $0x40] sm:$0xff] %v9545_v57  ;;  %v9547_v39 = vadd.f32 %v7888_v31, %v13113_v28  ;;  %v7890_v6 = vpop.f32.mrb[203].mxu0 }
 0x8b1   : > { %7952 = vst [vmem:[%s13122_s26 + $0x48] sm:$0xff] %v9546_v47  ;;  %v9548_v22 = vadd.f32 %v7890_v6, %v13117_v35 }
 0x8b2   : > { %7953 = vst [vmem:[%s13122_s26 + $0x50] sm:$0xff] %v9547_v39 }
 0x8b3   : > { %7954 = vst [vmem:[%s13122_s26 + $0x58] sm:$0xff] %v9548_v22 }
 0x8b5   : > { %v7894_v62 = vpop.f32.mrb[204].mxu0 }
 0x8b6   : > { %v9549_v21 = vadd.f32 %v7894_v62, %v13113_v28  ;;  %v7896_v10 = vpop.f32.mrb[205].mxu0 }
 0x8b7   : > { %v9550_v5 = vadd.f32 %v7896_v10, %v13117_v35  ;;  %v7898_v56 = vpop.f32.mrb[206].mxu0 }
 0x8b8   : > { %7955 = vst [vmem:[%s13122_s26 + $0x60] sm:$0xff] %v9549_v21  ;;  %v9551_v30 = vadd.f32 %v7898_v56, %v13113_v28  ;;  %v7900_v38 = vpop.f32.mrb[207].mxu0 }
 0x8b9   : > { %7956 = vst [vmem:[%s13122_s26 + $0x68] sm:$0xff] %v9550_v5  ;;  %v9552_v51 = vadd.f32 %v7900_v38, %v13117_v35 }
 0x8ba   : > { %7957 = vst [vmem:[%s13122_s26 + $0x70] sm:$0xff] %v9551_v30 }
 0x8bb   : > { %7958 = vst [vmem:[%s13122_s26 + $0x78] sm:$0xff] %v9552_v51 }
 0x8bd   : > { %v7904_v63 = vpop.f32.mrb[208].mxu0 }
 0x8be   : > { %v9553_v50 = vadd.f32 %v7904_v63, %v13113_v28  ;;  %v7906_v24 = vpop.f32.mrb[209].mxu0 }
 0x8bf   : > { %v9554_v11 = vadd.f32 %v7906_v24, %v13117_v35  ;;  %v7908_v40 = vpop.f32.mrb[210].mxu0 }
 0x8c0   : > { %7959 = vst [vmem:[%s13122_s26 + $0x80] sm:$0xff] %v9553_v50  ;;  %v9555_v4 = vadd.f32 %v7908_v40, %v13113_v28  ;;  %v7910_v25 = vpop.f32.mrb[211].mxu0 }
 0x8c1   : > { %7960 = vst [vmem:[%s13122_s26 + $0x88] sm:$0xff] %v9554_v11  ;;  %v9556_v43 = vadd.f32 %v7910_v25, %v13117_v35 }
 0x8c2   : > { %7961 = vst [vmem:[%s13122_s26 + $0x90] sm:$0xff] %v9555_v4 }
 0x8c3   : > { %7962 = vst [vmem:[%s13122_s26 + $0x98] sm:$0xff] %v9556_v43 }
 0x8c5   : > { %v7914_v26 = vpop.f32.mrb[212].mxu0 }
 0x8c6   : > { %v9557_v36 = vadd.f32 %v7914_v26, %v13113_v28  ;;  %v7916_v29 = vpop.f32.mrb[213].mxu0 }
 0x8c7   : > { %v9558_v42 = vadd.f32 %v7916_v29, %v13117_v35  ;;  %v7918_v45 = vpop.f32.mrb[214].mxu0 }
 0x8c8   : > { %7963 = vst [vmem:[%s13122_s26 + $0xa0] sm:$0xff] %v9557_v36  ;;  %v9559_v52 = vadd.f32 %v7918_v45, %v13113_v28  ;;  %v7920_v15 = vpop.f32.mrb[215].mxu0 }
 0x8c9   : > { %7964 = vst [vmem:[%s13122_s26 + $0xa8] sm:$0xff] %v9558_v42  ;;  %v9560_v0 = vadd.f32 %v7920_v15, %v13117_v35 }
 0x8ca   : > { %7965 = vst [vmem:[%s13122_s26 + $0xb0] sm:$0xff] %v9559_v52 }
 0x8cb   : > { %7966 = vst [vmem:[%s13122_s26 + $0xb8] sm:$0xff] %v9560_v0 }
 0x8cd   : > { %v7924_v49 = vpop.f32.mrb[216].mxu0 }
 0x8ce   : > { %v9561_v12 = vadd.f32 %v7924_v49, %v13113_v28  ;;  %v7926_v32 = vpop.f32.mrb[217].mxu0 }
 0x8cf   : > { %v9562_v59 = vadd.f32 %v7926_v32, %v13117_v35  ;;  %v7928_v60 = vpop.f32.mrb[218].mxu0 }
 0x8d0   : > { %7967 = vst [vmem:[%s13122_s26 + $0xc0] sm:$0xff] %v9561_v12  ;;  %v9563_v46 = vadd.f32 %v7928_v60, %v13113_v28  ;;  %v7930_v37 = vpop.f32.mrb[219].mxu0 }
 0x8d1   : > { %7968 = vst [vmem:[%s13122_s26 + $0xc8] sm:$0xff] %v9562_v59  ;;  %v9564_v58 = vadd.f32 %v7930_v37, %v13117_v35 }
 0x8d2   : > { %7969 = vst [vmem:[%s13122_s26 + $0xd0] sm:$0xff] %v9563_v46 }
 0x8d3   : > { %7970 = vst [vmem:[%s13122_s26 + $0xd8] sm:$0xff] %v9564_v58 }
 0x8d5   : > { %v7934_v33 = vpop.f32.mrb[220].mxu0 }
 0x8d6   : > { %v9565_v48 = vadd.f32 %v7934_v33, %v13113_v28  ;;  %v7936_v18 = vpop.f32.mrb[221].mxu0 }
 0x8d7   : > { %v9566_v9 = vadd.f32 %v7936_v18, %v13117_v35  ;;  %v7938_v55 = vpop.f32.mrb[222].mxu0 }
 0x8d8   : > { %7971 = vst [vmem:[%s13122_s26 + $0xe0] sm:$0xff] %v9565_v48  ;;  %v9567_v54 = vadd.f32 %v7938_v55, %v13113_v28  ;;  %v7940_v61 = vpop.f32.mrb[223].mxu0 }
 0x8d9   : > { %7972 = vst [vmem:[%s13122_s26 + $0xe8] sm:$0xff] %v9566_v9  ;;  %v9568_v20 = vadd.f32 %v7940_v61, %v13117_v35 }
 0x8da   : > { %7973 = vst [vmem:[%s13122_s26 + $0xf0] sm:$0xff] %v9567_v54 }
 0x8db   : > { %7974 = vst [vmem:[%s13122_s26 + $0xf8] sm:$0xff] %v9568_v20 }
 0x8dc PF: > { %s28_s21 = sadd.s32 1, %s10899_s21  }
 0x8dd   : > { %p25_p7 = scmp.ge.s32.totalorder %s28_s21, 4  }
 0x8df   :  { %27 = sbr.rel (!%p25_p7) target bundleno = 9 (0x9), region = 152 }
 0x8e6   :  { %8018 = vsyncpa [#allocation4], 1 }
 0x8e7   :  { %8020 = vsyncpa [#allocation4 + $0x1], 1 }
 0x8e8   :  { %8021 = vsyncpa [#allocation6], 1 }
 0x8e9   :  { %8022 = vsyncpa [#allocation9], 1 }
 0x8ea   :  { %8023 = vsyncpa [#allocation12], 1 }
 0x8eb   :  { %8024 = vsyncpa [#allocation15], 1 }

// kernel: _lambda_.7
= control target key start
LH: loop header
LB: loop body
LE: loop exit
PB: predicated region body
PF: predicated region fallthrough
CT: control target
= control target key end

     0   :  { %v956_v1 = vmov 0   ;;  %s1207_s1 = inlined_call_operand.vmem [shape: bf16[128,512], index: 1, kind: input, shape index: {}]   ;;  %s1208_s0 = inlined_call_operand.vmem [shape: bf16[32,128], index: 0, kind: input, shape index: {}]   ;;  %s1209_s3 = inlined_call_operand.vmem [shape: bf16[512,128], index: 3, kind: input, shape index: {}]   ;;  %s1210_s2 = inlined_call_operand.vmem [shape: f32[1,512], index: 2, kind: input, shape index: {}]   ;;  %s1211_s4 = inlined_call_operand.vmem [shape: f32[1,128], index: 4, kind: input, shape index: {}]   ;;  %s1212_s5 = inlined_call_operand.vmem [shape: f32[32,128], index: 5, kind: output, shape index: {}]  }
   0x1   :  { %v874_v0 = vld [vmem:[%s1207_s1 + $0x4] ss:$16 sps:$4 sm:$0xff]   ;;  %283 = vmatprep.mubr.bf16.mxu0 %v956_v1  ;;  %336 = vmatprep.mubr.bf16.mxu1 %v956_v1  ;;  %v876_v2 = vld [vmem:[%s1207_s1 + $0xc] ss:$16 sps:$4 sm:$0xff]   ;;  %v878_v3 = vld [vmem:[%s1207_s1] ss:$16 sps:$4 sm:$0xff]  }
   0x2   :  { %251 = vmatprep.subr.bf16.mxu0 %v874_v0  ;;  %v879_v4 = vld [vmem:[%s1207_s1 + $0x8] ss:$16 sps:$4 sm:$0xff]   ;;  %304 = vmatprep.subr.bf16.mxu1 %v876_v2  ;;  %v880_v5 = vld [vmem:[%s1207_s1 + $0x24] ss:$16 sps:$4 sm:$0xff]   ;;  %v882_v6 = vld [vmem:[%s1207_s1 + $0x2c] ss:$16 sps:$4 sm:$0xff]  }
   0x3   :  { %252 = vmatpush1.bf16.msra.mxu0 %v878_v3  ;;  %305 = vmatpush1.bf16.msra.mxu1 %v879_v4  ;;  %v884_v7 = vld [vmem:[%s1207_s1 + $0x20] ss:$16 sps:$4 sm:$0xff]   ;;  %v885_v8 = vld [vmem:[%s1207_s1 + $0x28] ss:$16 sps:$4 sm:$0xff]   ;;  %v886_v9 = vld [vmem:[%s1207_s1 + $0x44] ss:$16 sps:$4 sm:$0xff]   ;;  %v59_v3 = vlaneseq }
   0x4   :  { %253 = vmatprep.subr.bf16.mxu0 %v880_v5  ;;  %306 = vmatprep.subr.bf16.mxu1 %v882_v6  ;;  %v888_v10 = vld [vmem:[%s1207_s1 + $0x4c] ss:$16 sps:$4 sm:$0xff]   ;;  %v890_v11 = vld [vmem:[%s1207_s1 + $0x40] ss:$16 sps:$4 sm:$0xff]   ;;  %v891_v12 = vld [vmem:[%s1207_s1 + $0x48] ss:$16 sps:$4 sm:$0xff]  }
   0x5   :  { %v892_v13 = vld [vmem:[%s1207_s1 + $0x64] ss:$16 sps:$4 sm:$0xff]   ;;  %v894_v14 = vld [vmem:[%s1207_s1 + $0x6c] ss:$16 sps:$4 sm:$0xff]   ;;  %v896_v15 = vld [vmem:[%s1207_s1 + $0x60] ss:$16 sps:$4 sm:$0xff]  }
   0x6   :  { %v897_v16 = vld [vmem:[%s1207_s1 + $0x68] ss:$16 sps:$4 sm:$0xff]   ;;  %v898_v17 = vld [vmem:[%s1207_s1 + $0x84] ss:$16 sps:$4 sm:$0xff]   ;;  %v900_v18 = vld [vmem:[%s1207_s1 + $0x8c] ss:$16 sps:$4 sm:$0xff]  }
   0x7   :  { %254 = vmatpush1.bf16.msra.mxu0 %v884_v7  ;;  %307 = vmatpush1.bf16.msra.mxu1 %v885_v8  ;;  %v902_v19 = vld [vmem:[%s1207_s1 + $0x80] ss:$16 sps:$4 sm:$0xff]   ;;  %v903_v20 = vld [vmem:[%s1207_s1 + $0x88] ss:$16 sps:$4 sm:$0xff]   ;;  %v904_v21 = vld [vmem:[%s1207_s1 + $0xa4] ss:$16 sps:$4 sm:$0xff]  }
   0x8   :  { %255 = vmatprep.subr.bf16.mxu0 %v886_v9  ;;  %308 = vmatprep.subr.bf16.mxu1 %v888_v10  ;;  %v906_v22 = vld [vmem:[%s1207_s1 + $0xac] ss:$16 sps:$4 sm:$0xff]   ;;  %v908_v23 = vld [vmem:[%s1207_s1 + $0xa0] ss:$16 sps:$4 sm:$0xff]   ;;  %v909_v24 = vld [vmem:[%s1207_s1 + $0xa8] ss:$16 sps:$4 sm:$0xff]  }
   0x9   :  { %v910_v25 = vld [vmem:[%s1207_s1 + $0xc4] ss:$16 sps:$4 sm:$0xff]   ;;  %v912_v26 = vld [vmem:[%s1207_s1 + $0xcc] ss:$16 sps:$4 sm:$0xff]   ;;  %v914_v27 = vld [vmem:[%s1207_s1 + $0xc0] ss:$16 sps:$4 sm:$0xff]  }
   0xa   :  { %v915_v28 = vld [vmem:[%s1207_s1 + $0xc8] ss:$16 sps:$4 sm:$0xff]   ;;  %v916_v29 = vld [vmem:[%s1207_s1 + $0xe4] ss:$16 sps:$4 sm:$0xff]   ;;  %v918_v30 = vld [vmem:[%s1207_s1 + $0xec] ss:$16 sps:$4 sm:$0xff]  }
   0xb   :  { %256 = vmatpush1.bf16.msra.mxu0 %v890_v11  ;;  %309 = vmatpush1.bf16.msra.mxu1 %v891_v12  ;;  %v920_v31 = vld [vmem:[%s1207_s1 + $0xe0] ss:$16 sps:$4 sm:$0xff]   ;;  %v921_v32 = vld [vmem:[%s1207_s1 + $0xe8] ss:$16 sps:$4 sm:$0xff]   ;;  %v60_v4 = vshrl.u32 %v59_v3, 7 }
   0xc   :  { %257 = vmatprep.subr.bf16.mxu0 %v892_v13  ;;  %310 = vmatprep.subr.bf16.mxu1 %v894_v14  ;;  %v924_v33 = vld [vmem:[%s1209_s3 + $0x40] sm:$0xff]   ;;  %v928_v38 = vld [vmem:[%s1209_s3 + $0x48] sm:$0xff]   ;;  %v932_v43 = vld [vmem:[%s1209_s3 + $0x50] sm:$0xff]  }
   0xd   :  { %v925_v34 = vld [vmem:[%s1209_s3 + $0xc0] sm:$0xff]   ;;  %v929_v39 = vld [vmem:[%s1209_s3 + $0xc8] sm:$0xff]   ;;  %v933_v44 = vld [vmem:[%s1209_s3 + $0xd0] sm:$0xff]   ;;  %v61_v5 = vsub.s32 0, %v60_v4  ;;  %v69_v6 = vsub.s32 2, %v60_v4  ;;  %v65_v8 = vsub.s32 1, %v60_v4 }
   0xe   :  { %v922_v35 = vld [vmem:[%s1208_s0] sm:$0xff]   ;;  %v930_v40 = vld [vmem:[%s1209_s3 + $0x8] sm:$0xff]   ;;  %v934_v45 = vld [vmem:[%s1209_s3 + $0x10] sm:$0xff]   ;;  %v73_v9 = vsub.s32 3, %v60_v4 }
   0xf   :  { %258 = vmatpush1.bf16.msra.mxu0 %v896_v15  ;;  %311 = vmatpush1.bf16.msra.mxu1 %v897_v16  ;;  %v926_v36 = vld [vmem:[%s1209_s3] sm:$0xff]   ;;  %v931_v41 = vld [vmem:[%s1209_s3 + $0x88] sm:$0xff]   ;;  %v935_v46 = vld [vmem:[%s1209_s3 + $0x90] sm:$0xff]  }
  0x10   :  { %259 = vmatprep.subr.bf16.mxu0 %v898_v17  ;;  %312 = vmatprep.subr.bf16.mxu1 %v900_v18  ;;  %v927_v37 = vld [vmem:[%s1209_s3 + $0x80] sm:$0xff]   ;;  %v923_v42 = vld [vmem:[%s1208_s0 + $0x8] sm:$0xff]   ;;  %v936_v47 = vld [vmem:[%s1209_s3 + $0x58] sm:$0xff]  }
  0x11   :  { %v937_v48 = vld [vmem:[%s1209_s3 + $0xd8] sm:$0xff]   ;;  %v940_v51 = vld [vmem:[%s1209_s3 + $0x60] sm:$0xff]   ;;  %v944_v55 = vld [vmem:[%s1209_s3 + $0x68] sm:$0xff]  }
  0x12   :  { %v938_v49 = vld [vmem:[%s1209_s3 + $0x18] sm:$0xff]   ;;  %v941_v52 = vld [vmem:[%s1209_s3 + $0xe0] sm:$0xff]   ;;  %v945_v56 = vld [vmem:[%s1209_s3 + $0xe8] sm:$0xff]  }
  0x13   :  { %260 = vmatpush1.bf16.msra.mxu0 %v902_v19  ;;  %313 = vmatpush1.bf16.msra.mxu1 %v903_v20  ;;  %v939_v50 = vld [vmem:[%s1209_s3 + $0x98] sm:$0xff]   ;;  %v942_v53 = vld [vmem:[%s1209_s3 + $0x20] sm:$0xff]   ;;  %v946_v57 = vld [vmem:[%s1209_s3 + $0x28] sm:$0xff]  }
  0x14   :  { %261 = vmatprep.subr.bf16.mxu0 %v904_v21  ;;  %314 = vmatprep.subr.bf16.mxu1 %v906_v22  ;;  %v943_v54 = vld [vmem:[%s1209_s3 + $0xa0] sm:$0xff]   ;;  %v947_v58 = vld [vmem:[%s1209_s3 + $0xa8] sm:$0xff]   ;;  %v948_v59 = vld [vmem:[%s1209_s3 + $0x70] sm:$0xff]  }
  0x15   :  { %v949_v60 = vld [vmem:[%s1209_s3 + $0xf0] sm:$0xff]   ;;  %v952_v63 = vld [vmem:[%s1209_s3 + $0x78] sm:$0xff]   ;;  %v57_v7 = vld [vmem:[%s1210_s2] sm:$0xf] }
  0x16   :  { %v950_v61 = vld [vmem:[%s1209_s3 + $0x30] sm:$0xff]   ;;  %v953_v0 = vld [vmem:[%s1209_s3 + $0xf8] sm:$0xff]   ;;  %v62_v10 = vrot.slane %v57_v7, %v61_v5  ;;  %v70_v11 = vrot.slane %v57_v7, %v69_v6  ;;  %v66_v12 = vrot.slane %v57_v7, %v65_v8  ;;  %v74_v13 = vrot.slane %v57_v7, %v73_v9  ;;  %v784_v8 = vld [vmem:[%s1211_s4] ss:$0 sm:$0xff] }
  0x17   :  { %262 = vmatpush1.bf16.msra.mxu0 %v908_v23  ;;  %315 = vmatpush1.bf16.msra.mxu1 %v909_v24  ;;  %v951_v62 = vld [vmem:[%s1209_s3 + $0xb0] sm:$0xff]   ;;  %v955_v2 = vld [vmem:[%s1209_s3 + $0xb8] sm:$0xff]  }
  0x18   :  { %263 = vmatprep.subr.bf16.mxu0 %v910_v25  ;;  %316 = vmatprep.subr.bf16.mxu1 %v912_v26 }
  0x1b   :  { %264 = vmatpush1.bf16.msra.mxu0 %v914_v27  ;;  %317 = vmatpush1.bf16.msra.mxu1 %v915_v28 }
  0x1c   :  { %265 = vmatprep.subr.bf16.mxu0 %v916_v29  ;;  %318 = vmatprep.subr.bf16.mxu1 %v918_v30 }
  0x1f   :  { %266 = vmatpush1.bf16.msra.mxu0 %v920_v31  ;;  %319 = vmatpush1.bf16.msra.mxu1 %v921_v32 }
  0x20   :  { %817 = vmatprep.subr.bf16.mxu0 %v924_v33  ;;  %845 = vmatprep.subr.bf16.mxu1 %v925_v34 }
  0x22   :  { %284 = vmatmul.mubr.bf16.vlgmr.msra.gmra.mrb[0].mxu0 %v922_v35  ;;  %337 = vmatmul.mubr.bf16.vlgmr.msra.gmra.mrb[0].mxu1 %v922_v35 }
  0x23   :  { %293 = vmatprep.mubr.bf16.mxu0 %v956_v1  ;;  %346 = vmatprep.mubr.bf16.mxu1 %v956_v1  ;;  %v954_v1 = vld [vmem:[%s1209_s3 + $0x38] sm:$0xff]  }
  0x24   :  { %818 = vmatpush3.bf16.msra.mxu0 %v926_v36  ;;  %846 = vmatpush3.bf16.msra.mxu1 %v927_v37 }
  0x25   :  { %819 = vmatprep.subr.bf16.mxu0 %v928_v38  ;;  %847 = vmatprep.subr.bf16.mxu1 %v929_v39 }
  0x28   :  { %820 = vmatpush3.bf16.msra.mxu0 %v930_v40  ;;  %848 = vmatpush3.bf16.msra.mxu1 %v931_v41 }
  0x29   :  { %821 = vmatprep.subr.bf16.mxu0 %v932_v43  ;;  %849 = vmatprep.subr.bf16.mxu1 %v933_v44 }
  0x2a   :  { %294 = vmatmul.mubr.bf16.gmra.mrb[4].mxu0 %v923_v42  ;;  %347 = vmatmul.mubr.bf16.gmra.mrb[4].mxu1 %v923_v42 }
  0x2c   :  { %822 = vmatpush3.bf16.msra.mxu0 %v934_v45  ;;  %850 = vmatpush3.bf16.msra.mxu1 %v935_v46 }
  0x2d   :  { %823 = vmatprep.subr.bf16.mxu0 %v936_v47  ;;  %851 = vmatprep.subr.bf16.mxu1 %v937_v48 }
  0x30   :  { %824 = vmatpush3.bf16.msra.mxu0 %v938_v49  ;;  %852 = vmatpush3.bf16.msra.mxu1 %v939_v50 }
  0x31   :  { %825 = vmatprep.subr.bf16.mxu0 %v940_v51  ;;  %853 = vmatprep.subr.bf16.mxu1 %v941_v52 }
  0x34   :  { %826 = vmatpush3.bf16.msra.mxu0 %v942_v53  ;;  %854 = vmatpush3.bf16.msra.mxu1 %v943_v54 }
  0x35   :  { %827 = vmatprep.subr.bf16.mxu0 %v944_v55  ;;  %855 = vmatprep.subr.bf16.mxu1 %v945_v56 }
  0x38   :  { %828 = vmatpush3.bf16.msra.mxu0 %v946_v57  ;;  %856 = vmatpush3.bf16.msra.mxu1 %v947_v58 }
  0x39   :  { %829 = vmatprep.subr.bf16.mxu0 %v948_v59  ;;  %857 = vmatprep.subr.bf16.mxu1 %v949_v60 }
  0x3c   :  { %830 = vmatpush3.bf16.msra.mxu0 %v950_v61  ;;  %858 = vmatpush3.bf16.msra.mxu1 %v951_v62 }
  0x3d   :  { %831 = vmatprep.subr.bf16.mxu0 %v952_v63  ;;  %859 = vmatprep.subr.bf16.mxu1 %v953_v0 }
  0x40   :  { %832 = vmatpush3.bf16.msra.mxu0 %v954_v1  ;;  %860 = vmatpush3.bf16.msra.mxu1 %v955_v2 }
  0xf5   :  { %v285_v14 = vpop.f32.mrb[0].mxu0  ;;  %v338_v15 = vpop.f32.mrb[0].mxu1 }
  0xf6   :  { %v286_v16 = vadd.f32 %v285_v14, %v62_v10  ;;  %v339_v17 = vadd.f32 %v338_v15, %v70_v11  ;;  %v287_v18 = vpop.f32.mrb[1].mxu0  ;;  %v340_v19 = vpop.f32.mrb[1].mxu1 }
  0xf7   :  { %v288_v20 = vadd.f32 %v287_v18, %v66_v12  ;;  %v341_v21 = vadd.f32 %v340_v19, %v74_v13  ;;  %v289_v22 = vpop.f32.mrb[2].mxu0  ;;  %v342_v23 = vpop.f32.mrb[2].mxu1 }
  0xf8   :  { %v359_v24 = vmax.f32 %v339_v17, 0.0  ;;  %v290_v25 = vadd.f32 %v289_v22, %v62_v10  ;;  %v343_v26 = vadd.f32 %v342_v23, %v70_v11  ;;  %v291_v27 = vpop.f32.mrb[3].mxu0  ;;  %v344_v28 = vpop.f32.mrb[3].mxu1  ;;  %v357_v32 = vmax.f32 %v286_v16, 0.0 }
  0xf9   :  { %v360_v29 = vmax.f32 %v341_v21, 0.0  ;;  %v292_v30 = vadd.f32 %v291_v27, %v66_v12  ;;  %v345_v31 = vadd.f32 %v344_v28, %v74_v13  ;;  %v358_v35 = vmax.f32 %v288_v20, 0.0 }
  0xfa   :  { %v361_v33 = vmax.f32 %v290_v25, 0.0  ;;  %v363_v34 = vmax.f32 %v343_v26, 0.0 }
  0xfb   :  { %v362_v36 = vmax.f32 %v292_v30, 0.0  ;;  %v364_v37 = vmax.f32 %v345_v31, 0.0 }
  0xfc   :  { %v373_v38 = vpack.c.bf16 %v361_v33, %v357_v32  ;;  %v375_v39 = vpack.c.bf16 %v363_v34, %v359_v24 }
  0xfd   :  { %v374_v40 = vpack.c.bf16 %v362_v36, %v358_v35  ;;  %v376_v41 = vpack.c.bf16 %v364_v37, %v360_v29  ;;  %v295_v42 = vpop.f32.mrb[4].mxu0  ;;  %v348_v43 = vpop.f32.mrb[4].mxu1 }
  0xfe   :  { %v296_v44 = vadd.f32 %v295_v42, %v62_v10  ;;  %v349_v45 = vadd.f32 %v348_v43, %v70_v11  ;;  %v297_v46 = vpop.f32.mrb[5].mxu0  ;;  %v350_v47 = vpop.f32.mrb[5].mxu1 }
  0xff   :  { %v298_v48 = vadd.f32 %v297_v46, %v66_v12  ;;  %v351_v49 = vadd.f32 %v350_v47, %v74_v13  ;;  %v299_v50 = vpop.f32.mrb[6].mxu0  ;;  %v352_v51 = vpop.f32.mrb[6].mxu1  ;;  %676 = vmatprep.mubr.bf16.mxu0 %v374_v40  ;;  %725 = vmatprep.mubr.bf16.mxu1 %v376_v41 }
 0x100   :  { %v367_v52 = vmax.f32 %v349_v45, 0.0  ;;  %v300_v53 = vadd.f32 %v299_v50, %v62_v10  ;;  %v353_v54 = vadd.f32 %v352_v51, %v70_v11  ;;  %v301_v55 = vpop.f32.mrb[7].mxu0  ;;  %v354_v56 = vpop.f32.mrb[7].mxu1  ;;  %677 = vmatmul.mubr.bf16.vlgmr.msra.gmra.mrb[8].mxu0 %v373_v38  ;;  %726 = vmatmul.mubr.bf16.vlgmr.msra.gmra.mrb[8].mxu1 %v375_v39  ;;  %v365_v60 = vmax.f32 %v296_v44, 0.0 }
 0x101   :  { %v368_v57 = vmax.f32 %v351_v49, 0.0  ;;  %v302_v58 = vadd.f32 %v301_v55, %v66_v12  ;;  %v355_v59 = vadd.f32 %v354_v56, %v74_v13  ;;  %v366_v63 = vmax.f32 %v298_v48, 0.0 }
 0x102   :  { %v369_v61 = vmax.f32 %v300_v53, 0.0  ;;  %v371_v62 = vmax.f32 %v353_v54, 0.0 }
 0x103   :  { %v370_v0 = vmax.f32 %v302_v58, 0.0  ;;  %v372_v1 = vmax.f32 %v355_v59, 0.0 }
 0x104   :  { %v377_v2 = vpack.c.bf16 %v369_v61, %v365_v60  ;;  %v379_v3 = vpack.c.bf16 %v371_v62, %v367_v52 }
 0x105   :  { %v378_v4 = vpack.c.bf16 %v370_v0, %v366_v63  ;;  %v380_v5 = vpack.c.bf16 %v372_v1, %v368_v57 }
 0x107   :  { %684 = vmatprep.mubr.bf16.mxu0 %v378_v4  ;;  %733 = vmatprep.mubr.bf16.mxu1 %v380_v5 }
 0x108   :  { %685 = vmatmul.mubr.bf16.gmra.mrb[12].mxu0 %v377_v2  ;;  %734 = vmatmul.mubr.bf16.gmra.mrb[12].mxu1 %v379_v3 }
 0x1d3   :  { %v833_v6 = vpop.f32.mrb[8].mxu0  ;;  %v861_v7 = vpop.f32.mrb[8].mxu1 }
 0x1d4   :  { %v834_v9 = vpop.f32.mrb[9].mxu0  ;;  %v862_v10 = vpop.f32.mrb[9].mxu1 }
 0x1d5   :  { %v835_v11 = vadd.f32 %v834_v9, %v833_v6  ;;  %v863_v12 = vadd.f32 %v862_v10, %v861_v7  ;;  %v836_v13 = vpop.f32.mrb[10].mxu0  ;;  %v864_v14 = vpop.f32.mrb[10].mxu1 }
 0x1d6   :  { %v837_v15 = vpop.f32.mrb[11].mxu0  ;;  %v865_v16 = vpop.f32.mrb[11].mxu1 }
 0x1d7   :  { %v679_v17 = vadd.f32 %v835_v11, %v784_v8  ;;  %v838_v18 = vadd.f32 %v837_v15, %v836_v13  ;;  %v866_v19 = vadd.f32 %v865_v16, %v864_v14 }
 0x1d9   :  { %v728_v20 = vadd.f32 %v863_v12, %v679_v17  ;;  %v682_v21 = vadd.f32 %v838_v18, %v784_v8 }
 0x1db   :  { %742 = vst [vmem:[%s1212_s5] sm:$0xff] %v728_v20  ;;  %v731_v22 = vadd.f32 %v866_v19, %v682_v21  ;;  %v839_v23 = vpop.f32.mrb[12].mxu0  ;;  %v867_v24 = vpop.f32.mrb[12].mxu1 }
 0x1dc   :  { %v840_v25 = vpop.f32.mrb[13].mxu0  ;;  %v868_v26 = vpop.f32.mrb[13].mxu1 }
 0x1dd   :  { %743 = vst [vmem:[%s1212_s5 + $0x8] sm:$0xff] %v731_v22  ;;  %v841_v27 = vadd.f32 %v840_v25, %v839_v23  ;;  %v869_v28 = vadd.f32 %v868_v26, %v867_v24  ;;  %v842_v29 = vpop.f32.mrb[14].mxu0  ;;  %v870_v30 = vpop.f32.mrb[14].mxu1 }
 0x1de   :  { %v843_v31 = vpop.f32.mrb[15].mxu0  ;;  %v871_v32 = vpop.f32.mrb[15].mxu1 }
 0x1df   :  { %v687_v33 = vadd.f32 %v841_v27, %v784_v8  ;;  %v844_v34 = vadd.f32 %v843_v31, %v842_v29  ;;  %v872_v35 = vadd.f32 %v871_v32, %v870_v30 }
 0x1e1   :  { %v736_v36 = vadd.f32 %v869_v28, %v687_v33  ;;  %v690_v37 = vadd.f32 %v844_v34, %v784_v8 }
 0x1e3   :  { %744 = vst [vmem:[%s1212_s5 + $0x10] sm:$0xff] %v736_v36  ;;  %v739_v38 = vadd.f32 %v872_v35, %v690_v37 }
 0x1e5   :  { %745 = vst [vmem:[%s1212_s5 + $0x18] sm:$0xff] %v739_v38 }

</bundles_post_ra>
